<compile_context>
chip_gen: v7x
topology: tpu7x:2x2x1
jax: 0.10.0
libtpu: 0.0.40
codegen_flags: <defaults>
</compile_context>

<pallas_src>
import functools
import math

import jax
import jax.numpy as jnp
from jax.experimental import pallas as pl
from jax.experimental.pallas import tpu as pltpu


# ----------------------------------------------------------------------------
# Fused kernel: all branches + projection for one (batch, row-tile) grid step.
# ----------------------------------------------------------------------------
def _aspp_fused_kernel(x_ref, wpt_ref, watr_ref, bcat_ref, wprj_ref, pool_ref,
                       o_ref, *, rates, rmax, th, W, Cin, Cp):
    """Shapes seen by the kernel:
      x_ref   : (1, Hp, Wp, Cin)   zero-padded NHWC image (bf16)
      wpt_ref : (Cin, half)        1x1-branch weight, BN scale folded (bf16)
      watr_ref: (R, 9*Cin, half)   dilated-3x3 weights packed as K=9*Cin (bf16)
      bcat_ref: (1, cat_c)         concatenated per-branch folded BN bias (f32)
      wprj_ref: (cat_c, Cp)        projection weight, non-pool rows, BN folded
      pool_ref: (1, 1, Cp)         pooled-branch contribution + proj BN bias
      o_ref   : (1, th, W, Cp)     projected, ReLU'd output tile (f32)
    """
    h0 = pl.program_id(1) * th
    if th % 8 == 0:
        h0 = pl.multiple_of(h0, 8)        # keep dynamic row starts sublane-aligned
    TW = th * W
    cdt = wprj_ref.dtype

    def tap(dy, dx):
        # (th, W, Cin) shifted window of the padded image (stays in VMEM).
        return x_ref[0, pl.ds(h0 + rmax + dy, th), pl.ds(rmax + dx, W), :]

    center = tap(0, 0)

    # Branch 0: 1x1 conv — one (TW, Cin) x (Cin, half) matmul, f32 accumulate.
    pieces = [jnp.dot(center.reshape(TW, Cin), wpt_ref[...],
                      preferred_element_type=jnp.float32)]

    # Dilated 3x3 branches: ONE matmul per rate with K = 9*Cin; the 9 shifted
    # taps form an in-VMEM im2col slab (row order = (ky*3+kx)*Cin + ci).
    for bi, r in enumerate(rates):
        taps = [center if (ky == 1 and kx == 1)
                else tap((ky - 1) * r, (kx - 1) * r)
                for ky in range(3) for kx in range(3)]
        slab = jnp.concatenate(taps, axis=-1).reshape(TW, 9 * Cin)
        pieces.append(jnp.dot(slab, watr_ref[bi],
                              preferred_element_type=jnp.float32))

    # Concatenated branch activations: one bias + ReLU, then a single packed
    # projection matmul (no per-branch lane padding, no acc-add chain).
    ycat = jnp.concatenate(pieces, axis=-1)                      # (TW, cat_c) f32
    ycat = jnp.maximum(ycat + bcat_ref[...], 0.0).astype(cdt)
    acc = jnp.dot(ycat, wprj_ref[...], preferred_element_type=jnp.float32)

    # Pooled-branch contribution (constant over HxW) + proj bias, final ReLU.
    acc = acc + pool_ref[0]
    o_ref[0] = jnp.maximum(acc, 0.0).reshape(th, W, Cp).astype(o_ref.dtype)


# ----------------------------------------------------------------------------
# Parameter construction: PyTorch-shaped weights -> folded / packed layouts.
# ----------------------------------------------------------------------------
def _round_up(x, m):
    return ((x + m - 1) // m) * m


def _fold_bn(gamma, beta, mean, var, eps=1e-5):
    scale = gamma / jnp.sqrt(var + eps)
    return scale, beta - mean * scale


def init_params(key, in_channels, atrous_rates, out_channels,
                compute_dtype=jnp.bfloat16):
    rates = tuple(atrous_rates)
    assert len(rates) >= 1
    half = out_channels // 2
    n_br = 2 + len(rates)                 # 1x1, atrous..., pooling
    cat_full = n_br * half                # torch.cat width (incl. pooling)
    cat_c = (n_br - 1) * half             # width the kernel materializes
    Cp = _round_up(out_channels, 128)     # lane-padded projection width

    def bn(k, c):
        k1, k2, k3, k4 = jax.random.split(k, 4)
        gamma = 1.0 + 0.1 * jax.random.normal(k1, (c,), jnp.float32)
        beta = 0.1 * jax.random.normal(k2, (c,), jnp.float32)
        mean = 0.1 * jax.random.normal(k3, (c,), jnp.float32)
        var = 1.0 + 0.1 * jnp.abs(jax.random.normal(k4, (c,), jnp.float32))
        return _fold_bn(gamma, beta, mean, var)

    keys = iter(jax.random.split(key, 2 * n_br + 2))
    # Raw PyTorch-layout conv weights (cout, cin, kh, kw) + folded BN per conv.
    w1x1 = 0.1 * jax.random.normal(next(keys), (half, in_channels, 1, 1), jnp.float32)
    s1, b1 = bn(next(keys), half)
    w_as, sb_as = [], []
    for _ in rates:
        w_as.append(0.1 * jax.random.normal(next(keys), (half, in_channels, 3, 3),
                                            jnp.float32))
        sb_as.append(bn(next(keys), half))
    wpl = 0.1 * jax.random.normal(next(keys), (half, in_channels, 1, 1), jnp.float32)
    spl, bpl = bn(next(keys), half)
    wpr = 0.1 * jax.random.normal(next(keys), (out_channels, cat_full, 1, 1),
                                  jnp.float32)
    spr, bpr = bn(next(keys), out_channels)

    # Fold BN scales into conv weights; repack into matmul layouts.
    w_point = w1x1.reshape(half, in_channels).T * s1[None, :]             # (Cin, half)
    w_atr = jnp.stack(
        [jnp.transpose(w, (2, 3, 1, 0)).reshape(9 * in_channels, half) * s[None, :]
         for w, (s, _) in zip(w_as, sb_as)], axis=0)                      # (R, 9Cin, half)
    b_cat = jnp.concatenate([b1] + [b for (_, b) in sb_as])[None, :]      # (1, cat_c)

    # Projection: fold BN scale into columns, pad columns to Cp, split pool rows.
    wproj_m = wpr.reshape(out_channels, cat_full).T * spr[None, :]        # (cat_full, Cout)
    wproj_m = jnp.pad(wproj_m, ((0, 0), (0, Cp - out_channels)))          # (cat_full, Cp)
    w_proj = wproj_m[:cat_c]                                              # non-pool rows
    w_proj_pool = wproj_m[cat_c:]                                         # (half, Cp)
    b_proj = jnp.pad(bpr, (0, Cp - out_channels))                         # (Cp,)

    return dict(
        rates=rates, in_channels=in_channels, out_channels=out_channels,
        half=half, cat_c=cat_c, Cp=Cp, compute_dtype=compute_dtype,
        w_point=w_point.astype(compute_dtype),
        w_atr=w_atr.astype(compute_dtype),
        b_cat=b_cat.astype(jnp.float32),
        w_proj=w_proj.astype(compute_dtype),
        # Pooling branch (tiny, folded into a per-image bias; kept f32).
        w_pool=wpl.reshape(half, in_channels).T * spl[None, :],           # (Cin, half)
        b_pool=bpl,
        w_proj_pool=w_proj_pool,
        b_proj=b_proj,
        # Raw weights + folded BN pairs for the pure-JAX reference check.
        _ref=dict(w1x1=w1x1, bn1=(s1, b1), w_atr=w_as, bn_atr=sb_as,
                  w_pool=wpl, bn_pool=(spl, bpl), w_proj=wpr, bn_proj=(spr, bpr)),
    )


# ----------------------------------------------------------------------------
# Forward pass (equivalent to MultiAtrousModule.forward, NCHW in / NCHW out).
# ----------------------------------------------------------------------------
def _vmem_bytes_estimate(shape, itemsize):
    """Rough VMEM footprint of one buffer with (8, 128) layout padding."""
    if len(shape) == 1:
        return _round_up(shape[0], 128) * itemsize
    lead = 1
    for d in shape[:-2]:
        lead *= d
    return lead * _round_up(shape[-2], 8) * _round_up(shape[-1], 128) * itemsize


def multi_atrous_forward(x_nchw, params, tw_target=512):
    rates = params["rates"]
    rmax = max(rates)
    cdt = params["compute_dtype"]
    Cout, Cp, half, cat_c = (params["out_channels"], params["Cp"],
                             params["half"], params["cat_c"])
    N, Cin, H, W = x_nchw.shape
    R = len(rates)

    # Pooling branch: avg-pool -> 1x1+BN+ReLU is constant over HxW, so its
    # projection contribution + projection BN bias collapse into one tiny
    # per-image bias added in the kernel before the final ReLU (exact algebra).
    # TODO(synk): on v5e this mean could be fused into the same HBM pass as the
    # pad/bf16 cast below; left as a separate tiny reduction for clarity.
    x_mean = jnp.mean(x_nchw.astype(jnp.float32), axis=(2, 3))           # (N, Cin)
    yp = jnp.maximum(x_mean @ params["w_pool"] + params["b_pool"][None, :], 0.0)
    pool_bias = yp @ params["w_proj_pool"] + params["b_proj"][None, :]   # (N, Cp)
    pool_bias = pool_bias[:, None, :].astype(jnp.float32)                # (N, 1, Cp)

    # NCHW -> NHWC, bf16 cast, one shared rmax-wide zero halo (valid for all
    # rates).  XLA fuses cast+transpose+pad into a single HBM pass.
    xp = jnp.pad(jnp.transpose(x_nchw.astype(cdt), (0, 2, 3, 1)),
                 ((0, 0), (rmax, rmax), (rmax, rmax), (0, 0)))
    Hp, Wp = H + 2 * rmax, W + 2 * rmax

    # Row tile: largest divisor of H with th*W <= tw_target so the matmul M
    # dimension (th*W) is MXU-friendly (~128-512) and the grid stays short.
    th = 1
    for d in range(1, H + 1):
        if H % d == 0 and d * W <= max(tw_target, W):
            th = d
    grid = (N, H // th)
    TW = th * W

    # Explicit VMEM budget: double-buffered blocks + in-kernel temporaries.
    # TODO(synk): for realistic ASPP shapes on v7x (64 MiB VMEM), switch x to
    # memory_space=pl.ANY and manually DMA only th + 2*rmax halo rows per step.
    io_bytes = 2 * (_vmem_bytes_estimate((1, Hp, Wp, Cin), 2)
                    + _vmem_bytes_estimate((Cin, half), 2)
                    + _vmem_bytes_estimate((R, 9 * Cin, half), 2)
                    + _vmem_bytes_estimate((1, cat_c), 4)
                    + _vmem_bytes_estimate((cat_c, Cp), 2)
                    + _vmem_bytes_estimate((1, 1, Cp), 4)
                    + _vmem_bytes_estimate((1, th, W, Cp), 4))
    tmp_bytes = (_vmem_bytes_estimate((TW, 9 * Cin), 2)
                 + _vmem_bytes_estimate((TW, cat_c), 4)
                 + _vmem_bytes_estimate((TW, cat_c), 2)
                 + _vmem_bytes_estimate((TW, Cp), 4))
    vmem_limit = int(min(max(io_bytes + 2 * tmp_bytes + (2 << 20), 32 << 20),
                         96 << 20))

    flops = 2 * N * H * W * (Cin * half + R * 9 * Cin * half + cat_c * Cp)
    bytes_accessed = int(xp.size * 2 + params["w_point"].size * 2
                         + params["w_atr"].size * 2 + params["w_proj"].size * 2
                         + params["b_cat"].size * 4 + pool_bias.size * 4
                         + N * H * W * Cp * 4)

    kernel = functools.partial(_aspp_fused_kernel, rates=rates, rmax=rmax,
                               th=th, W=W, Cin=Cin, Cp=Cp)

    out = pl.pallas_call(
        kernel,
        out_shape=jax.ShapeDtypeStruct((N, H, W, Cp), jnp.float32),
        grid=grid,
        in_specs=[
            # Full padded image per batch (halo for the dilated taps); block
            # index is constant along the inner row-tile axis -> DMA'd once/n.
            pl.BlockSpec((1, Hp, Wp, Cin), lambda n, h: (n, 0, 0, 0)),
            pl.BlockSpec((Cin, half), lambda n, h: (0, 0)),
            pl.BlockSpec((R, 9 * Cin, half), lambda n, h: (0, 0, 0)),
            pl.BlockSpec((1, cat_c), lambda n, h: (0, 0)),
            pl.BlockSpec((cat_c, Cp), lambda n, h: (0, 0)),
            pl.BlockSpec((1, 1, Cp), lambda n, h: (n, 0, 0)),
        ],
        out_specs=pl.BlockSpec((1, th, W, Cp), lambda n, h: (n, h, 0, 0)),
        compiler_params=pltpu.CompilerParams(
            dimension_semantics=("parallel", "parallel"),
            vmem_limit_bytes=vmem_limit),
        cost_estimate=pl.CostEstimate(flops=flops, transcendentals=0,
                                      bytes_accessed=bytes_accessed),
    )(xp, params["w_point"], params["w_atr"], params["b_cat"],
      params["w_proj"], pool_bias)

    if Cp != Cout:
        out = out[..., :Cout]                 # strip lane padding
    return jnp.transpose(out, (0, 3, 1, 2))   # back to NCHW (module boundary)


# ----------------------------------------------------------------------------
# Pure-JAX f32 reference mirroring MultiAtrousModule.forward (inference BN).
# ----------------------------------------------------------------------------
def multi_atrous_reference(x_nchw, params):
    raw = params["_ref"]
    x = x_nchw.astype(jnp.float32)

    def conv2d(inp, w, pad, dil):
        return jax.lax.conv_general_dilated(
            inp, w, window_strides=(1, 1), padding=[(pad, pad), (pad, pad)],
            rhs_dilation=(dil, dil), dimension_numbers=("NCHW", "OIHW", "NCHW"))

    def bn_relu(y, sb):
        s, b = sb
        return jnp.maximum(y * s[None, :, None, None] + b[None, :, None, None], 0.0)

    outs = [bn_relu(conv2d(x, raw["w1x1"], 0, 1), raw["bn1"])]
    for w, sb, r in zip(raw["w_atr"], raw["bn_atr"], params["rates"]):
        outs.append(bn_relu(conv2d(x, w, r, r), sb))
    xm = jnp.mean(x, axis=(2, 3), keepdims=True)
    yp = bn_relu(conv2d(xm, raw["w_pool"], 0, 1), raw["bn_pool"])
    outs.append(jnp.broadcast_to(yp, outs[0].shape))
    cat = jnp.concatenate(outs, axis=1)
    return bn_relu(conv2d(cat, raw["w_proj"], 0, 1), raw["bn_proj"])


if __name__ == "__main__":
    # Small shapes consistent with the module:
    #   in_channels=4, atrous_rates=[2, 3], out_channels=32, input NCHW (2,4,16,16)
    in_channels = 4
    atrous_rates = [2, 3]
    out_channels = 32
    N, H, W = 2, 16, 16

    key = jax.random.PRNGKey(0)
    kx, kp = jax.random.split(key)
    x = jax.random.normal(kx, (N, in_channels, H, W), jnp.float32)
    params = init_params(kp, in_channels, atrous_rates, out_channels)

    fwd = jax.jit(functools.partial(multi_atrous_forward, params=params))
    y = fwd(x)
    jax.block_until_ready(y)

    assert y.shape == (N, out_channels, H, W), y.shape
    assert bool(jnp.all(jnp.isfinite(y)))

    # Numerical check vs the f32 reference (kernel uses bf16 weights/acts).
    y_ref = multi_atrous_reference(x, params)
    err = float(jnp.max(jnp.abs(y.astype(jnp.float32) - y_ref)))
    tol = 5e-2 * (1.0 + float(jnp.max(jnp.abs(y_ref))))
    assert err <= tol, (err, tol)

    print("KERNEL_OK")
</pallas_src>

<mosaic_0001>
module attributes {stable_mosaic.version = 11 : i64} {
  func.func @_aspp_fused_kernel(%arg0: i32, %arg1: i32, %arg2: memref<1x22x22x4xbf16, #tpu.memory_space<vmem>>, %arg3: memref<4x16xbf16, #tpu.memory_space<vmem>>, %arg4: memref<2x36x16xbf16, #tpu.memory_space<vmem>>, %arg5: memref<1x48xf32, #tpu.memory_space<vmem>>, %arg6: memref<48x128xbf16, #tpu.memory_space<vmem>>, %arg7: memref<1x1x128xf32, #tpu.memory_space<vmem>>, %arg8: memref<1x16x16x128xf32, #tpu.memory_space<vmem>>) attributes {dimension_semantics = [#tpu.dimension_semantics<parallel>, #tpu.dimension_semantics<parallel>], iteration_bounds = array<i64: 2, 1>, scalar_prefetch = 0 : i64, scratch_operands = 0 : i64, tpu.core_type = #tpu.core_type<tc>, window_params = [{transform_indices = @transform_0, window_bounds = array<i64: 1, 22, 22, 4>}, {pipeline_mode = #tpu.pipeline_mode<synchronous>, transform_indices = @transform_1, window_bounds = array<i64: 4, 16>}, {pipeline_mode = #tpu.pipeline_mode<synchronous>, transform_indices = @transform_2, window_bounds = array<i64: 2, 36, 16>}, {pipeline_mode = #tpu.pipeline_mode<synchronous>, transform_indices = @transform_3, window_bounds = array<i64: 1, 48>}, {pipeline_mode = #tpu.pipeline_mode<synchronous>, transform_indices = @transform_4, window_bounds = array<i64: 48, 128>}, {transform_indices = @transform_5, window_bounds = array<i64: 1, 1, 128>}, {transform_indices = @transform_6, window_bounds = array<i64: 1, 16, 16, 128>}]} {
    %c16_i32 = arith.constant 16 : i32
    %0 = arith.muli %arg1, %c16_i32 : i32
    %1 = tpu.assume_multiple %0, 8 : i32
    %c3_i32 = arith.constant 3 : i32
    %2 = arith.addi %1, %c3_i32 : i32
    %c0_i32 = arith.constant 0 : i32
    %3 = arith.addi %2, %c0_i32 : i32
    %c0 = arith.constant 0 : index
    %4 = arith.index_cast %3 : i32 to index
    %c3 = arith.constant 3 : index
    %c0_0 = arith.constant 0 : index
    %5 = vector.load %arg2[%c0, %4, %c3, %c0_0] : memref<1x22x22x4xbf16, #tpu.memory_space<vmem>>, vector<1x16x16x4xbf16>
    %6 = vector.shape_cast %5 : vector<1x16x16x4xbf16> to vector<16x16x4xbf16>
    %7 = vector.shape_cast %6 : vector<16x16x4xbf16> to vector<256x4xbf16>
    %c0_1 = arith.constant 0 : index
    %c0_2 = arith.constant 0 : index
    %8 = vector.load %arg3[%c0_1, %c0_2] : memref<4x16xbf16, #tpu.memory_space<vmem>>, vector<4x16xbf16>
    %cst = arith.constant dense<0.000000e+00> : vector<256x16xf32>
    %9 = tpu.matmul %7, %8, %cst {dimension_numbers = #tpu.dot_dimension_numbers<[1], [0], [0], [1], [0, 0, 1, 1], [], []>} : vector<256x4xbf16>, vector<4x16xbf16>, vector<256x16xf32> -> vector<256x16xf32>
    %c3_i32_3 = arith.constant 3 : i32
    %10 = arith.addi %1, %c3_i32_3 : i32
    %c-2_i32 = arith.constant -2 : i32
    %11 = arith.addi %10, %c-2_i32 : i32
    %c0_4 = arith.constant 0 : index
    %12 = arith.index_cast %11 : i32 to index
    %c1 = arith.constant 1 : index
    %c0_5 = arith.constant 0 : index
    %13 = vector.load %arg2[%c0_4, %12, %c1, %c0_5] : memref<1x22x22x4xbf16, #tpu.memory_space<vmem>>, vector<1x16x16x4xbf16>
    %14 = vector.shape_cast %13 : vector<1x16x16x4xbf16> to vector<16x16x4xbf16>
    %c3_i32_6 = arith.constant 3 : i32
    %15 = arith.addi %1, %c3_i32_6 : i32
    %c-2_i32_7 = arith.constant -2 : i32
    %16 = arith.addi %15, %c-2_i32_7 : i32
    %c0_8 = arith.constant 0 : index
    %17 = arith.index_cast %16 : i32 to index
    %c3_9 = arith.constant 3 : index
    %c0_10 = arith.constant 0 : index
    %18 = vector.load %arg2[%c0_8, %17, %c3_9, %c0_10] : memref<1x22x22x4xbf16, #tpu.memory_space<vmem>>, vector<1x16x16x4xbf16>
    %19 = vector.shape_cast %18 : vector<1x16x16x4xbf16> to vector<16x16x4xbf16>
    %c3_i32_11 = arith.constant 3 : i32
    %20 = arith.addi %1, %c3_i32_11 : i32
    %c-2_i32_12 = arith.constant -2 : i32
    %21 = arith.addi %20, %c-2_i32_12 : i32
    %c0_13 = arith.constant 0 : index
    %22 = arith.index_cast %21 : i32 to index
    %c5 = arith.constant 5 : index
    %c0_14 = arith.constant 0 : index
    %23 = vector.load %arg2[%c0_13, %22, %c5, %c0_14] : memref<1x22x22x4xbf16, #tpu.memory_space<vmem>>, vector<1x16x16x4xbf16>
    %24 = vector.shape_cast %23 : vector<1x16x16x4xbf16> to vector<16x16x4xbf16>
    %c3_i32_15 = arith.constant 3 : i32
    %25 = arith.addi %1, %c3_i32_15 : i32
    %c0_i32_16 = arith.constant 0 : i32
    %26 = arith.addi %25, %c0_i32_16 : i32
    %c0_17 = arith.constant 0 : index
    %27 = arith.index_cast %26 : i32 to index
    %c1_18 = arith.constant 1 : index
    %c0_19 = arith.constant 0 : index
    %28 = vector.load %arg2[%c0_17, %27, %c1_18, %c0_19] : memref<1x22x22x4xbf16, #tpu.memory_space<vmem>>, vector<1x16x16x4xbf16>
    %29 = vector.shape_cast %28 : vector<1x16x16x4xbf16> to vector<16x16x4xbf16>
    %c3_i32_20 = arith.constant 3 : i32
    %30 = arith.addi %1, %c3_i32_20 : i32
    %c0_i32_21 = arith.constant 0 : i32
    %31 = arith.addi %30, %c0_i32_21 : i32
    %c0_22 = arith.constant 0 : index
    %32 = arith.index_cast %31 : i32 to index
    %c5_23 = arith.constant 5 : index
    %c0_24 = arith.constant 0 : index
    %33 = vector.load %arg2[%c0_22, %32, %c5_23, %c0_24] : memref<1x22x22x4xbf16, #tpu.memory_space<vmem>>, vector<1x16x16x4xbf16>
    %34 = vector.shape_cast %33 : vector<1x16x16x4xbf16> to vector<16x16x4xbf16>
    %c3_i32_25 = arith.constant 3 : i32
    %35 = arith.addi %1, %c3_i32_25 : i32
    %c2_i32 = arith.constant 2 : i32
    %36 = arith.addi %35, %c2_i32 : i32
    %c0_26 = arith.constant 0 : index
    %37 = arith.index_cast %36 : i32 to index
    %c1_27 = arith.constant 1 : index
    %c0_28 = arith.constant 0 : index
    %38 = vector.load %arg2[%c0_26, %37, %c1_27, %c0_28] : memref<1x22x22x4xbf16, #tpu.memory_space<vmem>>, vector<1x16x16x4xbf16>
    %39 = vector.shape_cast %38 : vector<1x16x16x4xbf16> to vector<16x16x4xbf16>
    %c3_i32_29 = arith.constant 3 : i32
    %40 = arith.addi %1, %c3_i32_29 : i32
    %c2_i32_30 = arith.constant 2 : i32
    %41 = arith.addi %40, %c2_i32_30 : i32
    %c0_31 = arith.constant 0 : index
    %42 = arith.index_cast %41 : i32 to index
    %c3_32 = arith.constant 3 : index
    %c0_33 = arith.constant 0 : index
    %43 = vector.load %arg2[%c0_31, %42, %c3_32, %c0_33] : memref<1x22x22x4xbf16, #tpu.memory_space<vmem>>, vector<1x16x16x4xbf16>
    %44 = vector.shape_cast %43 : vector<1x16x16x4xbf16> to vector<16x16x4xbf16>
    %c3_i32_34 = arith.constant 3 : i32
    %45 = arith.addi %1, %c3_i32_34 : i32
    %c2_i32_35 = arith.constant 2 : i32
    %46 = arith.addi %45, %c2_i32_35 : i32
    %c0_36 = arith.constant 0 : index
    %47 = arith.index_cast %46 : i32 to index
    %c5_37 = arith.constant 5 : index
    %c0_38 = arith.constant 0 : index
    %48 = vector.load %arg2[%c0_36, %47, %c5_37, %c0_38] : memref<1x22x22x4xbf16, #tpu.memory_space<vmem>>, vector<1x16x16x4xbf16>
    %49 = vector.shape_cast %48 : vector<1x16x16x4xbf16> to vector<16x16x4xbf16>
    %50 = tpu.concatenate %14, %19, %24, %29, %6, %34, %39, %44, %49 in 2 : vector<16x16x4xbf16>, vector<16x16x4xbf16>, vector<16x16x4xbf16>, vector<16x16x4xbf16>, vector<16x16x4xbf16>, vector<16x16x4xbf16>, vector<16x16x4xbf16>, vector<16x16x4xbf16>, vector<16x16x4xbf16> -> vector<16x16x36xbf16>
    %51 = vector.shape_cast %50 : vector<16x16x36xbf16> to vector<256x36xbf16>
    %c0_39 = arith.constant 0 : index
    %c0_40 = arith.constant 0 : index
    %c0_41 = arith.constant 0 : index
    %52 = vector.load %arg4[%c0_39, %c0_40, %c0_41] : memref<2x36x16xbf16, #tpu.memory_space<vmem>>, vector<1x36x16xbf16>
    %53 = vector.shape_cast %52 : vector<1x36x16xbf16> to vector<36x16xbf16>
    %cst_42 = arith.constant dense<0.000000e+00> : vector<256x16xf32>
    %54 = tpu.matmul %51, %53, %cst_42 {dimension_numbers = #tpu.dot_dimension_numbers<[1], [0], [0], [1], [0, 0, 1, 1], [], []>} : vector<256x36xbf16>, vector<36x16xbf16>, vector<256x16xf32> -> vector<256x16xf32>
    %c3_i32_43 = arith.constant 3 : i32
    %55 = arith.addi %1, %c3_i32_43 : i32
    %c-3_i32 = arith.constant -3 : i32
    %56 = arith.addi %55, %c-3_i32 : i32
    %c0_44 = arith.constant 0 : index
    %57 = arith.index_cast %56 : i32 to index
    %c0_45 = arith.constant 0 : index
    %c0_46 = arith.constant 0 : index
    %58 = vector.load %arg2[%c0_44, %57, %c0_45, %c0_46] : memref<1x22x22x4xbf16, #tpu.memory_space<vmem>>, vector<1x16x16x4xbf16>
    %59 = vector.shape_cast %58 : vector<1x16x16x4xbf16> to vector<16x16x4xbf16>
    %c3_i32_47 = arith.constant 3 : i32
    %60 = arith.addi %1, %c3_i32_47 : i32
    %c-3_i32_48 = arith.constant -3 : i32
    %61 = arith.addi %60, %c-3_i32_48 : i32
    %c0_49 = arith.constant 0 : index
    %62 = arith.index_cast %61 : i32 to index
    %c3_50 = arith.constant 3 : index
    %c0_51 = arith.constant 0 : index
    %63 = vector.load %arg2[%c0_49, %62, %c3_50, %c0_51] : memref<1x22x22x4xbf16, #tpu.memory_space<vmem>>, vector<1x16x16x4xbf16>
    %64 = vector.shape_cast %63 : vector<1x16x16x4xbf16> to vector<16x16x4xbf16>
    %c3_i32_52 = arith.constant 3 : i32
    %65 = arith.addi %1, %c3_i32_52 : i32
    %c-3_i32_53 = arith.constant -3 : i32
    %66 = arith.addi %65, %c-3_i32_53 : i32
    %c0_54 = arith.constant 0 : index
    %67 = arith.index_cast %66 : i32 to index
    %c6 = arith.constant 6 : index
    %c0_55 = arith.constant 0 : index
    %68 = vector.load %arg2[%c0_54, %67, %c6, %c0_55] : memref<1x22x22x4xbf16, #tpu.memory_space<vmem>>, vector<1x16x16x4xbf16>
    %69 = vector.shape_cast %68 : vector<1x16x16x4xbf16> to vector<16x16x4xbf16>
    %c3_i32_56 = arith.constant 3 : i32
    %70 = arith.addi %1, %c3_i32_56 : i32
    %c0_i32_57 = arith.constant 0 : i32
    %71 = arith.addi %70, %c0_i32_57 : i32
    %c0_58 = arith.constant 0 : index
    %72 = arith.index_cast %71 : i32 to index
    %c0_59 = arith.constant 0 : index
    %c0_60 = arith.constant 0 : index
    %73 = vector.load %arg2[%c0_58, %72, %c0_59, %c0_60] : memref<1x22x22x4xbf16, #tpu.memory_space<vmem>>, vector<1x16x16x4xbf16>
    %74 = vector.shape_cast %73 : vector<1x16x16x4xbf16> to vector<16x16x4xbf16>
    %c3_i32_61 = arith.constant 3 : i32
    %75 = arith.addi %1, %c3_i32_61 : i32
    %c0_i32_62 = arith.constant 0 : i32
    %76 = arith.addi %75, %c0_i32_62 : i32
    %c0_63 = arith.constant 0 : index
    %77 = arith.index_cast %76 : i32 to index
    %c6_64 = arith.constant 6 : index
    %c0_65 = arith.constant 0 : index
    %78 = vector.load %arg2[%c0_63, %77, %c6_64, %c0_65] : memref<1x22x22x4xbf16, #tpu.memory_space<vmem>>, vector<1x16x16x4xbf16>
    %79 = vector.shape_cast %78 : vector<1x16x16x4xbf16> to vector<16x16x4xbf16>
    %c3_i32_66 = arith.constant 3 : i32
    %80 = arith.addi %1, %c3_i32_66 : i32
    %c3_i32_67 = arith.constant 3 : i32
    %81 = arith.addi %80, %c3_i32_67 : i32
    %c0_68 = arith.constant 0 : index
    %82 = arith.index_cast %81 : i32 to index
    %c0_69 = arith.constant 0 : index
    %c0_70 = arith.constant 0 : index
    %83 = vector.load %arg2[%c0_68, %82, %c0_69, %c0_70] : memref<1x22x22x4xbf16, #tpu.memory_space<vmem>>, vector<1x16x16x4xbf16>
    %84 = vector.shape_cast %83 : vector<1x16x16x4xbf16> to vector<16x16x4xbf16>
    %c3_i32_71 = arith.constant 3 : i32
    %85 = arith.addi %1, %c3_i32_71 : i32
    %c3_i32_72 = arith.constant 3 : i32
    %86 = arith.addi %85, %c3_i32_72 : i32
    %c0_73 = arith.constant 0 : index
    %87 = arith.index_cast %86 : i32 to index
    %c3_74 = arith.constant 3 : index
    %c0_75 = arith.constant 0 : index
    %88 = vector.load %arg2[%c0_73, %87, %c3_74, %c0_75] : memref<1x22x22x4xbf16, #tpu.memory_space<vmem>>, vector<1x16x16x4xbf16>
    %89 = vector.shape_cast %88 : vector<1x16x16x4xbf16> to vector<16x16x4xbf16>
    %c3_i32_76 = arith.constant 3 : i32
    %90 = arith.addi %1, %c3_i32_76 : i32
    %c3_i32_77 = arith.constant 3 : i32
    %91 = arith.addi %90, %c3_i32_77 : i32
    %c0_78 = arith.constant 0 : index
    %92 = arith.index_cast %91 : i32 to index
    %c6_79 = arith.constant 6 : index
    %c0_80 = arith.constant 0 : index
    %93 = vector.load %arg2[%c0_78, %92, %c6_79, %c0_80] : memref<1x22x22x4xbf16, #tpu.memory_space<vmem>>, vector<1x16x16x4xbf16>
    %94 = vector.shape_cast %93 : vector<1x16x16x4xbf16> to vector<16x16x4xbf16>
    %95 = tpu.concatenate %59, %64, %69, %74, %6, %79, %84, %89, %94 in 2 : vector<16x16x4xbf16>, vector<16x16x4xbf16>, vector<16x16x4xbf16>, vector<16x16x4xbf16>, vector<16x16x4xbf16>, vector<16x16x4xbf16>, vector<16x16x4xbf16>, vector<16x16x4xbf16>, vector<16x16x4xbf16> -> vector<16x16x36xbf16>
    %96 = vector.shape_cast %95 : vector<16x16x36xbf16> to vector<256x36xbf16>
    %c1_81 = arith.constant 1 : index
    %c0_82 = arith.constant 0 : index
    %c0_83 = arith.constant 0 : index
    %97 = vector.load %arg4[%c1_81, %c0_82, %c0_83] : memref<2x36x16xbf16, #tpu.memory_space<vmem>>, vector<1x36x16xbf16>
    %98 = vector.shape_cast %97 : vector<1x36x16xbf16> to vector<36x16xbf16>
    %cst_84 = arith.constant dense<0.000000e+00> : vector<256x16xf32>
    %99 = tpu.matmul %96, %98, %cst_84 {dimension_numbers = #tpu.dot_dimension_numbers<[1], [0], [0], [1], [0, 0, 1, 1], [], []>} : vector<256x36xbf16>, vector<36x16xbf16>, vector<256x16xf32> -> vector<256x16xf32>
    %100 = tpu.concatenate %9, %54, %99 in 1 : vector<256x16xf32>, vector<256x16xf32>, vector<256x16xf32> -> vector<256x48xf32>
    %c0_85 = arith.constant 0 : index
    %c0_86 = arith.constant 0 : index
    %101 = vector.load %arg5[%c0_85, %c0_86] : memref<1x48xf32, #tpu.memory_space<vmem>>, vector<1x48xf32>
    %102 = vector.broadcast %101 : vector<1x48xf32> to vector<256x48xf32>
    %103 = arith.addf %100, %102 : vector<256x48xf32>
    %cst_87 = arith.constant 0.000000e+00 : f32
    %104 = vector.broadcast %cst_87 : f32 to vector<256x48xf32>
    %105 = arith.maximumf %103, %104 : vector<256x48xf32>
    %106 = arith.truncf %105 : vector<256x48xf32> to vector<256x48xbf16>
    %c0_88 = arith.constant 0 : index
    %c0_89 = arith.constant 0 : index
    %107 = vector.load %arg6[%c0_88, %c0_89] : memref<48x128xbf16, #tpu.memory_space<vmem>>, vector<48x128xbf16>
    %cst_90 = arith.constant dense<0.000000e+00> : vector<256x128xf32>
    %108 = tpu.matmul %106, %107, %cst_90 {dimension_numbers = #tpu.dot_dimension_numbers<[1], [0], [0], [1], [0, 0, 1, 1], [], []>} : vector<256x48xbf16>, vector<48x128xbf16>, vector<256x128xf32> -> vector<256x128xf32>
    %c0_91 = arith.constant 0 : index
    %c0_92 = arith.constant 0 : index
    %c0_93 = arith.constant 0 : index
    %109 = vector.load %arg7[%c0_91, %c0_92, %c0_93] : memref<1x1x128xf32, #tpu.memory_space<vmem>>, vector<1x1x128xf32>
    %110 = vector.shape_cast %109 : vector<1x1x128xf32> to vector<1x128xf32>
    %111 = vector.broadcast %110 : vector<1x128xf32> to vector<256x128xf32>
    %112 = arith.addf %108, %111 : vector<256x128xf32>
    %cst_94 = arith.constant 0.000000e+00 : f32
    %113 = vector.broadcast %cst_94 : f32 to vector<256x128xf32>
    %114 = arith.maximumf %112, %113 : vector<256x128xf32>
    %115 = vector.shape_cast %114 : vector<256x128xf32> to vector<16x16x128xf32>
    %c0_95 = arith.constant 0 : index
    %c0_96 = arith.constant 0 : index
    %c0_97 = arith.constant 0 : index
    %c0_98 = arith.constant 0 : index
    %116 = vector.load %arg8[%c0_95, %c0_96, %c0_97, %c0_98] : memref<1x16x16x128xf32, #tpu.memory_space<vmem>>, vector<1x16x16x128xf32>
    %117 = vector.shape_cast %116 : vector<1x16x16x128xf32> to vector<16x16x128xf32>
    %118 = vector.shape_cast %115 : vector<16x16x128xf32> to vector<1x16x16x128xf32>
    tpu.vector_store %arg8[%c0_95, %c0_96, %c0_97, %c0_98], %118 {strides = array<i32>} : memref<1x16x16x128xf32, #tpu.memory_space<vmem>>, vector<1x16x16x128xf32>,
    return
  }
  func.func @transform_0(%arg0: i32, %arg1: i32) -> (i32, i32, i32, i32) {
    %c0_i32 = arith.constant 0 : i32
    %c0_i32_0 = arith.constant 0 : i32
    %c0_i32_1 = arith.constant 0 : i32
    %c0_i32_2 = arith.constant 0 : i32
    return %arg0, %c0_i32, %c0_i32_0, %c0_i32_1 : i32, i32, i32, i32
  }
  func.func @transform_1(%arg0: i32, %arg1: i32) -> (i32, i32) {
    %c0_i32 = arith.constant 0 : i32
    %c0_i32_0 = arith.constant 0 : i32
    %c0_i32_1 = arith.constant 0 : i32
    return %c0_i32, %c0_i32_0 : i32, i32
  }
  func.func @transform_2(%arg0: i32, %arg1: i32) -> (i32, i32, i32) {
    %c0_i32 = arith.constant 0 : i32
    %c0_i32_0 = arith.constant 0 : i32
    %c0_i32_1 = arith.constant 0 : i32
    %c0_i32_2 = arith.constant 0 : i32
    return %c0_i32, %c0_i32_0, %c0_i32_1 : i32, i32, i32
  }
  func.func @transform_3(%arg0: i32, %arg1: i32) -> (i32, i32) {
    %c0_i32 = arith.constant 0 : i32
    %c0_i32_0 = arith.constant 0 : i32
    %c0_i32_1 = arith.constant 0 : i32
    return %c0_i32, %c0_i32_0 : i32, i32
  }
  func.func @transform_4(%arg0: i32, %arg1: i32) -> (i32, i32) {
    %c0_i32 = arith.constant 0 : i32
    %c0_i32_0 = arith.constant 0 : i32
    %c0_i32_1 = arith.constant 0 : i32
    return %c0_i32, %c0_i32_0 : i32, i32
  }
  func.func @transform_5(%arg0: i32, %arg1: i32) -> (i32, i32, i32) {
    %c0_i32 = arith.constant 0 : i32
    %c0_i32_0 = arith.constant 0 : i32
    %c0_i32_1 = arith.constant 0 : i32
    return %arg0, %c0_i32, %c0_i32_0 : i32, i32, i32
  }
  func.func @transform_6(%arg0: i32, %arg1: i32) -> (i32, i32, i32, i32) {
    %c0_i32 = arith.constant 0 : i32
    %c0_i32_0 = arith.constant 0 : i32
    %c0_i32_1 = arith.constant 0 : i32
    return %arg0, %arg1, %c0_i32, %c0_i32_0 : i32, i32, i32, i32
  }
}

</mosaic_0001>

<bundles_post_ra>
// kernel: multi_atrous_forward.1
= control target key start
LH: loop header
LB: loop body
LE: loop exit
PB: predicated region body
PF: predicated region fallthrough
CT: control target
= control target key end

     0   :  { %s9479_s21 = smov 0   ;;  %s9481_s22 = smov 0   ;;  %s14062_s0 = inlined_call_operand.vmem [shape: bf16[2,22,22,4], index: 0, kind: input, shape index: {}]   ;;  %s14063_s1 = inlined_call_operand.vmem [shape: bf16[4,16], index: 1, kind: input, shape index: {}]   ;;  %s14064_s2 = inlined_call_operand.vmem [shape: bf16[2,36,16], index: 2, kind: input, shape index: {}]   ;;  %s14065_s3 = inlined_call_operand.vmem [shape: f32[1,48], index: 3, kind: input, shape index: {}]   ;;  %s14066_s4 = inlined_call_operand.vmem [shape: bf16[48,128], index: 4, kind: input, shape index: {}]   ;;  %s14067_s5 = inlined_call_operand.vmem [shape: f32[2,1,128], index: 5, kind: input, shape index: {}]   ;;  %s14068_s6 = inlined_call_operand.vmem [shape: f32[2,16,16,128], index: 6, kind: output, shape index: {}]  }
   0x1   :  { %s9483_s23 = smov 0  }
   0x2 LB: > { %s28_s24 = sadd.s32 1, %s9430_s22  ;;  %p7518_p0 = scmp.ge.s32.totalorder %s9434_s23, 1  ;;  %s9434_s23 = sphi %s9483_s23, %s16_s23   ;;  %s9430_s22 = sphi %s9481_s22, %s14594_s22   ;;  %s9426_s21 = sphi %s9479_s21, %s14593_s21  }
   0x3   : > { %p30_p1 = scmp.ge.s32.totalorder %s28_s24, 2  ;;  %p234_p2 = scmp.lt.s32.totalorder %s9434_s23, 3 }
   0x5   : > { %s14596_s24 = smov (%p30_p1, %s28_s24), 0  ;;  %p235_p3 = pnand %p7518_p0, %p234_p2 }
   0x7   : > { %238 = sbr.rel (%p235_p3) target bundleno = 1473 (0x5c1), region = 44 }
   0xe   : > { %p272_p4 = scmp.lt.s32.totalorder %s9426_s21, 1  ;;  %vm1579_vm0 = vcmask 1046528   ;;  %s9436_s29 = smov 4   ;;  %vm1788_vm1 = vcmask 1045504   ;;  %vm345_vm2 = vsmask.f32 2304 }
   0xf   : > { %s9437_s30 = smov 8   ;;  %s9438_s7 = smov 12   ;;  %vm894_vm3 = vcmask 1041408   ;;  %vm4485_vm4 = vsmask.f32 6400  ;;  %vm845_vm6 = vcmask 31744  }
  0x10   : > { %s14598_s21 = smov (!%p272_p4, %s9426_s21), 1  ;;  %s9439_s8 = smov 16   ;;  %vm346_vm5 = vsmask.f32 6416  ;;  %vm4886_vm7 = vcmask 1044480   ;;  %vm3213_vm9 = vcmask 64512  }
  0x11   : > { %s8806_s25 = smul.u32 264, %s14598_s21  ;;  %s9440_s9 = smov 20   ;;  %vm10449_vm8 = vmor %vm345_vm2, %vm346_vm5  ;;  %vm3278_vm10 = vcmask 97280   ;;  %vm3343_vm11 = vcmask 130048   ;;  %vm3408_vm12 = vcmask 162816   ;;  %vm3473_vm13 = vcmask 195584  }
  0x12   : > { %s9441_s12 = smov 24   ;;  %s9442_s13 = smov 28   ;;  %vm3538_vm14 = vcmask 228352   ;;  %vm3603_vm15 = vcmask 261120   ;;  %vm3668_vm2 = vsmask.f32 7424 }
  0x13   : > { %s9503_s28 = scalar_lea.vmem %s14062_s0, %s8806_s25  ;;  %s9443_s18 = smov 32  }
  0x14   : > { %v8839_v0 = vld [vmem:[%s9503_s28 + $0x20] ss:$0 sps:$4 sm:$0x33]   ;;  %v8840_v1 = vld [vmem:[%s9503_s28 + $0x14] ss:$0 sps:$4 sm:$0x33]   ;;  %s279_s17 = scalar_lea.vmem %s14067_s5, %s14598_s21 }
  0x15   : > { %v1584_v2 = vrot.slane %v8839_v0, 1  ;;  %v8841_v3 = vld [vmem:[%s9503_s28 + $0x2c] ss:$0 sps:$4 sm:$0x33]   ;;  %v1581_v4 = vrot.slane %v8840_v1, 1 }
  0x16   : > { %v9509_v5 = vld [vmem:[%s9503_s28 + $0x10] sm:$0xf]  ;;  %v7650_v6 = vld [vmem:[%s9503_s28 + $0xc] sm:$0xe]  ;;  %v1587_v7 = vrot.slane %v8841_v3, 1 }
  0x17   : > { %1634 = vrot.lane.b32.xlu1 %v1584_v2, %s9436_s29  ;;  %v7922_v8 = vcombine.low %v7650_v6, %v9509_v5  ;;  %v8843_v9 = vld [vmem:[%s9503_s28 + $0x38] ss:$0 sps:$4 sm:$0x33]   ;;  %1630 = vrot.lane.b32.xlu0 %v1581_v4, %s9436_s29  ;;  %v9517_v10 = vld [vmem:[%s9503_s28 + $0x28] sm:$0xf] }
  0x18   : > { %v7654_v11 = vld [vmem:[%s9503_s28 + $0x24] sm:$0xe]  ;;  %v9521_v12 = vld [vmem:[%s9503_s28 + $0x1c] sm:$0xf]  ;;  %v7652_v15 = vld [vmem:[%s9503_s28 + $0x18] sm:$0xe] }
  0x19   : > { %v1580_v13 = vrot.slane %v7922_v8, 1  ;;  %v7926_v14 = vcombine.low %v7654_v11, %v9517_v10  ;;  %v9526_v16 = vld [vmem:[%s9503_s28 + $0x34] sm:$0xf]  ;;  %v7924_v17 = vcombine.low %v7652_v15, %v9521_v12  ;;  %v7656_v18 = vld [vmem:[%s9503_s28 + $0x30] sm:$0xe]  ;;  %v1590_v21 = vrot.slane %v8843_v9, 1 }
  0x1a   : > { %v9531_v19 = vld [vmem:[%s9503_s28 + $0x40] sm:$0xf]  ;;  %v7928_v23 = vcombine.low %v7656_v18, %v9526_v16  ;;  %v7658_v24 = vld [vmem:[%s9503_s28 + $0x3c] sm:$0xe]  ;;  %v9542_v30 = vld [vmem:[%s9503_s28 + $0x4c] sm:$0xf] }
  0x1b   : > { %1638 = vrot.lane.b32.xlu1 %v1587_v7, %s9436_s29  ;;  %v1582_v20 = vsel %vm1579_vm0, %v1580_v13, %v1581_v4  ;;  %v1586_v22 = vrot.slane %v7926_v14, 1  ;;  %v1583_v25 = vrot.slane %v7924_v17, 1  ;;  %v8847_v28 = vld [vmem:[%s9503_s28 + $0x44] ss:$0 sps:$4 sm:$0x33]   ;;  %v7930_v29 = vcombine.low %v7658_v24, %v9531_v19 }
  0x1c   : > { %1628 = vrot.lane.b32.xlu0 %v1582_v20, %s9436_s29  ;;  %v1589_v27 = vrot.slane %v7928_v23, 1  ;;  %v7660_v31 = vld [vmem:[%s9503_s28 + $0x48] sm:$0xe]  ;;  %v1593_v34 = vrot.slane %v8847_v28, 1  ;;  %v9552_v38 = vld [vmem:[%s9503_s28 + $0x58] sm:$0xf] }
  0x1d   : > { %v1588_v26 = vsel %vm1579_vm0, %v1586_v22, %v1587_v7  ;;  %v1585_v32 = vsel %vm1579_vm0, %v1583_v25, %v1584_v2  ;;  %v1592_v35 = vrot.slane %v7930_v29, 1  ;;  %v8849_v36 = vld [vmem:[%s9503_s28 + $0x50] ss:$0 sps:$4 sm:$0x33]   ;;  %v7932_v37 = vcombine.low %v7660_v31, %v9542_v30  ;;  %v7662_v39 = vld [vmem:[%s9503_s28 + $0x54] sm:$0xe] }
  0x1e   : > { %v1591_v33 = vsel %vm1579_vm0, %v1589_v27, %v1590_v21  ;;  %v1596_v41 = vrot.slane %v8849_v36, 1  ;;  %v8851_v43 = vld [vmem:[%s9503_s28 + $0x5c] ss:$0 sps:$4 sm:$0x33]   ;;  %v7934_v44 = vcombine.low %v7662_v39, %v9552_v38  ;;  %v9561_v45 = vld [vmem:[%s9503_s28 + $0x64] sm:$0xf] }
  0x1f   : > { %1642 = vrot.lane.b32.xlu1 %v1590_v21, %s9436_s29  ;;  %v1594_v40 = vsel %vm1579_vm0, %v1592_v35, %v1593_v34  ;;  %v1595_v42 = vrot.slane %v7932_v37, 1  ;;  %v7664_v46 = vld [vmem:[%s9503_s28 + $0x60] sm:$0xe]  ;;  %v1599_v48 = vrot.slane %v8851_v43, 1  ;;  %v9570_v52 = vld [vmem:[%s9503_s28 + $0x70] sm:$0xf] }
  0x20   : > { %1636 = vrot.lane.b32.xlu0 %v1588_v26, %s9436_s29  ;;  %v1598_v49 = vrot.slane %v7934_v44, 1  ;;  %v8853_v50 = vld [vmem:[%s9503_s28 + $0x68] ss:$0 sps:$4 sm:$0x33]   ;;  %v7936_v51 = vcombine.low %v7664_v46, %v9561_v45  ;;  %v7666_v53 = vld [vmem:[%s9503_s28 + $0x6c] sm:$0xe] }
  0x21   : > { %v1597_v47 = vsel %vm1579_vm0, %v1595_v42, %v1596_v41  ;;  %v1602_v55 = vrot.slane %v8853_v50, 1  ;;  %v8855_v57 = vld [vmem:[%s9503_s28 + $0x74] ss:$0 sps:$4 sm:$0x33]   ;;  %v7938_v58 = vcombine.low %v7666_v53, %v9570_v52  ;;  %v9579_v59 = vld [vmem:[%s9503_s28 + $0x7c] sm:$0xf] }
  0x22   : > { %v1600_v54 = vsel %vm1579_vm0, %v1598_v49, %v1599_v48  ;;  %v1601_v56 = vrot.slane %v7936_v51, 1  ;;  %v7668_v60 = vld [vmem:[%s9503_s28 + $0x78] sm:$0xe]  ;;  %v8857_v61 = vld [vmem:[%s9503_s28 + $0x80] ss:$0 sps:$4 sm:$0x33]  }
  0x23   : > { %1632 = vrot.lane.b32.xlu1 %v1585_v32, %s9436_s29  ;;  %v1605_v63 = vrot.slane %v8855_v57, 1  ;;  %v1604_v0 = vrot.slane %v7938_v58, 1  ;;  %v7940_v1 = vcombine.low %v7668_v60, %v9579_v59  ;;  %v9588_v2 = vld [vmem:[%s9503_s28 + $0x88] sm:$0xf]  ;;  %v7670_v3 = vld [vmem:[%s9503_s28 + $0x84] sm:$0xe] }
  0x24   : > { %1640 = vrot.lane.b32.xlu0 %v1591_v33, %s9436_s29  ;;  %v1603_v62 = vsel %vm1579_vm0, %v1601_v56, %v1602_v55  ;;  %v1608_v4 = vrot.slane %v8857_v61, 1  ;;  %v8859_v8 = vld [vmem:[%s9503_s28 + $0x8c] ss:$0 sps:$4 sm:$0x33]   ;;  %v7942_v9 = vcombine.low %v7670_v3, %v9588_v2  ;;  %v9597_v11 = vld [vmem:[%s9503_s28 + $0x94] sm:$0xf] }
  0x25   : > { %v1606_v6 = vsel %vm1579_vm0, %v1604_v0, %v1605_v63  ;;  %v1607_v7 = vrot.slane %v7940_v1, 1  ;;  %v7672_v13 = vld [vmem:[%s9503_s28 + $0x90] sm:$0xe]  ;;  %v8861_v14 = vld [vmem:[%s9503_s28 + $0x98] ss:$0 sps:$4 sm:$0x33]  }
  0x26   : > { %v1611_v17 = vrot.slane %v8859_v8, 1  ;;  %v1610_v18 = vrot.slane %v7942_v9, 1  ;;  %v7944_v20 = vcombine.low %v7672_v13, %v9597_v11  ;;  %v9606_v21 = vld [vmem:[%s9503_s28 + $0xa0] sm:$0xf]  ;;  %v7674_v22 = vld [vmem:[%s9503_s28 + $0x9c] sm:$0xe] }
  0x27   : > { %1646 = vrot.lane.b32.xlu1 %v1593_v34, %s9436_s29  ;;  %v1609_v15 = vsel %vm1579_vm0, %v1607_v7, %v1608_v4  ;;  %v1614_v24 = vrot.slane %v8861_v14, 1  ;;  %v8863_v26 = vld [vmem:[%s9503_s28 + $0xa4] ss:$0 sps:$4 sm:$0x33]   ;;  %v7946_v27 = vcombine.low %v7674_v22, %v9606_v21  ;;  %v9615_v28 = vld [vmem:[%s9503_s28 + $0xac] sm:$0xf] }
  0x28   : > { %1644 = vrot.lane.b32.xlu0 %v1594_v40, %s9436_s29  ;;  %v1612_v23 = vsel %vm1579_vm0, %v1610_v18, %v1611_v17  ;;  %v1613_v25 = vrot.slane %v7944_v20, 1  ;;  %v7676_v29 = vld [vmem:[%s9503_s28 + $0xa8] sm:$0xe]  ;;  %v8865_v31 = vld [vmem:[%s9503_s28 + $0xb0] ss:$0 sps:$4 sm:$0x33]  }
  0x29   : > { %v1617_v33 = vrot.slane %v8863_v26, 1  ;;  %v1616_v34 = vrot.slane %v7946_v27, 1  ;;  %v7948_v35 = vcombine.low %v7676_v29, %v9615_v28  ;;  %v9624_v36 = vld [vmem:[%s9503_s28 + $0xb8] sm:$0xf]  ;;  %v7678_v37 = vld [vmem:[%s9503_s28 + $0xb4] sm:$0xe] }
  0x2a   : > { %v1615_v32 = vsel %vm1579_vm0, %v1613_v25, %v1614_v24  ;;  %v1620_v39 = vrot.slane %v8865_v31, 1  ;;  %v8867_v42 = vld [vmem:[%s9503_s28 + $0xbc] ss:$0 sps:$4 sm:$0x33]   ;;  %v7950_v43 = vcombine.low %v7678_v37, %v9624_v36  ;;  %v9633_v44 = vld [vmem:[%s9503_s28 + $0xc4] sm:$0xf] }
  0x2b   : > { %1650 = vrot.lane.b32.xlu1 %v1596_v41, %s9436_s29  ;;  %v1618_v40 = vsel %vm1579_vm0, %v1616_v34, %v1617_v33  ;;  %v1619_v41 = vrot.slane %v7948_v35, 1  ;;  %v7680_v46 = vld [vmem:[%s9503_s28 + $0xc0] sm:$0xe]  ;;  %v1623_v49 = vrot.slane %v8867_v42, 1  ;;  %v7682_v53 = vld [vmem:[%s9503_s28 + $0xc] sm:$0xc] }
  0x2c   : > { %1648 = vrot.lane.b32.xlu0 %v1597_v47, %s9436_s29  ;;  %v8869_v47 = vld [vmem:[%s9503_s28 + $0xc8] ss:$0 sps:$4 sm:$0x33]   ;;  %v1622_v50 = vrot.slane %v7950_v43, 1  ;;  %v7952_v51 = vcombine.low %v7680_v46, %v9633_v44  ;;  %v7954_v58 = vcombine.low %v7682_v53, %v9509_v5  ;;  %v7684_v60 = vld [vmem:[%s9503_s28 + $0x18] sm:$0xc] }
  0x2d   : > { %v8871_v57 = vld [vmem:[%s9503_s28 + $0x14] ss:$0 sps:$4 sm:$0x77]   ;;  %v8873_v61 = vld [vmem:[%s9503_s28 + $0x20] ss:$0 sps:$4 sm:$0x77]   ;;  %v7956_v1 = vcombine.low %v7684_v60, %v9521_v12 }
  0x2e   : > { %v1625_v56 = vrot.slane %v7952_v51, 1  ;;  %v1789_v0 = vrot.slane %v7954_v58, 2  ;;  %v7686_v3 = vld [vmem:[%s9503_s28 + $0x24] sm:$0xc]  ;;  %v7688_v9 = vld [vmem:[%s9503_s28 + $0x30] sm:$0xc] }
  0x2f   : > { %1654 = vrot.lane.b32.xlu1 %v1599_v48, %s9436_s29  ;;  %v1621_v48 = vsel %vm1579_vm0, %v1619_v41, %v1620_v39  ;;  %v8875_v7 = vld [vmem:[%s9503_s28 + $0x2c] ss:$0 sps:$4 sm:$0x77]   ;;  %v7958_v8 = vcombine.low %v7686_v3, %v9517_v10  ;;  %v8877_v12 = vld [vmem:[%s9503_s28 + $0x38] ss:$0 sps:$4 sm:$0x77]  }
  0x30   : > { %1652 = vrot.lane.b32.xlu0 %v1600_v54, %s9436_s29  ;;  %v1626_v54 = vrot.slane %v8869_v47, 1  ;;  %v1796_v14 = vrot.slane %v8875_v7, 2  ;;  %v7690_v18 = vld [vmem:[%s9503_s28 + $0x3c] sm:$0xc]  ;;  %v1799_v10 = vrot.slane %v8877_v12, 2 }
  0x31   : > { %v7692_v25 = vld [vmem:[%s9503_s28 + $0x48] sm:$0xc]  ;;  %v8883_v35 = vld [vmem:[%s9503_s28 + $0x5c] ss:$0 sps:$4 sm:$0x77]  }
  0x32   : > { %v7964_v31 = vcombine.low %v7692_v25, %v9542_v30  ;;  %v8885_v30 = vld [vmem:[%s9503_s28 + $0x68] ss:$0 sps:$4 sm:$0x77]   ;;  %v1808_v41 = vrot.slane %v8883_v35, 2  ;;  %v7698_v46 = vld [vmem:[%s9503_s28 + $0x6c] sm:$0xc] }
  0x33   : > { %1658 = vrot.lane.b32.xlu1 %v1602_v55, %s9436_s29  ;;  %v1624_v55 = vsel %vm1579_vm0, %v1622_v50, %v1623_v49  ;;  %v1811_v47 = vrot.slane %v8885_v30, 2  ;;  %v7970_v50 = vcombine.low %v7698_v46, %v9570_v52  ;;  %v7700_v51 = vld [vmem:[%s9503_s28 + $0x78] sm:$0xc]  ;;  %v7708_v12 = vld [vmem:[%s9503_s28 + $0xa8] sm:$0xc] }
  0x34   : > { %1656 = vrot.lane.b32.xlu0 %v1603_v62, %s9436_s29  ;;  %v1627_v62 = vsel %vm1579_vm0, %v1625_v56, %v1626_v54  ;;  %v1804_v34 = vrot.slane %v7964_v31, 2  ;;  %v7972_v56 = vcombine.low %v7700_v51, %v9579_v59  ;;  %v8893_v59 = vld [vmem:[%s9503_s28 + $0x98] ss:$0 sps:$4 sm:$0x77]   ;;  %v7714_v35 = vld [vmem:[%s9503_s28 + $0x24] sm:$0xf] }
  0x35   : > { %v8907_v25 = vld [vmem:[%s9503_s28 + $0xc8] ss:$0 sps:$4 sm:$0x77]   ;;  %v8915_v46 = vld [vmem:[%s9503_s28 + $0x38] ss:$0 sps:$4 sm:$0x11]  }
  0x36   : > { %v1816_v60 = vrot.slane %v7972_v56, 2  ;;  %v8919_v51 = vld [vmem:[%s9503_s28 + $0x44] ss:$0 sps:$4 sm:$0x11]  }
  0x37   : > { %1662 = vrot.lane.b32.xlu1 %v1605_v63, %s9436_s29  ;;  %v1790_v63 = vrot.slane %v8871_v57, 2  ;;  %v7702_v57 = vld [vmem:[%s9503_s28 + $0x84] sm:$0xc] }
  0x38   : > { %1660 = vrot.lane.b32.xlu0 %v1606_v6, %s9436_s29  ;;  %v1792_v6 = vrot.slane %v7956_v1, 2 }
  0x39   : > { %v1791_v5 = vsel %vm1788_vm1, %v1789_v0, %v1790_v63 }
  0x3b   : > { %1666 = vrot.lane.b32.xlu1 %v1608_v4, %s9436_s29  ;;  %v1793_v4 = vrot.slane %v8873_v61, 2  ;;  %v8891_v61 = vld [vmem:[%s9503_s28 + $0x8c] ss:$0 sps:$4 sm:$0x77]  }
  0x3c   : > { %1664 = vrot.lane.b32.xlu0 %v1609_v15, %s9436_s29  ;;  %v1795_v15 = vrot.slane %v7958_v8, 2  ;;  %v1820_v1 = vrot.slane %v8891_v61, 2  ;;  %v8895_v8 = vld [vmem:[%s9503_s28 + $0xa4] ss:$0 sps:$4 sm:$0x77]  }
  0x3d   : > { %v1794_v13 = vsel %vm1788_vm1, %v1792_v6, %v1793_v4  ;;  %v1823_v6 = vrot.slane %v8893_v59, 2 }
  0x3e   : > { %v1797_v20 = vsel %vm1788_vm1, %v1795_v15, %v1796_v14  ;;  %v8899_v15 = vld [vmem:[%s9503_s28 + $0xb0] ss:$0 sps:$4 sm:$0x77]  }
  0x3f   : > { %1670 = vrot.lane.b32.xlu1 %v1611_v17, %s9436_s29  ;;  %v7960_v17 = vcombine.low %v7688_v9, %v9526_v16  ;;  %v8881_v16 = vld [vmem:[%s9503_s28 + $0x50] ss:$0 sps:$4 sm:$0x77]  }
  0x40   : > { %1668 = vrot.lane.b32.xlu0 %v1612_v23, %s9436_s29  ;;  %v8879_v23 = vld [vmem:[%s9503_s28 + $0x44] ss:$0 sps:$4 sm:$0x77]  }
  0x41   : > { %v1798_v22 = vrot.slane %v7960_v17, 2  ;;  %v1802_v27 = vrot.slane %v8879_v23, 2  ;;  %v7980_v17 = vcombine.low %v7708_v12, %v9615_v28  ;;  %v7726_v12 = vld [vmem:[%s9503_s28 + $0x6c] sm:$0xf] }
  0x43   : > { %1674 = vrot.lane.b32.xlu1 %v1614_v24, %s9436_s29  ;;  %v7962_v24 = vcombine.low %v7690_v18, %v9531_v19  ;;  %v1800_v26 = vsel %vm1788_vm1, %v1798_v22, %v1799_v10  ;;  %v1805_v19 = vrot.slane %v8881_v16, 2  ;;  %v7710_v18 = vld [vmem:[%s9503_s28 + $0xb4] sm:$0xc]  ;;  %v8903_v22 = vld [vmem:[%s9503_s28 + $0xbc] ss:$0 sps:$4 sm:$0x77]  }
  0x44   : > { %1672 = vrot.lane.b32.xlu0 %v1615_v32, %s9436_s29  ;;  %v7694_v32 = vld [vmem:[%s9503_s28 + $0x54] sm:$0xc]  ;;  %v7982_v23 = vcombine.low %v7710_v18, %v9624_v36  ;;  %v7728_v18 = vld [vmem:[%s9503_s28 + $0x78] sm:$0xf] }
  0x45   : > { %v1801_v29 = vrot.slane %v7962_v24, 2  ;;  %v7966_v37 = vcombine.low %v7694_v32, %v9552_v38  ;;  %v7712_v24 = vld [vmem:[%s9503_s28 + $0xc0] sm:$0xc] }
  0x47   : > { %1678 = vrot.lane.b32.xlu1 %v1617_v33, %s9436_s29  ;;  %v1803_v33 = vsel %vm1788_vm1, %v1801_v29, %v1802_v27  ;;  %v1807_v42 = vrot.slane %v7966_v37, 2  ;;  %v7984_v29 = vcombine.low %v7712_v24, %v9633_v44  ;;  %v9750_v44 = vld [vmem:[%s9503_s28 + $0x28] sm:$0xf]  ;;  %v7730_v24 = vld [vmem:[%s9503_s28 + $0x84] sm:$0xf] }
  0x48   : > { %1676 = vrot.lane.b32.xlu0 %v1618_v40, %s9436_s29  ;;  %v1806_v40 = vsel %vm1788_vm1, %v1804_v34, %v1805_v19 }
  0x49   : > { %v1809_v38 = vsel %vm1788_vm1, %v1807_v42, %v1808_v41  ;;  %v7986_v42 = vcombine.low %v7714_v35, %v9750_v44 }
  0x4b   : > { %1682 = vrot.lane.b32.xlu1 %v1620_v39, %s9436_s29  ;;  %v7696_v39 = vld [vmem:[%s9503_s28 + $0x60] sm:$0xc] }
  0x4c   : > { %1680 = vrot.lane.b32.xlu0 %v1621_v48, %s9436_s29  ;;  %v7968_v43 = vcombine.low %v7696_v39, %v9561_v45  ;;  %v8889_v45 = vld [vmem:[%s9503_s28 + $0x80] ss:$0 sps:$4 sm:$0x77]  }
  0x4d   : > { %v1817_v52 = vrot.slane %v8889_v45, 2  ;;  %v7718_v45 = vld [vmem:[%s9503_s28 + $0x3c] sm:$0xf] }
  0x4e   : > { %v1810_v48 = vrot.slane %v7968_v43, 2 }
  0x4f   : > { %1686 = vrot.lane.b32.xlu1 %v1623_v49, %s9436_s29  ;;  %v8887_v49 = vld [vmem:[%s9503_s28 + $0x74] ss:$0 sps:$4 sm:$0x77]   ;;  %v1818_v0 = vsel %vm1788_vm1, %v1816_v60, %v1817_v52 }
  0x50   : > { %1684 = vrot.lane.b32.xlu0 %v1624_v55, %s9436_s29  ;;  %v1812_v53 = vsel %vm1788_vm1, %v1810_v48, %v1811_v47  ;;  %v1813_v55 = vrot.slane %v7970_v50, 2  ;;  %v9774_v48 = vld [vmem:[%s9503_s28 + $0x40] sm:$0xf] }
  0x53   : > { %1690 = vrot.lane.b32.xlu1 %v1626_v54, %s9436_s29  ;;  %v1814_v54 = vrot.slane %v8887_v49, 2 }
  0x54   : > { %1688 = vrot.lane.b32.xlu0 %v1627_v62, %s9436_s29  ;;  %v7974_v62 = vcombine.low %v7702_v57, %v9588_v2  ;;  %v7720_v57 = vld [vmem:[%s9503_s28 + $0x48] sm:$0xf] }
  0x55   : > { %v1815_v58 = vsel %vm1788_vm1, %v1813_v55, %v1814_v54  ;;  %v7990_v55 = vcombine.low %v7718_v45, %v9774_v48 }
  0x56   : > { %v1819_v3 = vrot.slane %v7974_v62, 2  ;;  %v9802_v62 = vld [vmem:[%s9503_s28 + $0x58] sm:$0xf] }
  0x57   : > { %1839 = vrot.lane.b32.xlu1 %v1790_v63, %s9437_s30  ;;  %v7704_v63 = vld [vmem:[%s9503_s28 + $0x90] sm:$0xc] }
  0x58   : > { %1837 = vrot.lane.b32.xlu0 %v1791_v5, %s9437_s30  ;;  %v7976_v5 = vcombine.low %v7704_v63, %v9597_v11  ;;  %v1821_v2 = vsel %vm1788_vm1, %v1819_v3, %v1820_v1  ;;  %v7722_v63 = vld [vmem:[%s9503_s28 + $0x54] sm:$0xf] }
  0x5a   : > { %v1822_v7 = vrot.slane %v7976_v5, 2  ;;  %v8931_v5 = vld [vmem:[%s9503_s28 + $0x68] ss:$0 sps:$4 sm:$0x11]  }
  0x5b   : > { %1843 = vrot.lane.b32.xlu1 %v1793_v4, %s9437_s30  ;;  %v7706_v4 = vld [vmem:[%s9503_s28 + $0x9c] sm:$0xc] }
  0x5c   : > { %1841 = vrot.lane.b32.xlu0 %v1794_v13, %s9437_s30  ;;  %v7978_v9 = vcombine.low %v7706_v4, %v9606_v21  ;;  %v1824_v11 = vsel %vm1788_vm1, %v1822_v7, %v1823_v6  ;;  %v1826_v13 = vrot.slane %v8895_v8, 2  ;;  %v9815_v4 = vld [vmem:[%s9503_s28 + $0x64] sm:$0xf]  ;;  %v9822_v7 = vld [vmem:[%s9503_s28 + $0x70] sm:$0xf] }
  0x5f   : > { %1847 = vrot.lane.b32.xlu1 %v1796_v14, %s9437_s30  ;;  %v1825_v14 = vrot.slane %v7978_v9, 2 }
  0x60   : > { %1845 = vrot.lane.b32.xlu0 %v1797_v20, %s9437_s30  ;;  %v1828_v20 = vrot.slane %v7980_v17, 2 }
  0x61   : > { %v1827_v21 = vsel %vm1788_vm1, %v1825_v14, %v1826_v13  ;;  %v9834_v14 = vld [vmem:[%s9503_s28 + $0x7c] sm:$0xf] }
  0x63   : > { %1851 = vrot.lane.b32.xlu1 %v1799_v10, %s9437_s30  ;;  %v1829_v10 = vrot.slane %v8899_v15, 2  ;;  %v7998_v15 = vcombine.low %v7726_v12, %v9822_v7 }
  0x64   : > { %1849 = vrot.lane.b32.xlu0 %v1800_v26, %s9437_s30  ;;  %v1832_v26 = vrot.slane %v8903_v22, 2  ;;  %v9848_v22 = vld [vmem:[%s9503_s28 + $0x88] sm:$0xf] }
  0x65   : > { %v1830_v16 = vsel %vm1788_vm1, %v1828_v20, %v1829_v10  ;;  %v8000_v20 = vcombine.low %v7728_v18, %v9834_v14 }
  0x67   : > { %1855 = vrot.lane.b32.xlu1 %v1802_v27, %s9437_s30  ;;  %v1831_v27 = vrot.slane %v7982_v23, 2 }
  0x68   : > { %1853 = vrot.lane.b32.xlu0 %v1803_v33, %s9437_s30  ;;  %v1834_v33 = vrot.slane %v7984_v29, 2  ;;  %v9862_v29 = vld [vmem:[%s9503_s28 + $0x94] sm:$0xf] }
  0x69   : > { %v1833_v32 = vsel %vm1788_vm1, %v1831_v27, %v1832_v26 }
  0x6b   : > { %1859 = vrot.lane.b32.xlu1 %v1805_v19, %s9437_s30  ;;  %v1835_v19 = vrot.slane %v8907_v25, 2 }
  0x6c   : > { %1857 = vrot.lane.b32.xlu0 %v1806_v40, %s9437_s30  ;;  %v8911_v40 = vld [vmem:[%s9503_s28 + $0x2c] ss:$0 sps:$4 sm:$0x11]  }
  0x6d   : > { %v1836_v39 = vsel %vm1788_vm1, %v1834_v33, %v1835_v19  ;;  %v8947_v33 = vld [vmem:[%s9503_s28 + $0x98] ss:$0 sps:$4 sm:$0x11]  }
  0x6f   : > { %1863 = vrot.lane.b32.xlu1 %v1808_v41, %s9437_s30  ;;  %v9762_v41 = vld [vmem:[%s9503_s28 + $0x34] sm:$0xf] }
  0x70   : > { %1861 = vrot.lane.b32.xlu0 %v1809_v38, %s9437_s30  ;;  %v7716_v38 = vld [vmem:[%s9503_s28 + $0x30] sm:$0xf] }
  0x71   : > { %v7988_v49 = vcombine.low %v7716_v38, %v9762_v41 }
  0x73   : > { %1867 = vrot.lane.b32.xlu1 %v1811_v47, %s9437_s30 }
  0x74   : > { %1865 = vrot.lane.b32.xlu0 %v1812_v53, %s9437_s30 }
  0x77   : > { %1871 = vrot.lane.b32.xlu1 %v1814_v54, %s9437_s30  ;;  %v9786_v54 = vld [vmem:[%s9503_s28 + $0x4c] sm:$0xf] }
  0x78   : > { %1869 = vrot.lane.b32.xlu0 %v1815_v58, %s9437_s30  ;;  %v8923_v58 = vld [vmem:[%s9503_s28 + $0x50] ss:$0 sps:$4 sm:$0x11]   ;;  %v7992_v60 = vcombine.low %v7720_v57, %v9786_v54 }
  0x7b   : > { %1875 = vrot.lane.b32.xlu1 %v1817_v52, %s9437_s30 }
  0x7c   : > { %1873 = vrot.lane.b32.xlu0 %v1818_v0, %s9437_s30  ;;  %v8927_v0 = vld [vmem:[%s9503_s28 + $0x5c] ss:$0 sps:$4 sm:$0x11]  }
  0x7f   : > { %1879 = vrot.lane.b32.xlu1 %v1820_v1, %s9437_s30  ;;  %v7994_v1 = vcombine.low %v7722_v63, %v9802_v62 }
  0x80   : > { %1877 = vrot.lane.b32.xlu0 %v1821_v2, %s9437_s30  ;;  %v7724_v2 = vld [vmem:[%s9503_s28 + $0x60] sm:$0xf] }
  0x81   : > { %v7996_v8 = vcombine.low %v7724_v2, %v9815_v4  ;;  %v8959_v2 = vld [vmem:[%s9503_s28 + $0xbc] ss:$0 sps:$4 sm:$0x11]  }
  0x83   : > { %1883 = vrot.lane.b32.xlu1 %v1823_v6, %s9437_s30 }
  0x84   : > { %1881 = vrot.lane.b32.xlu0 %v1824_v11, %s9437_s30 }
  0x87   : > { %1887 = vrot.lane.b32.xlu1 %v1826_v13, %s9437_s30  ;;  %v8935_v13 = vld [vmem:[%s9503_s28 + $0x74] ss:$0 sps:$4 sm:$0x11]  }
  0x88   : > { %1885 = vrot.lane.b32.xlu0 %v1827_v21, %s9437_s30 }
  0x89   : > { %v9735_v28 = vpop.permute.xlu1 %1634  ;;  %v9739_v31 = vpop.permute.xlu0 %1630 }
  0x8a   : > { %14138 = vst [vmem:[#allocation2_spill] sm:$0xff] %v9735_v28  ;;  %14139 = vst [vmem:[#allocation3_spill] sm:$0xff] %v9739_v31 }
  0x8b   : > { %1891 = vrot.lane.b32.xlu1 %v1829_v10, %s9437_s30  ;;  %v8939_v10 = vld [vmem:[%s9503_s28 + $0x80] ss:$0 sps:$4 sm:$0x11]  }
  0x8c   : > { %1889 = vrot.lane.b32.xlu0 %v1830_v16, %s9437_s30  ;;  %v8943_v16 = vld [vmem:[%s9503_s28 + $0x8c] ss:$0 sps:$4 sm:$0x11]  }
  0x8d   : > { %v9743_v36 = vpop.permute.xlu1 %1638 }
  0x8e   : > { %14140 = vst [vmem:[#allocation4_spill] sm:$0xff] %v9743_v36  ;;  %v9746_v34 = vpop.permute.xlu0 %1628 }
  0x8f   : > { %14141 = vst [vmem:[#allocation5_spill] sm:$0xff] %v9746_v34  ;;  %1895 = vrot.lane.b32.xlu1 %v1832_v26, %s9437_s30  ;;  %v8002_v26 = vcombine.low %v7730_v24, %v9848_v22  ;;  %v9920_v24 = vld [vmem:[%s9503_s28 + $0xd0] sm:$0xf] }
  0x90   : > { %1893 = vrot.lane.b32.xlu0 %v1833_v32, %s9437_s30  ;;  %v7732_v32 = vld [vmem:[%s9503_s28 + $0x90] sm:$0xf] }
  0x91   : > { %v9754_v37 = vpop.permute.xlu1 %1642  ;;  %v8004_v35 = vcombine.low %v7732_v32, %v9862_v29  ;;  %v8963_v32 = vld [vmem:[%s9503_s28 + $0xd4] ss:$0 sps:$4 sm:$0x11]  }
  0x92   : > { %14142 = vst [vmem:[#allocation6_spill] sm:$0xff] %v9754_v37  ;;  %v9757_v30 = vpop.permute.xlu0 %1636 }
  0x93   : > { %14143 = vst [vmem:[#allocation7_spill] sm:$0xff] %v9757_v30  ;;  %1899 = vrot.lane.b32.xlu1 %v1835_v19, %s9437_s30  ;;  %v10286_v30 = vld [vmem:[%s9503_s28 + $0x50] ss:$0 sps:$4 sm:$0x33]  }
  0x94   : > { %1897 = vrot.lane.b32.xlu0 %v1836_v39, %s9437_s30  ;;  %v9872_v39 = vld [vmem:[%s9503_s28 + $0xa0] sm:$0xf] }
  0x95   : > { %v9766_v43 = vpop.permute.xlu1 %1632 }
  0x96   : > { %14144 = vst [vmem:[#allocation8_spill] sm:$0xff] %v9766_v43  ;;  %v9770_v47 = vpop.permute.xlu0 %1640 }
  0x97   : > { %14145 = vst [vmem:[#allocation9_spill] sm:$0xff] %v9770_v47  ;;  %2031 = vrot.lane.b32.xlu1 %v8911_v40, %s9438_s7 }
  0x98   : > { %2029 = vrot.lane.b32.xlu0 %v7986_v42, %s9438_s7  ;;  %v8951_v42 = vld [vmem:[%s9503_s28 + $0xa4] ss:$0 sps:$4 sm:$0x11]  }
  0x99   : > { %v9778_v50 = vpop.permute.xlu1 %1646 }
  0x9a   : > { %14146 = vst [vmem:[#allocation10_spill] sm:$0xff] %v9778_v50  ;;  %v9782_v53 = vpop.permute.xlu0 %1644 }
  0x9b   : > { %14147 = vst [vmem:[#allocation11_spill] sm:$0xff] %v9782_v53  ;;  %2035 = vrot.lane.b32.xlu1 %v8915_v46, %s9438_s7  ;;  %v7734_v46 = vld [vmem:[%s9503_s28 + $0x9c] sm:$0xf] }
  0x9c   : > { %2033 = vrot.lane.b32.xlu0 %v7988_v49, %s9438_s7  ;;  %v9882_v49 = vld [vmem:[%s9503_s28 + $0xac] sm:$0xf] }
  0x9d   : > { %v9790_v56 = vpop.permute.xlu1 %1650 }
  0x9e   : > { %14148 = vst [vmem:[#allocation12_spill] sm:$0xff] %v9790_v56  ;;  %v9793_v52 = vpop.permute.xlu0 %1648 }
  0x9f   : > { %14149 = vst [vmem:[#allocation13_spill] sm:$0xff] %v9793_v52  ;;  %2039 = vrot.lane.b32.xlu1 %v8919_v51, %s9438_s7  ;;  %v8006_v51 = vcombine.low %v7734_v46, %v9872_v39  ;;  %v9936_v46 = vld [vmem:[%s9503_s28 + $0xdc] sm:$0xf] }
  0xa0   : > { %2037 = vrot.lane.b32.xlu0 %v7990_v55, %s9438_s7  ;;  %v7736_v55 = vld [vmem:[%s9503_s28 + $0xa8] sm:$0xf] }
  0xa1   : > { %v9799_v61 = vpop.permute.xlu1 %1654 }
  0xa2   : > { %14150 = vst [vmem:[#allocation14_spill] sm:$0xff] %v9799_v61  ;;  %v9805_v59 = vpop.permute.xlu0 %1652 }
  0xa3   : > { %14151 = vst [vmem:[#allocation15_spill] sm:$0xff] %v9805_v59  ;;  %2043 = vrot.lane.b32.xlu1 %v8923_v58, %s9438_s7  ;;  %v8955_v58 = vld [vmem:[%s9503_s28 + $0xb0] ss:$0 sps:$4 sm:$0x11]  }
  0xa4   : > { %2041 = vrot.lane.b32.xlu0 %v7992_v60, %s9438_s7  ;;  %v8008_v60 = vcombine.low %v7736_v55, %v9882_v49 }
  0xa5   : > { %v9811_v3 = vpop.permute.xlu1 %1658 }
  0xa6   : > { %14152 = vst [vmem:[#allocation16_spill] sm:$0xff] %v9811_v3  ;;  %v9818_v6 = vpop.permute.xlu0 %1656 }
  0xa7   : > { %14153 = vst [vmem:[#allocation17_spill] sm:$0xff] %v9818_v6  ;;  %2047 = vrot.lane.b32.xlu1 %v8927_v0, %s9438_s7  ;;  %v9898_v0 = vld [vmem:[%s9503_s28 + $0xb8] sm:$0xf]  ;;  %v10025_v6 = vld [vmem:[%s9503_s28 + $0x54] sm:$0xe] }
  0xa8   : > { %2045 = vrot.lane.b32.xlu0 %v7994_v1, %s9438_s7  ;;  %v7738_v1 = vld [vmem:[%s9503_s28 + $0xb4] sm:$0xf] }
  0xa9   : > { %v9826_v9 = vpop.permute.xlu1 %1662 }
  0xaa   : > { %14154 = vst [vmem:[#allocation18_spill] sm:$0xff] %v9826_v9  ;;  %v9829_v11 = vpop.permute.xlu0 %1660 }
  0xab   : > { %14155 = vst [vmem:[#allocation19_spill] sm:$0xff] %v9829_v11  ;;  %2051 = vrot.lane.b32.xlu1 %v8931_v5, %s9438_s7 }
  0xac   : > { %2049 = vrot.lane.b32.xlu0 %v7996_v8, %s9438_s7  ;;  %v8010_v8 = vcombine.low %v7738_v1, %v9898_v0 }
  0xad   : > { %v9838_v17 = vpop.permute.xlu1 %1666 }
  0xae   : > { %14156 = vst [vmem:[#allocation20_spill] sm:$0xff] %v9838_v17  ;;  %v9841_v21 = vpop.permute.xlu0 %1664 }
  0xaf   : > { %14157 = vst [vmem:[#allocation21_spill] sm:$0xff] %v9841_v21  ;;  %2055 = vrot.lane.b32.xlu1 %v8935_v13, %s9438_s7  ;;  %v9910_v13 = vld [vmem:[%s9503_s28 + $0xc4] sm:$0xf] }
  0xb0   : > { %2053 = vrot.lane.b32.xlu0 %v7998_v15, %s9438_s7  ;;  %v7740_v15 = vld [vmem:[%s9503_s28 + $0xc0] sm:$0xf] }
  0xb1   : > { %v9850_v23 = vpop.permute.xlu1 %1670 }
  0xb2   : > { %14158 = vst [vmem:[#allocation22_spill] sm:$0xff] %v9850_v23  ;;  %v9853_v25 = vpop.permute.xlu0 %1668  ;;  %v7536_v23 = vld [vmem:[%s9503_s28 + $0x5c] sm:$0x3] }
  0xb3   : > { %14159 = vst [vmem:[#allocation23_spill] sm:$0xff] %v9853_v25  ;;  %2059 = vrot.lane.b32.xlu1 %v8939_v10, %s9438_s7  ;;  %v8961_v10 = vld [vmem:[%s9503_s28 + $0xc8] ss:$0 sps:$4 sm:$0x11]   ;;  %v10004_v25 = vld [vmem:[%s9503_s28 + $0x48] sm:$0xe]  ;;  %v10029_v3 = vcombine.low %v7536_v23, %v7536_v23 }
  0xb4   : > { %2057 = vrot.lane.b32.xlu0 %v8000_v20, %s9438_s7  ;;  %v8012_v20 = vcombine.low %v7740_v15, %v9910_v13  ;;  %v9956_v15 = vld [vmem:[%s9503_s28 + $0x30] sm:$0xe]  ;;  %v7542_v23 = vld [vmem:[%s9503_s28 + $0x74] sm:$0x3] }
  0xb5   : > { %v9859_v27 = vpop.permute.xlu1 %1674  ;;  %14184 = vst [vmem:[#allocation48_spill] sm:$0xff] %v10029_v3 }
  0xb6   : > { %14160 = vst [vmem:[#allocation24_spill] sm:$0xff] %v9859_v27  ;;  %v9865_v19 = vpop.permute.xlu0 %1672 }
  0xb7   : > { %14161 = vst [vmem:[#allocation25_spill] sm:$0xff] %v9865_v19  ;;  %2063 = vrot.lane.b32.xlu1 %v8943_v16, %s9438_s7  ;;  %v7742_v16 = vld [vmem:[%s9503_s28 + $0xcc] sm:$0xf] }
  0xb8   : > { %2061 = vrot.lane.b32.xlu0 %v8002_v26, %s9438_s7 }
  0xb9   : > { %v9874_v40 = vpop.permute.xlu1 %1678 }
  0xba   : > { %14162 = vst [vmem:[#allocation26_spill] sm:$0xff] %v9874_v40  ;;  %v9878_v38 = vpop.permute.xlu0 %1676 }
  0xbb   : > { %14163 = vst [vmem:[#allocation27_spill] sm:$0xff] %v9878_v38  ;;  %2067 = vrot.lane.b32.xlu1 %v8947_v33, %s9438_s7  ;;  %v9927_v33 = vld [vmem:[%s9503_s28 + $0x2c] sm:$0x3] }
  0xbc   : > { %2065 = vrot.lane.b32.xlu0 %v8004_v35, %s9438_s7  ;;  %v9946_v1 = vcombine.low %v9927_v33, %v9927_v33  ;;  %v368_v28 = vshrl.u32 %v9927_v33, 16 }
  0xbd   : > { %v9886_v45 = vpop.permute.xlu1 %1682 }
  0xbe   : > { %14164 = vst [vmem:[#allocation28_spill] sm:$0xff] %v9886_v45  ;;  %v9889_v57 = vpop.permute.xlu0 %1680 }
  0xbf   : > { %14165 = vst [vmem:[#allocation29_spill] sm:$0xff] %v9889_v57  ;;  %2071 = vrot.lane.b32.xlu1 %v8951_v42, %s9438_s7  ;;  %v9932_v42 = vld [vmem:[%s9503_s28 + $0x24] sm:$0xe] }
  0xc0   : > { %2069 = vrot.lane.b32.xlu0 %v8006_v51, %s9438_s7  ;;  %v8014_v51 = vcombine.low %v7742_v16, %v9920_v24 }
  0xc1   : > { %v9895_v63 = vpop.permute.xlu1 %1686 }
  0xc2   : > { %14166 = vst [vmem:[#allocation30_spill] sm:$0xff] %v9895_v63  ;;  %v9901_v5 = vpop.permute.xlu0 %1684 }
  0xc3   : > { %14167 = vst [vmem:[#allocation31_spill] sm:$0xff] %v9901_v5  ;;  %2075 = vrot.lane.b32.xlu1 %v8955_v58, %s9438_s7  ;;  %v8965_v58 = vld [vmem:[%s9503_s28 + $0xe0] ss:$0 sps:$4 sm:$0x11]   ;;  %v9973_v5 = vcombine.low %v9956_v15, %v9762_v41 }
  0xc4   : > { %2073 = vrot.lane.b32.xlu0 %v8008_v60, %s9438_s7  ;;  %v7744_v60 = vld [vmem:[%s9503_s28 + $0xd8] sm:$0xf] }
  0xc5   : > { %v9907_v12 = vpop.permute.xlu1 %1690  ;;  %v2192_v19 = vrot.slane %v9973_v5, 1 }
  0xc6   : > { %14168 = vst [vmem:[#allocation32_spill] sm:$0xff] %v9907_v12  ;;  %v9913_v18 = vpop.permute.xlu0 %1688  ;;  %v2190_v12 = vrot.slane %v9946_v1, 1 }
  0xc7   : > { %14169 = vst [vmem:[#allocation33_spill] sm:$0xff] %v9913_v18  ;;  %2079 = vrot.lane.b32.xlu1 %v8959_v2, %s9438_s7  ;;  %v9950_v2 = vcombine.low %v9932_v42, %v9750_v44 }
  0xc8   : > { %2077 = vrot.lane.b32.xlu0 %v8010_v8, %s9438_s7  ;;  %v9953_v8 = vld [vmem:[%s9503_s28 + $0x38] sm:$0x3] }
  0xc9   : > { %v9923_v26 = vpop.permute.xlu1 %1839  ;;  %v2189_v18 = vrot.slane %v9950_v2, 1  ;;  %v9969_v63 = vcombine.low %v9953_v8, %v9953_v8 }
  0xca   : > { %14170 = vst [vmem:[#allocation34_spill] sm:$0xff] %v9923_v26  ;;  %v9929_v35 = vpop.permute.xlu0 %1837 }
  0xcb   : > { %14171 = vst [vmem:[#allocation35_spill] sm:$0xff] %v9929_v35  ;;  %2083 = vrot.lane.b32.xlu1 %v8961_v10, %s9438_s7  ;;  %v2191_v40 = vsel %vm1579_vm0, %v2189_v18, %v2190_v12  ;;  %v2193_v38 = vrot.slane %v9969_v63, 1 }
  0xcc   : > { %2081 = vrot.lane.b32.xlu0 %v8012_v20, %s9438_s7  ;;  %v8016_v20 = vcombine.low %v7744_v60, %v9936_v46  ;;  %v9981_v60 = vld [vmem:[%s9503_s28 + $0x3c] sm:$0xe] }
  0xcd   : > { %v9940_v55 = vpop.permute.xlu1 %1843  ;;  %v9996_v27 = vcombine.low %v9981_v60, %v9774_v48  ;;  %v2194_v17 = vsel %vm1579_vm0, %v2192_v19, %v2193_v38 }
  0xce   : > { %14172 = vst [vmem:[#allocation36_spill] sm:$0xff] %v9940_v55  ;;  %v9958_v10 = vpop.permute.xlu0 %1841 }
  0xcf   : > { %14173 = vst [vmem:[#allocation37_spill] sm:$0xff] %v9958_v10  ;;  %2087 = vrot.lane.b32.xlu1 %v8963_v32, %s9438_s7  ;;  %v9976_v32 = vld [vmem:[%s9503_s28 + $0x44] sm:$0x3]  ;;  %14178 = vst [vmem:[#allocation42_spill] sm:$0xff] %v9996_v27  ;;  %v2195_v9 = vrot.slane %v9996_v27, 1 }
  0xd0   : > { %2085 = vrot.lane.b32.xlu0 %v8014_v51, %s9438_s7  ;;  %v9987_v45 = vcombine.low %v9976_v32, %v9976_v32 }
  0xd1   : > { %v9963_v16 = vpop.permute.xlu1 %1847 }
  0xd2   : > { %14174 = vst [vmem:[#allocation38_spill] sm:$0xff] %v9963_v16  ;;  %v9978_v51 = vpop.permute.xlu0 %1845  ;;  %14176 = vst [vmem:[#allocation40_spill] sm:$0xff] %v9987_v45  ;;  %v2196_v11 = vrot.slane %v9987_v45, 1  ;;  %v9020_v16 = vld [vmem:[%s9503_s28 + $0x8] ss:$0 sps:$4 sm:$0x33]  }
  0xd3   : > { %14175 = vst [vmem:[#allocation39_spill] sm:$0xff] %v9978_v51  ;;  %2091 = vrot.lane.b32.xlu1 %v8965_v58, %s9438_s7  ;;  %v9999_v58 = vld [vmem:[%s9503_s28 + $0x50] sm:$0x3]  ;;  %v8230_v45 = vld [vmem:[%s9503_s28 + $0x30] sm:$0x8] }
  0xd4   : > { %2089 = vrot.lane.b32.xlu0 %v8016_v20, %s9438_s7  ;;  %v10010_v18 = vcombine.low %v9999_v58, %v9999_v58  ;;  %v2197_v59 = vsel %vm1579_vm0, %v2195_v9, %v2196_v11  ;;  %v2202_v9 = vrot.slane %v10029_v3, 1 }
  0xd5   : > { %v9989_v57 = vpop.permute.xlu1 %1851 }
  0xd6   : > { %14177 = vst [vmem:[#allocation41_spill] sm:$0xff] %v9989_v57  ;;  %v10001_v20 = vpop.permute.xlu0 %1849  ;;  %14180 = vst [vmem:[#allocation44_spill] sm:$0xff] %v10010_v18  ;;  %v2199_v61 = vrot.slane %v10010_v18, 1 }
  0xd7   : > { %14179 = vst [vmem:[#allocation43_spill] sm:$0xff] %v10001_v20  ;;  %2239 = vrot.lane.b32.xlu1 %v2190_v12, %s9439_s8  ;;  %v10020_v12 = vcombine.low %v10004_v25, %v9786_v54 }
  0xd8   : > { %2237 = vrot.lane.b32.xlu0 %v2191_v40, %s9439_s8 }
  0xd9   : > { %v10013_v21 = vpop.permute.xlu1 %1855  ;;  %14182 = vst [vmem:[#allocation46_spill] sm:$0xff] %v10020_v12 }
  0xda   : > { %14181 = vst [vmem:[#allocation45_spill] sm:$0xff] %v10013_v21  ;;  %v10022_v40 = vpop.permute.xlu0 %1853  ;;  %v2198_v21 = vrot.slane %v10020_v12, 1 }
  0xdb   : > { %14183 = vst [vmem:[#allocation47_spill] sm:$0xff] %v10022_v40  ;;  %2243 = vrot.lane.b32.xlu1 %v2193_v38, %s9439_s8  ;;  %v10038_v40 = vcombine.low %v10025_v6, %v9802_v62  ;;  %v7539_v38 = vld [vmem:[%s9503_s28 + $0x68] sm:$0x3] }
  0xdc   : > { %2241 = vrot.lane.b32.xlu0 %v2194_v17, %s9439_s8  ;;  %v10044_v17 = vld [vmem:[%s9503_s28 + $0x60] sm:$0xe]  ;;  %v2200_v56 = vsel %vm1579_vm0, %v2198_v21, %v2199_v61  ;;  %v10054_v53 = vcombine.low %v7539_v38, %v7539_v38 }
  0xdd   : > { %v10031_v19 = vpop.permute.xlu1 %1859  ;;  %14186 = vst [vmem:[#allocation50_spill] sm:$0xff] %v10038_v40  ;;  %14188 = vst [vmem:[#allocation52_spill] sm:$0xff] %v10044_v17  ;;  %v2201_v62 = vrot.slane %v10038_v40, 1  ;;  %v7858_v40 = vld [vmem:[%s9503_s28 + $0x3c] sm:$0xc] }
  0xde   : > { %14185 = vst [vmem:[#allocation49_spill] sm:$0xff] %v10031_v19  ;;  %v10040_v52 = vpop.permute.xlu0 %1857  ;;  %14190 = vst [vmem:[#allocation54_spill] sm:$0xff] %v10054_v53  ;;  %v2205_v20 = vrot.slane %v10054_v53, 1 }
  0xdf   : > { %14187 = vst [vmem:[#allocation51_spill] sm:$0xff] %v10040_v52  ;;  %2247 = vrot.lane.b32.xlu1 %v2196_v11, %s9439_s8  ;;  %v10058_v52 = vcombine.low %v10044_v17, %v9815_v4  ;;  %v7545_v11 = vld [vmem:[%s9503_s28 + $0x80] sm:$0x3]  ;;  %v2203_v38 = vsel %vm1579_vm0, %v2201_v62, %v2202_v9 }
  0xe0   : > { %2245 = vrot.lane.b32.xlu0 %v2197_v59, %s9439_s8  ;;  %v7540_v59 = vld [vmem:[%s9503_s28 + $0x6c] sm:$0xe] }
  0xe1   : > { %v10050_v19 = vpop.permute.xlu1 %1863  ;;  %14191 = vst [vmem:[#allocation55_spill] sm:$0xff] %v10058_v52  ;;  %v2204_v4 = vrot.slane %v10058_v52, 1  ;;  %v10283_v52 = vld [vmem:[%s9503_s28 + $0x3c] sm:$0xf] }
  0xe2   : > { %14189 = vst [vmem:[#allocation53_spill] sm:$0xff] %v10050_v19  ;;  %v10060_v50 = vpop.permute.xlu0 %1861  ;;  %v10066_v19 = vcombine.low %v7542_v23, %v7542_v23  ;;  %v7548_v23 = vld [vmem:[%s9503_s28 + $0x8c] sm:$0x3] }
  0xe3   : > { %14192 = vst [vmem:[#allocation56_spill] sm:$0xff] %v10060_v50  ;;  %2251 = vrot.lane.b32.xlu1 %v2199_v61, %s9439_s8  ;;  %v10074_v50 = vcombine.low %v7540_v59, %v9822_v7  ;;  %v7543_v61 = vld [vmem:[%s9503_s28 + $0x78] sm:$0xe]  ;;  %v2206_v62 = vsel %vm1579_vm0, %v2204_v4, %v2205_v20 }
  0xe4   : > { %2249 = vrot.lane.b32.xlu0 %v2200_v56, %s9439_s8  ;;  %14193 = vst [vmem:[#allocation57_spill] sm:$0xff] %v10066_v19  ;;  %v10081_v56 = vcombine.low %v7545_v11, %v7545_v11  ;;  %v2208_v51 = vrot.slane %v10066_v19, 1  ;;  %v10090_v59 = vcombine.low %v7543_v61, %v9834_v14  ;;  %v10096_v11 = vcombine.low %v7548_v23, %v7548_v23  ;;  %v7549_v23 = vld [vmem:[%s9503_s28 + $0x90] sm:$0xe] }
  0xe5   : > { %v10068_v21 = vpop.permute.xlu1 %1867  ;;  %14195 = vst [vmem:[#allocation59_spill] sm:$0xff] %v10074_v50  ;;  %v2207_v7 = vrot.slane %v10074_v50, 1  ;;  %v10255_v19 = vld [vmem:[%s9503_s28 + $0x10] sm:$0xf] }
  0xe6   : > { %14194 = vst [vmem:[#allocation58_spill] sm:$0xff] %v10068_v21  ;;  %v10076_v57 = vpop.permute.xlu0 %1865  ;;  %14197 = vst [vmem:[#allocation61_spill] sm:$0xff] %v10081_v56  ;;  %v2210_v14 = vrot.slane %v10090_v59, 1 }
  0xe7   : > { %14196 = vst [vmem:[#allocation60_spill] sm:$0xff] %v10076_v57  ;;  %2255 = vrot.lane.b32.xlu1 %v2202_v9, %s9439_s8  ;;  %14199 = vst [vmem:[#allocation63_spill] sm:$0xff] %v10090_v59  ;;  %v7546_v9 = vld [vmem:[%s9503_s28 + $0x84] sm:$0xe]  ;;  %v2209_v4 = vsel %vm1579_vm0, %v2207_v7, %v2208_v51 }
  0xe8   : > { %2253 = vrot.lane.b32.xlu0 %v2203_v38, %s9439_s8  ;;  %14201 = vst [vmem:[#allocation65_spill] sm:$0xff] %v10096_v11  ;;  %v10105_v61 = vcombine.low %v7546_v9, %v9848_v22  ;;  %v10121_v9 = vcombine.low %v7549_v23, %v9862_v29 }
  0xe9   : > { %v10084_v21 = vpop.permute.xlu1 %1871 }
  0xea   : > { %14198 = vst [vmem:[#allocation62_spill] sm:$0xff] %v10084_v21  ;;  %v10092_v57 = vpop.permute.xlu0 %1869  ;;  %v2211_v21 = vrot.slane %v10081_v56, 1  ;;  %14203 = vst [vmem:[#allocation67_spill] sm:$0xff] %v10105_v61  ;;  %v2213_v56 = vrot.slane %v10105_v61, 1  ;;  %v2216_v29 = vrot.slane %v10121_v9, 1 }
  0xeb   : > { %14200 = vst [vmem:[#allocation64_spill] sm:$0xff] %v10092_v57  ;;  %2259 = vrot.lane.b32.xlu1 %v2205_v20, %s9439_s8  ;;  %v7551_v20 = vld [vmem:[%s9503_s28 + $0x98] sm:$0x3]  ;;  %14207 = vst [vmem:[#allocation71_spill] sm:$0xff] %v10121_v9  ;;  %v7828_v61 = vld [vmem:[%s9503_s28 + $0x48] sm:$0xe] }
  0xec   : > { %2257 = vrot.lane.b32.xlu0 %v2206_v62, %s9439_s8  ;;  %v2214_v62 = vrot.slane %v10096_v11, 1  ;;  %v2212_v7 = vsel %vm1579_vm0, %v2210_v14, %v2211_v21  ;;  %v10118_v22 = vcombine.low %v7551_v20, %v7551_v20 }
  0xed   : > { %v10099_v38 = vpop.permute.xlu1 %1875 }
  0xee   : > { %14202 = vst [vmem:[#allocation66_spill] sm:$0xff] %v10099_v38  ;;  %v10107_v57 = vpop.permute.xlu0 %1873  ;;  %14206 = vst [vmem:[#allocation70_spill] sm:$0xff] %v10118_v22  ;;  %v2215_v14 = vsel %vm1579_vm0, %v2213_v56, %v2214_v62  ;;  %v2217_v20 = vrot.slane %v10118_v22, 1  ;;  %v7566_v22 = vld [vmem:[%s9503_s28 + $0xd4] sm:$0x3] }
  0xef   : > { %14204 = vst [vmem:[#allocation68_spill] sm:$0xff] %v10107_v57  ;;  %2263 = vrot.lane.b32.xlu1 %v2208_v51, %s9439_s8  ;;  %v7554_v57 = vld [vmem:[%s9503_s28 + $0xa4] sm:$0x3]  ;;  %v7552_v51 = vld [vmem:[%s9503_s28 + $0x9c] sm:$0xe] }
  0xf0   : > { %2261 = vrot.lane.b32.xlu0 %v2209_v4, %s9439_s8  ;;  %v10129_v4 = vcombine.low %v7554_v57, %v7554_v57  ;;  %v10137_v23 = vcombine.low %v7552_v51, %v9872_v39 }
  0xf1   : > { %v10114_v38 = vpop.permute.xlu1 %1879 }
  0xf2   : > { %14205 = vst [vmem:[#allocation69_spill] sm:$0xff] %v10114_v38  ;;  %v10124_v59 = vpop.permute.xlu0 %1877  ;;  %14209 = vst [vmem:[#allocation73_spill] sm:$0xff] %v10129_v4  ;;  %v2219_v39 = vrot.slane %v10137_v23, 1 }
  0xf3   : > { %14208 = vst [vmem:[#allocation72_spill] sm:$0xff] %v10124_v59  ;;  %2267 = vrot.lane.b32.xlu1 %v2211_v21, %s9439_s8  ;;  %14211 = vst [vmem:[#allocation75_spill] sm:$0xff] %v10137_v23  ;;  %v7557_v59 = vld [vmem:[%s9503_s28 + $0xb0] sm:$0x3]  ;;  %v7555_v21 = vld [vmem:[%s9503_s28 + $0xa8] sm:$0xe] }
  0xf4   : > { %2265 = vrot.lane.b32.xlu0 %v2212_v7, %s9439_s8  ;;  %v10145_v57 = vcombine.low %v7557_v59, %v7557_v59  ;;  %v2218_v7 = vsel %vm1579_vm0, %v2216_v29, %v2217_v20  ;;  %v10153_v51 = vcombine.low %v7555_v21, %v9882_v49  ;;  %v7563_v29 = vld [vmem:[%s9503_s28 + $0xc8] sm:$0x3] }
  0xf5   : > { %v10131_v38 = vpop.permute.xlu1 %1883 }
  0xf6   : > { %14210 = vst [vmem:[#allocation74_spill] sm:$0xff] %v10131_v38  ;;  %v10140_v11 = vpop.permute.xlu0 %1881  ;;  %14213 = vst [vmem:[#allocation77_spill] sm:$0xff] %v10145_v57  ;;  %v2220_v38 = vrot.slane %v10129_v4, 1  ;;  %v2223_v21 = vrot.slane %v10145_v57, 1  ;;  %v2222_v23 = vrot.slane %v10153_v51, 1  ;;  %v10186_v57 = vcombine.low %v7566_v22, %v7566_v22 }
  0xf7   : > { %14212 = vst [vmem:[#allocation76_spill] sm:$0xff] %v10140_v11  ;;  %2271 = vrot.lane.b32.xlu1 %v2214_v62, %s9439_s8  ;;  %14215 = vst [vmem:[#allocation79_spill] sm:$0xff] %v10153_v51  ;;  %v7560_v11 = vld [vmem:[%s9503_s28 + $0xbc] sm:$0x3] }
  0xf8   : > { %2269 = vrot.lane.b32.xlu0 %v2215_v14, %s9439_s8  ;;  %v7558_v14 = vld [vmem:[%s9503_s28 + $0xb4] sm:$0xe]  ;;  %v10161_v59 = vcombine.low %v7560_v11, %v7560_v11  ;;  %v2221_v49 = vsel %vm1579_vm0, %v2219_v39, %v2220_v38  ;;  %v7569_v11 = vld [vmem:[%s9503_s28 + $0xe0] sm:$0x3]  ;;  %14223 = vst [vmem:[#allocation87_spill] sm:$0xff] %v10186_v57 }
  0xf9   : > { %v10147_v56 = vpop.permute.xlu1 %1887 }
  0xfa   : > { %14214 = vst [vmem:[#allocation78_spill] sm:$0xff] %v10147_v56  ;;  %v10156_v62 = vpop.permute.xlu0 %1885  ;;  %14217 = vst [vmem:[#allocation81_spill] sm:$0xff] %v10161_v59  ;;  %v7561_v56 = vld [vmem:[%s9503_s28 + $0xc0] sm:$0xe]  ;;  %v2226_v51 = vrot.slane %v10161_v59, 1 }
  0xfb   : > { %14216 = vst [vmem:[#allocation80_spill] sm:$0xff] %v10156_v62  ;;  %2275 = vrot.lane.b32.xlu1 %v2217_v20, %s9439_s8  ;;  %v10171_v62 = vcombine.low %v7558_v14, %v9898_v0  ;;  %v7564_v20 = vld [vmem:[%s9503_s28 + $0xcc] sm:$0xe]  ;;  %v10184_v39 = vcombine.low %v7561_v56, %v9910_v13  ;;  %v7746_v14 = vld [vmem:[%s9503_s28 + $0x24] sm:$0xc] }
  0xfc   : > { %2273 = vrot.lane.b32.xlu0 %v2218_v7, %s9439_s8  ;;  %v7567_v7 = vld [vmem:[%s9503_s28 + $0xd8] sm:$0xe]  ;;  %v10189_v0 = vcombine.low %v7564_v20, %v9920_v24  ;;  %v10206_v24 = vld [vmem:[%s9503_s28 + $0x2c] ss:$0 sps:$4 sm:$0x77]  }
  0xfd   : > { %v10165_v4 = vpop.permute.xlu1 %1891  ;;  %14219 = vst [vmem:[#allocation83_spill] sm:$0xff] %v10171_v62  ;;  %14222 = vst [vmem:[#allocation86_spill] sm:$0xff] %v10184_v39  ;;  %v10202_v22 = vcombine.low %v7567_v7, %v9936_v46  ;;  %v2228_v20 = vrot.slane %v10184_v39, 1  ;;  %v7748_v7 = vld [vmem:[%s9503_s28 + $0x30] sm:$0xc]  ;;  %v14236_v47 = vrot.slane %v10206_v24, 2 }
  0xfe   : > { %14218 = vst [vmem:[#allocation82_spill] sm:$0xff] %v10165_v4  ;;  %v10175_v9 = vpop.permute.xlu0 %1889  ;;  %v10181_v4 = vcombine.low %v7563_v29, %v7563_v29  ;;  %14224 = vst [vmem:[#allocation88_spill] sm:$0xff] %v10189_v0  ;;  %v10197_v29 = vcombine.low %v7569_v11, %v7569_v11  ;;  %v2232_v11 = vrot.slane %v10186_v57, 1  ;;  %v2231_v46 = vrot.slane %v10189_v0, 1  ;;  %v10234_v39 = vld [vmem:[%s9503_s28 + $0x40] sm:$0xf] }
  0xff   : > { %14220 = vst [vmem:[#allocation84_spill] sm:$0xff] %v10175_v9  ;;  %2279 = vrot.lane.b32.xlu1 %v2220_v38, %s9439_s8  ;;  %v2224_v38 = vsel %vm1579_vm0, %v2222_v23, %v2223_v21  ;;  %14228 = vst [vmem:[#allocation92_spill] sm:$0xff] %v10202_v22  ;;  %v8050_v23 = vcombine.low %v7746_v14, %v9750_v44  ;;  %v10220_v14 = vld [vmem:[%s9503_s28 + $0x38] ss:$0 sps:$4 sm:$0x77]   ;;  %v2234_v57 = vrot.slane %v10202_v22, 1 }
 0x100   : > { %2277 = vrot.lane.b32.xlu0 %v2221_v49, %s9439_s8  ;;  %14221 = vst [vmem:[#allocation85_spill] sm:$0xff] %v10181_v4  ;;  %v2225_v49 = vrot.slane %v10171_v62, 1  ;;  %14226 = vst [vmem:[#allocation90_spill] sm:$0xff] %v10197_v29  ;;  %v2229_v56 = vrot.slane %v10181_v4, 1  ;;  %v7752_v4 = vld [vmem:[%s9503_s28 + $0x48] sm:$0xc] }
 0x101   : > { %v10192_v9 = vpop.permute.xlu1 %1895  ;;  %v10227_v0 = vld [vmem:[%s9503_s28 + $0x44] ss:$0 sps:$4 sm:$0x77]   ;;  %v2397_v44 = vrot.slane %v8050_v23, 2  ;;  %v7826_v59 = vld [vmem:[%s9503_s28 + $0x3c] sm:$0xe] }
 0x102   : > { %14225 = vst [vmem:[#allocation89_spill] sm:$0xff] %v10192_v9  ;;  %v10199_v13 = vpop.permute.xlu0 %1893  ;;  %v2227_v9 = vsel %vm1579_vm0, %v2225_v49, %v2226_v51  ;;  %v10240_v22 = vld [vmem:[%s9503_s28 + $0x50] ss:$0 sps:$4 sm:$0x77]   ;;  %v10243_v62 = vld [vmem:[%s9503_s28 + $0x4c] sm:$0xf] }
 0x103   : > { %14227 = vst [vmem:[#allocation91_spill] sm:$0xff] %v10199_v13  ;;  %2283 = vrot.lane.b32.xlu1 %v2223_v21, %s9439_s8  ;;  %14231 = vst [vmem:[#allocation95_spill] sm:$0xff] %v10240_v22  ;;  %v4097_v49 = vld [vmem:[%s9503_s28] sm:$0xe]  ;;  %v14240_v10 = vrot.slane %v10227_v0, 2 }
 0x104   : > { %2281 = vrot.lane.b32.xlu0 %v2224_v38, %s9439_s8  ;;  %v7750_v38 = vld [vmem:[%s9503_s28 + $0x3c] sm:$0xc] }
 0x105   : > { %v10215_v21 = vpop.permute.xlu1 %1899 }
 0x106   : > { %14229 = vst [vmem:[#allocation93_spill] sm:$0xff] %v10215_v21  ;;  %v10223_v13 = vpop.permute.xlu0 %1897  ;;  %v8052_v21 = vcombine.low %v7748_v7, %v9762_v41  ;;  %v2230_v41 = vsel %vm1579_vm0, %v2228_v20, %v2229_v56  ;;  %v8056_v7 = vcombine.low %v7752_v4, %v9786_v54  ;;  %v9022_v4 = vld [vmem:[%s9503_s28 + $0x14] ss:$0 sps:$4 sm:$0x33]  }
 0x107   : > { %14230 = vst [vmem:[#allocation94_spill] sm:$0xff] %v10223_v13  ;;  %2287 = vrot.lane.b32.xlu1 %v2226_v51, %s9439_s8  ;;  %v8054_v13 = vcombine.low %v7750_v38, %v9774_v48  ;;  %v10246_v51 = vld [vmem:[%s9503_s28 + $0x4] sm:$0xf]  ;;  %v8114_v48 = vcombine.low %v7826_v59, %v10234_v39  ;;  %v8116_v59 = vcombine.low %v7828_v61, %v10243_v62  ;;  %v4515_v55 = vshll.u32 %v9022_v4, 16 }
 0x108   : > { %2285 = vrot.lane.b32.xlu0 %v2227_v9, %s9439_s8  ;;  %v4099_v9 = vld [vmem:[%s9503_s28 + $0xc] sm:$0xe]  ;;  %v10262_v38 = vld [vmem:[%s9503_s28 + $0x44] ss:$0 sps:$4 sm:$0x33]   ;;  %v2400_v20 = vrot.slane %v8052_v21, 2  ;;  %v8357_v54 = vcombine.low %v4097_v49, %v10246_v51 }
 0x109   : > { %v10249_v23 = vpop.permute.xlu1 %2031  ;;  %v2403_v37 = vrot.slane %v8054_v13, 2  ;;  %v8359_v36 = vcombine.low %v4099_v9, %v10255_v19  ;;  %v14235_v21 = vrot.slane %v10197_v29, 1  ;;  %v2406_v13 = vrot.slane %v8056_v7, 2 }
 0x10a   : > { %14232 = vst [vmem:[#allocation96_spill] sm:$0xff] %v10249_v23  ;;  %v10258_v50 = vpop.permute.xlu0 %2029  ;;  %v2797_v3 = vrot.slane %v8114_v48, 1  ;;  %v4512_v7 = vshrl.u32 %v9022_v4, 16  ;;  %v2800_v23 = vrot.slane %v8116_v59, 1  ;;  %v8146_v59 = vcombine.low %v7858_v40, %v10234_v39 }
 0x10b   : > { %14233 = vst [vmem:[#allocation97_spill] sm:$0xff] %v10258_v50  ;;  %2291 = vrot.lane.b32.xlu1 %v2229_v56, %s9439_s8  ;;  %v2233_v56 = vsel %vm1579_vm0, %v2231_v46, %v2232_v11  ;;  %v2236_v49 = vsel %vm1579_vm0, %v2234_v57, %v14235_v21  ;;  %v7860_v57 = vld [vmem:[%s9503_s28 + $0x48] sm:$0xc]  ;;  %v4498_v21 = vshll.u32 %v9020_v16, 16  ;;  %v4504_v9 = vshrl.u32 %v8359_v36, 16 }
 0x10c   : > { %2289 = vrot.lane.b32.xlu0 %v2230_v41, %s9439_s8  ;;  %v2399_v41 = vsel %vm1788_vm1, %v2397_v44, %v14236_v47  ;;  %v4487_v47 = vshrl.u32 %v8357_v54, 16  ;;  %v4490_v44 = vshll.u32 %v8357_v54, 16  ;;  %v4507_v48 = vshll.u32 %v8359_v36, 16  ;;  %v4129_v36 = vld [vmem:[%s9503_s28] sm:$0x8] }
 0x10d   : > { %v10273_v53 = vpop.permute.xlu1 %2035  ;;  %v10304_v54 = vsel %vm1788_vm1, %v2403_v37, %v14240_v10  ;;  %v10322_v37 = vld [vmem:[%s9503_s28 + $0x48] sm:$0xf]  ;;  %v8148_v10 = vcombine.low %v7860_v57, %v10243_v62  ;;  %v10337_v35 = vrot.slane %v4498_v21, 2  ;;  %v10343_v57 = vrot.slane %v4504_v9, 1 }
 0x10e   : > { %14234 = vst [vmem:[#allocation98_spill] sm:$0xff] %v10273_v53  ;;  %v10288_v61 = vpop.permute.xlu0 %2033  ;;  %v4495_v53 = vshrl.u32 %v9020_v16, 16  ;;  %v10326_v16 = vld [vmem:[%s9503_s28 + $0x50] ss:$0 sps:$4 sm:$0x77]   ;;  %v10333_v50 = vrot.slane %v4487_v47, 1 }
 0x10f   : > { %14237 = vst [vmem:[#allocation99_spill] sm:$0xff] %v10288_v61  ;;  %2295 = vrot.lane.b32.xlu1 %v2232_v11, %s9439_s8  ;;  %v14239_v61 = vrot.slane %v10220_v14, 2  ;;  %v10345_v26 = vrot.slane %v4507_v48, 2  ;;  %v14246_v9 = vrot.slane %v10286_v30, 1 }
 0x110   : > { %2293 = vrot.lane.b32.xlu0 %v2233_v56, %s9439_s8  ;;  %v10309_v56 = vld [vmem:[%s9503_s28 + $0x44] ss:$0 sps:$4 sm:$0x77]   ;;  %v10328_v40 = vrot.slane %v4495_v53, 1  ;;  %v10347_v53 = vrot.slane %v4515_v55, 2  ;;  %v10367_v55 = vrot.slane %v8146_v59, 2 }
 0x111   : > { %v10296_v46 = vpop.permute.xlu1 %2039  ;;  %v2402_v11 = vsel %vm1788_vm1, %v2400_v20, %v14239_v61  ;;  %v14242_v20 = vrot.slane %v10240_v22, 2  ;;  %v5088_v59 = vshrl.u32 %v9946_v1, 16 }
 0x112   : > { %14238 = vst [vmem:[#allocation100_spill] sm:$0xff] %v10296_v46  ;;  %v10312_v4 = vpop.permute.xlu0 %2037  ;;  %v10335_v46 = vrot.slane %v4490_v44, 2  ;;  %v14245_v44 = vrot.slane %v10262_v38, 1 }
 0x113   : > { %14241 = vst [vmem:[#allocation101_spill] sm:$0xff] %v10312_v4  ;;  %v10319_v61 = vsel %vm1788_vm1, %v2406_v13, %v14242_v20  ;;  %v14243_v4 = vrot.slane %v10197_v29, 1  ;;  %v10339_v13 = vrot.slane %v4512_v7, 1  ;;  %v4131_v20 = vld [vmem:[%s9503_s28 + $0xc] sm:$0x8]  ;;  %v8389_v29 = vcombine.low %v4129_v36, %v10246_v51 }
 0x114   : > { %2297 = vrot.lane.b32.xlu0 %v2236_v49, %s9439_s8  ;;  %v10358_v21 = vsel %vm1579_vm0, %v2797_v3, %v14245_v44  ;;  %v10365_v7 = vsel %vm1579_vm0, %v2800_v23, %v14246_v9  ;;  %v10372_v36 = vrot.slane %v8148_v10, 2  ;;  %v5080_v3 = vshrl.u32 %v9950_v2, 16 }
 0x115   : > { %2299 = vrot.lane.b32.xlu1 %v14243_v4, %s9439_s8  ;;  %v10351_v4 = vld [vmem:[%s9503_s28 + $0x8] ss:$0 sps:$4 sm:$0x77]   ;;  %v10353_v47 = vpop.permute.xlu1 %2043  ;;  %v14248_v44 = vrot.slane %v10206_v24, 2  ;;  %v5083_v10 = vshll.u32 %v9950_v2, 16  ;;  %v5091_v9 = vshll.u32 %v9946_v1, 16 }
 0x116   : > { %14244 = vst [vmem:[#allocation102_spill] sm:$0xff] %v10353_v47  ;;  %v10369_v51 = vpop.permute.xlu0 %2041  ;;  %v8391_v47 = vcombine.low %v4131_v20, %v10255_v19  ;;  %v349_v2 = vshrl.u32 %v9932_v42, 16  ;;  %v10403_v20 = vrot.slane %v5080_v3, 1  ;;  %v8229_v3 = vld [vmem:[%s9503_s28 + $0x24] sm:$0x8]  ;;  %v10422_v12 = vrot.slane %v5088_v59, 1 }
 0x117   : > { %14247 = vst [vmem:[#allocation103_spill] sm:$0xff] %v10369_v51  ;;  %v14251_v51 = vrot.slane %v10220_v14, 2  ;;  %v10413_v1 = vrot.slane %v5083_v10, 2  ;;  %v5105_v10 = vshrl.u32 %v9969_v63, 16  ;;  %v14254_v59 = vrot.slane %v10227_v0, 2 }
 0x118   : > { %2445 = vrot.lane.b32.xlu0 %v2399_v41, %s9440_s9  ;;  %v352_v41 = vshll.u32 %v9932_v42, 16  ;;  %v10401_v19 = vrot.slane %v8391_v47, 3  ;;  %v5097_v42 = vshrl.u32 %v9973_v5, 16  ;;  %v351_v47 = vrot.slane %v349_v2, 5 }
 0x119   : > { %2447 = vrot.lane.b32.xlu1 %v14248_v44, %s9440_s9  ;;  %v10390_v44 = vrot.slane %v8389_v29, 3  ;;  %v10393_v48 = vpop.permute.xlu1 %2047  ;;  %v10406_v29 = vld [vmem:[%s9503_s28 + $0x28] sm:$0xf]  ;;  %v370_v0 = vrot.slane %v368_v28, 5 }
 0x11a   : > { %14249 = vst [vmem:[#allocation104_spill] sm:$0xff] %v10393_v48  ;;  %v10399_v49 = vpop.permute.xlu0 %2045  ;;  %v358_v23 = vshrl.u32 %v10406_v29, 16  ;;  %v361_v48 = vshll.u32 %v10406_v29, 16  ;;  %v354_v43 = vrot.slane %v352_v41, 6  ;;  %v8437_v41 = vcombine.low %v8229_v3, %v10406_v29  ;;  %v9329_v3 = vld [vmem:[%s9503_s28 + $0x34] sm:$0xf] }
 0x11b   : > { %14250 = vst [vmem:[#allocation105_spill] sm:$0xff] %v10399_v49  ;;  %v5100_v49 = vshll.u32 %v9973_v5, 16  ;;  %v371_v29 = vshll.u32 %v9927_v33, 16  ;;  %v14259_v33 = vcombine.low %v10283_v52, %v10234_v39  ;;  %v5086_v39 = vor.u32 %v10413_v1, %v10403_v20  ;;  %v10490_v20 = vld [vmem:[%s9503_s28 + $0x4c] sm:$0xf] }
 0x11c   : > { %2449 = vrot.lane.b32.xlu0 %v2402_v11, %s9440_s9  ;;  %v360_v34 = vrot.slane %v358_v23, 5  ;;  %v363_v31 = vrot.slane %v361_v48, 6  ;;  %v5108_v11 = vshll.u32 %v9969_v63, 16  ;;  %v796_v23 = vld [vmem:[%s14063_s1] sm:$0x3]  ;;  %v355_v48 = vor.u32 %v354_v43, %v351_v47 }
 0x11d   : > { %2451 = vrot.lane.b32.xlu1 %v14251_v51, %s9440_s9  ;;  %v10420_v18 = vpop.permute.xlu1 %2051  ;;  %v10424_v51 = vrot.slane %v5091_v9, 2  ;;  %v10437_v9 = vld [vmem:[%s9503_s28 + $0x14] ss:$0 sps:$4 sm:$0x77]   ;;  %8803 = vmatprep.subr.msk.bf16.mxu0 %vm894_vm3, %v796_v23  ;;  %v896_v63 = vsel %vm894_vm3, %v796_v23, 0  ;;  %v377_v47 = vshrl.u32 %v9956_v15, 16 }
 0x11e   : > { %14252 = vst [vmem:[#allocation106_spill] sm:$0xff] %v10420_v18  ;;  %v10427_v5 = vpop.permute.xlu0 %2049  ;;  %v364_v2 = vor.u32 %v363_v31, %v360_v34  ;;  %v10440_v18 = vrot.slane %v5097_v42, 1  ;;  %v10446_v31 = vrot.slane %v5100_v49, 2  ;;  %8656 = vmatpush3.bf16.msra.mxu0 %v896_v63  ;;  %v356_v43 = vrot.slane %v355_v48, 4 }
 0x11f   : > { %14253 = vst [vmem:[#allocation107_spill] sm:$0xff] %v10427_v5  ;;  %v386_v23 = vshrl.u32 %v9329_v3, 16  ;;  %v389_v49 = vshll.u32 %v9329_v3, 16  ;;  %v10461_v63 = vrot.slane %v5105_v10, 1  ;;  %v10463_v5 = vrot.slane %v5108_v11, 2 }
 0x120   : > { %2453 = vrot.lane.b32.xlu0 %v10304_v54, %s9440_s9  ;;  %v380_v54 = vshll.u32 %v9956_v15, 16  ;;  %v366_v48 = vrot.slane %v364_v2, 4  ;;  %v373_v28 = vrot.slane %v371_v29, 6  ;;  %v365_v15 = vsel %vm10449_vm8, %v356_v43, %v364_v2 }
 0x121   : > { %2455 = vrot.lane.b32.xlu1 %v14254_v59, %s9440_s9  ;;  %v10454_v42 = vpop.permute.xlu1 %2055  ;;  %v388_v22 = vrot.slane %v386_v23, 5  ;;  %v391_v11 = vrot.slane %v389_v49, 6  ;;  %v396_v29 = vshrl.u32 %v9953_v8, 16  ;;  %v4891_v52 = vrot.slane %v10437_v9, 3 }
 0x122   : > { %14257 = vst [vmem:[#allocation108_spill] sm:$0xff] %v10454_v42  ;;  %v10459_v59 = vpop.permute.xlu0 %2053  ;;  %v379_v42 = vrot.slane %v377_v47, 5  ;;  %v382_v27 = vrot.slane %v380_v54, 6  ;;  %v374_v10 = vor.u32 %v373_v28, %v370_v0  ;;  %v8438_v2 = vcombine.low %v8230_v45, %v9329_v3  ;;  %v8277_v45 = vld [vmem:[%s9503_s28 + $0x48] sm:$0xe] }
 0x123   : > { %14258 = vst [vmem:[#allocation109_spill] sm:$0xff] %v10459_v59  ;;  %v399_v59 = vshll.u32 %v9953_v8, 16  ;;  %v392_v54 = vor.u32 %v391_v11, %v388_v22  ;;  %v398_v23 = vrot.slane %v396_v29, 5  ;;  %v5094_v8 = vor.u32 %v10424_v51, %v10422_v12  ;;  %v9013_v22 = vld [vmem:[%s9503_s28 + $0x44] ss:$0 sps:$4 sm:$0x11]  }
 0x124   : > { %2457 = vrot.lane.b32.xlu0 %v10319_v61, %s9440_s9  ;;  %v383_v43 = vor.u32 %v382_v27, %v379_v42  ;;  %v5431_v61 = vrot.slane %v8437_v41, 3  ;;  %v375_v0 = vsel %vm10449_vm8, %v366_v48, %v374_v10  ;;  %v14262_v41 = vcombine.low %v10322_v37, %v10243_v62  ;;  %v9014_v49 = vld [vmem:[%s9503_s28 + $0x50] ss:$0 sps:$4 sm:$0x11]   ;;  %v10533_v10 = vld [vmem:[%s9503_s28 + $0x58] sm:$0xf] }
 0x125   : > { %2637 = vrot.lane.b32.xlu1 %v14259_v33, %s9441_s12  ;;  %v10476_v17 = vpop.permute.xlu1 %2059  ;;  %v7570_v27 = vcombine.low %v365_v15, %v375_v0  ;;  %v401_v9 = vrot.slane %v399_v59, 6  ;;  %v5432_v42 = vrot.slane %v10206_v24, 3  ;;  %v5111_v12 = vor.u32 %v10463_v5, %v10461_v63  ;;  %v10530_v15 = vld [vmem:[%s9503_s28 + $0x54] sm:$0xf] }
 0x126   : > { %14260 = vst [vmem:[#allocation110_spill] sm:$0xff] %v10476_v17  ;;  %v10481_v47 = vpop.permute.xlu0 %2057  ;;  %v384_v1 = vrot.slane %v383_v43, 4  ;;  %v394_v51 = vrot.slane %v392_v54, 4  ;;  %v5434_v59 = vrot.slane %v8438_v2, 3  ;;  %v5435_v62 = vrot.slane %v10220_v14, 3 }
 0x127   : > { %14261 = vst [vmem:[#allocation111_spill] sm:$0xff] %v10481_v47  ;;  %8657 = vmatprep.mubr.msk.bf16.mxu0 %vm845_vm6, %v7570_v27  ;;  %v402_v37 = vor.u32 %v401_v9, %v398_v23  ;;  %v14267_v14 = vor.u32 %v10337_v35, %v10328_v40  ;;  %v14268_v28 = vor.u32 %v10335_v46, %v10333_v50  ;;  %v14271_v46 = vrot.slane %v10351_v4, 3  ;;  %v9096_v9 = vld [vmem:[%s14064_s2 + $0x8] sm:$0xff]   ;;  %v9369_v47 = vld [vmem:[%s9503_s28 + $0x10] sm:$0xf] }
 0x128   : > { %2641 = vrot.lane.b32.xlu0 %v14262_v41, %s9441_s12  ;;  %v393_v24 = vsel %vm10449_vm8, %v384_v1, %v392_v54  ;;  %v14270_v35 = vor.u32 %v10345_v26, %v10343_v57  ;;  %v10557_v11 = vsel %vm4886_vm7, %v10401_v19, %v4891_v52  ;;  %v9090_v26 = vld [vmem:[%s14064_s2] sm:$0xff]   ;;  %v10569_v57 = vsel %vm4485_vm4, %v5086_v39, %v5094_v8  ;;  %v8279_v41 = vld [vmem:[%s9503_s28 + $0x54] sm:$0xe]  ;;  %v10744_v52 = vld [vmem:[%s9503_s28 + $0x58] sm:$0xf] }
 0x129   : > { %2845 = vrot.lane.b32.xlu1 %v10358_v21, %s9442_s13  ;;  %v5103_v21 = vor.u32 %v10446_v31, %v10440_v18  ;;  %v10503_v3 = vpop.permute.xlu1 %2063  ;;  %v14265_v18 = vrot.slane %v10309_v56, 2  ;;  %v14266_v31 = vrot.slane %v10326_v16, 2  ;;  %v10527_v33 = vsel %vm4485_vm4, %v14268_v28, %v14267_v14  ;;  %8689 = vmatprep.subr.bf16.mxu1 %v9090_v26  ;;  %v10592_v54 = vld [vmem:[%s9503_s28 + $0x40] sm:$0xf]  ;;  %v10626_v14 = vld [vmem:[%s9503_s28 + $0x58] sm:$0xf] }
 0x12a   : > { %14263 = vst [vmem:[#allocation112_spill] sm:$0xff] %v10503_v3  ;;  %v10510_v48 = vpop.permute.xlu0 %2061  ;;  %v10553_v40 = vsel %vm4886_vm7, %v10390_v44, %v14271_v46  ;;  %v10580_v29 = vsel %vm4886_vm7, %v5434_v59, %v5435_v62  ;;  %v405_v2 = vshrl.u32 %v9981_v60, 16  ;;  %v408_v39 = vshll.u32 %v9981_v60, 16  ;;  %8690 = vmatpush3.bf16.msra.mxu1 %v9090_v26  ;;  %v10612_v59 = vld [vmem:[%s9503_s28 + $0x64] sm:$0xf] }
 0x12b   : > { %14264 = vst [vmem:[#allocation113_spill] sm:$0xff] %v10510_v48  ;;  %v3007_v5 = vsel %vm1788_vm1, %v10367_v55, %v14265_v18  ;;  %v3010_v63 = vsel %vm1788_vm1, %v10372_v36, %v14266_v31  ;;  %v10536_v55 = vcombine.low %v8277_v45, %v10490_v20  ;;  %v14269_v36 = vor.u32 %v10347_v53, %v10339_v13  ;;  %v10615_v62 = vld [vmem:[%s9503_s28 + $0x54] sm:$0xe] }
 0x12c   : > { %v403_v13 = vsel %vm10449_vm8, %v394_v51, %v402_v37  ;;  %2639 = vrot.lane.b32.xlu0 %v9013_v22, %s9441_s12  ;;  %v10572_v53 = vsel %vm4886_vm7, %v5431_v61, %v5432_v42  ;;  %v10575_v4 = vsel %vm4485_vm4, %v5103_v21, %v5111_v12  ;;  %v414_v23 = vshrl.u32 %v10592_v54, 16  ;;  %8691 = vmatprep.subr.bf16.mxu1 %v9096_v9 }
 0x12d   : > { %2849 = vrot.lane.b32.xlu1 %v10365_v7, %s9442_s13  ;;  %v10547_v50 = vsel %vm4485_vm4, %v14270_v35, %v14269_v36  ;;  %v10560_v7 = vld [vmem:[%s9503_s28 + $0x50] ss:$0 sps:$4 sm:$0x33]   ;;  %v7571_v19 = vcombine.low %v393_v24, %v403_v13  ;;  %v10577_v44 = vpop.permute.xlu1 %2067  ;;  %v5720_v61 = vshrl.u32 %v10536_v55, 16  ;;  %v5723_v0 = vshll.u32 %v10536_v55, 16 }
 0x12e   : > { %14272 = vst [vmem:[#allocation114_spill] sm:$0xff] %v10577_v44  ;;  %v10586_v43 = vpop.permute.xlu0 %2065  ;;  %v417_v8 = vshll.u32 %v10592_v54, 16  ;;  %v5728_v60 = vshrl.u32 %v10560_v7, 16  ;;  %v5731_v45 = vshll.u32 %v10560_v7, 16  ;;  %v407_v27 = vrot.slane %v405_v2, 5  ;;  %8692 = vmatpush3.bf16.msra.mxu1 %v9096_v9 }
 0x12f   : > { %14273 = vst [vmem:[#allocation115_spill] sm:$0xff] %v10586_v43  ;;  %8658 = vmatmul.mubr.msk.bf16.vlgmr.msra.gmra.mrb[0].mxu0 %vm845_vm6, %v7571_v19  ;;  %v410_v1 = vrot.slane %v408_v39, 6  ;;  %v416_v22 = vrot.slane %v414_v23, 5  ;;  %v424_v21 = vshrl.u32 %v9976_v32, 16  ;;  %v427_v12 = vshll.u32 %v9976_v32, 16 }
 0x130   : > { %3053 = vrot.lane.b32.xlu0 %v3007_v5, %s9443_s18  ;;  %v419_v42 = vrot.slane %v417_v8, 6  ;;  %v433_v37 = vshrl.u32 %v10004_v25, 16  ;;  %v436_v18 = vshll.u32 %v10004_v25, 16  ;;  %v10620_v5 = vld [vmem:[%s9503_s28 + $0x4c] sm:$0xf]  ;;  %v10628_v28 = vrot.slane %v5720_v61, 1 }
 0x131   : > { %2643 = vrot.lane.b32.xlu1 %v9014_v49, %s9441_s12  ;;  %v10606_v51 = vpop.permute.xlu1 %2071  ;;  %v10609_v49 = vld [vmem:[%s9503_s28 + $0x60] sm:$0xf]  ;;  %v411_v24 = vor.u32 %v410_v1, %v407_v27  ;;  %v442_v31 = vshrl.u32 %v10620_v5, 16  ;;  %v426_v35 = vrot.slane %v424_v21, 5  ;;  %v429_v46 = vrot.slane %v427_v12, 6 }
 0x132   : > { %14274 = vst [vmem:[#allocation116_spill] sm:$0xff] %v10606_v51  ;;  %v10623_v32 = vpop.permute.xlu0 %2069  ;;  %v420_v36 = vor.u32 %v419_v42, %v416_v22  ;;  %v10632_v25 = vcombine.low %v8279_v41, %v10626_v14  ;;  %v435_v13 = vrot.slane %v433_v37, 5  ;;  %v438_v26 = vrot.slane %v436_v18, 6  ;;  %v10637_v19 = vld [vmem:[%s14064_s2 + $0x10] ss:$0 sps:$4 sm:$0x33]  }
 0x133   : > { %14275 = vst [vmem:[#allocation117_spill] sm:$0xff] %v10623_v32  ;;  %v412_v7 = vrot.slane %v411_v24, 4  ;;  %v14276_v2 = vrot.slane %v10262_v38, 1  ;;  %v10643_v39 = vld [vmem:[%s9503_s28 + $0x48] sm:$0xf]  ;;  %v430_v61 = vor.u32 %v429_v46, %v426_v35  ;;  %v444_v23 = vrot.slane %v442_v31, 5  ;;  %8804 = vmatprep.subr.msk.bf16.mxu1 %vm894_vm3, %v10637_v19 }
 0x134   : > { %v445_v8 = vshll.u32 %v10620_v5, 16  ;;  %v10649_v1 = vld [vmem:[%s9503_s28 + $0x5c] ss:$0 sps:$4 sm:$0x33]   ;;  %v439_v41 = vor.u32 %v438_v26, %v435_v13  ;;  %v452_v38 = vshrl.u32 %v9999_v58, 16  ;;  %v455_v22 = vshll.u32 %v9999_v58, 16 }
 0x135   : > { %3057 = vrot.lane.b32.xlu1 %v3010_v63, %s9443_s18  ;;  %2847 = vrot.lane.b32.xlu0 %v14276_v2, %s9442_s13  ;;  %v422_v63 = vrot.slane %v420_v36, 4  ;;  %v10646_v27 = vpop.permute.xlu1 %2075  ;;  %v421_v9 = vsel %vm10449_vm8, %v412_v7, %v420_v36  ;;  %v8118_v12 = vcombine.low %v10615_v62, %v10533_v10  ;;  %v7832_v24 = vld [vmem:[%s9503_s28 + $0x60] sm:$0xe]  ;;  %v9043_v37 = vld [vmem:[%s9503_s28 + $0x5c] ss:$0 sps:$4 sm:$0x33]  }
 0x136   : > { %14277 = vst [vmem:[#allocation118_spill] sm:$0xff] %v10646_v27  ;;  %v10657_v42 = vpop.permute.xlu0 %2073  ;;  %v447_v31 = vrot.slane %v445_v8, 6  ;;  %v14279_v58 = vrot.slane %v10286_v30, 1  ;;  %v10671_v36 = vld [vmem:[%s9503_s28 + $0x54] sm:$0xf]  ;;  %v10675_v35 = vrot.slane %v5723_v0, 2  ;;  %v8120_v0 = vcombine.low %v7832_v24, %v10612_v59 }
 0x137   : > { %14278 = vst [vmem:[#allocation119_spill] sm:$0xff] %v10657_v42  ;;  %v431_v18 = vsel %vm10449_vm8, %v422_v63, %v430_v61  ;;  %v440_v7 = vrot.slane %v439_v41, 4  ;;  %v454_v62 = vrot.slane %v452_v38, 5  ;;  %v10679_v13 = vrot.slane %v5728_v60, 1  ;;  %v7862_v60 = vld [vmem:[%s9503_s28 + $0x54] sm:$0xc] }
 0x138   : > { %v7572_v46 = vcombine.low %v421_v9, %v431_v18  ;;  %v10681_v26 = vrot.slane %v5731_v45, 2  ;;  %v10684_v2 = vld [vmem:[%s9503_s28 + $0x68] ss:$0 sps:$4 sm:$0x33]   ;;  %v448_v30 = vor.u32 %v447_v31, %v444_v23  ;;  %v457_v63 = vrot.slane %v455_v22, 6 }
 0x139   : > { %2851 = vrot.lane.b32.xlu1 %v14279_v58, %s9442_s13  ;;  %4758 = vrot.lane.b32.xlu0 %v10527_v33, %s9436_s29  ;;  %v10686_v61 = vpop.permute.xlu1 %2079  ;;  %v5737_v8 = vshrl.u32 %v10632_v25, 16  ;;  %v5740_v33 = vshll.u32 %v10632_v25, 16  ;;  %v5745_v23 = vshrl.u32 %v9043_v37, 16  ;;  %v10703_v24 = vrot.slane %v8118_v12, 1  ;;  %v8309_v31 = vld [vmem:[%s9503_s28 + $0x48] sm:$0x8] }
 0x13a   : > { %14280 = vst [vmem:[#allocation120_spill] sm:$0xff] %v10686_v61  ;;  %8661 = vmatprep.mubr.msk.bf16.mxu0 %vm845_vm6, %v7572_v46  ;;  %v10695_v45 = vpop.permute.xlu0 %2077  ;;  %v449_v9 = vsel %vm10449_vm8, %v440_v7, %v448_v30  ;;  %v450_v41 = vrot.slane %v448_v30, 4  ;;  %v458_v38 = vor.u32 %v457_v63, %v454_v62  ;;  %v5748_v18 = vshll.u32 %v9043_v37, 16  ;;  %v10716_v62 = vld [vmem:[%s9503_s28 + $0x5c] ss:$0 sps:$4 sm:$0x77]  }
 0x13b   : > { %14281 = vst [vmem:[#allocation121_spill] sm:$0xff] %v10695_v45  ;;  %v14282_v58 = vrot.slane %v10309_v56, 2  ;;  %v8150_v7 = vcombine.low %v7862_v60, %v10533_v10  ;;  %v10722_v30 = vrot.slane %v8120_v0, 1  ;;  %v10728_v55 = vrot.slane %v5737_v8, 1  ;;  %v4101_v61 = vld [vmem:[%s9503_s28 + $0x18] sm:$0xe] }
 0x13c   : > { %v459_v12 = vsel %vm10449_vm8, %v450_v41, %v458_v38  ;;  %v10730_v60 = vrot.slane %v5740_v33, 2  ;;  %v10732_v21 = vrot.slane %v5745_v23, 1  ;;  %v8501_v41 = vcombine.low %v8309_v31, %v10490_v20  ;;  %v9025_v38 = vld [vmem:[%s9503_s28 + $0x24] sm:$0xff]   ;;  %v7864_v31 = vld [vmem:[%s9503_s28 + $0x60] sm:$0xc] }
 0x13d   : > { %4760 = vrot.lane.b32.xlu1 %v10547_v50, %s9436_s29  ;;  %3055 = vrot.lane.b32.xlu0 %v14282_v58, %s9443_s18  ;;  %v10720_v37 = vpop.permute.xlu1 %2083  ;;  %v7573_v63 = vcombine.low %v449_v9, %v459_v12  ;;  %v461_v58 = vshrl.u32 %v10025_v6, 16  ;;  %v14285_v0 = vrot.slane %v10326_v16, 2  ;;  %v10739_v9 = vrot.slane %v5748_v18, 2  ;;  %v14287_v50 = vld [vmem:[#allocation52_spill] sm:$0xff]  ;;  %v9334_v45 = vld [vmem:[%s9503_s28 + $0x60] sm:$0xe] }
 0x13e   : > { %14283 = vst [vmem:[#allocation122_spill] sm:$0xff] %v10720_v37  ;;  %v10726_v22 = vpop.permute.xlu0 %2081  ;;  %v464_v8 = vshll.u32 %v10025_v6, 16  ;;  %v470_v33 = vshrl.u32 %v10744_v52, 16  ;;  %v10749_v23 = vrot.slane %v8150_v7, 2  ;;  %v473_v18 = vshll.u32 %v10744_v52, 16  ;;  %v9028_v7 = vld [vmem:[%s9503_s28 + $0x30] sm:$0xff]  }
 0x13f   : > { %14284 = vst [vmem:[#allocation123_spill] sm:$0xff] %v10726_v22  ;;  %8662 = vmatmul.mubr.msk.bf16.gmra.mrb[4].mxu0 %vm845_vm6, %v7573_v63  ;;  %v463_v12 = vrot.slane %v461_v58, 5  ;;  %v9333_v63 = vld [vmem:[%s9503_s28 + $0x5c] sm:$0x3]  ;;  %v489_v25 = vshrl.u32 %v14287_v50, 16  ;;  %v10765_v37 = vrot.slane %v8501_v41, 3 }
 0x140   : > { %v480_v58 = vshrl.u32 %v9333_v63, 16  ;;  %v466_v6 = vrot.slane %v464_v8, 6  ;;  %v472_v56 = vrot.slane %v470_v33, 5  ;;  %v483_v46 = vshll.u32 %v9333_v63, 16  ;;  %v10770_v33 = vld [vmem:[%s9503_s28 + $0x1c] sm:$0xf] }
 0x141   : > { %3059 = vrot.lane.b32.xlu1 %v14285_v0, %s9443_s18  ;;  %4935 = vrot.lane.b32.xlu0 %v10553_v40, %s9437_s30  ;;  %v10755_v0 = vpop.permute.xlu1 %2087  ;;  %v10763_v16 = vld [vmem:[%s9503_s28 + $0x50] ss:$0 sps:$4 sm:$0x77]   ;;  %v475_v22 = vrot.slane %v473_v18, 6  ;;  %v8152_v8 = vcombine.low %v7864_v31, %v10612_v59  ;;  %v492_v18 = vshll.u32 %v9334_v45, 16 }
 0x142   : > { %14286 = vst [vmem:[#allocation124_spill] sm:$0xff] %v10755_v0  ;;  %v10758_v40 = vpop.permute.xlu0 %2085  ;;  %v482_v0 = vrot.slane %v480_v58, 5  ;;  %v467_v50 = vor.u32 %v466_v6, %v463_v12  ;;  %v485_v63 = vrot.slane %v483_v46, 6  ;;  %v10778_v58 = vld [vmem:[%s9503_s28 + $0x64] sm:$0xf] }
 0x143   : > { %14288 = vst [vmem:[#allocation52_spill] sm:$0xff] %v10758_v40  ;;  %v491_v40 = vrot.slane %v489_v25, 5  ;;  %v476_v41 = vor.u32 %v475_v22, %v472_v56  ;;  %v501_v31 = vshll.u32 %v10778_v58, 16  ;;  %v9336_v12 = vld [vmem:[%s9503_s28 + $0x68] sm:$0x3]  ;;  %v5751_v22 = vor.u32 %v10739_v9, %v10732_v21 }
 0x144   : > { %v468_v46 = vrot.slane %v467_v50, 4  ;;  %v486_v25 = vor.u32 %v485_v63, %v482_v0  ;;  %v508_v6 = vshrl.u32 %v9336_v12, 16  ;;  %v9054_v45 = vld [vmem:[%s9503_s28 + $0x20] ss:$0 sps:$4 sm:$0x33]   ;;  %v494_v32 = vrot.slane %v492_v18, 6 }
 0x145   : > { %5047 = vrot.lane.b32.xlu1 %v9025_v38, %s9438_s7  ;;  %4937 = vrot.lane.b32.xlu0 %v10557_v11, %s9437_s30  ;;  %v498_v38 = vshrl.u32 %v10778_v58, 16  ;;  %v10782_v27 = vpop.permute.xlu1 %2091  ;;  %v511_v11 = vshll.u32 %v9336_v12, 16  ;;  %v478_v56 = vrot.slane %v476_v41, 4  ;;  %v10793_v44 = vld [vmem:[%s9503_s28 + $0x68] ss:$0 sps:$4 sm:$0x77]   ;;  %v8361_v0 = vcombine.low %v4101_v61, %v10770_v33 }
 0x146   : > { %14289 = vst [vmem:[#allocation125_spill] sm:$0xff] %v10782_v27  ;;  %v10785_v42 = vpop.permute.xlu0 %2089  ;;  %v477_v50 = vsel %vm10449_vm8, %v468_v46, %v476_v41  ;;  %v503_v63 = vrot.slane %v501_v31, 6  ;;  %v510_v12 = vrot.slane %v508_v6, 5  ;;  %v6120_v21 = vrot.slane %v10763_v16, 3  ;;  %v8311_v31 = vld [vmem:[%s9503_s28 + $0x54] sm:$0x8] }
 0x147   : > { %14290 = vst [vmem:[#allocation126_spill] sm:$0xff] %v10785_v42  ;;  %v500_v51 = vrot.slane %v498_v38, 5  ;;  %v487_v9 = vsel %vm10449_vm8, %v478_v56, %v486_v25  ;;  %v495_v18 = vor.u32 %v494_v32, %v491_v40  ;;  %v513_v38 = vrot.slane %v511_v11, 6 }
 0x148   : > { %v3014_v27 = vrot.slane %v8152_v8, 2  ;;  %v7574_v42 = vcombine.low %v477_v50, %v487_v9  ;;  %v3899_v61 = vsel %vm894_vm3, %v10637_v19, 0  ;;  %v4529_v46 = vshrl.u32 %v9054_v45, 16 }
 0x149   : > { %5351 = vrot.lane.b32.xlu1 %v10569_v57, %s9439_s8  ;;  %5049 = vrot.lane.b32.xlu0 %v9028_v7, %s9438_s7  ;;  %v10802_v57 = vpop.permute.xlu1 %2239  ;;  %v504_v43 = vor.u32 %v503_v63, %v500_v51  ;;  %v4532_v7 = vshll.u32 %v9054_v45, 16  ;;  %v496_v6 = vrot.slane %v495_v18, 4  ;;  %v514_v16 = vor.u32 %v513_v38, %v510_v12 }
 0x14a   : > { %v10806_v41 = vpop.permute.xlu0 %2237  ;;  %8694 = vmatpush3.bf16.msra.mxu1 %v3899_v61  ;;  %v14127_v32 = vrot.slane %v10793_v44, 2  ;;  %v4521_v40 = vshrl.u32 %v8361_v0, 16  ;;  %v4524_v51 = vshll.u32 %v8361_v0, 16  ;;  %8665 = vmatprep.mubr.msk.bf16.mxu0 %vm845_vm6, %v7574_v42  ;;  %v14291_v8 = vrot.slane %v10649_v1, 1  ;;  %v9337_v0 = vld [vmem:[%s9503_s28 + $0x6c] sm:$0xe] }
 0x14b   : > { %v506_v19 = vrot.slane %v504_v43, 4  ;;  %v14293_v11 = vor.u32 %v10675_v35, %v10628_v28  ;;  %v14294_v42 = vrot.slane %v10684_v2, 1  ;;  %v505_v56 = vsel %vm10449_vm8, %v496_v6, %v504_v43  ;;  %v10848_v35 = vld [vmem:[%s9503_s28 + $0x5c] ss:$0 sps:$4 sm:$0x77]  }
 0x14c   : > { %v10819_v25 = vsel %vm1579_vm0, %v10703_v24, %v14291_v8  ;;  %v8503_v28 = vcombine.low %v8311_v31, %v10626_v14  ;;  %v517_v50 = vshrl.u32 %v9337_v0, 16  ;;  %v14296_v63 = vrot.slane %v10716_v62, 2  ;;  %v10881_v61 = vld [vmem:[%s9503_s28 + $0x28] sm:$0xf]  ;;  %v4103_v31 = vld [vmem:[%s9503_s28 + $0x24] sm:$0xe] }
 0x14d   : > { %5479 = vrot.lane.b32.xlu1 %v10572_v53, %s9440_s9  ;;  %5353 = vrot.lane.b32.xlu0 %v10575_v4, %s9439_s8  ;;  %v14292_v53 = vor.u32 %v10681_v26, %v10679_v13  ;;  %v10834_v4 = vsel %vm1579_vm0, %v10722_v30, %v14294_v42  ;;  %v10838_v24 = vpop.permute.xlu1 %2243  ;;  %v14295_v13 = vor.u32 %v10730_v60, %v10728_v55  ;;  %v10861_v60 = vrot.slane %v4529_v46, 1  ;;  %v9338_v46 = vld [vmem:[%s9503_s28 + $0x70] sm:$0xf] }
 0x14e   : > { %v515_v30 = vsel %vm10449_vm8, %v506_v19, %v514_v16  ;;  %v10853_v43 = vpop.permute.xlu0 %2241  ;;  %v10859_v55 = vsel %vm1788_vm1, %v10749_v23, %v14296_v63  ;;  %v10869_v9 = vsel %vm4886_vm7, %v10765_v37, %v6120_v21  ;;  %v10874_v18 = vsel %vm1788_vm1, %v3014_v27, %v14127_v32 }
 0x14f   : > { %v10828_v45 = vsel %vm4485_vm4, %v14293_v11, %v14292_v53  ;;  %v10844_v26 = vsel %vm4485_vm4, %v14295_v13, %v5751_v22  ;;  %v10863_v22 = vrot.slane %v4532_v7, 2  ;;  %v7575_v12 = vcombine.low %v505_v56, %v515_v30 }
 0x150   : > { %v10876_v23 = vrot.slane %v4521_v40, 1  ;;  %v10878_v38 = vrot.slane %v4524_v51, 2  ;;  %v519_v37 = vrot.slane %v517_v50, 5  ;;  %v520_v21 = vshll.u32 %v9337_v0, 16  ;;  %v9339_v51 = vld [vmem:[%s9503_s28 + $0x74] sm:$0x3] }
 0x151   : > { %5481 = vrot.lane.b32.xlu1 %v10580_v29, %s9440_s9  ;;  %v14297_v29 = vcombine.low %v10530_v15, %v10533_v10  ;;  %8666 = vmatmul.mubr.msk.bf16.gmra.mrb[8].mxu0 %vm845_vm6, %v7575_v12  ;;  %v526_v7 = vshrl.u32 %v9338_v46, 16  ;;  %v529_v27 = vshll.u32 %v9338_v46, 16  ;;  %v10890_v6 = vpop.permute.xlu1 %2247  ;;  %v10892_v16 = vrot.slane %v8503_v28, 3  ;;  %v9348_v28 = vld [vmem:[%s9503_s28 + $0x98] sm:$0x3] }
 0x152   : > { %v536_v19 = vshrl.u32 %v9339_v51, 16  ;;  %v539_v8 = vshll.u32 %v9339_v51, 16  ;;  %v10896_v53 = vpop.permute.xlu0 %2245  ;;  %v8363_v15 = vcombine.low %v4103_v31, %v10881_v61  ;;  %v522_v10 = vrot.slane %v520_v21, 6  ;;  %v9340_v31 = vld [vmem:[%s9503_s28 + $0x78] sm:$0xe] }
 0x153   : > { %2645 = vrot.lane.b32.xlu0 %v14297_v29, %s9441_s12  ;;  %v528_v11 = vrot.slane %v526_v7, 5  ;;  %v531_v42 = vrot.slane %v529_v27, 6  ;;  %v14298_v56 = vcombine.low %v10609_v49, %v10612_v59  ;;  %v14299_v50 = vcombine.low %v10643_v39, %v10490_v20  ;;  %v9058_v21 = vld [vmem:[%s9503_s28 + $0x2c] ss:$0 sps:$4 sm:$0x33]  }
 0x154   : > { %v538_v30 = vrot.slane %v536_v19, 5  ;;  %v541_v0 = vrot.slane %v539_v8, 6  ;;  %v523_v63 = vor.u32 %v522_v10, %v519_v37  ;;  %v545_v29 = vshrl.u32 %v9340_v31, 16  ;;  %v9341_v7 = vld [vmem:[%s9503_s28 + $0x7c] sm:$0xf]  ;;  %v9116_v10 = vld [vmem:[%s14064_s2 + $0x14] sm:$0xff]  }
 0x155   : > { %2649 = vrot.lane.b32.xlu1 %v14298_v56, %s9441_s12  ;;  %v532_v12 = vor.u32 %v531_v42, %v528_v11  ;;  %v548_v49 = vshll.u32 %v9340_v31, 16  ;;  %v10912_v59 = vpop.permute.xlu1 %2251  ;;  %v554_v27 = vshrl.u32 %v9341_v7, 16  ;;  %v557_v51 = vshll.u32 %v9341_v7, 16  ;;  %v9342_v19 = vld [vmem:[%s9503_s28 + $0x80] sm:$0x3]  ;;  %8727 = vmatprep.subr.bf16.mxu0 %v9116_v10 }
 0x156   : > { %v542_v46 = vor.u32 %v541_v0, %v538_v30  ;;  %v564_v8 = vshrl.u32 %v9342_v19, 16  ;;  %v10917_v56 = vpop.permute.xlu0 %2249  ;;  %v4538_v32 = vshrl.u32 %v8363_v15, 16  ;;  %v524_v20 = vrot.slane %v523_v63, 4  ;;  %v4133_v42 = vld [vmem:[%s9503_s28 + $0x18] sm:$0x8]  ;;  %8728 = vmatpush3.bf16.msra.mxu0 %v9116_v10 }
 0x157   : > { %5591 = vrot.lane.b32.xlu0 %v14299_v50, %s9441_s12  ;;  %v534_v39 = vrot.slane %v532_v12, 4  ;;  %v547_v37 = vrot.slane %v545_v29, 5  ;;  %v14300_v11 = vcombine.low %v10671_v36, %v10626_v14  ;;  %v4541_v30 = vshll.u32 %v8363_v15, 16 }
 0x158   : > { %v550_v0 = vrot.slane %v548_v49, 6  ;;  %v556_v50 = vrot.slane %v554_v27, 5  ;;  %v559_v31 = vrot.slane %v557_v51, 6  ;;  %v533_v63 = vsel %vm10449_vm8, %v524_v20, %v532_v12  ;;  %v9343_v20 = vld [vmem:[%s9503_s28 + $0x84] sm:$0xe] }
 0x159   : > { %5593 = vrot.lane.b32.xlu1 %v14300_v11, %s9441_s12  ;;  %v543_v29 = vsel %vm10449_vm8, %v534_v39, %v542_v46  ;;  %v566_v7 = vrot.slane %v564_v8, 5  ;;  %v567_v13 = vshll.u32 %v9342_v19, 16  ;;  %v10933_v14 = vpop.permute.xlu1 %2255  ;;  %v4546_v36 = vshrl.u32 %v9058_v21, 16  ;;  %v9122_v19 = vld [vmem:[%s14064_s2 + $0x1c] sm:$0xff]   ;;  %v14303_v8 = vld [vmem:[#allocation95_spill] sm:$0xff] }
 0x15a   : > { %14301 = vst [vmem:[#allocation127_spill] sm:$0xff] %v10933_v14  ;;  %v7576_v15 = vcombine.low %v533_v63, %v543_v29  ;;  %v551_v49 = vor.u32 %v550_v0, %v547_v37  ;;  %v560_v27 = vor.u32 %v559_v31, %v556_v50  ;;  %v10935_v51 = vpop.permute.xlu0 %2253  ;;  %v4549_v11 = vshll.u32 %v9058_v21, 16  ;;  %v9344_v31 = vld [vmem:[%s9503_s28 + $0x88] sm:$0xf]  ;;  %8729 = vmatprep.subr.bf16.mxu0 %v9122_v19 }
 0x15b   : > { %2853 = vrot.lane.b32.xlu0 %v10819_v25, %s9442_s13  ;;  %14302 = vst [vmem:[#allocation128_spill] sm:$0xff] %v10935_v51  ;;  %v8393_v25 = vcombine.low %v4133_v42, %v10770_v33  ;;  %v569_v12 = vrot.slane %v567_v13, 6  ;;  %v573_v46 = vshrl.u32 %v9343_v20, 16  ;;  %v14304_v39 = vrot.slane %v14303_v8, 2  ;;  %8730 = vmatpush3.bf16.msra.mxu0 %v9122_v19  ;;  %v14373_v51 = vld [vmem:[#allocation41_spill] sm:$0xff] }
 0x15c   : > { %v10945_v37 = vrot.slane %v4538_v32, 1  ;;  %v10947_v10 = vrot.slane %v4541_v30, 2  ;;  %8669 = vmatprep.mubr.msk.bf16.mxu0 %vm845_vm6, %v7576_v15  ;;  %v552_v33 = vrot.slane %v551_v49, 4  ;;  %v562_v21 = vrot.slane %v560_v27, 4  ;;  %v9345_v49 = vld [vmem:[%s9503_s28 + $0x8c] sm:$0x3] }
 0x15d   : > { %2459 = vrot.lane.b32.xlu1 %v14304_v39, %s9440_s9  ;;  %v9042_v13 = vld [vmem:[%s9503_s28 + $0x5c] ss:$0 sps:$4 sm:$0x11]   ;;  %v570_v42 = vor.u32 %v569_v12, %v566_v7  ;;  %v575_v0 = vrot.slane %v573_v46, 5  ;;  %v576_v50 = vshll.u32 %v9343_v20, 16  ;;  %v582_v63 = vshrl.u32 %v9344_v31, 16  ;;  %v10954_v32 = vpop.permute.xlu1 %2259 }
 0x15e   : > { %14305 = vst [vmem:[#allocation95_spill] sm:$0xff] %v10954_v32  ;;  %v10956_v30 = vrot.slane %v4546_v36, 1  ;;  %v561_v29 = vsel %vm10449_vm8, %v552_v33, %v560_v27  ;;  %v585_v15 = vshll.u32 %v9344_v31, 16  ;;  %v592_v8 = vshrl.u32 %v9345_v49, 16 }
 0x15f   : > { %5991 = vrot.lane.b32.xlu0 %v10828_v45, %s9442_s13  ;;  %v10961_v45 = vpop.permute.xlu0 %2257  ;;  %v10964_v7 = vld [vmem:[%s9503_s28 + $0x20] ss:$0 sps:$4 sm:$0x77]   ;;  %v10966_v12 = vrot.slane %v4549_v11, 2  ;;  %v571_v20 = vsel %vm10449_vm8, %v562_v21, %v570_v42  ;;  %v578_v36 = vrot.slane %v576_v50, 6  ;;  %v584_v46 = vrot.slane %v582_v63, 5 }
 0x160   : > { %14306 = vst [vmem:[#allocation129_spill] sm:$0xff] %v10961_v45  ;;  %v10972_v27 = vrot.slane %v8393_v25, 3  ;;  %v7577_v19 = vcombine.low %v561_v29, %v571_v20  ;;  %v587_v39 = vrot.slane %v585_v15, 6  ;;  %v594_v33 = vrot.slane %v592_v8, 5  ;;  %v9346_v50 = vld [vmem:[%s9503_s28 + $0x90] sm:$0xe] }
 0x161   : > { %2857 = vrot.lane.b32.xlu1 %v10834_v4, %s9442_s13  ;;  %v10977_v11 = vld [vmem:[%s14064_s2 + $0x24] ss:$0 sps:$4 sm:$0x33]   ;;  %v579_v21 = vor.u32 %v578_v36, %v575_v0  ;;  %v595_v42 = vshll.u32 %v9345_v49, 16  ;;  %v601_v31 = vshrl.u32 %v9346_v50, 16  ;;  %v604_v63 = vshll.u32 %v9346_v50, 16  ;;  %v10981_v4 = vpop.permute.xlu1 %2263 }
 0x162   : > { %14307 = vst [vmem:[#allocation130_spill] sm:$0xff] %v10981_v4  ;;  %v4135_v25 = vld [vmem:[%s9503_s28 + $0x24] sm:$0x8]  ;;  %8670 = vmatmul.mubr.msk.bf16.gmra.mrb[12].mxu0 %vm845_vm6, %v7577_v19  ;;  %v588_v29 = vor.u32 %v587_v39, %v584_v46  ;;  %v9347_v15 = vld [vmem:[%s9503_s28 + $0x94] sm:$0xf]  ;;  %v620_v40 = vshrl.u32 %v9348_v28, 16  ;;  %8805 = vmatprep.subr.msk.bf16.mxu0 %vm894_vm3, %v10977_v11  ;;  %v4544_v19 = vor.u32 %v10947_v10, %v10945_v37 }
 0x163   : > { %2647 = vrot.lane.b32.xlu0 %v9042_v13, %s9441_s12  ;;  %v610_v8 = vshrl.u32 %v9347_v15, 16  ;;  %v613_v20 = vshll.u32 %v9347_v15, 16  ;;  %v10989_v13 = vpop.permute.xlu0 %2261  ;;  %v580_v49 = vrot.slane %v579_v21, 4  ;;  %v597_v36 = vrot.slane %v595_v42, 6  ;;  %v9370_v45 = vld [vmem:[%s9503_s28 + $0x1c] sm:$0xf] }
 0x164   : > { %14308 = vst [vmem:[#allocation131_spill] sm:$0xff] %v10989_v13  ;;  %v603_v50 = vrot.slane %v601_v31, 5  ;;  %v9046_v46 = vld [vmem:[%s9503_s28 + $0x68] ss:$0 sps:$4 sm:$0x11]   ;;  %v590_v39 = vrot.slane %v588_v29, 4  ;;  %v8395_v3 = vcombine.low %v4135_v25, %v10881_v61 }
 0x165   : > { %5993 = vrot.lane.b32.xlu1 %v10844_v26, %s9442_s13  ;;  %v606_v15 = vrot.slane %v604_v63, 6  ;;  %v612_v48 = vrot.slane %v610_v8, 5  ;;  %v9060_v0 = vld [vmem:[%s9503_s28 + $0x2c] ss:$0 sps:$4 sm:$0x77]   ;;  %v589_v21 = vsel %vm10449_vm8, %v580_v49, %v588_v29  ;;  %v598_v42 = vor.u32 %v597_v36, %v594_v33  ;;  %v11003_v17 = vpop.permute.xlu1 %2267  ;;  %v14310_v13 = vld [vmem:[#allocation42_spill] sm:$0xff] }
 0x166   : > { %v615_v31 = vrot.slane %v613_v20, 6  ;;  %14309 = vst [vmem:[#allocation132_spill] sm:$0xff] %v11003_v17  ;;  %v7754_v26 = vld [vmem:[%s9503_s28 + $0x54] sm:$0xc]  ;;  %v5114_v4 = vshrl.u32 %v14310_v13, 16  ;;  %v622_v10 = vrot.slane %v620_v40, 5  ;;  %v4552_v40 = vor.u32 %v10966_v12, %v10956_v30 }
 0x167   : > { %3061 = vrot.lane.b32.xlu0 %v10859_v55, %s9443_s18  ;;  %v607_v37 = vor.u32 %v606_v15, %v603_v50  ;;  %v623_v63 = vshll.u32 %v9348_v28, 16  ;;  %v11007_v8 = vpop.permute.xlu0 %2265  ;;  %v5117_v55 = vshll.u32 %v14310_v13, 16  ;;  %v14312_v61 = vld [vmem:[#allocation40_spill] sm:$0xff]  ;;  %v599_v29 = vsel %vm10449_vm8, %v590_v39, %v598_v42  ;;  %v11021_v15 = vld [vmem:[%s9503_s28 + $0x5c] ss:$0 sps:$4 sm:$0x77]  }
 0x168   : > { %14311 = vst [vmem:[#allocation42_spill] sm:$0xff] %v11007_v8  ;;  %v5122_v25 = vshrl.u32 %v14312_v61, 16  ;;  %v616_v33 = vor.u32 %v615_v31, %v612_v48  ;;  %v5125_v20 = vshll.u32 %v14312_v61, 16  ;;  %v7578_v49 = vcombine.low %v589_v21, %v599_v29  ;;  %v14315_v12 = vld [vmem:[#allocation46_spill] sm:$0xff] }
 0x169   : > { %2651 = vrot.lane.b32.xlu1 %v9046_v46, %s9441_s12  ;;  %v608_v36 = vrot.slane %v607_v37, 4  ;;  %v625_v50 = vrot.slane %v623_v63, 6  ;;  %v4896_v28 = vrot.slane %v8395_v3, 3  ;;  %v8058_v13 = vcombine.low %v7754_v26, %v10744_v52  ;;  %v11023_v39 = vpop.permute.xlu1 %2271  ;;  %v8231_v52 = vld [vmem:[%s9503_s28 + $0x3c] sm:$0x8] }
 0x16a   : > { %v618_v48 = vrot.slane %v616_v33, 4  ;;  %14313 = vst [vmem:[#allocation40_spill] sm:$0xff] %v11023_v39  ;;  %v4897_v46 = vrot.slane %v9060_v0, 3  ;;  %v11025_v42 = vrot.slane %v5114_v4, 1  ;;  %8673 = vmatprep.mubr.msk.bf16.mxu0 %vm845_vm6, %v7578_v49  ;;  %v11032_v30 = vrot.slane %v5117_v55, 2  ;;  %v14316_v0 = vld [vmem:[#allocation44_spill] sm:$0xff] }
 0x16b   : > { %6167 = vrot.lane.b32.xlu0 %v10869_v9, %s9443_s18  ;;  %v617_v21 = vsel %vm10449_vm8, %v608_v36, %v616_v33  ;;  %v626_v9 = vor.u32 %v625_v50, %v622_v10  ;;  %v11030_v31 = vpop.permute.xlu0 %2269  ;;  %v11034_v3 = vrot.slane %v5122_v25, 1  ;;  %v5131_v26 = vshrl.u32 %v14315_v12, 16 }
 0x16c   : > { %14314 = vst [vmem:[#allocation133_spill] sm:$0xff] %v11030_v31  ;;  %v5134_v37 = vshll.u32 %v14315_v12, 16  ;;  %v11041_v4 = vrot.slane %v5125_v20, 2  ;;  %v5139_v63 = vshrl.u32 %v14316_v0, 16  ;;  %v5142_v10 = vshll.u32 %v14316_v0, 16 }
 0x16d   : > { %3065 = vrot.lane.b32.xlu1 %v10874_v18, %s9443_s18  ;;  %v627_v55 = vsel %vm10449_vm8, %v618_v48, %v626_v9  ;;  %v14317_v61 = vrot.slane %v10649_v1, 1  ;;  %v14318_v25 = vrot.slane %v10848_v35, 3  ;;  %v2409_v18 = vrot.slane %v8058_v13, 2  ;;  %v11055_v49 = vpop.permute.xlu1 %2275 }
 0x16e   : > { %v14129_v33 = vrot.slane %v11021_v15, 2  ;;  %v7579_v20 = vcombine.low %v617_v21, %v627_v55  ;;  %14319 = vst [vmem:[#allocation46_spill] sm:$0xff] %v11055_v49  ;;  %v14320_v36 = vor.u32 %v10863_v22, %v10861_v60  ;;  %v14321_v50 = vor.u32 %v10878_v38, %v10876_v23  ;;  %v7756_v21 = vld [vmem:[%s9503_s28 + $0x60] sm:$0xc]  ;;  %v9349_v23 = vld [vmem:[%s9503_s28 + $0x9c] sm:$0xe] }
 0x16f   : > { %2855 = vrot.lane.b32.xlu0 %v14317_v61, %s9442_s13  ;;  %v6124_v29 = vsel %vm4886_vm7, %v10892_v16, %v14318_v25  ;;  %v14322_v35 = vrot.slane %v10964_v7, 3  ;;  %v4553_v16 = vsel %vm4485_vm4, %v4544_v19, %v4552_v40  ;;  %v8439_v13 = vcombine.low %v8231_v52, %v10592_v54  ;;  %v11071_v9 = vpop.permute.xlu0 %2273  ;;  %v9350_v52 = vld [vmem:[%s9503_s28 + $0xa0] sm:$0xf]  ;;  %v9366_v49 = vld [vmem:[%s9503_s28 + $0xd8] sm:$0xe] }
 0x170   : > { %v4536_v1 = vsel %vm4485_vm4, %v14321_v50, %v14320_v36  ;;  %14323 = vst [vmem:[#allocation44_spill] sm:$0xff] %v11071_v9  ;;  %v11074_v12 = vsel %vm4886_vm7, %v4896_v28, %v4897_v46  ;;  %v11076_v60 = vrot.slane %v5131_v26, 1  ;;  %v11078_v22 = vrot.slane %v5134_v37, 2  ;;  %8674 = vmatmul.mubr.msk.bf16.gmra.mrb[16].mxu0 %vm845_vm6, %v7579_v20 }
 0x171   : > { %v4895_v48 = vsel %vm4886_vm7, %v10972_v27, %v14322_v35  ;;  %v629_v38 = vshrl.u32 %v9349_v23, 16  ;;  %6169 = vrot.lane.b32.xlu1 %v6124_v29, %s9443_s18  ;;  %v5120_v54 = vor.u32 %v11032_v30, %v11025_v42  ;;  %v5128_v7 = vor.u32 %v11041_v4, %v11034_v3  ;;  %v11098_v30 = vpop.permute.xlu1 %2279  ;;  %v9351_v4 = vld [vmem:[%s9503_s28 + $0xa4] sm:$0x3] }
 0x172   : > { %v11087_v27 = vrot.slane %v5139_v63, 1  ;;  %v11089_v19 = vrot.slane %v5142_v10, 2  ;;  %v11095_v40 = vsel %vm1788_vm1, %v2409_v18, %v14129_v33  ;;  %v8060_v28 = vcombine.low %v7756_v21, %v10778_v58  ;;  %14324 = vst [vmem:[#allocation134_spill] sm:$0xff] %v11098_v30  ;;  %v9352_v10 = vld [vmem:[%s9503_s28 + $0x44] ss:$0 sps:$4 sm:$0x77]  }
 0x173   : > { %4762 = vrot.lane.b32.xlu0 %v4536_v1, %s9436_s29  ;;  %v631_v46 = vrot.slane %v629_v38, 5  ;;  %v632_v42 = vshll.u32 %v9349_v23, 16  ;;  %v5437_v3 = vrot.slane %v8439_v13, 3  ;;  %v638_v26 = vshrl.u32 %v9350_v52, 16  ;;  %v11102_v63 = vpop.permute.xlu0 %2277  ;;  %v8232_v21 = vld [vmem:[%s9503_s28 + $0x48] sm:$0x8] }
 0x174   : > { %v641_v37 = vshll.u32 %v9350_v52, 16  ;;  %v648_v0 = vshrl.u32 %v9351_v4, 16  ;;  %14325 = vst [vmem:[#allocation135_spill] sm:$0xff] %v11102_v63  ;;  %v5438_v55 = vrot.slane %v9352_v10, 3  ;;  %v5137_v61 = vor.u32 %v11078_v22, %v11076_v60  ;;  %v9353_v23 = vld [vmem:[%s9503_s28 + $0xa8] sm:$0xe] }
 0x175   : > { %v11108_v58 = vld [vmem:[%s9503_s28 + $0x68] ss:$0 sps:$4 sm:$0x77]   ;;  %v634_v25 = vrot.slane %v632_v42, 6  ;;  %v651_v29 = vshll.u32 %v9351_v4, 16  ;;  %v14326_v18 = vrot.slane %v10716_v62, 2  ;;  %v5145_v20 = vor.u32 %v11089_v19, %v11087_v27  ;;  %v11120_v62 = vpop.permute.xlu1 %2283 }
 0x176   : > { %v640_v36 = vrot.slane %v638_v26, 5  ;;  %v643_v50 = vrot.slane %v641_v37, 6  ;;  %v650_v1 = vrot.slane %v648_v0, 5  ;;  %v14327_v35 = vrot.slane %v10684_v2, 1  ;;  %14328 = vst [vmem:[#allocation136_spill] sm:$0xff] %v11120_v62 }
 0x177   : > { %3063 = vrot.lane.b32.xlu1 %v14326_v18, %s9443_s18  ;;  %v2412_v13 = vrot.slane %v8060_v28, 2  ;;  %v635_v60 = vor.u32 %v634_v25, %v631_v46  ;;  %v653_v22 = vrot.slane %v651_v29, 6  ;;  %v657_v38 = vshrl.u32 %v9353_v23, 16  ;;  %v9354_v27 = vld [vmem:[%s9503_s28 + $0xac] sm:$0xf]  ;;  %v11123_v37 = vpop.permute.xlu0 %2281 }
 0x178   : > { %2859 = vrot.lane.b32.xlu0 %v14327_v35, %s9442_s13  ;;  %v644_v42 = vor.u32 %v643_v50, %v640_v36  ;;  %v660_v52 = vshll.u32 %v9353_v23, 16  ;;  %v666_v19 = vshrl.u32 %v9354_v27, 16  ;;  %v669_v26 = vshll.u32 %v9354_v27, 16  ;;  %14329 = vst [vmem:[#allocation137_spill] sm:$0xff] %v11123_v37  ;;  %v7834_v10 = vld [vmem:[%s9503_s28 + $0x6c] sm:$0xe] }
 0x179   : > { %v14128_v2 = vrot.slane %v11108_v58, 2  ;;  %v636_v28 = vrot.slane %v635_v60, 4  ;;  %v654_v4 = vor.u32 %v653_v22, %v650_v1  ;;  %v659_v46 = vrot.slane %v657_v38, 5  ;;  %v8281_v36 = vld [vmem:[%s9503_s28 + $0x60] sm:$0xe]  ;;  %v11134_v22 = vpop.permute.xlu1 %2287 }
 0x17a   : > { %v8440_v0 = vcombine.low %v8232_v21, %v10620_v5  ;;  %v646_v25 = vrot.slane %v644_v42, 4  ;;  %v662_v29 = vrot.slane %v660_v52, 6  ;;  %v668_v18 = vrot.slane %v666_v19, 5  ;;  %v9355_v35 = vld [vmem:[%s9503_s28 + $0xb0] sm:$0x3]  ;;  %14330 = vst [vmem:[#allocation138_spill] sm:$0xff] %v11134_v22 }
 0x17b   : > { %4939 = vrot.lane.b32.xlu1 %v4895_v48, %s9437_s30  ;;  %v645_v50 = vsel %vm10449_vm8, %v636_v28, %v644_v42  ;;  %v671_v1 = vrot.slane %v669_v26, 6  ;;  %v676_v48 = vshrl.u32 %v9355_v35, 16  ;;  %v679_v60 = vshll.u32 %v9355_v35, 16  ;;  %v11146_v23 = vld [vmem:[%s9503_s28 + $0x70] sm:$0xf]  ;;  %v11153_v27 = vpop.permute.xlu0 %2285  ;;  %v9061_v28 = vld [vmem:[%s9503_s28 + $0x48] sm:$0xff]  }
 0x17c   : > { %4764 = vrot.lane.b32.xlu0 %v4553_v16, %s9436_s29  ;;  %v11137_v5 = vsel %vm4485_vm4, %v5120_v54, %v5128_v7  ;;  %v11140_v21 = vsel %vm4886_vm7, %v5437_v3, %v5438_v55  ;;  %v11143_v16 = vld [vmem:[%s9503_s28 + $0x6c] sm:$0xf]  ;;  %v11149_v38 = vld [vmem:[%s9503_s28 + $0x60] sm:$0xf]  ;;  %v655_v42 = vsel %vm10449_vm8, %v646_v25, %v654_v4  ;;  %v663_v52 = vor.u32 %v662_v29, %v659_v46  ;;  %v11156_v19 = vld [vmem:[%s9503_s28 + $0x64] sm:$0xf] }
 0x17d   : > { %14331 = vst [vmem:[#allocation139_spill] sm:$0xff] %v11153_v27  ;;  %v8122_v54 = vcombine.low %v7834_v10, %v11146_v23  ;;  %v11160_v7 = vld [vmem:[%s9503_s28 + $0x74] ss:$0 sps:$4 sm:$0x33]   ;;  %v7580_v3 = vcombine.low %v645_v50, %v655_v42  ;;  %v672_v55 = vor.u32 %v671_v1, %v668_v18  ;;  %v678_v26 = vrot.slane %v676_v48, 5  ;;  %v9062_v18 = vld [vmem:[%s9503_s28 + $0x3c] sm:$0xff]  }
 0x17e   : > { %v11166_v4 = vsel %vm4485_vm4, %v5137_v61, %v5145_v20  ;;  %v11169_v46 = vcombine.low %v8281_v36, %v11156_v19  ;;  %v664_v25 = vrot.slane %v663_v52, 4  ;;  %v681_v29 = vrot.slane %v679_v60, 6  ;;  %v11185_v36 = vpop.permute.xlu1 %2291  ;;  %v11190_v1 = vld [vmem:[%s9503_s28 + $0x50] ss:$0 sps:$4 sm:$0x77]  }
 0x17f   : > { %4941 = vrot.lane.b32.xlu1 %v11074_v12, %s9437_s30  ;;  %v14332_v10 = vrot.slane %v10793_v44, 2  ;;  %v11180_v12 = vsel %vm1788_vm1, %v2412_v13, %v14128_v2  ;;  %v11182_v61 = vrot.slane %v8440_v0, 3  ;;  %8677 = vmatprep.mubr.msk.bf16.mxu0 %vm845_vm6, %v7580_v3  ;;  %v674_v20 = vrot.slane %v672_v55, 4  ;;  %14333 = vst [vmem:[#allocation140_spill] sm:$0xff] %v11185_v36  ;;  %v11196_v0 = vpop.permute.xlu0 %2289  ;;  %v9357_v3 = vld [vmem:[%s9503_s28 + $0xb4] sm:$0xe] }
 0x180   : > { %v9077_v48 = vld [vmem:[%s9503_s28 + $0x68] ss:$0 sps:$4 sm:$0x33]   ;;  %v673_v13 = vsel %vm10449_vm8, %v664_v25, %v672_v55  ;;  %v682_v60 = vor.u32 %v681_v29, %v678_v26  ;;  %14334 = vst [vmem:[#allocation141_spill] sm:$0xff] %v11196_v0  ;;  %v11198_v42 = vrot.slane %v8122_v54, 1  ;;  %v688_v2 = vshll.u32 %v9357_v3, 16 }
 0x181   : > { %3067 = vrot.lane.b32.xlu0 %v14332_v10, %s9443_s18  ;;  %v685_v10 = vshrl.u32 %v9357_v3, 16  ;;  %v5754_v33 = vshrl.u32 %v11169_v46, 16  ;;  %v5757_v44 = vshll.u32 %v11169_v46, 16  ;;  %v9358_v26 = vld [vmem:[%s9503_s28 + $0xb8] sm:$0xf]  ;;  %v5762_v3 = vshrl.u32 %v9077_v48, 16 }
 0x182   : > { %v683_v55 = vsel %vm10449_vm8, %v674_v20, %v682_v60  ;;  %v694_v25 = vshrl.u32 %v9358_v26, 16  ;;  %v690_v50 = vrot.slane %v688_v2, 6  ;;  %v697_v52 = vshll.u32 %v9358_v26, 16  ;;  %v11209_v35 = vpop.permute.xlu1 %2295  ;;  %v9359_v36 = vld [vmem:[%s9503_s28 + $0xbc] sm:$0x3] }
 0x183   : > { %5053 = vrot.lane.b32.xlu1 %v9061_v28, %s9438_s7  ;;  %v7581_v54 = vcombine.low %v673_v13, %v683_v55  ;;  %v687_v29 = vrot.slane %v685_v10, 5  ;;  %14335 = vst [vmem:[#allocation142_spill] sm:$0xff] %v11209_v35  ;;  %v704_v0 = vshrl.u32 %v9359_v36, 16  ;;  %v707_v46 = vshll.u32 %v9359_v36, 16  ;;  %v11212_v22 = vpop.permute.xlu0 %2293  ;;  %v9360_v60 = vld [vmem:[%s9503_s28 + $0xc0] sm:$0xe] }
 0x184   : > { %v696_v28 = vrot.slane %v694_v25, 5  ;;  %14336 = vst [vmem:[#allocation143_spill] sm:$0xff] %v11212_v22  ;;  %v5765_v20 = vshll.u32 %v9077_v48, 16  ;;  %v699_v13 = vrot.slane %v697_v52, 6  ;;  %v713_v2 = vshrl.u32 %v9360_v60, 16 }
 0x185   : > { %5051 = vrot.lane.b32.xlu0 %v9062_v18, %s9438_s7  ;;  %8678 = vmatmul.mubr.msk.bf16.gmra.mrb[20].mxu0 %vm845_vm6, %v7581_v54  ;;  %v691_v18 = vor.u32 %v690_v50, %v687_v29  ;;  %v11218_v10 = vrot.slane %v5754_v33, 1  ;;  %v706_v55 = vrot.slane %v704_v0, 5  ;;  %v709_v26 = vrot.slane %v707_v46, 6  ;;  %v11223_v48 = vld [vmem:[%s9503_s28 + $0x78] sm:$0xf] }
 0x186   : > { %v716_v36 = vshll.u32 %v9360_v60, 16  ;;  %v11226_v50 = vld [vmem:[%s9503_s28 + $0x7c] sm:$0xf]  ;;  %v700_v25 = vor.u32 %v699_v13, %v696_v28  ;;  %v715_v54 = vrot.slane %v713_v2, 5  ;;  %v9361_v29 = vld [vmem:[%s9503_s28 + $0xc4] sm:$0xf] }
 0x187   : > { %2461 = vrot.lane.b32.xlu1 %v11095_v40, %s9440_s9  ;;  %v692_v52 = vrot.slane %v691_v18, 4  ;;  %v722_v40 = vshrl.u32 %v9361_v29, 16  ;;  %v11229_v33 = vpop.permute.xlu1 %2299  ;;  %v11232_v0 = vld [vmem:[%s9503_s28 + $0x6c] sm:$0xf]  ;;  %v710_v46 = vor.u32 %v709_v26, %v706_v55  ;;  %v725_v35 = vshll.u32 %v9361_v29, 16  ;;  %v11235_v27 = vpop.permute.xlu0 %2297 }
 0x188   : > { %14337 = vst [vmem:[#allocation144_spill] sm:$0xff] %v11229_v33  ;;  %v718_v60 = vrot.slane %v716_v36, 6  ;;  %v9362_v22 = vld [vmem:[%s9503_s28 + $0xc8] sm:$0x3]  ;;  %14338 = vst [vmem:[#allocation145_spill] sm:$0xff] %v11235_v27  ;;  %v11240_v37 = vrot.slane %v5757_v44, 2 }
 0x189   : > { %5355 = vrot.lane.b32.xlu0 %v11137_v5, %s9439_s8  ;;  %v732_v5 = vshrl.u32 %v9362_v22, 16  ;;  %v11238_v62 = vld [vmem:[%s9503_s28 + $0x70] sm:$0xf]  ;;  %v701_v28 = vsel %vm10449_vm8, %v692_v52, %v700_v25  ;;  %v702_v18 = vrot.slane %v700_v25, 4  ;;  %v724_v13 = vrot.slane %v722_v40, 5 }
 0x18a   : > { %v8283_v2 = vld [vmem:[%s9503_s28 + $0x6c] sm:$0xe]  ;;  %v11247_v55 = vrot.slane %v5762_v3, 1  ;;  %v11249_v26 = vrot.slane %v5765_v20, 2  ;;  %v719_v36 = vor.u32 %v718_v60, %v715_v54  ;;  %v727_v29 = vrot.slane %v725_v35, 6 }
 0x18b   : > { %5483 = vrot.lane.b32.xlu1 %v11140_v21, %s9440_s9  ;;  %v14339_v44 = vrot.slane %v11190_v1, 3  ;;  %v711_v25 = vsel %vm10449_vm8, %v702_v18, %v710_v46  ;;  %v734_v21 = vrot.slane %v732_v5, 5  ;;  %v735_v40 = vshll.u32 %v9362_v22, 16  ;;  %v11259_v3 = vpop.permute.xlu1 %2447  ;;  %v11263_v60 = vpop.permute.xlu0 %2445  ;;  %v9365_v18 = vld [vmem:[%s9503_s28 + $0xd4] sm:$0x3] }
 0x18c   : > { %v8092_v35 = vcombine.low %v11223_v48, %v11226_v50  ;;  %v7582_v20 = vcombine.low %v701_v28, %v711_v25  ;;  %v720_v54 = vrot.slane %v719_v36, 4  ;;  %v11268_v1 = vcombine.low %v8283_v2, %v11238_v62  ;;  %v9364_v25 = vld [vmem:[%s9503_s28 + $0xd0] sm:$0xf]  ;;  %v11302_v27 = vld [vmem:[%s9503_s28 + $0x74] ss:$0 sps:$4 sm:$0x33]  }
 0x18d   : > { %5357 = vrot.lane.b32.xlu0 %v11166_v4, %s9439_s8  ;;  %v5442_v52 = vsel %vm4886_vm7, %v11182_v61, %v14339_v44  ;;  %v728_v4 = vor.u32 %v727_v29, %v724_v13  ;;  %v14340_v22 = vrot.slane %v11160_v7, 1  ;;  %v737_v5 = vrot.slane %v735_v40, 6  ;;  %v11285_v13 = vld [vmem:[%s9503_s28 + $0x78] sm:$0xe] }
 0x18e   : > { %v14341_v48 = vcombine.low %v11143_v16, %v11146_v23  ;;  %8681 = vmatprep.mubr.msk.bf16.mxu0 %vm845_vm6, %v7582_v20  ;;  %v750_v40 = vshrl.u32 %v9364_v25, 16  ;;  %v753_v28 = vshll.u32 %v9364_v25, 16  ;;  %v760_v20 = vshrl.u32 %v9365_v18, 16 }
 0x18f   : > { %v11274_v46 = vsel %vm1579_vm0, %v11198_v42, %v14340_v22  ;;  %v730_v2 = vrot.slane %v728_v4, 4  ;;  %v9363_v42 = vld [vmem:[%s9503_s28 + $0xcc] sm:$0xe]  ;;  %v729_v16 = vsel %vm10449_vm8, %v720_v54, %v728_v4  ;;  %v738_v29 = vor.u32 %v737_v5, %v734_v21  ;;  %v11294_v22 = vpop.permute.xlu1 %2451  ;;  %v11297_v33 = vpop.permute.xlu0 %2449 }
 0x190   : > { %2653 = vrot.lane.b32.xlu1 %v14341_v48, %s9441_s12  ;;  %v741_v36 = vshrl.u32 %v9363_v42, 16  ;;  %v744_v44 = vshll.u32 %v9363_v42, 16  ;;  %v763_v61 = vshll.u32 %v9365_v18, 16  ;;  %v5771_v21 = vshrl.u32 %v11268_v1, 16 }
 0x191   : > { %2465 = vrot.lane.b32.xlu0 %v11180_v12, %s9440_s9  ;;  %v8124_v12 = vcombine.low %v11285_v13, %v11226_v50  ;;  %v739_v54 = vsel %vm10449_vm8, %v730_v2, %v738_v29  ;;  %v14342_v5 = vcombine.low %v11149_v38, %v11156_v19  ;;  %v5774_v18 = vshll.u32 %v11268_v1, 16 }
 0x192   : > { %v743_v48 = vrot.slane %v741_v36, 5  ;;  %v746_v4 = vrot.slane %v744_v44, 6  ;;  %v7583_v42 = vcombine.low %v729_v16, %v739_v54  ;;  %v752_v36 = vrot.slane %v750_v40, 5  ;;  %v11317_v44 = vld [vmem:[%s9503_s28 + $0x80] ss:$0 sps:$4 sm:$0x33]  }
 0x193   : > { %v755_v13 = vrot.slane %v753_v28, 6  ;;  %v762_v63 = vrot.slane %v760_v20, 5  ;;  %v765_v30 = vrot.slane %v763_v61, 6  ;;  %v769_v2 = vshrl.u32 %v9366_v49, 16  ;;  %v11314_v29 = vpop.permute.xlu1 %2455  ;;  %v9367_v16 = vld [vmem:[%s9503_s28 + $0xdc] sm:$0xf] }
 0x194   : > { %5595 = vrot.lane.b32.xlu1 %v14342_v5, %s9441_s12  ;;  %v747_v25 = vor.u32 %v746_v4, %v743_v48  ;;  %8682 = vmatmul.mubr.msk.bf16.gmra.mrb[24].mxu0 %vm845_vm6, %v7583_v42  ;;  %v772_v1 = vshll.u32 %v9366_v49, 16  ;;  %v778_v28 = vshrl.u32 %v9367_v16, 16  ;;  %v781_v40 = vshll.u32 %v9367_v16, 16  ;;  %v7602_v4 = vld [vmem:[%s9503_s28 + $0xc] sm:$0xf] }
 0x195   : > { %5485 = vrot.lane.b32.xlu0 %v5442_v52, %s9440_s9  ;;  %v756_v38 = vor.u32 %v755_v13, %v752_v36  ;;  %v11321_v52 = vpop.permute.xlu0 %2453  ;;  %v5779_v61 = vshrl.u32 %v11302_v27, 16  ;;  %v766_v20 = vor.u32 %v765_v30, %v762_v63  ;;  %v771_v54 = vrot.slane %v769_v2, 5  ;;  %v8897_v13 = vld [vmem:[%s9503_s28 + $0x20] ss:$0 sps:$4 sm:$0x11]  }
 0x196   : > { %v748_v48 = vrot.slane %v747_v25, 4  ;;  %v5782_v5 = vshll.u32 %v11302_v27, 16  ;;  %v774_v49 = vrot.slane %v772_v1, 6  ;;  %v780_v36 = vrot.slane %v778_v28, 5  ;;  %v7605_v16 = vld [vmem:[%s9503_s28 + $0x18] sm:$0xf] }
 0x197   : > { %v758_v42 = vrot.slane %v756_v38, 4  ;;  %v14343_v9 = vrot.slane %v11021_v15, 2  ;;  %v783_v63 = vrot.slane %v781_v40, 6  ;;  %v9368_v25 = vld [vmem:[%s9503_s28 + $0xe0] sm:$0x3]  ;;  %v11336_v31 = vpop.permute.xlu1 %2637  ;;  %v2812_v1 = vrot.slane %v8124_v12, 1 }
 0x198   : > { %2657 = vrot.lane.b32.xlu1 %v8092_v35, %s9441_s12  ;;  %v757_v30 = vsel %vm10449_vm8, %v748_v48, %v756_v38  ;;  %v788_v2 = vshrl.u32 %v9368_v25, 16  ;;  %v791_v35 = vshll.u32 %v9368_v25, 16  ;;  %v8898_v27 = vld [vmem:[%s9503_s28 + $0x14] ss:$0 sps:$4 sm:$0x11]   ;;  %v775_v39 = vor.u32 %v774_v49, %v771_v54 }
 0x199   : > { %2463 = vrot.lane.b32.xlu0 %v14343_v9, %s9440_s9  ;;  %v767_v9 = vsel %vm10449_vm8, %v758_v42, %v766_v20  ;;  %v11341_v17 = vpop.permute.xlu0 %2457  ;;  %v11343_v38 = vrot.slane %v5771_v21, 1  ;;  %v7866_v40 = vld [vmem:[%s9503_s28 + $0x6c] sm:$0xc]  ;;  %v784_v8 = vor.u32 %v783_v63, %v780_v36  ;;  %v7890_v32 = vcombine.low %v7602_v4, %v9369_v47  ;;  %v11353_v20 = vld [vmem:[%s9503_s28 + $0x34] sm:$0xf] }
 0x19a   : > { %v7584_v48 = vcombine.low %v757_v30, %v767_v9  ;;  %v790_v25 = vrot.slane %v788_v2, 5  ;;  %v7892_v12 = vcombine.low %v7605_v16, %v9370_v45  ;;  %v14344_v28 = vcombine.low %v11232_v0, %v11238_v62  ;;  %v4105_v54 = vld [vmem:[%s9503_s28 + $0x30] sm:$0xe]  ;;  %v14347_v30 = vld [vmem:[#allocation2_spill] sm:$0xff]  ;;  %v14349_v2 = vld [vmem:[#allocation5_spill] sm:$0xff] }
 0x19b   : > { %v776_v42 = vrot.slane %v775_v39, 4  ;;  %v793_v21 = vrot.slane %v791_v35, 6  ;;  %v5776_v49 = vrot.slane %v5774_v18, 2  ;;  %v5781_v36 = vrot.slane %v5779_v61, 1  ;;  %v11359_v4 = vpop.permute.xlu1 %2845  ;;  %v7868_v9 = vld [vmem:[%s9503_s28 + $0x78] sm:$0xc] }
 0x19c   : > { %5597 = vrot.lane.b32.xlu1 %v14344_v28, %s9441_s12  ;;  %v5784_v47 = vrot.slane %v5782_v5, 2  ;;  %8685 = vmatprep.mubr.msk.bf16.mxu0 %vm845_vm6, %v7584_v48  ;;  %v786_v45 = vrot.slane %v784_v8, 4  ;;  %v14345_v0 = vor.u32 %v11249_v26, %v11247_v55  ;;  %v14346_v39 = vor.u32 %v11240_v37, %v11218_v10  ;;  %v11370_v18 = vld [vmem:[%s9503_s28 + $0x74] ss:$0 sps:$4 sm:$0x77]   ;;  %v14348_v55 = vld [vmem:[#allocation3_spill] sm:$0xff] }
 0x19d   : > { %2861 = vrot.lane.b32.xlu0 %v11274_v46, %s9442_s13  ;;  %v8154_v46 = vcombine.low %v7866_v40, %v11146_v23  ;;  %v785_v61 = vsel %vm10449_vm8, %v776_v42, %v784_v8  ;;  %v794_v5 = vor.u32 %v793_v21, %v790_v25  ;;  %v11376_v63 = vsel %vm845_vm6, %v8897_v13, %v14347_v30  ;;  %v11380_v37 = vpop.permute.xlu0 %2641  ;;  %v8313_v10 = vld [vmem:[%s9503_s28 + $0x60] sm:$0x8] }
 0x19e   : > { %v5769_v16 = vsel %vm4485_vm4, %v14346_v39, %v14345_v0  ;;  %v3122_v26 = vsel %vm845_vm6, %v8898_v27, %v14348_v55  ;;  %v8365_v23 = vcombine.low %v4105_v54, %v11353_v20  ;;  %v3119_v35 = vsel %vm845_vm6, %v7890_v32, %v14349_v2  ;;  %v9095_v27 = vld [vmem:[%s9503_s28 + $0x38] ss:$0 sps:$4 sm:$0x33]   ;;  %v9080_v32 = vld [vmem:[%s9503_s28 + $0x74] ss:$0 sps:$4 sm:$0x11]  }
 0x19f   : > { %v14350_v8 = vrot.slane %v11108_v58, 2  ;;  %v14351_v28 = vrot.slane %v11317_v44, 1  ;;  %v795_v40 = vsel %vm10449_vm8, %v786_v45, %v794_v5  ;;  %v6525_v48 = vsel %vm894_vm3, %v10977_v11, 0  ;;  %v11403_v0 = vpop.permute.xlu1 %2849  ;;  %v9086_v39 = vld [vmem:[%s9503_s28 + $0x68] ss:$0 sps:$4 sm:$0x77]  }
 0x1a0   : > { %v5777_v25 = vor.u32 %v5776_v49, %v11343_v38  ;;  %v5785_v54 = vor.u32 %v5784_v47, %v5781_v36  ;;  %v7585_v42 = vcombine.low %v785_v61, %v795_v40  ;;  %8732 = vmatpush3.bf16.msra.mxu0 %v6525_v48  ;;  %v3017_v34 = vrot.slane %v8154_v46, 2  ;;  %v11416_v36 = vld [vmem:[%s9503_s28 + $0x80] ss:$0 sps:$4 sm:$0x77]   ;;  %v14354_v47 = vld [vmem:[#allocation35_spill] sm:$0xff] }
 0x1a1   : > { %2467 = vrot.lane.b32.xlu1 %v14350_v8, %s9440_s9  ;;  %v2814_v13 = vsel %vm1579_vm0, %v2812_v1, %v14351_v28  ;;  %5995 = vrot.lane.b32.xlu0 %v5769_v16, %s9442_s13  ;;  %v14352_v1 = vld [vmem:[#allocation8_spill] sm:$0xff]  ;;  %v3018_v45 = vrot.slane %v11370_v18, 2  ;;  %v8505_v11 = vcombine.low %v8313_v10, %v11156_v19  ;;  %v14353_v16 = vld [vmem:[#allocation34_spill] sm:$0xff]  ;;  %v11412_v38 = vpop.permute.xlu0 %2639  ;;  %v8156_v49 = vcombine.low %v7868_v9, %v11226_v50  ;;  %v8315_v19 = vld [vmem:[%s9503_s28 + $0x6c] sm:$0x8] }
 0x1a2   : > { %v3125_v21 = vsel %vm845_vm6, %v7892_v12, %v14352_v1  ;;  %v11410_v5 = vsel %vm3213_vm9, %v3122_v26, %v14353_v16  ;;  %v4555_v12 = vshrl.u32 %v8365_v23, 16  ;;  %8686 = vmatmul.mubr.msk.bf16.gmra.mrb[28].mxu0 %vm845_vm6, %v7585_v42  ;;  %v3215_v46 = vsel %vm3213_vm9, %v3119_v35, %v14354_v47  ;;  %v9093_v26 = vld [vmem:[%s9503_s28 + $0x74] ss:$0 sps:$4 sm:$0x77]   ;;  %v14355_v10 = vld [vmem:[#allocation97_spill] sm:$0xff] }
 0x1a3   : > { %v4558_v61 = vshll.u32 %v8365_v23, 16  ;;  %v4563_v30 = vshrl.u32 %v9095_v27, 16  ;;  %v4566_v55 = vshll.u32 %v9095_v27, 16  ;;  %v5786_v50 = vsel %vm4485_vm4, %v5777_v25, %v5785_v54  ;;  %v11428_v35 = vpop.permute.xlu1 %2643  ;;  %v4107_v9 = vld [vmem:[%s9503_s28 + $0x3c] sm:$0xe] }
 0x1a4   : > { %v3280_v2 = vsel %vm3278_vm10, %v3215_v46, %v14355_v10  ;;  %v3019_v23 = vsel %vm1788_vm1, %v3017_v34, %v3018_v45  ;;  %v6125_v8 = vrot.slane %v8505_v11, 3  ;;  %v6126_v28 = vrot.slane %v9086_v39, 3  ;;  %v9084_v42 = vld [vmem:[%s9503_s28 + $0x80] ss:$0 sps:$4 sm:$0x11]   ;;  %v14356_v39 = vld [vmem:[#allocation37_spill] sm:$0xff] }
 0x1a5   : > { %2865 = vrot.lane.b32.xlu1 %v2814_v13, %s9442_s13  ;;  %2655 = vrot.lane.b32.xlu0 %v9080_v32, %s9441_s12  ;;  %v11434_v13 = vld [vmem:[%s9503_s28 + $0x40] sm:$0xf]  ;;  %v3054_v27 = vpop.permute.xlu0 %3053  ;;  %v3020_v40 = vrot.slane %v8156_v49, 2  ;;  %v3021_v48 = vrot.slane %v11416_v36, 2  ;;  %v8507_v32 = vcombine.low %v8315_v19, %v11238_v62  ;;  %v4557_v25 = vrot.slane %v4555_v12, 1 }
 0x1a6   : > { %v3345_v54 = vsel %vm3343_vm11, %v3280_v2, %v10806_v41  ;;  %v4560_v1 = vrot.slane %v4558_v61, 2  ;;  %v4565_v34 = vrot.slane %v4563_v30, 1  ;;  %v4568_v11 = vrot.slane %v4566_v55, 2  ;;  %v9101_v12 = vld [vmem:[%s9503_s28 + $0x44] ss:$0 sps:$4 sm:$0x33]  }
 0x1a7   : > { %v3219_v16 = vsel %vm3213_vm9, %v3125_v21, %v14356_v39  ;;  %v3410_v49 = vsel %vm3408_vm12, %v3345_v54, %v11263_v60  ;;  %v8367_v62 = vcombine.low %v4107_v9, %v11434_v13  ;;  %v14357_v41 = vld [vmem:[#allocation99_spill] sm:$0xff]  ;;  %v3058_v19 = vpop.permute.xlu1 %3057  ;;  %v6127_v61 = vsel %vm4886_vm7, %v6125_v8, %v6126_v28  ;;  %v4137_v30 = vld [vmem:[%s9503_s28 + $0x30] sm:$0x8]  ;;  %v9099_v28 = vld [vmem:[%s9503_s28 + $0x38] ss:$0 sps:$4 sm:$0x77]  }
 0x1a8   : > { %v3284_v47 = vsel %vm3278_vm10, %v3219_v16, %v14357_v41  ;;  %v3475_v46 = vsel %vm3473_vm13, %v3410_v49, %v11336_v31  ;;  %v6129_v21 = vrot.slane %v9093_v26, 3  ;;  %v3022_v10 = vsel %vm1788_vm1, %v3020_v40, %v3021_v48 }
 0x1a9   : > { %5997 = vrot.lane.b32.xlu1 %v5786_v50, %s9442_s13  ;;  %3069 = vrot.lane.b32.xlu0 %v3019_v23, %s9443_s18  ;;  %v3349_v60 = vsel %vm3343_vm11, %v3284_v47, %v10853_v43  ;;  %v3540_v55 = vsel %vm3538_vm14, %v3475_v46, %v11359_v4  ;;  %v2848_v50 = vpop.permute.xlu0 %2847  ;;  %v6128_v2 = vrot.slane %v8507_v32, 3  ;;  %v4561_v26 = vor.u32 %v4560_v1, %v4557_v25  ;;  %v14358_v32 = vld [vmem:[#allocation36_spill] sm:$0xff] }
 0x1aa   : > { %v3414_v31 = vsel %vm3408_vm12, %v3349_v60, %v11297_v33  ;;  %v3605_v23 = vsel %vm3603_vm15, %v3540_v55, %v3054_v27  ;;  %v4569_v8 = vor.u32 %v4568_v11, %v4565_v34  ;;  %v8397_v4 = vcombine.low %v4137_v30, %v11353_v20  ;;  %v14359_v1 = vld [vmem:[#allocation96_spill] sm:$0xff]  ;;  %v14360_v34 = vld [vmem:[#allocation98_spill] sm:$0xff] }
 0x1ab   : > { %v3479_v43 = vsel %vm3473_vm13, %v3414_v31, %v11380_v37  ;;  %v4572_v9 = vshrl.u32 %v8367_v62, 16  ;;  %v4580_v40 = vshrl.u32 %v9101_v12, 16  ;;  %v3221_v33 = vsel %vm3213_vm9, %v11376_v63, %v14358_v32  ;;  %v2852_v54 = vpop.permute.xlu1 %2851 }
 0x1ac   : > { %v3544_v27 = vsel %vm3538_vm14, %v3479_v43, %v11403_v0  ;;  %v4575_v25 = vshll.u32 %v8367_v62, 16  ;;  %v3282_v37 = vsel %vm3278_vm10, %v11410_v5, %v14359_v1  ;;  %v3286_v20 = vsel %vm3278_vm10, %v3221_v33, %v14360_v34  ;;  %v14362_v1 = vld [vmem:[#allocation50_spill] sm:$0xff] }
 0x1ad   : > { %2659 = vrot.lane.b32.xlu1 %v9084_v42, %s9441_s12  ;;  %6171 = vrot.lane.b32.xlu0 %v6127_v61, %s9443_s18  ;;  %v4583_v42 = vshll.u32 %v9101_v12, 16  ;;  %v3671_v11 = vshll.u32 %v3605_v23, 16  ;;  %v3609_v39 = vsel %vm3603_vm15, %v3544_v27, %v3058_v19  ;;  %v11483_v16 = vpop.permute.xlu0 %4758  ;;  %v3347_v63 = vsel %vm3343_vm11, %v3282_v37, %v10802_v57  ;;  %v4139_v19 = vld [vmem:[%s9503_s28 + $0x3c] sm:$0x8] }
 0x1ae   : > { %v6130_v0 = vsel %vm4886_vm7, %v6128_v2, %v6129_v21  ;;  %v4570_v49 = vsel %vm4485_vm4, %v4561_v26, %v4569_v8  ;;  %v4900_v62 = vrot.slane %v9099_v28, 3  ;;  %v3412_v5 = vsel %vm3408_vm12, %v3347_v63, %v11259_v3  ;;  %v9103_v2 = vld [vmem:[%s9503_s28 + $0x44] ss:$0 sps:$4 sm:$0x77]  }
 0x1af   : > { %v14361_v12 = vrot.slane %v11160_v7, 1  ;;  %v4899_v41 = vrot.slane %v8397_v4, 3  ;;  %v4574_v47 = vrot.slane %v4572_v9, 1  ;;  %v4582_v46 = vrot.slane %v4580_v40, 1  ;;  %v11498_v21 = vpop.permute.xlu1 %4760 }
 0x1b0   : > { %v3477_v57 = vsel %vm3473_vm13, %v3412_v5, %v11412_v38  ;;  %v3681_v61 = vshll.u32 %v3609_v39, 16  ;;  %v4577_v30 = vrot.slane %v4575_v25, 2  ;;  %v4585_v60 = vrot.slane %v4583_v42, 2 }
 0x1b1   : > { %3073 = vrot.lane.b32.xlu1 %v3022_v10, %s9443_s18  ;;  %2863 = vrot.lane.b32.xlu0 %v14361_v12, %s9442_s13  ;;  %v3351_v3 = vsel %vm3343_vm11, %v3286_v20, %v10838_v24  ;;  %v3673_v55 = vrot.slane %v3671_v11, 1  ;;  %v3542_v7 = vsel %vm3538_vm14, %v3477_v57, %v2848_v50  ;;  %v3056_v10 = vpop.permute.xlu0 %3055  ;;  %vm3849_vm3 = vcmask 293888   ;;  %v7758_v20 = vld [vmem:[%s9503_s28 + $0x6c] sm:$0xc] }
 0x1b2   : > { %v3416_v31 = vsel %vm3408_vm12, %v3351_v3, %v11294_v22  ;;  %v3607_v26 = vsel %vm3603_vm15, %v3542_v7, %v3056_v10  ;;  %v8399_v38 = vcombine.low %v4139_v19, %v11434_v13  ;;  %v3669_v24 = vshrl.u32 %v3605_v23, 16  ;;  %v8233_v3 = vld [vmem:[%s9503_s28 + $0x54] sm:$0x8] }
 0x1b3   : > { %v3481_v8 = vsel %vm3473_vm13, %v3416_v31, %v11428_v35  ;;  %v3675_v28 = vshll.u32 %v3607_v26, 16  ;;  %v4901_v50 = vsel %vm4886_vm7, %v4899_v41, %v4900_v62  ;;  %v3683_v43 = vrot.slane %v3681_v61, 1  ;;  %v3060_v22 = vpop.permute.xlu1 %3059  ;;  %v11539_v41 = vld [vmem:[%s9503_s28 + $0x70] sm:$0xf] }
 0x1b4   : > { %v3546_v4 = vsel %vm3538_vm14, %v3481_v8, %v2852_v54  ;;  %v4578_v9 = vor.u32 %v4577_v30, %v4574_v47  ;;  %v4586_v40 = vor.u32 %v4585_v60, %v4582_v46  ;;  %v3674_v32 = vor.u32 %v3673_v55, %v3669_v24  ;;  %v11543_v46 = vld [vmem:[%s9503_s28 + $0x74] ss:$0 sps:$4 sm:$0x77]   ;;  %v14365_v55 = vld [vmem:[#allocation55_spill] sm:$0xff]  ;;  %v9104_v8 = vld [vmem:[%s9503_s28 + $0x60] sm:$0xff]  }
 0x1b5   : > { %6173 = vrot.lane.b32.xlu1 %v6130_v0, %s9443_s18  ;;  %4766 = vrot.lane.b32.xlu0 %v4570_v49, %s9436_s29  ;;  %v3677_v33 = vrot.slane %v3675_v28, 1  ;;  %v3611_v13 = vsel %vm3603_vm15, %v3546_v4, %v3060_v22  ;;  %v11515_v27 = vpop.permute.xlu0 %4935  ;;  %v4903_v35 = vrot.slane %v9103_v2, 3  ;;  %v3679_v23 = vshrl.u32 %v3609_v39, 16  ;;  %v14364_v39 = vld [vmem:[#allocation48_spill] sm:$0xff]  ;;  %v14366_v2 = vld [vmem:[#allocation54_spill] sm:$0xff] }
 0x1b6   : > { %v3685_v25 = vshll.u32 %v3611_v13, 16  ;;  %v4902_v42 = vrot.slane %v8399_v38, 3  ;;  %v5148_v54 = vshrl.u32 %v14362_v1, 16  ;;  %v14363_v37 = vrot.slane %v11317_v44, 1  ;;  %v9105_v28 = vld [vmem:[%s9503_s28 + $0x54] sm:$0xff]  }
 0x1b7   : > { %v3678_v34 = vsel %vm3668_vm2, %v3674_v32, %v3677_v33  ;;  %v5151_v11 = vshll.u32 %v14362_v1, 16  ;;  %v5156_v63 = vshrl.u32 %v14364_v39, 16  ;;  %v5159_v0 = vshll.u32 %v14364_v39, 16  ;;  %v11530_v49 = vpop.permute.xlu1 %5047  ;;  %v9372_v22 = vld [vmem:[%s9503_s28 + $0x58] sm:$0xf] }
 0x1b8   : > { %v3684_v18 = vor.u32 %v3683_v43, %v3679_v23  ;;  %8695 = vmatprep.mubr.msk.bf16.mxu1 %vm3849_vm3, %v3678_v34  ;;  %v4587_v44 = vsel %vm4485_vm4, %v4578_v9, %v4586_v40  ;;  %v4904_v12 = vsel %vm4886_vm7, %v4902_v42, %v4903_v35  ;;  %v8062_v47 = vcombine.low %v7758_v20, %v11539_v41  ;;  %v11579_v20 = vld [vmem:[%s9503_s28 + $0x7c] sm:$0xf]  ;;  %v11583_v39 = vld [vmem:[%s9503_s28 + $0x80] ss:$0 sps:$4 sm:$0x77]  }
 0x1b9   : > { %3071 = vrot.lane.b32.xlu1 %v3018_v45, %s9443_s18  ;;  %2867 = vrot.lane.b32.xlu0 %v14363_v37, %s9442_s13  ;;  %v3687_v45 = vrot.slane %v3685_v25, 1  ;;  %v11533_v62 = vpop.permute.xlu0 %4937  ;;  %v5150_v19 = vrot.slane %v5148_v54, 1  ;;  %v5153_v57 = vrot.slane %v5151_v11, 2  ;;  %v5158_v61 = vrot.slane %v5156_v63, 1  ;;  %v7760_v25 = vld [vmem:[%s9503_s28 + $0x78] sm:$0xc] }
 0x1ba   : > { %v5161_v30 = vrot.slane %v5159_v0, 2  ;;  %v5165_v7 = vshrl.u32 %v14365_v55, 16  ;;  %v5168_v10 = vshll.u32 %v14365_v55, 16  ;;  %v5173_v31 = vshrl.u32 %v14366_v2, 16  ;;  %v8234_v63 = vld [vmem:[%s9503_s28 + $0x60] sm:$0x8] }
 0x1bb   : > { %v3688_v5 = vsel %vm3668_vm2, %v3684_v18, %v3687_v45  ;;  %v11547_v60 = vpop.permute.xlu1 %5351  ;;  %v5176_v26 = vshll.u32 %v14366_v2, 16  ;;  %v14131_v24 = vrot.slane %v11543_v46, 2  ;;  %v5154_v43 = vor.u32 %v5153_v57, %v5150_v19  ;;  %v7796_v18 = vld [vmem:[%s9503_s28 + $0x84] sm:$0xf]  ;;  %v11593_v45 = vld [vmem:[%s9503_s28 + $0x88] sm:$0xf] }
 0x1bc   : > { %8696 = vmatmul.mubr.msk.bf16.vlgmr.msra.gmra.mrb[0].mxu1 %vm3849_vm3, %v3688_v5  ;;  %v5162_v4 = vor.u32 %v5161_v30, %v5158_v61  ;;  %v8441_v9 = vcombine.low %v8233_v3, %v9372_v22  ;;  %v5167_v32 = vrot.slane %v5165_v7, 1  ;;  %v5170_v33 = vrot.slane %v5168_v10, 2  ;;  %v8285_v30 = vld [vmem:[%s9503_s28 + $0x78] sm:$0xe]  ;;  %v7608_v3 = vld [vmem:[%s9503_s28 + $0x24] sm:$0xf] }
 0x1bd   : > { %4943 = vrot.lane.b32.xlu1 %v4901_v50, %s9437_s30  ;;  %4768 = vrot.lane.b32.xlu0 %v4587_v44, %s9436_s29  ;;  %v11554_v38 = vpop.permute.xlu0 %5049  ;;  %v2415_v50 = vrot.slane %v8062_v47, 2  ;;  %v5175_v13 = vrot.slane %v5173_v31, 1  ;;  %v5178_v35 = vrot.slane %v5176_v26, 2  ;;  %v5444_v42 = vrot.slane %v11021_v15, 3  ;;  %v9374_v44 = vld [vmem:[%s9503_s28 + $0x64] sm:$0xf] }
 0x1be   : > { %v5163_v54 = vsel %vm4485_vm4, %v5154_v43, %v5162_v4  ;;  %v5171_v37 = vor.u32 %v5170_v33, %v5167_v32  ;;  %v8064_v11 = vcombine.low %v7760_v25, %v11579_v20  ;;  %v8442_v5 = vcombine.low %v8234_v63, %v9374_v44  ;;  %v7611_v55 = vld [vmem:[%s9503_s28 + $0x30] sm:$0xf]  ;;  %v8253_v10 = vld [vmem:[%s9503_s28 + $0x78] sm:$0xf]  ;;  %v11610_v2 = vld [vmem:[%s9503_s28 + $0x7c] sm:$0xf] }
 0x1bf   : > { %v11564_v40 = vpop.permute.xlu1 %5479  ;;  %v2417_v36 = vsel %vm1788_vm1, %v2415_v50, %v14131_v24  ;;  %v5179_v34 = vor.u32 %v5178_v35, %v5175_v13  ;;  %v14130_v57 = vrot.slane %v11583_v39, 2  ;;  %v8094_v7 = vcombine.low %v7796_v18, %v11593_v45  ;;  %v7838_v43 = vld [vmem:[%s9503_s28 + $0x84] sm:$0xe]  ;;  %v9121_v4 = vld [vmem:[%s9503_s28 + $0x80] ss:$0 sps:$4 sm:$0x33]  }
 0x1c0   : > { %v2418_v19 = vrot.slane %v8064_v11, 2  ;;  %v5446_v31 = vrot.slane %v8442_v5, 3  ;;  %v5447_v26 = vrot.slane %v11108_v58, 3  ;;  %v8477_v50 = vcombine.low %v8285_v30, %v11610_v2  ;;  %v8901_v22 = vld [vmem:[%s9503_s28 + $0x2c] ss:$0 sps:$4 sm:$0x11]  }
 0x1c1   : > { %4945 = vrot.lane.b32.xlu1 %v4904_v12, %s9437_s30  ;;  %3075 = vrot.lane.b32.xlu0 %v3021_v48, %s9443_s18  ;;  %v11566_v23 = vpop.permute.xlu0 %5353  ;;  %v5443_v48 = vrot.slane %v8441_v9, 3  ;;  %v5180_v47 = vsel %vm4485_vm4, %v5171_v37, %v5179_v34  ;;  %v8905_v9 = vld [vmem:[%s9503_s28 + $0x38] ss:$0 sps:$4 sm:$0x11]   ;;  %v9375_v33 = vld [vmem:[%s9503_s28 + $0x28] sm:$0xf]  ;;  %v8457_v35 = vcombine.low %v8253_v10, %v11610_v2  ;;  %v8126_v34 = vcombine.low %v7838_v43, %v11593_v45 }
 0x1c2   : > { %v7894_v58 = vcombine.low %v7608_v3, %v9375_v33  ;;  %v4065_v13 = vld [vmem:[%s9503_s28] sm:$0xf]  ;;  %v7799_v25 = vld [vmem:[%s9503_s28 + $0x90] sm:$0xf]  ;;  %v11635_v37 = vld [vmem:[%s9503_s28 + $0x94] sm:$0xf] }
 0x1c3   : > { %v11575_v1 = vpop.permute.xlu1 %5481  ;;  %v5445_v15 = vsel %vm4886_vm7, %v5443_v48, %v5444_v42  ;;  %v9376_v48 = vld [vmem:[%s9503_s28 + $0x34] sm:$0xf]  ;;  %v11639_v11 = vld [vmem:[%s9503_s28 + $0x8c] ss:$0 sps:$4 sm:$0x33]   ;;  %v5788_v18 = vshrl.u32 %v8477_v50, 16 }
 0x1c4   : > { %v7896_v42 = vcombine.low %v7611_v55, %v9376_v48  ;;  %v5791_v44 = vshll.u32 %v8477_v50, 16  ;;  %v5796_v5 = vshrl.u32 %v9121_v4, 16  ;;  %v14367_v3 = vld [vmem:[#allocation4_spill] sm:$0xff]  ;;  %v9128_v43 = vld [vmem:[%s9503_s28 + $0x8c] ss:$0 sps:$4 sm:$0x33]  }
 0x1c5   : > { %5057 = vrot.lane.b32.xlu1 %v9104_v8, %s9438_s7  ;;  %5055 = vrot.lane.b32.xlu0 %v9105_v28, %s9438_s7  ;;  %v11586_v0 = vpop.permute.xlu0 %2645  ;;  %v2420_v28 = vsel %vm1788_vm1, %v2418_v19, %v14130_v57  ;;  %v3134_v55 = vsel %vm845_vm6, %v8901_v22, %v14367_v3  ;;  %v7840_v50 = vld [vmem:[%s9503_s28 + $0x90] sm:$0xe]  ;;  %v9377_v48 = vld [vmem:[%s9503_s28 + $0x4] sm:$0xf]  ;;  %v2815_v3 = vrot.slane %v8126_v34, 1 }
 0x1c6   : > { %v8255_v22 = vld [vmem:[%s9503_s28 + $0x84] sm:$0xf]  ;;  %v11676_v34 = vld [vmem:[%s9503_s28 + $0x98] ss:$0 sps:$4 sm:$0x33]  }
 0x1c7   : > { %v11596_v12 = vpop.permute.xlu1 %2649  ;;  %v14371_v24 = vld [vmem:[#allocation38_spill] sm:$0xff] }
 0x1c9   : > { %2469 = vrot.lane.b32.xlu1 %v2417_v36, %s9440_s9  ;;  %5359 = vrot.lane.b32.xlu0 %v5163_v54, %s9439_s8  ;;  %v11600_v61 = vpop.permute.xlu0 %5591  ;;  %v8287_v36 = vld [vmem:[%s9503_s28 + $0x84] sm:$0xe]  ;;  %v5448_v54 = vsel %vm4886_vm7, %v5446_v31, %v5447_v26  ;;  %v14369_v31 = vld [vmem:[#allocation7_spill] sm:$0xff] }
 0x1ca   : > { %v3131_v26 = vsel %vm845_vm6, %v7894_v58, %v14369_v31  ;;  %v5793_v31 = vrot.slane %v5791_v44, 2 }
 0x1cb   : > { %v11613_v8 = vpop.permute.xlu1 %5593 }
 0x1cd   : > { %5487 = vrot.lane.b32.xlu1 %v5445_v15, %s9440_s9  ;;  %5361 = vrot.lane.b32.xlu0 %v5180_v47, %s9439_s8  ;;  %v11623_v32 = vpop.permute.xlu0 %2853  ;;  %v11644_v15 = vld [vmem:[%s9503_s28 + $0x88] sm:$0xf]  ;;  %v5799_v47 = vshll.u32 %v9121_v4, 16  ;;  %v14370_v4 = vld [vmem:[#allocation9_spill] sm:$0xff] }
 0x1ce   : > { %v8479_v30 = vcombine.low %v8287_v36, %v11644_v15  ;;  %v3137_v33 = vsel %vm845_vm6, %v7896_v42, %v14370_v4  ;;  %v8341_v36 = vcombine.low %v4065_v13, %v9377_v48  ;;  %v3225_v42 = vsel %vm3213_vm9, %v3134_v55, %v14371_v24  ;;  %v14372_v4 = vld [vmem:[#allocation39_spill] sm:$0xff] }
 0x1cf   : > { %v11641_v63 = vpop.permute.xlu1 %2459  ;;  %v5801_v57 = vrot.slane %v5799_v47, 2  ;;  %v3223_v13 = vsel %vm3213_vm9, %v3131_v26, %v14372_v4  ;;  %v5816_v47 = vshll.u32 %v9128_v43, 16  ;;  %v14374_v55 = vld [vmem:[#allocation43_spill] sm:$0xff]  ;;  %v9378_v4 = vld [vmem:[%s9503_s28 + $0x10] sm:$0xf] }
 0x1d0   : > { %v5808_v44 = vshll.u32 %v8479_v30, 16  ;;  %v3227_v26 = vsel %vm3213_vm9, %v3137_v33, %v14374_v55  ;;  %v7870_v55 = vld [vmem:[%s9503_s28 + $0x84] sm:$0xc] }
 0x1d1   : > { %2661 = vrot.lane.b32.xlu1 %v8094_v7, %s9441_s12  ;;  %2473 = vrot.lane.b32.xlu0 %v2420_v28, %s9440_s9  ;;  %v11646_v19 = vpop.permute.xlu0 %5991  ;;  %v14368_v7 = vld [vmem:[#allocation6_spill] sm:$0xff]  ;;  %v8096_v28 = vcombine.low %v7799_v25, %v11635_v37  ;;  %v5798_v25 = vrot.slane %v5796_v5, 1  ;;  %v5813_v5 = vshrl.u32 %v9128_v43, 16 }
 0x1d2   : > { %v3140_v10 = vsel %vm845_vm6, %v8905_v9, %v14368_v7  ;;  %v4067_v7 = vld [vmem:[%s9503_s28 + $0xc] sm:$0xf]  ;;  %v5805_v9 = vshrl.u32 %v8479_v30, 16 }
 0x1d3   : > { %v11666_v58 = vpop.permute.xlu1 %2857  ;;  %v11682_v24 = vsel %vm3213_vm9, %v3140_v10, %v14373_v51  ;;  %v8342_v14 = vcombine.low %v4067_v7, %v9378_v4  ;;  %v14376_v51 = vrot.slane %v11639_v11, 1  ;;  %v5802_v33 = vor.u32 %v5801_v57, %v5798_v25 }
 0x1d4   : > { %v2819_v4 = vrot.slane %v11676_v34, 1  ;;  %v5818_v57 = vrot.slane %v5816_v47, 2  ;;  %v11727_v47 = vld [vmem:[%s9503_s28 + $0x4c] sm:$0xf] }
 0x1d5   : > { %5599 = vrot.lane.b32.xlu1 %v8457_v35, %s9441_s12  ;;  %5489 = vrot.lane.b32.xlu0 %v5448_v54, %s9440_s9  ;;  %v5790_v35 = vrot.slane %v5788_v18, 1  ;;  %v11672_v48 = vpop.permute.xlu0 %2647  ;;  %v8128_v54 = vcombine.low %v7840_v50, %v11635_v37  ;;  %v8458_v18 = vcombine.low %v8255_v22, %v11644_v15  ;;  %v6201_v50 = vsel %vm845_vm6, %v8341_v36, %v11483_v16 }
 0x1d6   : > { %v6248_v30 = vsel %vm3213_vm9, %v6201_v50, %v11515_v27  ;;  %v2817_v10 = vsel %vm1579_vm0, %v2815_v3, %v14376_v51  ;;  %v5810_v3 = vrot.slane %v5808_v44, 2  ;;  %v14378_v50 = vld [vmem:[#allocation101_spill] sm:$0xff] }
 0x1d7   : > { %v11694_v43 = vpop.permute.xlu1 %5993  ;;  %v5794_v22 = vor.u32 %v5793_v31, %v5790_v35  ;;  %v6280_v16 = vsel %vm3278_vm10, %v6248_v30, %v11530_v49  ;;  %v2818_v7 = vrot.slane %v8128_v54, 1  ;;  %v5815_v35 = vrot.slane %v5813_v5, 1  ;;  %v14377_v31 = vld [vmem:[#allocation100_spill] sm:$0xff] }
 0x1d8   : > { %v6312_v27 = vsel %vm3343_vm11, %v6280_v16, %v11547_v60  ;;  %v3290_v25 = vsel %vm3278_vm10, %v3225_v42, %v14377_v31  ;;  %v3288_v49 = vsel %vm3278_vm10, %v3223_v13, %v14378_v50  ;;  %v8158_v60 = vcombine.low %v7870_v55, %v11593_v45  ;;  %v4109_v45 = vld [vmem:[%s9503_s28 + $0x48] sm:$0xe]  ;;  %v7872_v16 = vld [vmem:[%s9503_s28 + $0x90] sm:$0xc] }
 0x1d9   : > { %2665 = vrot.lane.b32.xlu1 %v8096_v28, %s9441_s12  ;;  %v14375_v28 = vrot.slane %v11543_v46, 2  ;;  %v3062_v36 = vpop.permute.xlu0 %3061  ;;  %v6344_v54 = vsel %vm3408_vm12, %v6312_v27, %v11564_v40  ;;  %v3353_v42 = vsel %vm3343_vm11, %v3288_v49, %v10896_v53  ;;  %v5803_v40 = vsel %vm4485_vm4, %v5794_v22, %v5802_v33  ;;  %v11741_v22 = vld [vmem:[%s9503_s28 + $0x80] ss:$0 sps:$4 sm:$0x77]  }
 0x1da   : > { %v6376_v13 = vsel %vm3473_vm13, %v6344_v54, %v11600_v61  ;;  %v3355_v30 = vsel %vm3343_vm11, %v3290_v25, %v10890_v6  ;;  %v2820_v51 = vsel %vm1579_vm0, %v2818_v7, %v2819_v4  ;;  %v6204_v33 = vsel %vm845_vm6, %v8342_v14, %v11498_v21  ;;  %v9140_v27 = vld [vmem:[%s9503_s28 + $0x50] ss:$0 sps:$4 sm:$0x33]   ;;  %v9125_v14 = vld [vmem:[%s9503_s28 + $0x8c] ss:$0 sps:$4 sm:$0x11]  }
 0x1db   : > { %2471 = vrot.lane.b32.xlu0 %v14375_v28, %s9440_s9  ;;  %v5807_v28 = vrot.slane %v5805_v9, 1  ;;  %v11715_v9 = vld [vmem:[%s9503_s28 + $0x8c] ss:$0 sps:$4 sm:$0x77]   ;;  %v11723_v5 = vpop.permute.xlu1 %2651  ;;  %v6408_v53 = vsel %vm3538_vm14, %v6376_v13, %v11646_v19  ;;  %v5819_v19 = vor.u32 %v5818_v57, %v5815_v35  ;;  %v6250_v31 = vsel %vm3213_vm9, %v6204_v33, %v11533_v62 }
 0x1dc   : > { %v3023_v21 = vrot.slane %v8158_v60, 2  ;;  %v8369_v25 = vcombine.low %v4109_v45, %v11727_v47  ;;  %v3024_v62 = vrot.slane %v11715_v9, 2  ;;  %v11774_v60 = vld [vmem:[%s9503_s28 + $0x98] ss:$0 sps:$4 sm:$0x77]  }
 0x1dd   : > { %5601 = vrot.lane.b32.xlu1 %v8458_v18, %s9441_s12  ;;  %v14379_v18 = vld [vmem:[#allocation103_spill] sm:$0xff]  ;;  %v6168_v61 = vpop.permute.xlu0 %6167  ;;  %v5811_v55 = vor.u32 %v5810_v3, %v5807_v28  ;;  %v6282_v28 = vsel %vm3278_vm10, %v6250_v31, %v11554_v38  ;;  %v8160_v38 = vcombine.low %v7872_v16, %v11635_v37 }
 0x1de   : > { %v3292_v44 = vsel %vm3278_vm10, %v3227_v26, %v14379_v18  ;;  %v3418_v26 = vsel %vm3408_vm12, %v3353_v42, %v11321_v52  ;;  %v6440_v6 = vsel %vm3603_vm15, %v6408_v53, %v6168_v61  ;;  %v14380_v52 = vrot.slane %v11583_v39, 2  ;;  %v4111_v53 = vld [vmem:[%s9503_s28 + $0x54] sm:$0xe]  ;;  %v9138_v33 = vld [vmem:[%s9503_s28 + $0x8c] ss:$0 sps:$4 sm:$0x77]  }
 0x1df   : > { %2869 = vrot.lane.b32.xlu0 %v2817_v10, %s9442_s13  ;;  %v8317_v10 = vld [vmem:[%s9503_s28 + $0x78] sm:$0x8]  ;;  %v3483_v7 = vsel %vm3473_vm13, %v3418_v26, %v11586_v0  ;;  %8733 = vmatprep.mubr.msk.bf16.mxu0 %vm3849_vm3, %v6440_v6  ;;  %v3066_v35 = vpop.permute.xlu1 %3065  ;;  %v3357_v57 = vsel %vm3343_vm11, %v3292_v44, %v10917_v56  ;;  %v6314_v50 = vsel %vm3343_vm11, %v6282_v28, %v11566_v23  ;;  %v6132_v56 = vrot.slane %v11741_v22, 3 }
 0x1e0   : > { %v3548_v3 = vsel %vm3538_vm14, %v3483_v7, %v11623_v32  ;;  %v8509_v0 = vcombine.low %v8317_v10, %v11610_v2  ;;  %v6346_v32 = vsel %vm3408_vm12, %v6314_v50, %v11575_v1  ;;  %v4597_v2 = vshrl.u32 %v9140_v27, 16  ;;  %v11792_v26 = vld [vmem:[%s9503_s28 + $0x58] sm:$0xf] }
 0x1e1   : > { %2475 = vrot.lane.b32.xlu1 %v14380_v52, %s9440_s9  ;;  %v11770_v49 = vsel %vm3603_vm15, %v3548_v3, %v3062_v36  ;;  %v2856_v54 = vpop.permute.xlu0 %2855  ;;  %v4600_v18 = vshll.u32 %v9140_v27, 16  ;;  %v6378_v23 = vsel %vm3473_vm13, %v6346_v32, %v11613_v8  ;;  %v5820_v37 = vsel %vm4485_vm4, %v5811_v55, %v5819_v19  ;;  %v8319_v36 = vld [vmem:[%s9503_s28 + $0x84] sm:$0x8]  ;;  %v9131_v52 = vld [vmem:[%s9503_s28 + $0x98] ss:$0 sps:$4 sm:$0x11]  }
 0x1e2   : > { %v4589_v44 = vshrl.u32 %v8369_v25, 16  ;;  %v4592_v42 = vshll.u32 %v8369_v25, 16  ;;  %v6410_v1 = vsel %vm3538_vm14, %v6378_v23, %v11694_v43  ;;  %v3691_v13 = vshll.u32 %v11770_v49, 16  ;;  %v9144_v25 = vld [vmem:[%s9503_s28 + $0x5c] ss:$0 sps:$4 sm:$0x33]  }
 0x1e3   : > { %5999 = vrot.lane.b32.xlu0 %v5803_v40, %s9442_s13  ;;  %v6170_v40 = vpop.permute.xlu1 %6169  ;;  %v3025_v45 = vsel %vm1788_vm1, %v3023_v21, %v3024_v62  ;;  %v6131_v8 = vrot.slane %v8509_v0, 3  ;;  %v3420_v61 = vsel %vm3408_vm12, %v3355_v30, %v11314_v29  ;;  %v3026_v43 = vrot.slane %v8160_v38, 2 }
 0x1e4   : > { %v3027_v22 = vrot.slane %v11774_v60, 2  ;;  %v3422_v6 = vsel %vm3408_vm12, %v3357_v57, %v11341_v17  ;;  %v8511_v55 = vcombine.low %v8319_v36, %v11644_v15  ;;  %v4599_v29 = vrot.slane %v4597_v2, 1  ;;  %v7764_v60 = vld [vmem:[%s9503_s28 + $0x90] sm:$0xc] }
 0x1e5   : > { %2873 = vrot.lane.b32.xlu1 %v2820_v51, %s9442_s13  ;;  %v6442_v51 = vsel %vm3603_vm15, %v6410_v1, %v6170_v40  ;;  %v11798_v10 = vpop.permute.xlu0 %4762  ;;  %v4602_v30 = vrot.slane %v4600_v18, 2  ;;  %v3485_v19 = vsel %vm3473_vm13, %v3420_v61, %v11672_v48  ;;  %v4591_v16 = vrot.slane %v4589_v44, 1 }
 0x1e6   : > { %8734 = vmatmul.mubr.msk.bf16.vlgmr.msra.gmra.mrb[32].mxu0 %vm3849_vm3, %v6442_v51  ;;  %v4594_v27 = vrot.slane %v4592_v42, 2  ;;  %v8371_v31 = vcombine.low %v4111_v53, %v11792_v26  ;;  %v3487_v17 = vsel %vm3473_vm13, %v3422_v6, %v11596_v12  ;;  %v3693_v7 = vrot.slane %v3691_v13, 1  ;;  %v9142_v53 = vld [vmem:[%s9503_s28 + $0x50] ss:$0 sps:$4 sm:$0x77]  }
 0x1e7   : > { %2663 = vrot.lane.b32.xlu0 %v9125_v14, %s9441_s12  ;;  %v3550_v14 = vsel %vm3538_vm14, %v3485_v19, %v2856_v54  ;;  %v6133_v15 = vsel %vm4886_vm7, %v6131_v8, %v6132_v56  ;;  %v3552_v48 = vsel %vm3538_vm14, %v3487_v17, %v11666_v58  ;;  %v3028_v0 = vsel %vm1788_vm1, %v3026_v43, %v3027_v22  ;;  %v4141_v56 = vld [vmem:[%s9503_s28 + $0x48] sm:$0x8]  ;;  %v9146_v17 = vld [vmem:[%s9503_s28 + $0x5c] ss:$0 sps:$4 sm:$0x77]  }
 0x1e8   : > { %v6135_v57 = vrot.slane %v9138_v33, 3  ;;  %v3689_v12 = vshrl.u32 %v11770_v49, 16  ;;  %v3617_v50 = vsel %vm3603_vm15, %v3552_v48, %v3066_v35  ;;  %v6134_v38 = vrot.slane %v8511_v55, 3  ;;  %v14381_v35 = vld [vmem:[#allocation102_spill] sm:$0xff]  ;;  %v4143_v33 = vld [vmem:[%s9503_s28 + $0x54] sm:$0x8] }
 0x1e9   : > { %6001 = vrot.lane.b32.xlu1 %v5820_v37, %s9442_s13  ;;  %v3064_v21 = vpop.permute.xlu1 %3063  ;;  %v4595_v32 = vor.u32 %v4594_v27, %v4591_v16  ;;  %v4603_v58 = vor.u32 %v4602_v30, %v4599_v29  ;;  %v4606_v2 = vshrl.u32 %v8371_v31, 16  ;;  %v4609_v18 = vshll.u32 %v8371_v31, 16 }
 0x1ea   : > { %v3615_v28 = vsel %vm3603_vm15, %v3550_v14, %v3064_v21  ;;  %v2860_v3 = vpop.permute.xlu0 %2859  ;;  %v3694_v23 = vor.u32 %v3693_v7, %v3689_v12  ;;  %v4614_v44 = vshrl.u32 %v9144_v25, 16  ;;  %v4617_v49 = vshll.u32 %v9144_v25, 16  ;;  %v7762_v12 = vld [vmem:[%s9503_s28 + $0x84] sm:$0xc] }
 0x1eb   : > { %3077 = vrot.lane.b32.xlu0 %v3025_v45, %s9443_s18  ;;  %v3695_v54 = vshll.u32 %v3615_v28, 16  ;;  %v3294_v42 = vsel %vm3278_vm10, %v11682_v24, %v14381_v35  ;;  %v3701_v1 = vshll.u32 %v3617_v50, 16  ;;  %v8401_v8 = vcombine.low %v4141_v56, %v11727_v47  ;;  %v14385_v35 = vld [vmem:[#allocation63_spill] sm:$0xff] }
 0x1ec   : > { %v3359_v40 = vsel %vm3343_vm11, %v3294_v42, %v10912_v59  ;;  %v14382_v51 = vrot.slane %v11639_v11, 1  ;;  %v6136_v24 = vsel %vm4886_vm7, %v6134_v38, %v6135_v57  ;;  %v4604_v59 = vsel %vm4485_vm4, %v4595_v32, %v4603_v58  ;;  %v14384_v32 = vld [vmem:[#allocation57_spill] sm:$0xff] }
 0x1ed   : > { %2667 = vrot.lane.b32.xlu1 %v9131_v52, %s9441_s12  ;;  %v3697_v37 = vrot.slane %v3695_v54, 1  ;;  %v11828_v36 = vpop.permute.xlu1 %4939  ;;  %v3424_v61 = vsel %vm3408_vm12, %v3359_v40, %v11641_v63  ;;  %v4608_v43 = vrot.slane %v4606_v2, 1  ;;  %v4611_v52 = vrot.slane %v4609_v18, 2  ;;  %v11886_v2 = vld [vmem:[%s9503_s28 + $0x88] sm:$0xf] }
 0x1ee   : > { %v11833_v13 = vpop.permute.xlu0 %4764  ;;  %v3489_v47 = vsel %vm3473_vm13, %v3424_v61, %v11723_v5  ;;  %v4616_v63 = vrot.slane %v4614_v44, 1  ;;  %v4619_v55 = vrot.slane %v4617_v49, 2  ;;  %v3703_v29 = vrot.slane %v3701_v1, 1 }
 0x1ef   : > { %6175 = vrot.lane.b32.xlu0 %v6133_v15, %s9443_s18  ;;  %v3698_v45 = vsel %vm3668_vm2, %v3694_v23, %v3697_v37  ;;  %v3554_v11 = vsel %vm3538_vm14, %v3489_v47, %v2860_v3  ;;  %v4905_v16 = vrot.slane %v8401_v8, 3  ;;  %v4906_v27 = vrot.slane %v9142_v53, 3  ;;  %v11890_v23 = vld [vmem:[%s9503_s28 + $0x8c] ss:$0 sps:$4 sm:$0x77]   ;;  %v14386_v53 = vld [vmem:[#allocation61_spill] sm:$0xff] }
 0x1f0   : > { %8699 = vmatprep.mubr.msk.bf16.mxu1 %vm3849_vm3, %v3698_v45  ;;  %v8403_v31 = vcombine.low %v4143_v33, %v11792_v26  ;;  %v3699_v5 = vshrl.u32 %v3617_v50, 16  ;;  %v4612_v21 = vor.u32 %v4611_v52, %v4608_v43  ;;  %v4620_v15 = vor.u32 %v4619_v55, %v4616_v63  ;;  %v14383_v50 = vld [vmem:[#allocation59_spill] sm:$0xff] }
 0x1f1   : > { %3081 = vrot.lane.b32.xlu1 %v3028_v0, %s9443_s18  ;;  %v11852_v6 = vpop.permute.xlu1 %4941  ;;  %v4907_v26 = vsel %vm4886_vm7, %v4905_v16, %v4906_v27  ;;  %v4909_v0 = vrot.slane %v9146_v17, 3  ;;  %v5182_v54 = vshrl.u32 %v14383_v50, 16  ;;  %v5185_v38 = vshll.u32 %v14383_v50, 16  ;;  %v8235_v45 = vld [vmem:[%s9503_s28 + $0x6c] sm:$0x8] }
 0x1f2   : > { %v3704_v25 = vor.u32 %v3703_v29, %v3699_v5  ;;  %v4908_v3 = vrot.slane %v8403_v31, 3  ;;  %v5190_v9 = vshrl.u32 %v14384_v32, 16  ;;  %v4621_v58 = vsel %vm4485_vm4, %v4612_v21, %v4620_v15  ;;  %v9148_v33 = vld [vmem:[%s9503_s28 + $0x6c] sm:$0xff]   ;;  %v11925_v15 = vld [vmem:[%s9503_s28 + $0x94] sm:$0xf] }
 0x1f3   : > { %2871 = vrot.lane.b32.xlu0 %v14382_v51, %s9442_s13  ;;  %v3068_v30 = vpop.permute.xlu0 %3067  ;;  %v5193_v34 = vshll.u32 %v14384_v32, 16  ;;  %v8066_v18 = vcombine.low %v7762_v12, %v11886_v2  ;;  %v5184_v37 = vrot.slane %v5182_v54, 1  ;;  %v5187_v44 = vrot.slane %v5185_v38, 2  ;;  %v8289_v32 = vld [vmem:[%s9503_s28 + $0x90] sm:$0xe] }
 0x1f4   : > { %v3619_v19 = vsel %vm3603_vm15, %v3554_v11, %v3068_v30  ;;  %v5192_v49 = vrot.slane %v5190_v9, 1  ;;  %v5199_v42 = vshrl.u32 %v14385_v35, 16  ;;  %v5202_v8 = vshll.u32 %v14385_v35, 16 }
 0x1f5   : > { %6177 = vrot.lane.b32.xlu1 %v6136_v24, %s9443_s18  ;;  %v3705_v7 = vshll.u32 %v3619_v19, 16  ;;  %v11860_v14 = vpop.permute.xlu1 %5053  ;;  %v5195_v40 = vrot.slane %v5193_v34, 2  ;;  %v5207_v61 = vshrl.u32 %v14386_v53, 16  ;;  %v5210_v51 = vshll.u32 %v14386_v53, 16  ;;  %v7614_v34 = vld [vmem:[%s9503_s28 + $0x3c] sm:$0xf] }
 0x1f6   : > { %v2421_v43 = vrot.slane %v8066_v18, 2  ;;  %v2422_v47 = vrot.slane %v11890_v23, 2  ;;  %v5188_v52 = vor.u32 %v5187_v44, %v5184_v37  ;;  %v8443_v63 = vcombine.low %v8235_v45, %v11539_v41  ;;  %v11953_v18 = vld [vmem:[%s9503_s28 + $0x94] sm:$0xf]  ;;  %v7617_v37 = vld [vmem:[%s9503_s28 + $0x48] sm:$0xf] }
 0x1f7   : > { %4770 = vrot.lane.b32.xlu0 %v4604_v59, %s9436_s29  ;;  %v3707_v48 = vrot.slane %v3705_v7, 1  ;;  %v11862_v28 = vpop.permute.xlu0 %5051  ;;  %v9147_v59 = vld [vmem:[%s9503_s28 + $0x78] sm:$0xff]   ;;  %v5201_v55 = vrot.slane %v5199_v42, 1  ;;  %v5196_v11 = vor.u32 %v5195_v40, %v5192_v49  ;;  %v5204_v30 = vrot.slane %v5202_v8, 2  ;;  %v8257_v44 = vld [vmem:[%s9503_s28 + $0x90] sm:$0xf] }
 0x1f8   : > { %v5209_v19 = vrot.slane %v5207_v61, 1  ;;  %v5212_v16 = vrot.slane %v5210_v51, 2  ;;  %v2423_v41 = vsel %vm1788_vm1, %v2421_v43, %v2422_v47  ;;  %v5450_v31 = vrot.slane %v11543_v46, 3  ;;  %v7842_v49 = vld [vmem:[%s9503_s28 + $0x9c] sm:$0xe] }
 0x1f9   : > { %3079 = vrot.lane.b32.xlu1 %v3024_v62, %s9443_s18  ;;  %v3708_v57 = vsel %vm3668_vm2, %v3704_v25, %v3707_v48  ;;  %v11877_v62 = vpop.permute.xlu1 %2461  ;;  %v5197_v5 = vsel %vm4485_vm4, %v5188_v52, %v5196_v11  ;;  %v5205_v7 = vor.u32 %v5204_v30, %v5201_v55  ;;  %v8068_v25 = vcombine.low %v7764_v60, %v11925_v15  ;;  %v11929_v48 = vld [vmem:[%s9503_s28 + $0x98] ss:$0 sps:$4 sm:$0x77]   ;;  %v8913_v53 = vld [vmem:[%s9503_s28 + $0x44] ss:$0 sps:$4 sm:$0x11]  }
 0x1fa   : > { %8700 = vmatmul.mubr.msk.bf16.gmra.mrb[4].mxu1 %vm3849_vm3, %v3708_v57  ;;  %v5213_v21 = vor.u32 %v5212_v16, %v5209_v19  ;;  %v11939_v57 = vld [vmem:[%s9503_s28 + $0xa0] sm:$0xf]  ;;  %v2425_v38 = vrot.slane %v11929_v48, 2  ;;  %v5453_v45 = vrot.slane %v11583_v39, 3  ;;  %v8459_v55 = vcombine.low %v8257_v44, %v11953_v18  ;;  %v7805_v11 = vld [vmem:[%s9503_s28 + $0xa8] sm:$0xf] }
 0x1fb   : > { %2875 = vrot.lane.b32.xlu0 %v2819_v4, %s9442_s13  ;;  %v11881_v56 = vpop.permute.xlu0 %5355  ;;  %v4910_v4 = vsel %vm4886_vm7, %v4908_v3, %v4909_v0  ;;  %v8236_v3 = vld [vmem:[%s9503_s28 + $0x78] sm:$0x8]  ;;  %v7802_v0 = vld [vmem:[%s9503_s28 + $0x9c] sm:$0xf]  ;;  %v2424_v54 = vrot.slane %v8068_v25, 2  ;;  %v8130_v19 = vcombine.low %v7842_v49, %v11939_v57  ;;  %v14387_v25 = vld [vmem:[#allocation10_spill] sm:$0xff] }
 0x1fc   : > { %v5214_v50 = vsel %vm4485_vm4, %v5205_v7, %v5213_v21  ;;  %v8444_v9 = vcombine.low %v8236_v3, %v11579_v20  ;;  %v8481_v20 = vcombine.low %v8289_v32, %v11953_v18  ;;  %v9163_v8 = vld [vmem:[%s9503_s28 + $0x98] ss:$0 sps:$4 sm:$0x33]   ;;  %v8917_v61 = vld [vmem:[%s9503_s28 + $0x50] ss:$0 sps:$4 sm:$0x11]   ;;  %v3146_v3 = vsel %vm845_vm6, %v8913_v53, %v14387_v25 }
 0x1fd   : > { %4947 = vrot.lane.b32.xlu1 %v4907_v26, %s9437_s30  ;;  %v11894_v1 = vpop.permute.xlu1 %5483  ;;  %v2426_v42 = vsel %vm1788_vm1, %v2424_v54, %v2425_v38  ;;  %v8291_v30 = vld [vmem:[%s9503_s28 + $0x9c] sm:$0xe]  ;;  %v11980_v39 = vld [vmem:[%s9503_s28 + $0xac] sm:$0xf]  ;;  %v5830_v7 = vshrl.u32 %v9163_v8, 16  ;;  %v5833_v21 = vshll.u32 %v9163_v8, 16 }
 0x1fe   : > { %v5452_v40 = vrot.slane %v8444_v9, 3  ;;  %v11984_v16 = vld [vmem:[%s9503_s28 + $0xa4] ss:$0 sps:$4 sm:$0x33]   ;;  %v5822_v60 = vshrl.u32 %v8481_v20, 16  ;;  %v14388_v54 = vld [vmem:[#allocation11_spill] sm:$0xff]  ;;  %v8100_v44 = vcombine.low %v7805_v11, %v11980_v39 }
 0x1ff   : > { %4772 = vrot.lane.b32.xlu0 %v4621_v58, %s9436_s29  ;;  %v11900_v24 = vpop.permute.xlu0 %5357  ;;  %v14389_v9 = vld [vmem:[#allocation12_spill] sm:$0xff]  ;;  %v9168_v49 = vld [vmem:[%s9503_s28 + $0xa4] ss:$0 sps:$4 sm:$0x33]   ;;  %v2821_v53 = vrot.slane %v8130_v19, 1  ;;  %v5835_v11 = vrot.slane %v5833_v21, 2 }
 0x200   : > { %v14394_v21 = vld [vmem:[#allocation51_spill] sm:$0xff] }
 0x201   : > { %4949 = vrot.lane.b32.xlu1 %v4910_v4, %s9437_s30  ;;  %v8098_v4 = vcombine.low %v7802_v0, %v11939_v57  ;;  %v8259_v0 = vld [vmem:[%s9503_s28 + $0x9c] sm:$0xf] }
 0x202   : > { %v11910_v29 = vpop.permute.xlu1 %2653 }
 0x203   : > { %3083 = vrot.lane.b32.xlu0 %v3027_v22, %s9443_s18  ;;  %v11912_v27 = vpop.permute.xlu0 %2465  ;;  %v5449_v22 = vrot.slane %v8443_v63, 3  ;;  %v4069_v63 = vld [vmem:[%s9503_s28 + $0x18] sm:$0xf] }
 0x205   : > { %5061 = vrot.lane.b32.xlu1 %v9147_v59, %s9438_s7  ;;  %v5451_v46 = vsel %vm4886_vm7, %v5449_v22, %v5450_v31  ;;  %v9381_v59 = vld [vmem:[%s9503_s28 + $0x40] sm:$0xf]  ;;  %v5454_v22 = vsel %vm4886_vm7, %v5452_v40, %v5453_v45  ;;  %v9383_v45 = vld [vmem:[%s9503_s28 + $0x1c] sm:$0xf] }
 0x206   : > { %v11921_v17 = vpop.permute.xlu1 %5595  ;;  %v7898_v43 = vcombine.low %v7614_v34, %v9381_v59  ;;  %v11990_v31 = vld [vmem:[%s9503_s28 + $0xa0] sm:$0xf]  ;;  %v3152_v34 = vsel %vm845_vm6, %v8917_v61, %v14389_v9  ;;  %v8343_v8 = vcombine.low %v4069_v63, %v9383_v45  ;;  %v2822_v59 = vrot.slane %v11984_v16, 1  ;;  %v12014_v61 = vld [vmem:[%s9503_s28 + $0xb0] ss:$0 sps:$4 sm:$0x33]  }
 0x207   : > { %5059 = vrot.lane.b32.xlu0 %v9148_v33, %s9438_s7  ;;  %v11931_v26 = vpop.permute.xlu0 %5485  ;;  %v9382_v33 = vld [vmem:[%s9503_s28 + $0x4c] sm:$0xf] }
 0x208   : > { %v7900_v52 = vcombine.low %v7617_v37, %v9382_v33  ;;  %v3143_v32 = vsel %vm845_vm6, %v7898_v43, %v14388_v54  ;;  %v5824_v33 = vrot.slane %v5822_v60, 1  ;;  %v14393_v54 = vld [vmem:[#allocation49_spill] sm:$0xff]  ;;  %v8460_v60 = vcombine.low %v8259_v0, %v11990_v31 }
 0x209   : > { %2477 = vrot.lane.b32.xlu1 %v2423_v41, %s9440_s9  ;;  %v12025_v9 = vsel %vm3213_vm9, %v3152_v34, %v14393_v54  ;;  %v2825_v0 = vrot.slane %v12014_v61, 1  ;;  %v9384_v54 = vld [vmem:[%s9503_s28 + $0x28] sm:$0xf] }
 0x20a   : > { %v11941_v12 = vpop.permute.xlu1 %2657 }
 0x20b   : > { %5363 = vrot.lane.b32.xlu0 %v5197_v5, %s9439_s8  ;;  %v11947_v58 = vpop.permute.xlu0 %2463  ;;  %v5825_v5 = vshll.u32 %v8481_v20, 16  ;;  %v7844_v20 = vld [vmem:[%s9503_s28 + $0xa8] sm:$0xe] }
 0x20c   : > { %v8132_v63 = vcombine.low %v7844_v20, %v11980_v39  ;;  %v4071_v20 = vld [vmem:[%s9503_s28 + $0x24] sm:$0xf] }
 0x20d   : > { %5491 = vrot.lane.b32.xlu1 %v5451_v46, %s9440_s9 }
 0x20e   : > { %v11960_v35 = vpop.permute.xlu1 %5597 }
 0x20f   : > { %5365 = vrot.lane.b32.xlu0 %v5214_v50, %s9439_s8  ;;  %v11969_v51 = vpop.permute.xlu0 %2861  ;;  %v8483_v50 = vcombine.low %v8291_v30, %v11990_v31  ;;  %v14392_v30 = vld [vmem:[#allocation47_spill] sm:$0xff] }
 0x210   : > { %v3231_v25 = vsel %vm3213_vm9, %v3143_v32, %v14392_v30  ;;  %v14395_v32 = vld [vmem:[#allocation104_spill] sm:$0xff] }
 0x211   : > { %2669 = vrot.lane.b32.xlu1 %v8098_v4, %s9441_s12  ;;  %v14390_v4 = vld [vmem:[#allocation13_spill] sm:$0xff]  ;;  %v5842_v19 = vshll.u32 %v8483_v50, 16 }
 0x212   : > { %v3149_v37 = vsel %vm845_vm6, %v7900_v52, %v14390_v4  ;;  %v5827_v52 = vrot.slane %v5825_v5, 2  ;;  %v5847_v5 = vshrl.u32 %v9168_v49, 16 }
 0x213   : > { %2481 = vrot.lane.b32.xlu0 %v2426_v42, %s9440_s9  ;;  %v11986_v41 = vpop.permute.xlu1 %2467  ;;  %v11994_v46 = vpop.permute.xlu0 %5995  ;;  %v14391_v42 = vld [vmem:[#allocation45_spill] sm:$0xff]  ;;  %v3235_v4 = vsel %vm3213_vm9, %v3149_v37, %v14394_v21  ;;  %v2823_v37 = vsel %vm1579_vm0, %v2821_v53, %v2822_v59  ;;  %v12051_v30 = vrot.slane %v5842_v19, 2  ;;  %v8344_v21 = vcombine.low %v4071_v20, %v9384_v54  ;;  %v14399_v19 = vld [vmem:[#allocation127_spill] sm:$0xff] }
 0x214   : > { %v3233_v40 = vsel %vm3213_vm9, %v3146_v3, %v14391_v42  ;;  %v12058_v53 = vrot.slane %v5847_v5, 1  ;;  %v12077_v5 = vld [vmem:[%s9503_s28 + $0xa4] ss:$0 sps:$4 sm:$0x77]  }
 0x215   : > { %5603 = vrot.lane.b32.xlu1 %v8459_v55, %s9441_s12  ;;  %v5832_v55 = vrot.slane %v5830_v7, 1  ;;  %v5850_v7 = vshll.u32 %v9168_v49, 16  ;;  %v3298_v42 = vsel %vm3278_vm10, %v3233_v40, %v14395_v32  ;;  %v5828_v49 = vor.u32 %v5827_v52, %v5824_v33  ;;  %v12063_v52 = vpop.f32.mrb[0].mxu0 }
 0x216   : > { %14396 = vst [vmem:[#allocation2_spill] sm:$0xff] %v12063_v52 }
 0x217   : > { %5493 = vrot.lane.b32.xlu0 %v5454_v22, %s9440_s9  ;;  %v12016_v43 = vpop.permute.xlu1 %2865  ;;  %v12020_v3 = vpop.permute.xlu0 %2655  ;;  %v5839_v22 = vshrl.u32 %v8483_v50, 16  ;;  %v6207_v50 = vsel %vm845_vm6, %v8343_v8, %v11798_v10  ;;  %v5836_v40 = vor.u32 %v5835_v11, %v5832_v55  ;;  %v2824_v8 = vrot.slane %v8132_v63, 1  ;;  %v14397_v55 = vld [vmem:[#allocation105_spill] sm:$0xff]  ;;  %v14398_v63 = vld [vmem:[#allocation107_spill] sm:$0xff] }
 0x218   : > { %v6252_v34 = vsel %vm3213_vm9, %v6207_v50, %v11828_v36  ;;  %v7874_v36 = vld [vmem:[%s9503_s28 + $0x9c] sm:$0xc]  ;;  %v12060_v33 = vrot.slane %v5850_v7, 2  ;;  %v3296_v11 = vsel %vm3278_vm10, %v3231_v25, %v14397_v55  ;;  %v12079_v7 = vpop.f32.mrb[1].mxu0  ;;  %v14401_v50 = vld [vmem:[#allocation128_spill] sm:$0xff]  ;;  %v6210_v55 = vsel %vm845_vm6, %v8344_v21, %v11833_v13 }
 0x219   : > { %2673 = vrot.lane.b32.xlu1 %v8100_v44, %s9441_s12  ;;  %v6284_v10 = vsel %vm3278_vm10, %v6252_v34, %v11862_v28  ;;  %v8321_v28 = vld [vmem:[%s9503_s28 + $0x90] sm:$0x8]  ;;  %14400 = vst [vmem:[#allocation3_spill] sm:$0xff] %v12079_v7  ;;  %v3361_v25 = vsel %vm3343_vm11, %v3296_v11, %v14401_v50  ;;  %v8162_v34 = vcombine.low %v7874_v36, %v11939_v57 }
 0x21a   : > { %v6316_v32 = vsel %vm3343_vm11, %v6284_v10, %v11881_v56  ;;  %v12071_v56 = vsel %vm3343_vm11, %v3298_v42, %v14399_v19  ;;  %v5837_v42 = vsel %vm4485_vm4, %v5828_v49, %v5836_v40  ;;  %v12093_v10 = vpop.f32.mrb[2].mxu0  ;;  %v8513_v57 = vcombine.low %v8321_v28, %v11953_v18  ;;  %v9173_v40 = vld [vmem:[%s9503_s28 + $0x98] ss:$0 sps:$4 sm:$0x77]  }
 0x21b   : > { %2479 = vrot.lane.b32.xlu0 %v2422_v47, %s9440_s9  ;;  %v12042_v44 = vpop.permute.xlu1 %5997  ;;  %v3070_v45 = vpop.permute.xlu0 %3069  ;;  %v12049_v47 = vrot.slane %v5839_v22, 1  ;;  %v3300_v22 = vsel %vm3278_vm10, %v3235_v4, %v14398_v63  ;;  %14402 = vst [vmem:[#allocation5_spill] sm:$0xff] %v12093_v10  ;;  %v9180_v18 = vld [vmem:[%s9503_s28 + $0x68] ss:$0 sps:$4 sm:$0x33]   ;;  %v6254_v28 = vsel %vm3213_vm9, %v6210_v55, %v11852_v6  ;;  %v3030_v63 = vrot.slane %v12077_v5, 2 }
 0x21c   : > { %v12104_v36 = vpop.f32.mrb[3].mxu0  ;;  %v14470_v10 = vld [vmem:[#allocation64_spill] sm:$0xff] }
 0x21d   : > { %5605 = vrot.lane.b32.xlu1 %v8460_v60, %s9441_s12  ;;  %v6348_v60 = vsel %vm3408_vm12, %v6316_v32, %v11894_v1  ;;  %v12090_v1 = vld [vmem:[%s9503_s28 + $0x64] sm:$0xf]  ;;  %v5845_v49 = vor.u32 %v12051_v30, %v12049_v47  ;;  %14403 = vst [vmem:[#allocation8_spill] sm:$0xff] %v12104_v36  ;;  %v7876_v47 = vld [vmem:[%s9503_s28 + $0xa8] sm:$0xc]  ;;  %v12118_v30 = vpop.f32.mrb[4].mxu0 }
 0x21e   : > { %v6380_v4 = vsel %vm3473_vm13, %v6348_v60, %v11921_v17  ;;  %v2826_v17 = vsel %vm1579_vm0, %v2824_v8, %v2825_v0  ;;  %v5853_v8 = vor.u32 %v12060_v33, %v12058_v53  ;;  %14404 = vst [vmem:[#allocation34_spill] sm:$0xff] %v12118_v30  ;;  %v12128_v21 = vpop.f32.mrb[5].mxu0  ;;  %v6286_v53 = vsel %vm3278_vm10, %v6254_v28, %v11860_v14  ;;  %v14476_v36 = vld [vmem:[#allocation113_spill] sm:$0xff] }
 0x21f   : > { %2877 = vrot.lane.b32.xlu0 %v2823_v37, %s9442_s13  ;;  %v12085_v20 = vpop.permute.xlu1 %2659  ;;  %v4113_v37 = vld [vmem:[%s9503_s28 + $0x60] sm:$0xe]  ;;  %v6412_v54 = vsel %vm3538_vm14, %v6380_v4, %v11994_v46  ;;  %v6172_v32 = vpop.permute.xlu0 %6171  ;;  %v3426_v46 = vsel %vm3408_vm12, %v3361_v25, %v11877_v62  ;;  %v9166_v62 = vld [vmem:[%s9503_s28 + $0xa4] ss:$0 sps:$4 sm:$0x11]   ;;  %14405 = vst [vmem:[#allocation35_spill] sm:$0xff] %v12128_v21  ;;  %v6318_v60 = vsel %vm3343_vm11, %v6286_v53, %v11900_v24 }
 0x220   : > { %v6444_v11 = vsel %vm3603_vm15, %v6412_v54, %v6172_v32  ;;  %v3491_v13 = vsel %vm3473_vm13, %v3426_v46, %v11910_v29  ;;  %v3029_v29 = vrot.slane %v8162_v34, 2  ;;  %v12137_v19 = vpop.f32.mrb[6].mxu0  ;;  %v6138_v4 = vrot.slane %v9173_v40, 3  ;;  %v8323_v54 = vld [vmem:[%s9503_s28 + $0x9c] sm:$0x8] }
 0x221   : > { %2483 = vrot.lane.b32.xlu1 %v2425_v38, %s9440_s9  ;;  %8737 = vmatprep.mubr.msk.bf16.mxu0 %vm3849_vm3, %v6444_v11  ;;  %v8373_v38 = vcombine.low %v4113_v37, %v12090_v1  ;;  %v3556_v6 = vsel %vm3538_vm14, %v3491_v13, %v11969_v51  ;;  %14406 = vst [vmem:[#allocation97_spill] sm:$0xff] %v12137_v19  ;;  %v12148_v51 = vpop.f32.mrb[7].mxu0  ;;  %v6137_v37 = vrot.slane %v8513_v57, 3  ;;  %v4631_v24 = vshrl.u32 %v9180_v18, 16  ;;  %v14408_v46 = vld [vmem:[#allocation129_spill] sm:$0xff]  ;;  %v14432_v19 = vld [vmem:[#allocation56_spill] sm:$0xff] }
 0x222   : > { %v12142_v50 = vsel %vm3603_vm15, %v3556_v6, %v3070_v45  ;;  %v8164_v14 = vcombine.low %v7876_v47, %v11980_v39  ;;  %14407 = vst [vmem:[#allocation37_spill] sm:$0xff] %v12148_v51  ;;  %v6350_v34 = vsel %vm3408_vm12, %v6318_v60, %v11931_v26  ;;  %v4634_v32 = vshll.u32 %v9180_v18, 16  ;;  %v12167_v47 = vld [vmem:[%s9503_s28 + $0xa4] ss:$0 sps:$4 sm:$0x77]  }
 0x223   : > { %6003 = vrot.lane.b32.xlu0 %v5837_v42, %s9442_s13  ;;  %v12134_v33 = vpop.permute.xlu1 %3073  ;;  %v2864_v25 = vpop.permute.xlu0 %2863  ;;  %v12146_v42 = vld [vmem:[%s9503_s28 + $0xb0] ss:$0 sps:$4 sm:$0x77]   ;;  %v6382_v45 = vsel %vm3473_vm13, %v6350_v34, %v11960_v35  ;;  %v5854_v39 = vsel %vm4485_vm4, %v5845_v49, %v5853_v8  ;;  %v4623_v40 = vshrl.u32 %v8373_v38, 16  ;;  %v4626_v55 = vshll.u32 %v8373_v38, 16 }
 0x224   : > { %v3365_v26 = vsel %vm3343_vm11, %v3300_v22, %v14408_v46  ;;  %v3711_v57 = vshll.u32 %v12142_v50, 16  ;;  %v3031_v35 = vsel %vm1788_vm1, %v3029_v29, %v3030_v63  ;;  %v3032_v18 = vrot.slane %v8164_v14, 2  ;;  %v4115_v13 = vld [vmem:[%s9503_s28 + $0x6c] sm:$0xe]  ;;  %v12185_v60 = vpop.f32.mrb[8].mxu0 }
 0x225   : > { %2881 = vrot.lane.b32.xlu1 %v2826_v17, %s9442_s13  ;;  %v6414_v17 = vsel %vm3538_vm14, %v6382_v45, %v12042_v44  ;;  %v3033_v22 = vrot.slane %v12146_v42, 2  ;;  %v8515_v28 = vcombine.low %v8323_v54, %v11990_v31  ;;  %v12175_v44 = vld [vmem:[%s9503_s28 + $0x70] sm:$0xf]  ;;  %v6139_v53 = vsel %vm4886_vm7, %v6137_v37, %v6138_v4  ;;  %14409 = vst [vmem:[#allocation99_spill] sm:$0xff] %v12185_v60  ;;  %v12193_v54 = vpop.f32.mrb[9].mxu0 }
 0x226   : > { %v9171_v38 = vld [vmem:[%s9503_s28 + $0xb0] ss:$0 sps:$4 sm:$0x11]   ;;  %v4633_v6 = vrot.slane %v4631_v24, 1  ;;  %v4636_v29 = vrot.slane %v4634_v32, 2  ;;  %v3430_v31 = vsel %vm3408_vm12, %v3365_v26, %v11912_v27  ;;  %14410 = vst [vmem:[#allocation36_spill] sm:$0xff] %v12193_v54  ;;  %v8375_v45 = vcombine.low %v4115_v13, %v12175_v44 }
 0x227   : > { %2671 = vrot.lane.b32.xlu0 %v9166_v62, %s9441_s12  ;;  %v6174_v11 = vpop.permute.xlu1 %6173  ;;  %v12170_v8 = vpop.permute.xlu0 %4766  ;;  %v3428_v62 = vsel %vm3408_vm12, %v12071_v56, %v11947_v58  ;;  %v4625_v58 = vrot.slane %v4623_v40, 1  ;;  %v4628_v56 = vrot.slane %v4626_v55, 2  ;;  %v9184_v34 = vld [vmem:[%s9503_s28 + $0x74] ss:$0 sps:$4 sm:$0x33]   ;;  %v3495_v4 = vsel %vm3473_vm13, %v3430_v31, %v11941_v12 }
 0x228   : > { %v6446_v49 = vsel %vm3603_vm15, %v6414_v17, %v6174_v11  ;;  %v3493_v14 = vsel %vm3473_vm13, %v3428_v62, %v12020_v3  ;;  %v3713_v37 = vrot.slane %v3711_v57, 1  ;;  %v12199_v27 = vpop.f32.mrb[10].mxu0  ;;  %v3560_v3 = vsel %vm3538_vm14, %v3495_v4, %v12016_v43  ;;  %v9208_v54 = vld [vmem:[%s9503_s28 + $0xbc] ss:$0 sps:$4 sm:$0x33]  }
 0x229   : > { %6005 = vrot.lane.b32.xlu1 %v5854_v39, %s9442_s13  ;;  %8738 = vmatmul.mubr.msk.bf16.gmra.mrb[36].mxu0 %vm3849_vm3, %v6446_v49  ;;  %v3558_v24 = vsel %vm3538_vm14, %v3493_v14, %v2864_v25  ;;  %14411 = vst [vmem:[#allocation96_spill] sm:$0xff] %v12199_v27  ;;  %v6140_v55 = vrot.slane %v8515_v28, 3  ;;  %v6141_v46 = vrot.slane %v12167_v47, 3  ;;  %v12205_v26 = vpop.f32.mrb[11].mxu0  ;;  %v3709_v12 = vshrl.u32 %v12142_v50, 16  ;;  %v14430_v27 = vld [vmem:[#allocation17_spill] sm:$0xff] }
 0x22a   : > { %14412 = vst [vmem:[#allocation98_spill] sm:$0xff] %v12205_v26  ;;  %v3625_v25 = vsel %vm3603_vm15, %v3560_v3, %v12134_v33  ;;  %v3034_v43 = vsel %vm1788_vm1, %v3032_v18, %v3033_v22  ;;  %v4629_v57 = vor.u32 %v4628_v56, %v4625_v58  ;;  %v4637_v11 = vor.u32 %v4636_v29, %v4633_v6  ;;  %v9182_v56 = vld [vmem:[%s9503_s28 + $0x68] ss:$0 sps:$4 sm:$0x77]  }
 0x22b   : > { %3085 = vrot.lane.b32.xlu0 %v3031_v35, %s9443_s18  ;;  %v3072_v32 = vpop.permute.xlu1 %3071  ;;  %v2868_v40 = vpop.permute.xlu0 %2867  ;;  %v4145_v35 = vld [vmem:[%s9503_s28 + $0x60] sm:$0x8]  ;;  %v4648_v47 = vshrl.u32 %v9184_v34, 16  ;;  %v4651_v49 = vshll.u32 %v9184_v34, 16  ;;  %v3714_v28 = vor.u32 %v3713_v37, %v3709_v12  ;;  %v4640_v33 = vshrl.u32 %v8375_v45, 16 }
 0x22c   : > { %v3623_v39 = vsel %vm3603_vm15, %v3558_v24, %v3072_v32  ;;  %v4643_v62 = vshll.u32 %v8375_v45, 16  ;;  %v3721_v18 = vshll.u32 %v3625_v25, 16  ;;  %v8405_v58 = vcombine.low %v4145_v35, %v12090_v1  ;;  %v4147_v24 = vld [vmem:[%s9503_s28 + $0x6c] sm:$0x8] }
 0x22d   : > { %v3715_v17 = vshll.u32 %v3623_v39, 16  ;;  %2675 = vrot.lane.b32.xlu1 %v9171_v38, %s9441_s12  ;;  %v14413_v38 = vld [vmem:[#allocation106_spill] sm:$0xff]  ;;  %v4638_v4 = vsel %vm4485_vm4, %v4629_v57, %v4637_v11  ;;  %v4650_v37 = vrot.slane %v4648_v47, 1  ;;  %v4642_v45 = vrot.slane %v4640_v33, 1 }
 0x22e   : > { %v3302_v31 = vsel %vm3278_vm10, %v12025_v9, %v14413_v38  ;;  %v6142_v9 = vsel %vm4886_vm7, %v6140_v55, %v6141_v46  ;;  %v4653_v3 = vrot.slane %v4651_v49, 2  ;;  %v3723_v39 = vrot.slane %v3721_v18, 1  ;;  %v14415_v38 = vld [vmem:[#allocation67_spill] sm:$0xff] }
 0x22f   : > { %6179 = vrot.lane.b32.xlu0 %v6139_v53, %s9443_s18  ;;  %v3717_v50 = vrot.slane %v3715_v17, 1  ;;  %v12216_v13 = vpop.permute.xlu1 %4943  ;;  %v12221_v14 = vpop.permute.xlu0 %4768  ;;  %v14414_v53 = vld [vmem:[#allocation95_spill] sm:$0xff]  ;;  %v4911_v55 = vrot.slane %v8405_v58, 3  ;;  %v4912_v46 = vrot.slane %v9182_v56, 3  ;;  %v8407_v17 = vcombine.low %v4147_v24, %v12175_v44 }
 0x230   : > { %v3367_v6 = vsel %vm3343_vm11, %v3302_v31, %v14414_v53  ;;  %v4654_v47 = vor.u32 %v4653_v3, %v4650_v37  ;;  %v5216_v31 = vshrl.u32 %v14415_v38, 16  ;;  %v5219_v18 = vshll.u32 %v14415_v38, 16  ;;  %v14416_v53 = vld [vmem:[#allocation65_spill] sm:$0xff]  ;;  %v12284_v37 = vld [vmem:[%s9503_s28 + $0xa4] ss:$0 sps:$4 sm:$0x77]  }
 0x231   : > { %3089 = vrot.lane.b32.xlu1 %v3034_v43, %s9443_s18  ;;  %v3718_v29 = vsel %vm3668_vm2, %v3714_v28, %v3717_v50  ;;  %v3432_v34 = vsel %vm3408_vm12, %v3367_v6, %v11986_v41  ;;  %v4645_v41 = vrot.slane %v4643_v62, 2  ;;  %v9186_v43 = vld [vmem:[%s9503_s28 + $0x74] ss:$0 sps:$4 sm:$0x77]   ;;  %v4913_v44 = vsel %vm4886_vm7, %v4911_v55, %v4912_v46  ;;  %v7766_v62 = vld [vmem:[%s9503_s28 + $0x9c] sm:$0xc] }
 0x232   : > { %8703 = vmatprep.mubr.msk.bf16.mxu1 %vm3849_vm3, %v3718_v29  ;;  %v3497_v1 = vsel %vm3473_vm13, %v3432_v34, %v12085_v20  ;;  %v3719_v20 = vshrl.u32 %v3625_v25, 16  ;;  %v4914_v50 = vrot.slane %v8407_v17, 3  ;;  %v4915_v33 = vrot.slane %v9186_v43, 3  ;;  %v14421_v3 = vld [vmem:[#allocation71_spill] sm:$0xff]  ;;  %v14422_v46 = vld [vmem:[#allocation70_spill] sm:$0xff] }
 0x233   : > { %2879 = vrot.lane.b32.xlu0 %v2822_v59, %s9442_s13  ;;  %v12240_v32 = vpop.permute.xlu1 %4945  ;;  %v3562_v16 = vsel %vm3538_vm14, %v3497_v1, %v2868_v40  ;;  %v3076_v59 = vpop.permute.xlu0 %3075  ;;  %v4646_v35 = vor.u32 %v4645_v41, %v4642_v45  ;;  %v5224_v5 = vshrl.u32 %v14416_v53, 16  ;;  %v5218_v1 = vrot.slane %v5216_v31, 1 }
 0x234   : > { %v3627_v12 = vsel %vm3603_vm15, %v3562_v16, %v3076_v59  ;;  %v3724_v40 = vor.u32 %v3723_v39, %v3719_v20  ;;  %v4916_v34 = vsel %vm4886_vm7, %v4914_v50, %v4915_v33  ;;  %v5221_v45 = vrot.slane %v5219_v18, 2 }
 0x235   : > { %6181 = vrot.lane.b32.xlu1 %v6142_v9, %s9443_s18  ;;  %v3725_v57 = vshll.u32 %v3627_v12, 16  ;;  %v4655_v61 = vsel %vm4485_vm4, %v4646_v35, %v4654_v47  ;;  %v12280_v9 = vld [vmem:[%s9503_s28 + $0xa0] sm:$0xf]  ;;  %v5226_v41 = vrot.slane %v5224_v5, 1  ;;  %v5233_v39 = vshrl.u32 %v14421_v3, 16  ;;  %v9188_v47 = vld [vmem:[%s9503_s28 + $0x84] sm:$0xff]  }
 0x236   : > { %v8237_v12 = vld [vmem:[%s9503_s28 + $0x84] sm:$0x8]  ;;  %v5236_v55 = vshll.u32 %v14421_v3, 16  ;;  %v5241_v17 = vshrl.u32 %v14422_v46, 16  ;;  %v5244_v43 = vshll.u32 %v14422_v46, 16  ;;  %v14132_v35 = vrot.slane %v12284_v37, 2 }
 0x237   : > { %4774 = vrot.lane.b32.xlu0 %v4638_v4, %s9436_s29  ;;  %v12248_v11 = vpop.permute.xlu1 %5057  ;;  %v3727_v49 = vrot.slane %v3725_v57, 1  ;;  %v12250_v28 = vpop.permute.xlu0 %5055  ;;  %v8070_v4 = vcombine.low %v7766_v62, %v12280_v9  ;;  %v9187_v57 = vld [vmem:[%s9503_s28 + $0x90] sm:$0xff]   ;;  %v5235_v50 = vrot.slane %v5233_v39, 1  ;;  %v12341_v46 = vld [vmem:[%s9503_s28 + $0xb8] sm:$0xf] }
 0x238   : > { %v5238_v62 = vrot.slane %v5236_v55, 2  ;;  %v5243_v38 = vrot.slane %v5241_v17, 1  ;;  %v5246_v31 = vrot.slane %v5244_v43, 2  ;;  %v7808_v55 = vld [vmem:[%s9503_s28 + $0xb4] sm:$0xf] }
 0x239   : > { %3087 = vrot.lane.b32.xlu1 %v3030_v63, %s9443_s18  ;;  %v3728_v25 = vsel %vm3668_vm2, %v3724_v40, %v3727_v49  ;;  %v12264_v63 = vpop.f32.mrb[12].mxu0  ;;  %v2427_v40 = vrot.slane %v8070_v4, 2  ;;  %v5222_v49 = vor.u32 %v5221_v45, %v5218_v1  ;;  %v12321_v4 = vld [vmem:[%s9503_s28 + $0xac] sm:$0xf] }
 0x23a   : > { %14417 = vst [vmem:[#allocation50_spill] sm:$0xff] %v12264_v63  ;;  %8704 = vmatmul.mubr.msk.bf16.gmra.mrb[8].mxu1 %vm3849_vm3, %v3728_v25  ;;  %v12271_v29 = vpop.f32.mrb[13].mxu0  ;;  %v12325_v45 = vld [vmem:[%s9503_s28 + $0xb0] ss:$0 sps:$4 sm:$0x77]   ;;  %v14427_v63 = vld [vmem:[#allocation14_spill] sm:$0xff] }
 0x23b   : > { %2883 = vrot.lane.b32.xlu0 %v2825_v0, %s9442_s13  ;;  %v12267_v6 = vpop.permute.xlu1 %2469  ;;  %v5227_v0 = vshll.u32 %v14416_v53, 16  ;;  %14418 = vst [vmem:[#allocation48_spill] sm:$0xff] %v12271_v29  ;;  %v12273_v58 = vpop.permute.xlu0 %5359  ;;  %v7768_v53 = vld [vmem:[%s9503_s28 + $0xa8] sm:$0xc]  ;;  %v14429_v29 = vld [vmem:[#allocation16_spill] sm:$0xff] }
 0x23c   : > { %v12275_v56 = vpop.f32.mrb[14].mxu0  ;;  %v8072_v1 = vcombine.low %v7768_v53, %v12321_v4 }
 0x23d   : > { %14419 = vst [vmem:[#allocation55_spill] sm:$0xff] %v12275_v56  ;;  %4951 = vrot.lane.b32.xlu1 %v4913_v44, %s9437_s30  ;;  %v12286_v24 = vpop.f32.mrb[15].mxu0  ;;  %v5229_v59 = vrot.slane %v5227_v0, 2  ;;  %v8445_v44 = vcombine.low %v8237_v12, %v11886_v2  ;;  %v2429_v2 = vsel %vm1788_vm1, %v2427_v40, %v14132_v35  ;;  %v5239_v0 = vor.u32 %v5238_v62, %v5235_v50  ;;  %v8293_v50 = vld [vmem:[%s9503_s28 + $0xa8] sm:$0xe] }
 0x23e   : > { %14420 = vst [vmem:[#allocation54_spill] sm:$0xff] %v12286_v24  ;;  %v2430_v40 = vrot.slane %v8072_v1, 2  ;;  %v7623_v62 = vld [vmem:[%s9503_s28 + $0x60] sm:$0xf]  ;;  %v4073_v35 = vld [vmem:[%s9503_s28 + $0x30] sm:$0xf] }
 0x23f   : > { %4776 = vrot.lane.b32.xlu0 %v4655_v61, %s9436_s29  ;;  %v12290_v16 = vpop.permute.xlu1 %5487  ;;  %v12296_v20 = vpop.permute.xlu0 %5361  ;;  %v5230_v25 = vor.u32 %v5229_v59, %v5226_v41  ;;  %v5455_v42 = vrot.slane %v8445_v44, 3  ;;  %v8238_v41 = vld [vmem:[%s9503_s28 + $0x90] sm:$0x8]  ;;  %v8921_v1 = vld [vmem:[%s9503_s28 + $0x5c] ss:$0 sps:$4 sm:$0x11]  }
 0x240   : > { %v8446_v17 = vcombine.low %v8238_v41, %v11925_v15  ;;  %v8102_v15 = vcombine.low %v7808_v55, %v12341_v46  ;;  %v8925_v41 = vld [vmem:[%s9503_s28 + $0x68] ss:$0 sps:$4 sm:$0x11]   ;;  %v7848_v56 = vld [vmem:[%s9503_s28 + $0xc0] sm:$0xe] }
 0x241   : > { %4953 = vrot.lane.b32.xlu1 %v4916_v34, %s9437_s30  ;;  %v5231_v61 = vsel %vm4485_vm4, %v5222_v49, %v5230_v25  ;;  %v5247_v34 = vor.u32 %v5246_v31, %v5243_v38  ;;  %v14133_v49 = vrot.slane %v12325_v45, 2  ;;  %v7620_v25 = vld [vmem:[%s9503_s28 + $0x54] sm:$0xf]  ;;  %v8261_v38 = vld [vmem:[%s9503_s28 + $0xa8] sm:$0xf]  ;;  %v3164_v60 = vsel %vm845_vm6, %v8925_v41, %v14429_v29 }
 0x242   : > { %v12360_v31 = vld [vmem:[%s9503_s28 + $0xac] sm:$0xf]  ;;  %v5458_v53 = vrot.slane %v8446_v17, 3  ;;  %v9388_v17 = vld [vmem:[%s9503_s28 + $0x64] sm:$0xf] }
 0x243   : > { %3091 = vrot.lane.b32.xlu0 %v3033_v22, %s9443_s18  ;;  %v12306_v33 = vpop.permute.xlu1 %2661  ;;  %v12308_v18 = vpop.permute.xlu0 %2473  ;;  %v5456_v22 = vrot.slane %v11890_v23, 3 }
 0x244   : > { %v12328_v3 = vpop.f32.mrb[16].mxu0 }
 0x245   : > { %5065 = vrot.lane.b32.xlu1 %v9187_v57, %s9438_s7  ;;  %14423 = vst [vmem:[#allocation4_spill] sm:$0xff] %v12328_v3  ;;  %v12332_v23 = vpop.f32.mrb[17].mxu0  ;;  %v5457_v12 = vsel %vm4886_vm7, %v5455_v42, %v5456_v22  ;;  %v2432_v22 = vsel %vm1788_vm1, %v2430_v40, %v14133_v49  ;;  %v8461_v40 = vcombine.low %v8261_v38, %v12360_v31  ;;  %v7811_v49 = vld [vmem:[%s9503_s28 + $0xc0] sm:$0xf] }
 0x246   : > { %14424 = vst [vmem:[#allocation6_spill] sm:$0xff] %v12332_v23  ;;  %v12335_v59 = vpop.f32.mrb[18].mxu0 }
 0x247   : > { %5063 = vrot.lane.b32.xlu0 %v9188_v47, %s9438_s7  ;;  %v12317_v5 = vpop.permute.xlu1 %5599  ;;  %v12330_v39 = vpop.permute.xlu0 %5489  ;;  %14425 = vst [vmem:[#allocation7_spill] sm:$0xff] %v12335_v59  ;;  %v5248_v47 = vsel %vm4485_vm4, %v5239_v0, %v5247_v34  ;;  %v7846_v0 = vld [vmem:[%s9503_s28 + $0xb4] sm:$0xe]  ;;  %v9203_v34 = vld [vmem:[%s9503_s28 + $0xb0] ss:$0 sps:$4 sm:$0x33]  }
 0x248   : > { %v12344_v43 = vpop.f32.mrb[19].mxu0  ;;  %v8295_v59 = vld [vmem:[%s9503_s28 + $0xb4] sm:$0xe]  ;;  %v5867_v23 = vshll.u32 %v9203_v34, 16 }
 0x249   : > { %2485 = vrot.lane.b32.xlu1 %v2429_v2, %s9440_s9  ;;  %14426 = vst [vmem:[#allocation9_spill] sm:$0xff] %v12344_v43  ;;  %v5459_v2 = vrot.slane %v11929_v48, 3  ;;  %v9387_v48 = vld [vmem:[%s9503_s28 + $0x58] sm:$0xf] }
 0x24a   : > { %v7902_v55 = vcombine.low %v7620_v25, %v9387_v48  ;;  %v12388_v43 = vld [vmem:[%s9503_s28 + $0xb8] sm:$0xf]  ;;  %v8134_v25 = vcombine.low %v7846_v0, %v12341_v46  ;;  %v14428_v0 = vld [vmem:[#allocation15_spill] sm:$0xff] }
 0x24b   : > { %5367 = vrot.lane.b32.xlu0 %v5231_v61, %s9439_s8  ;;  %v12346_v57 = vpop.permute.xlu1 %2665  ;;  %v8485_v61 = vcombine.low %v8293_v50, %v12360_v31  ;;  %v12382_v50 = vld [vmem:[%s9503_s28 + $0xc4] sm:$0xf]  ;;  %v5460_v3 = vsel %vm4886_vm7, %v5458_v53, %v5459_v2  ;;  %v8487_v2 = vcombine.low %v8295_v59, %v12388_v43  ;;  %v8263_v59 = vld [vmem:[%s9503_s28 + $0xb4] sm:$0xf] }
 0x24c   : > { %v3155_v24 = vsel %vm845_vm6, %v7902_v55, %v14428_v0  ;;  %v2827_v26 = vrot.slane %v8134_v25, 1  ;;  %v8136_v0 = vcombine.low %v7848_v56, %v12382_v50  ;;  %v12425_v25 = vld [vmem:[%s9503_s28 + $0xc8] ss:$0 sps:$4 sm:$0x33]   ;;  %v14433_v56 = vld [vmem:[#allocation58_spill] sm:$0xff] }
 0x24d   : > { %v12350_v44 = vpop.permute.xlu0 %2471  ;;  %5495 = vrot.lane.b32.xlu1 %v5457_v12, %s9440_s9  ;;  %v5859_v38 = vshll.u32 %v8485_v61, 16  ;;  %v5876_v55 = vshll.u32 %v8487_v2, 16  ;;  %v12429_v21 = vsel %vm3213_vm9, %v3164_v60, %v14433_v56  ;;  %v14436_v60 = vrot.slane %v12284_v37, 2 }
 0x24f   : > { %5369 = vrot.lane.b32.xlu0 %v5248_v47, %s9439_s8  ;;  %v12363_v42 = vpop.permute.xlu1 %5601  ;;  %v7904_v47 = vcombine.low %v7623_v62, %v9388_v17  ;;  %v12392_v62 = vld [vmem:[%s9503_s28 + $0xbc] ss:$0 sps:$4 sm:$0x33]   ;;  %v5864_v17 = vshrl.u32 %v9203_v34, 16  ;;  %v8104_v34 = vcombine.low %v7811_v49, %v12382_v50 }
 0x250   : > { %v14431_v49 = vld [vmem:[#allocation53_spill] sm:$0xff] }
 0x251   : > { %v12373_v12 = vpop.permute.xlu0 %2869  ;;  %2677 = vrot.lane.b32.xlu1 %v8102_v15, %s9441_s12  ;;  %v5856_v15 = vshrl.u32 %v8485_v61, 16  ;;  %v3161_v61 = vsel %vm845_vm6, %v7904_v47, %v14430_v27  ;;  %v5861_v27 = vrot.slane %v5859_v38, 2  ;;  %v5866_v47 = vrot.slane %v5864_v17, 1  ;;  %v14434_v17 = vld [vmem:[#allocation60_spill] sm:$0xff] }
 0x252   : > { %v5884_v38 = vshll.u32 %v9208_v54, 16 }
 0x253   : > { %2489 = vrot.lane.b32.xlu0 %v2432_v22, %s9440_s9  ;;  %v12394_v48 = vpop.permute.xlu1 %2475  ;;  %v3158_v22 = vsel %vm845_vm6, %v8921_v1, %v14427_v63  ;;  %v9389_v63 = vld [vmem:[%s9503_s28 + $0x34] sm:$0xf]  ;;  %v5858_v41 = vrot.slane %v5856_v15, 1  ;;  %v5881_v15 = vshrl.u32 %v9208_v54, 16 }
 0x254   : > { %v8345_v1 = vcombine.low %v4073_v35, %v9389_v63  ;;  %v3241_v30 = vsel %vm3213_vm9, %v3158_v22, %v14431_v49  ;;  %v3239_v35 = vsel %vm3213_vm9, %v3155_v24, %v14432_v19  ;;  %v5873_v63 = vshrl.u32 %v8487_v2, 16  ;;  %v14435_v19 = vld [vmem:[#allocation108_spill] sm:$0xff]  ;;  %v4075_v49 = vld [vmem:[%s9503_s28 + $0x3c] sm:$0xf] }
 0x255   : > { %v12399_v53 = vpop.permute.xlu0 %5999  ;;  %5607 = vrot.lane.b32.xlu1 %v8461_v40, %s9441_s12  ;;  %v5869_v40 = vrot.slane %v5867_v23, 2  ;;  %v8462_v23 = vcombine.low %v8263_v59, %v12388_v43  ;;  %v3243_v22 = vsel %vm3213_vm9, %v3161_v61, %v14434_v17  ;;  %v3306_v24 = vsel %vm3278_vm10, %v3241_v30, %v14435_v19 }
 0x256   : > { %v6213_v2 = vsel %vm845_vm6, %v8345_v1, %v12170_v8  ;;  %v5862_v30 = vor.u32 %v5861_v27, %v5858_v41  ;;  %v2830_v17 = vrot.slane %v8136_v0, 1  ;;  %v12455_v51 = vrot.slane %v5873_v63, 1  ;;  %v9390_v41 = vld [vmem:[%s9503_s28 + $0x40] sm:$0xf] }
 0x257   : > { %5497 = vrot.lane.b32.xlu0 %v5460_v3, %s9440_s9  ;;  %v12416_v29 = vpop.permute.xlu1 %2873  ;;  %v6256_v61 = vsel %vm3213_vm9, %v6213_v2, %v12216_v13  ;;  %v5870_v56 = vor.u32 %v5869_v40, %v5866_v47  ;;  %v7878_v13 = vld [vmem:[%s9503_s28 + $0xb4] sm:$0xc]  ;;  %v8346_v27 = vcombine.low %v4075_v49, %v9390_v41  ;;  %v5883_v47 = vrot.slane %v5881_v15, 1  ;;  %v8325_v40 = vld [vmem:[%s9503_s28 + $0xa8] sm:$0x8] }
 0x258   : > { %v12450_v8 = vpop.f32.mrb[20].mxu0  ;;  %v6288_v1 = vsel %vm3278_vm10, %v6256_v61, %v12250_v28  ;;  %v5886_v28 = vrot.slane %v5884_v38, 2  ;;  %v14442_v61 = vld [vmem:[#allocation111_spill] sm:$0xff] }
 0x259   : > { %v12422_v3 = vpop.permute.xlu0 %2663  ;;  %2681 = vrot.lane.b32.xlu1 %v8104_v34, %s9441_s12  ;;  %v14437_v34 = vrot.slane %v12392_v62, 1  ;;  %14438 = vst [vmem:[#allocation38_spill] sm:$0xff] %v12450_v8  ;;  %v12460_v2 = vpop.f32.mrb[21].mxu0  ;;  %v6320_v0 = vsel %vm3343_vm11, %v6288_v1, %v12273_v58  ;;  %v14443_v8 = vld [vmem:[#allocation130_spill] sm:$0xff]  ;;  %v14445_v38 = vld [vmem:[#allocation131_spill] sm:$0xff] }
 0x25a   : > { %14439 = vst [vmem:[#allocation39_spill] sm:$0xff] %v12460_v2  ;;  %v12467_v63 = vpop.f32.mrb[22].mxu0  ;;  %v12475_v49 = vsel %vm3343_vm11, %v3306_v24, %v14443_v8  ;;  %v6352_v58 = vsel %vm3408_vm12, %v6320_v0, %v12290_v16  ;;  %v5871_v24 = vsel %vm4485_vm4, %v5862_v30, %v5870_v56  ;;  %v8166_v16 = vcombine.low %v7878_v13, %v12341_v46  ;;  %v12494_v8 = vld [vmem:[%s9503_s28 + $0x7c] sm:$0xf]  ;;  %v14471_v2 = vld [vmem:[#allocation66_spill] sm:$0xff] }
 0x25b   : > { %2487 = vrot.lane.b32.xlu0 %v14436_v60, %s9440_s9  ;;  %v2829_v54 = vsel %vm1579_vm0, %v2827_v26, %v14437_v34  ;;  %v12448_v59 = vpop.permute.xlu1 %6001  ;;  %v12457_v26 = vrot.slane %v5876_v55, 2  ;;  %14440 = vst [vmem:[#allocation41_spill] sm:$0xff] %v12467_v63  ;;  %v14441_v55 = vld [vmem:[#allocation109_spill] sm:$0xff]  ;;  %v3308_v60 = vsel %vm3278_vm10, %v3243_v22, %v14442_v61  ;;  %v12483_v15 = vpop.f32.mrb[23].mxu0  ;;  %v6384_v22 = vsel %vm3473_vm13, %v6352_v58, %v12317_v5  ;;  %v9395_v63 = vld [vmem:[%s9503_s28 + $0x4c] sm:$0xf] }
 0x25c   : > { %v3304_v34 = vsel %vm3278_vm10, %v3239_v35, %v14441_v55  ;;  %14444 = vst [vmem:[#allocation43_spill] sm:$0xff] %v12483_v15  ;;  %v6416_v41 = vsel %vm3538_vm14, %v6384_v22, %v12399_v53  ;;  %v14446_v55 = vrot.slane %v12425_v25, 1  ;;  %v8517_v30 = vcombine.low %v8325_v40, %v12360_v31  ;;  %v9213_v56 = vld [vmem:[%s9503_s28 + $0xb0] ss:$0 sps:$4 sm:$0x77]  }
 0x25d   : > { %v3078_v19 = vpop.permute.xlu0 %3077  ;;  %5609 = vrot.lane.b32.xlu1 %v8462_v23, %s9441_s12  ;;  %v12481_v23 = vld [vmem:[%s9503_s28 + $0xbc] ss:$0 sps:$4 sm:$0x77]   ;;  %v3369_v35 = vsel %vm3343_vm11, %v3304_v34, %v14445_v38  ;;  %v5879_v34 = vor.u32 %v12457_v26, %v12455_v51  ;;  %v6216_v46 = vsel %vm845_vm6, %v8346_v27, %v12221_v14  ;;  %v14447_v61 = vrot.slane %v12325_v45, 2 }
 0x25e   : > { %v2832_v5 = vsel %vm1579_vm0, %v2830_v17, %v14446_v55  ;;  %v3434_v13 = vsel %vm3408_vm12, %v3369_v35, %v12267_v6  ;;  %v5887_v58 = vor.u32 %v5886_v28, %v5883_v47  ;;  %v9220_v17 = vld [vmem:[%s9503_s28 + $0x80] ss:$0 sps:$4 sm:$0x33]   ;;  %v6258_v51 = vsel %vm3213_vm9, %v6216_v46, %v12240_v32  ;;  %v9206_v14 = vld [vmem:[%s9503_s28 + $0xbc] ss:$0 sps:$4 sm:$0x11]  }
 0x25f   : > { %2885 = vrot.lane.b32.xlu0 %v2829_v54, %s9442_s13  ;;  %v12489_v1 = vpop.permute.xlu1 %2667  ;;  %v4117_v54 = vld [vmem:[%s9503_s28 + $0x78] sm:$0xe]  ;;  %v3499_v31 = vsel %vm3473_vm13, %v3434_v13, %v12306_v33  ;;  %v7880_v6 = vld [vmem:[%s9503_s28 + $0xc0] sm:$0xc]  ;;  %v6290_v27 = vsel %vm3278_vm10, %v6258_v51, %v12248_v11  ;;  %v3035_v28 = vrot.slane %v8166_v16, 2  ;;  %v3036_v33 = vrot.slane %v12481_v23, 2 }
 0x260   : > { %v8377_v26 = vcombine.low %v4117_v54, %v12494_v8  ;;  %v3564_v47 = vsel %vm3538_vm14, %v3499_v31, %v12373_v12  ;;  %v6322_v40 = vsel %vm3343_vm11, %v6290_v27, %v12296_v20  ;;  %v6143_v22 = vrot.slane %v8517_v30, 3  ;;  %v12535_v54 = vld [vmem:[%s9503_s28 + $0xc8] ss:$0 sps:$4 sm:$0x77]   ;;  %v8327_v16 = vld [vmem:[%s9503_s28 + $0xb4] sm:$0x8] }
 0x261   : > { %v6176_v0 = vpop.permute.xlu0 %6175  ;;  %2491 = vrot.lane.b32.xlu1 %v14447_v61, %s9440_s9  ;;  %v12532_v38 = vsel %vm3603_vm15, %v3564_v47, %v3078_v19  ;;  %v6354_v11 = vsel %vm3408_vm12, %v6322_v40, %v12330_v39  ;;  %v8168_v12 = vcombine.low %v7880_v6, %v12382_v50  ;;  %v5888_v19 = vsel %vm4485_vm4, %v5879_v34, %v5887_v58  ;;  %v14448_v39 = vld [vmem:[#allocation42_spill] sm:$0xff]  ;;  %v12555_v13 = vld [vmem:[%s9503_s28 + $0xbc] ss:$0 sps:$4 sm:$0x77]   ;;  %v12564_v58 = vld [vmem:[%s9503_s28 + $0x88] sm:$0xf] }
 0x262   : > { %v6448_v53 = vsel %vm3603_vm15, %v6416_v41, %v6176_v0  ;;  %v4665_v41 = vshrl.u32 %v9220_v17, 16  ;;  %v4668_v0 = vshll.u32 %v9220_v17, 16  ;;  %v6386_v20 = vsel %vm3473_vm13, %v6354_v11, %v12363_v42  ;;  %v4119_v17 = vld [vmem:[%s9503_s28 + $0x84] sm:$0xe] }
 0x263   : > { %6007 = vrot.lane.b32.xlu0 %v5871_v24, %s9442_s13  ;;  %8741 = vmatprep.mubr.msk.bf16.mxu0 %vm3849_vm3, %v6448_v53  ;;  %v3082_v32 = vpop.permute.xlu1 %3081  ;;  %v6144_v24 = vrot.slane %v9213_v56, 3  ;;  %v4657_v55 = vshrl.u32 %v8377_v26, 16  ;;  %v4660_v30 = vshll.u32 %v8377_v26, 16  ;;  %v3373_v56 = vsel %vm3343_vm11, %v3308_v60, %v14448_v39  ;;  %v9211_v31 = vld [vmem:[%s9503_s28 + $0xc8] ss:$0 sps:$4 sm:$0x11]  }
 0x264   : > { %v6418_v50 = vsel %vm3538_vm14, %v6386_v20, %v12448_v59  ;;  %v3037_v42 = vsel %vm1788_vm1, %v3035_v28, %v3036_v33  ;;  %v3039_v60 = vrot.slane %v12535_v54, 2  ;;  %v8519_v59 = vcombine.low %v8327_v16, %v12388_v43  ;;  %v9224_v40 = vld [vmem:[%s9503_s28 + $0x8c] ss:$0 sps:$4 sm:$0x33]   ;;  %v7772_v54 = vld [vmem:[%s9503_s28 + $0xc0] sm:$0xc] }
 0x265   : > { %v2872_v35 = vpop.permute.xlu0 %2871  ;;  %2889 = vrot.lane.b32.xlu1 %v2832_v5, %s9442_s13  ;;  %v3731_v5 = vshll.u32 %v12532_v38, 16  ;;  %v6145_v61 = vsel %vm4886_vm7, %v6143_v22, %v6144_v24  ;;  %v3436_v51 = vsel %vm3408_vm12, %v12475_v49, %v12350_v44  ;;  %v4667_v6 = vrot.slane %v4665_v41, 1 }
 0x266   : > { %v4670_v26 = vrot.slane %v4668_v0, 2  ;;  %v3438_v27 = vsel %vm3408_vm12, %v3373_v56, %v12308_v18  ;;  %v3501_v43 = vsel %vm3473_vm13, %v3436_v51, %v12422_v3  ;;  %v4659_v47 = vrot.slane %v4657_v55, 1 }
 0x267   : > { %2679 = vrot.lane.b32.xlu0 %v9206_v14, %s9441_s12  ;;  %v6178_v46 = vpop.permute.xlu1 %6177  ;;  %v3038_v14 = vrot.slane %v8168_v12, 2  ;;  %v4662_v28 = vrot.slane %v4660_v30, 2  ;;  %v12579_v44 = vpop.f32.mrb[24].mxu0  ;;  %v3503_v49 = vsel %vm3473_vm13, %v3438_v27, %v12346_v57  ;;  %v3733_v22 = vrot.slane %v3731_v5, 1 }
 0x268   : > { %v6450_v34 = vsel %vm3603_vm15, %v6418_v50, %v6178_v46  ;;  %14449 = vst [vmem:[#allocation100_spill] sm:$0xff] %v12579_v44  ;;  %v3566_v24 = vsel %vm3538_vm14, %v3501_v43, %v2872_v35  ;;  %v8379_v12 = vcombine.low %v4119_v17, %v12564_v58  ;;  %v12585_v18 = vpop.f32.mrb[25].mxu0  ;;  %v3568_v3 = vsel %vm3538_vm14, %v3503_v49, %v12416_v29  ;;  %v4149_v50 = vld [vmem:[%s9503_s28 + $0x78] sm:$0x8]  ;;  %v4151_v49 = vld [vmem:[%s9503_s28 + $0x84] sm:$0x8] }
 0x269   : > { %v12558_v53 = vpop.permute.xlu0 %4770  ;;  %6009 = vrot.lane.b32.xlu1 %v5888_v19, %s9442_s13  ;;  %8742 = vmatmul.mubr.msk.bf16.gmra.mrb[40].mxu0 %vm3849_vm3, %v6450_v34  ;;  %14450 = vst [vmem:[#allocation101_spill] sm:$0xff] %v12585_v18  ;;  %v6146_v0 = vrot.slane %v8519_v59, 3  ;;  %v6147_v20 = vrot.slane %v12555_v13, 3  ;;  %v12591_v19 = vpop.f32.mrb[26].mxu0  ;;  %v3729_v57 = vshrl.u32 %v12532_v38, 16  ;;  %v3633_v35 = vsel %vm3603_vm15, %v3568_v3, %v3082_v32  ;;  %v14453_v59 = vld [vmem:[#allocation110_spill] sm:$0xff] }
 0x26a   : > { %14451 = vst [vmem:[#allocation103_spill] sm:$0xff] %v12591_v19  ;;  %v3040_v30 = vsel %vm1788_vm1, %v3038_v14, %v3039_v60  ;;  %v12599_v29 = vpop.f32.mrb[27].mxu0  ;;  %v4663_v39 = vor.u32 %v4662_v28, %v4659_v47  ;;  %v4671_v56 = vor.u32 %v4670_v26, %v4667_v6  ;;  %v4682_v5 = vshrl.u32 %v9224_v40, 16  ;;  %v9222_v27 = vld [vmem:[%s9503_s28 + $0x80] ss:$0 sps:$4 sm:$0x77]  }
 0x26b   : > { %3093 = vrot.lane.b32.xlu0 %v3037_v42, %s9443_s18  ;;  %v3080_v11 = vpop.permute.xlu1 %3079  ;;  %14452 = vst [vmem:[#allocation102_spill] sm:$0xff] %v12599_v29  ;;  %v4685_v46 = vshll.u32 %v9224_v40, 16  ;;  %v3734_v38 = vor.u32 %v3733_v22, %v3729_v57  ;;  %v4674_v13 = vshrl.u32 %v8379_v12, 16  ;;  %v4677_v34 = vshll.u32 %v8379_v12, 16  ;;  %v7852_v44 = vld [vmem:[%s9503_s28 + $0xd8] sm:$0xe] }
 0x26c   : > { %v3631_v16 = vsel %vm3603_vm15, %v3566_v24, %v3080_v11  ;;  %v3310_v17 = vsel %vm3278_vm10, %v12429_v21, %v14453_v59  ;;  %v3741_v51 = vshll.u32 %v3633_v35, 16  ;;  %v8409_v26 = vcombine.low %v4149_v50, %v12494_v8  ;;  %v14466_v29 = vld [vmem:[#allocation19_spill] sm:$0xff] }
 0x26d   : > { %v2876_v41 = vpop.permute.xlu0 %2875  ;;  %v3735_v55 = vshll.u32 %v3631_v16, 16  ;;  %2683 = vrot.lane.b32.xlu1 %v9211_v31, %s9441_s12  ;;  %v14455_v47 = vrot.slane %v12392_v62, 1  ;;  %v6148_v21 = vsel %vm4886_vm7, %v6146_v0, %v6147_v20  ;;  %v4684_v28 = vrot.slane %v4682_v5, 1 }
 0x26e   : > { %v4687_v40 = vrot.slane %v4685_v46, 2  ;;  %v4672_v24 = vsel %vm4485_vm4, %v4663_v39, %v4671_v56  ;;  %v4679_v11 = vrot.slane %v4677_v34, 2  ;;  %v3743_v12 = vrot.slane %v3741_v51, 1  ;;  %v14458_v34 = vld [vmem:[#allocation75_spill] sm:$0xff] }
 0x26f   : > { %6183 = vrot.lane.b32.xlu0 %v6145_v61, %s9443_s18  ;;  %v3737_v42 = vrot.slane %v3735_v55, 1  ;;  %v12603_v32 = vpop.permute.xlu1 %4947  ;;  %v14454_v61 = vld [vmem:[#allocation132_spill] sm:$0xff]  ;;  %v4917_v0 = vrot.slane %v8409_v26, 3  ;;  %v4918_v20 = vrot.slane %v9222_v27, 3  ;;  %v8411_v57 = vcombine.low %v4151_v49, %v12564_v58 }
 0x270   : > { %v3375_v14 = vsel %vm3343_vm11, %v3310_v17, %v14454_v61  ;;  %v9226_v55 = vld [vmem:[%s9503_s28 + $0x8c] ss:$0 sps:$4 sm:$0x77]   ;;  %v4688_v50 = vor.u32 %v4687_v40, %v4684_v28  ;;  %v5250_v59 = vshrl.u32 %v14458_v34, 16  ;;  %v14460_v51 = vrot.slane %v12425_v25, 1 }
 0x271   : > { %v12608_v31 = vpop.permute.xlu0 %4772  ;;  %3097 = vrot.lane.b32.xlu1 %v3040_v30, %s9443_s18  ;;  %v3738_v6 = vsel %vm3668_vm2, %v3734_v38, %v3737_v42  ;;  %v3440_v43 = vsel %vm3408_vm12, %v3375_v14, %v12394_v48  ;;  %v4676_v48 = vrot.slane %v4674_v13, 1  ;;  %v4919_v58 = vsel %vm4886_vm7, %v4917_v0, %v4918_v20  ;;  %v7770_v14 = vld [vmem:[%s9503_s28 + $0xb4] sm:$0xc]  ;;  %v12669_v28 = vld [vmem:[%s9503_s28 + $0xb8] sm:$0xf] }
 0x272   : > { %8707 = vmatprep.mubr.msk.bf16.mxu1 %vm3849_vm3, %v3738_v6  ;;  %v3505_v22 = vsel %vm3473_vm13, %v3440_v43, %v12489_v1  ;;  %v3739_v1 = vshrl.u32 %v3633_v35, 16  ;;  %v4920_v35 = vrot.slane %v8411_v57, 3  ;;  %v4921_v13 = vrot.slane %v9226_v55, 3  ;;  %v12673_v49 = vld [vmem:[%s9503_s28 + $0xbc] ss:$0 sps:$4 sm:$0x77]  }
 0x273   : > { %2887 = vrot.lane.b32.xlu0 %v14455_v47, %s9442_s13  ;;  %v12626_v8 = vpop.permute.xlu1 %4949  ;;  %v3570_v62 = vsel %vm3538_vm14, %v3505_v22, %v2876_v41  ;;  %v4680_v56 = vor.u32 %v4679_v11, %v4676_v48  ;;  %v5253_v23 = vshll.u32 %v14458_v34, 16  ;;  %v8074_v40 = vcombine.low %v7770_v14, %v12669_v28  ;;  %v14464_v20 = vld [vmem:[#allocation77_spill] sm:$0xff] }
 0x274   : > { %v3744_v5 = vor.u32 %v3743_v12, %v3739_v1  ;;  %v5252_v22 = vrot.slane %v5250_v59, 1  ;;  %v5275_v57 = vshrl.u32 %v14464_v20, 16  ;;  %v5278_v55 = vshll.u32 %v14464_v20, 16 }
 0x275   : > { %v3084_v3 = vpop.permute.xlu0 %3083  ;;  %6185 = vrot.lane.b32.xlu1 %v6148_v21, %s9443_s18  ;;  %v12637_v41 = vpop.f32.mrb[28].mxu0  ;;  %v4689_v25 = vsel %vm4485_vm4, %v4680_v56, %v4688_v50  ;;  %v4922_v21 = vsel %vm4886_vm7, %v4920_v35, %v4921_v13  ;;  %v2433_v56 = vrot.slane %v8074_v40, 2  ;;  %v9228_v50 = vld [vmem:[%s9503_s28 + $0x9c] sm:$0xff]  }
 0x276   : > { %v3635_v16 = vsel %vm3603_vm15, %v3570_v62, %v3084_v3  ;;  %14456 = vst [vmem:[#allocation59_spill] sm:$0xff] %v12637_v41  ;;  %v12641_v42 = vpop.f32.mrb[29].mxu0  ;;  %v8239_v62 = vld [vmem:[%s9503_s28 + $0x9c] sm:$0x8]  ;;  %v14463_v3 = vld [vmem:[#allocation79_spill] sm:$0xff]  ;;  %v14465_v41 = vld [vmem:[#allocation18_spill] sm:$0xff] }
 0x277   : > { %v3745_v30 = vshll.u32 %v3635_v16, 16  ;;  %4778 = vrot.lane.b32.xlu0 %v4672_v24, %s9436_s29  ;;  %v12635_v39 = vpop.permute.xlu1 %5061  ;;  %14457 = vst [vmem:[#allocation57_spill] sm:$0xff] %v12641_v42  ;;  %v12648_v17 = vpop.f32.mrb[30].mxu0  ;;  %v5255_v24 = vrot.slane %v5253_v23, 2  ;;  %v5267_v16 = vshrl.u32 %v14463_v3, 16  ;;  %v5270_v0 = vshll.u32 %v14463_v3, 16 }
 0x278   : > { %14459 = vst [vmem:[#allocation63_spill] sm:$0xff] %v12648_v17  ;;  %v12658_v27 = vpop.f32.mrb[31].mxu0  ;;  %v8447_v35 = vcombine.low %v8239_v62, %v12280_v9  ;;  %v5462_v23 = vrot.slane %v12284_v37, 3  ;;  %v12722_v62 = vld [vmem:[%s9503_s28 + $0xd0] sm:$0xf] }
 0x279   : > { %v3747_v46 = vrot.slane %v3745_v30, 1  ;;  %v12639_v38 = vpop.permute.xlu0 %5059  ;;  %3095 = vrot.lane.b32.xlu1 %v3036_v33, %s9443_s18  ;;  %v14461_v33 = vld [vmem:[#allocation73_spill] sm:$0xff]  ;;  %14462 = vst [vmem:[#allocation61_spill] sm:$0xff] %v12658_v27  ;;  %v9227_v30 = vld [vmem:[%s9503_s28 + $0xa8] sm:$0xff]   ;;  %v5269_v34 = vrot.slane %v5267_v16, 1  ;;  %v5272_v59 = vrot.slane %v5270_v0, 2 }
 0x27a   : > { %v5258_v6 = vshrl.u32 %v14461_v33, 16  ;;  %v5261_v26 = vshll.u32 %v14461_v33, 16 }
 0x27b   : > { %2891 = vrot.lane.b32.xlu0 %v14460_v51, %s9442_s13  ;;  %v3748_v61 = vsel %vm3668_vm2, %v3744_v5, %v3747_v46  ;;  %v12661_v43 = vpop.permute.xlu1 %2477  ;;  %v14135_v5 = vrot.slane %v12673_v49, 2  ;;  %v5256_v46 = vor.u32 %v5255_v24, %v5252_v22  ;;  %v5277_v51 = vrot.slane %v5275_v57, 1  ;;  %v12712_v22 = vld [vmem:[%s9503_s28 + $0xc8] ss:$0 sps:$4 sm:$0x77]  }
 0x27c   : > { %8708 = vmatmul.mubr.msk.bf16.gmra.mrb[12].mxu1 %vm3849_vm3, %v3748_v61  ;;  %v5260_v48 = vrot.slane %v5258_v6, 1  ;;  %v5263_v11 = vrot.slane %v5261_v26, 2  ;;  %v5280_v61 = vrot.slane %v5278_v55, 2  ;;  %v5273_v26 = vor.u32 %v5272_v59, %v5269_v34  ;;  %v8240_v24 = vld [vmem:[%s9503_s28 + $0xa8] sm:$0x8] }
 0x27d   : > { %v12664_v47 = vpop.permute.xlu0 %5363  ;;  %4955 = vrot.lane.b32.xlu1 %v4919_v58, %s9437_s30  ;;  %v2435_v9 = vsel %vm1788_vm1, %v2433_v56, %v14135_v5  ;;  %v8448_v3 = vcombine.low %v8240_v24, %v12321_v4  ;;  %v14134_v57 = vrot.slane %v12712_v22, 2  ;;  %v8297_v55 = vld [vmem:[%s9503_s28 + $0xc0] sm:$0xe]  ;;  %v7626_v56 = vld [vmem:[%s9503_s28 + $0x6c] sm:$0xf] }
 0x27e   : > { %v5264_v58 = vor.u32 %v5263_v11, %v5260_v48  ;;  %v7814_v11 = vld [vmem:[%s9503_s28 + $0xcc] sm:$0xf]  ;;  %v12736_v4 = vld [vmem:[%s9503_s28 + $0xc4] sm:$0xf]  ;;  %v9394_v24 = vld [vmem:[%s9503_s28 + $0x7c] sm:$0xf] }
 0x27f   : > { %4780 = vrot.lane.b32.xlu0 %v4689_v25, %s9436_s29  ;;  %v12676_v12 = vpop.permute.xlu1 %5491  ;;  %v5281_v25 = vor.u32 %v5280_v61, %v5277_v51  ;;  %v8489_v34 = vcombine.low %v8297_v55, %v12736_v4  ;;  %v5464_v59 = vrot.slane %v8448_v3, 3 }
 0x280   : > { %v5265_v6 = vsel %vm4485_vm4, %v5256_v46, %v5264_v58  ;;  %v8929_v46 = vld [vmem:[%s9503_s28 + $0x74] ss:$0 sps:$4 sm:$0x11]   ;;  %v7629_v58 = vld [vmem:[%s9503_s28 + $0x78] sm:$0xf] }
 0x281   : > { %v12683_v1 = vpop.permute.xlu0 %5365  ;;  %4957 = vrot.lane.b32.xlu1 %v4922_v21, %s9437_s30  ;;  %v12708_v21 = vld [vmem:[%s9503_s28 + $0xc4] sm:$0xf]  ;;  %v5282_v0 = vsel %vm4485_vm4, %v5273_v26, %v5281_v25  ;;  %v7817_v26 = vld [vmem:[%s9503_s28 + $0xd8] sm:$0xf]  ;;  %v9393_v25 = vld [vmem:[%s9503_s28 + $0x70] sm:$0xf]  ;;  %v3170_v27 = vsel %vm845_vm6, %v8929_v46, %v14465_v41 }
 0x282   : > { %v8076_v40 = vcombine.low %v7772_v54, %v12708_v21  ;;  %v5465_v54 = vrot.slane %v12325_v45, 3  ;;  %v12763_v45 = vld [vmem:[%s9503_s28 + $0xdc] sm:$0xf]  ;;  %v5893_v5 = vshll.u32 %v8489_v34, 16  ;;  %v8267_v46 = vld [vmem:[%s9503_s28 + $0xcc] sm:$0xf] }
 0x283   : > { %3099 = vrot.lane.b32.xlu0 %v3039_v60, %s9443_s18  ;;  %v12693_v13 = vpop.permute.xlu1 %2669  ;;  %v5461_v60 = vrot.slane %v8447_v35, 3  ;;  %v8265_v35 = vld [vmem:[%s9503_s28 + $0xc0] sm:$0xf]  ;;  %v8108_v41 = vcombine.low %v7817_v26, %v12763_v45 }
 0x284   : > { %v2436_v20 = vrot.slane %v8076_v40, 2  ;;  %v7906_v40 = vcombine.low %v7626_v56, %v9393_v25  ;;  %v12771_v25 = vld [vmem:[%s9503_s28 + $0xd4] ss:$0 sps:$4 sm:$0x33]   ;;  %v14469_v26 = vld [vmem:[#allocation62_spill] sm:$0xff] }
 0x285   : > { %v12695_v14 = vpop.permute.xlu0 %2481  ;;  %5069 = vrot.lane.b32.xlu1 %v9227_v30, %s9438_s7  ;;  %v5463_v37 = vsel %vm4886_vm7, %v5461_v60, %v5462_v23  ;;  %v9243_v60 = vld [vmem:[%s9503_s28 + $0xc8] ss:$0 sps:$4 sm:$0x33]   ;;  %v8933_v23 = vld [vmem:[%s9503_s28 + $0x80] ss:$0 sps:$4 sm:$0x11]  }
 0x286   : > { %v2438_v61 = vsel %vm1788_vm1, %v2436_v20, %v14134_v57  ;;  %v8299_v20 = vld [vmem:[%s9503_s28 + $0xcc] sm:$0xe]  ;;  %v12779_v57 = vld [vmem:[%s9503_s28 + $0xd0] sm:$0xf]  ;;  %v5901_v17 = vshll.u32 %v9243_v60, 16 }
 0x287   : > { %5067 = vrot.lane.b32.xlu0 %v9228_v50, %s9438_s7  ;;  %v12704_v33 = vpop.permute.xlu1 %5603  ;;  %v8106_v50 = vcombine.low %v7814_v11, %v12722_v62  ;;  %v4077_v11 = vld [vmem:[%s9503_s28 + $0x48] sm:$0xf]  ;;  %v8491_v19 = vcombine.low %v8299_v20, %v12779_v57 }
 0x288   : > { %v8347_v15 = vcombine.low %v4077_v11, %v9395_v63 }
 0x289   : > { %v12715_v48 = vpop.permute.xlu0 %5493  ;;  %2493 = vrot.lane.b32.xlu1 %v2435_v9, %s9440_s9  ;;  %v7850_v9 = vld [vmem:[%s9503_s28 + $0xcc] sm:$0xe] }
 0x28a   : > { %v8138_v56 = vcombine.low %v7850_v9, %v12722_v62 }
 0x28b   : > { %5371 = vrot.lane.b32.xlu0 %v5265_v6, %s9439_s8  ;;  %v12725_v16 = vpop.permute.xlu1 %2673 }
 0x28c   : > { %v2833_v20 = vrot.slane %v8138_v56, 1  ;;  %v12812_v56 = vld [vmem:[%s9503_s28 + $0xe0] ss:$0 sps:$4 sm:$0x33]  }
 0x28d   : > { %v12730_v30 = vpop.permute.xlu0 %2479  ;;  %5499 = vrot.lane.b32.xlu1 %v5463_v37, %s9440_s9  ;;  %v7908_v37 = vcombine.low %v7629_v58, %v9394_v24  ;;  %v5890_v58 = vshrl.u32 %v8489_v34, 16  ;;  %v14468_v34 = vld [vmem:[#allocation21_spill] sm:$0xff] }
 0x28f   : > { %5373 = vrot.lane.b32.xlu0 %v5282_v0, %s9439_s8  ;;  %v12743_v51 = vpop.permute.xlu1 %5605  ;;  %v12759_v3 = vpop.f32.mrb[0].mxu1  ;;  %v8463_v0 = vcombine.low %v8265_v35, %v12736_v4  ;;  %v5466_v35 = vsel %vm4886_vm7, %v5464_v59, %v5465_v54  ;;  %v3167_v59 = vsel %vm845_vm6, %v7906_v40, %v14466_v29  ;;  %v14467_v54 = vld [vmem:[#allocation20_spill] sm:$0xff]  ;;  %v5892_v29 = vrot.slane %v5890_v58, 1 }
 0x290   : > { %v12767_v55 = vpop.f32.mrb[1].mxu1  ;;  %v3176_v18 = vsel %vm845_vm6, %v8933_v23, %v14467_v54  ;;  %v9248_v40 = vld [vmem:[%s9503_s28 + $0xd4] ss:$0 sps:$4 sm:$0x33]   ;;  %v5895_v23 = vrot.slane %v5893_v5, 2  ;;  %v5903_v54 = vrot.slane %v5901_v17, 2  ;;  %v3247_v63 = vsel %vm3213_vm9, %v3167_v59, %v14470_v10 }
 0x291   : > { %v12752_v6 = vpop.permute.xlu0 %2877  ;;  %2685 = vrot.lane.b32.xlu1 %v8106_v50, %s9441_s12  ;;  %v12775_v50 = vpop.f32.mrb[2].mxu1  ;;  %v5907_v58 = vshrl.u32 %v8491_v19, 16  ;;  %v12816_v5 = vsel %vm3213_vm9, %v3176_v18, %v14471_v2  ;;  %v8464_v10 = vcombine.low %v8267_v46, %v12779_v57  ;;  %v4079_v59 = vld [vmem:[%s9503_s28 + $0x54] sm:$0xf]  ;;  %v14475_v2 = vrot.slane %v12771_v25, 1 }
 0x292   : > { %v12785_v42 = vpop.f32.mrb[3].mxu1 }
 0x293   : > { %2497 = vrot.lane.b32.xlu0 %v2438_v61, %s9440_s9  ;;  %v12773_v24 = vpop.permute.xlu1 %2483  ;;  %v5898_v61 = vshrl.u32 %v9243_v60, 16  ;;  %v3173_v60 = vsel %vm845_vm6, %v7908_v37, %v14468_v34  ;;  %v3249_v34 = vsel %vm3213_vm9, %v3170_v27, %v14469_v26  ;;  %v6219_v27 = vsel %vm845_vm6, %v8347_v15, %v12558_v53 }
 0x294   : > { %v2835_v18 = vsel %vm1579_vm0, %v2833_v20, %v14475_v2  ;;  %v5918_v26 = vshll.u32 %v9248_v40, 16  ;;  %v5896_v15 = vor.u32 %v5895_v23, %v5892_v29  ;;  %v12840_v20 = vrot.slane %v5907_v58, 1  ;;  %v7882_v2 = vld [vmem:[%s9503_s28 + $0xcc] sm:$0xc]  ;;  %v9396_v23 = vld [vmem:[%s9503_s28 + $0x58] sm:$0xf] }
 0x295   : > { %v12783_v9 = vpop.permute.xlu0 %6003  ;;  %5611 = vrot.lane.b32.xlu1 %v8463_v0, %s9441_s12  ;;  %v5900_v37 = vrot.slane %v5898_v61, 1  ;;  %v8140_v0 = vcombine.low %v7852_v44, %v12763_v45  ;;  %v14472_v61 = vld [vmem:[#allocation68_spill] sm:$0xff] }
 0x296   : > { %v3251_v17 = vsel %vm3213_vm9, %v3173_v60, %v14472_v61  ;;  %v14473_v44 = vld [vmem:[#allocation112_spill] sm:$0xff]  ;;  %v5915_v60 = vshrl.u32 %v9248_v40, 16 }
 0x297   : > { %5501 = vrot.lane.b32.xlu0 %v5466_v35, %s9440_s9  ;;  %v12802_v52 = vpop.permute.xlu1 %2881  ;;  %v5910_v35 = vshll.u32 %v8491_v19, 16  ;;  %v3314_v7 = vsel %vm3278_vm10, %v3249_v34, %v14473_v44  ;;  %v14474_v19 = vrot.slane %v12673_v49, 2  ;;  %v5904_v53 = vor.u32 %v5903_v54, %v5900_v37  ;;  %v8329_v54 = vld [vmem:[%s9503_s28 + $0xc0] sm:$0x8] }
 0x298   : > { %v2836_v34 = vrot.slane %v8140_v0, 1  ;;  %v8348_v37 = vcombine.low %v4079_v59, %v9396_v23  ;;  %v14478_v0 = vld [vmem:[#allocation40_spill] sm:$0xff]  ;;  %v9253_v23 = vld [vmem:[%s9503_s28 + $0xc8] ss:$0 sps:$4 sm:$0x77]  }
 0x299   : > { %v12809_v11 = vpop.permute.xlu0 %2671  ;;  %2689 = vrot.lane.b32.xlu1 %v8108_v41, %s9441_s12  ;;  %v6260_v41 = vsel %vm3213_vm9, %v6219_v27, %v12603_v32  ;;  %v5912_v40 = vrot.slane %v5910_v35, 2  ;;  %v3312_v32 = vsel %vm3278_vm10, %v3247_v63, %v14476_v36  ;;  %v14477_v27 = vld [vmem:[#allocation115_spill] sm:$0xff]  ;;  %v12854_v58 = vsel %vm3343_vm11, %v3314_v7, %v14478_v0  ;;  %v4121_v59 = vld [vmem:[%s9503_s28 + $0x90] sm:$0xe] }
 0x29a   : > { %v6292_v61 = vsel %vm3278_vm10, %v6260_v41, %v12639_v38  ;;  %v3316_v29 = vsel %vm3278_vm10, %v3251_v17, %v14477_v27  ;;  %v5917_v36 = vrot.slane %v5915_v60, 1  ;;  %v5920_v63 = vrot.slane %v5918_v26, 2  ;;  %v12860_v17 = vld [vmem:[%s9503_s28 + $0x94] sm:$0xf]  ;;  %v14479_v41 = vld [vmem:[#allocation133_spill] sm:$0xff] }
 0x29b   : > { %2495 = vrot.lane.b32.xlu0 %v14474_v19, %s9440_s9  ;;  %v12835_v46 = vpop.permute.xlu1 %6005  ;;  %v2837_v19 = vrot.slane %v12812_v56, 1  ;;  %v6324_v38 = vsel %vm3343_vm11, %v6292_v61, %v12664_v47  ;;  %v3377_v47 = vsel %vm3343_vm11, %v3312_v32, %v14479_v41  ;;  %v5905_v61 = vsel %vm4485_vm4, %v5896_v15, %v5904_v53  ;;  %v12912_v41 = vld [vmem:[%s9503_s28 + $0xe0] ss:$0 sps:$4 sm:$0x77]  }
 0x29c   : > { %v6356_v35 = vsel %vm3408_vm12, %v6324_v38, %v12676_v12  ;;  %v8170_v12 = vcombine.low %v7882_v2, %v12722_v62  ;;  %v8521_v27 = vcombine.low %v8329_v54, %v12736_v4  ;;  %v6222_v62 = vsel %vm845_vm6, %v8348_v37, %v12608_v31  ;;  %v7884_v2 = vld [vmem:[%s9503_s28 + $0xd8] sm:$0xc]  ;;  %v9246_v31 = vld [vmem:[%s9503_s28 + $0xd4] ss:$0 sps:$4 sm:$0x11]  }
 0x29d   : > { %v3086_v44 = vpop.permute.xlu0 %3085  ;;  %5613 = vrot.lane.b32.xlu1 %v8464_v10, %s9441_s12  ;;  %v6388_v10 = vsel %vm3473_vm13, %v6356_v35, %v12704_v33  ;;  %v2838_v32 = vsel %vm1579_vm0, %v2836_v34, %v2837_v19  ;;  %v5913_v33 = vor.u32 %v5912_v40, %v12840_v20  ;;  %v3442_v15 = vsel %vm3408_vm12, %v3377_v47, %v12661_v43  ;;  %v9260_v40 = vld [vmem:[%s9503_s28 + $0x98] ss:$0 sps:$4 sm:$0x33]   ;;  %v8331_v47 = vld [vmem:[%s9503_s28 + $0xcc] sm:$0x8] }
 0x29e   : > { %v6420_v60 = vsel %vm3538_vm14, %v6388_v10, %v12783_v9  ;;  %v14480_v53 = vrot.slane %v12712_v22, 2  ;;  %v8381_v34 = vcombine.low %v4121_v59, %v12860_v17  ;;  %v6262_v20 = vsel %vm3213_vm9, %v6222_v62, %v12626_v8 }
 0x29f   : > { %2893 = vrot.lane.b32.xlu0 %v2835_v18, %s9442_s13  ;;  %v12867_v7 = vpop.permute.xlu1 %2675  ;;  %v12872_v18 = vld [vmem:[%s9503_s28 + $0xd4] ss:$0 sps:$4 sm:$0x77]   ;;  %v3507_v4 = vsel %vm3473_vm13, %v3442_v15, %v12693_v13  ;;  %v5921_v43 = vor.u32 %v5920_v63, %v5917_v36  ;;  %v6294_v37 = vsel %vm3278_vm10, %v6262_v20, %v12635_v39  ;;  %v3041_v8 = vrot.slane %v8170_v12, 2 }
 0x2a0   : > { %v3572_v38 = vsel %vm3538_vm14, %v3507_v4, %v12752_v6  ;;  %v3042_v0 = vrot.slane %v12872_v18, 2  ;;  %v6326_v13 = vsel %vm3343_vm11, %v6294_v37, %v12683_v1  ;;  %v6150_v36 = vrot.slane %v9253_v23, 3  ;;  %v9251_v23 = vld [vmem:[%s9503_s28 + $0xe0] ss:$0 sps:$4 sm:$0x11]  }
 0x2a1   : > { %v6180_v26 = vpop.permute.xlu0 %6179  ;;  %2499 = vrot.lane.b32.xlu1 %v14480_v53, %s9440_s9  ;;  %v12908_v35 = vsel %vm3603_vm15, %v3572_v38, %v3086_v44  ;;  %v8172_v63 = vcombine.low %v7884_v2, %v12763_v45  ;;  %v6358_v39 = vsel %vm3408_vm12, %v6326_v13, %v12715_v48  ;;  %v6149_v6 = vrot.slane %v8521_v27, 3  ;;  %v4123_v53 = vld [vmem:[%s9503_s28 + $0x9c] sm:$0xe]  ;;  %v9258_v20 = vld [vmem:[%s9503_s28 + $0xd4] ss:$0 sps:$4 sm:$0x77]  }
 0x2a2   : > { %v6452_v9 = vsel %vm3603_vm15, %v6420_v60, %v6180_v26  ;;  %v4691_v10 = vshrl.u32 %v8381_v34, 16  ;;  %v6390_v1 = vsel %vm3473_vm13, %v6358_v39, %v12743_v51  ;;  %v5922_v45 = vsel %vm4485_vm4, %v5913_v33, %v5921_v43  ;;  %v14481_v60 = vld [vmem:[#allocation44_spill] sm:$0xff] }
 0x2a3   : > { %6011 = vrot.lane.b32.xlu0 %v5905_v61, %s9442_s13  ;;  %8745 = vmatprep.mubr.msk.bf16.mxu0 %vm3849_vm3, %v6452_v9  ;;  %v3090_v54 = vpop.permute.xlu1 %3089  ;;  %v4694_v61 = vshll.u32 %v8381_v34, 16  ;;  %v4699_v44 = vshrl.u32 %v9260_v40, 16  ;;  %v4702_v12 = vshll.u32 %v9260_v40, 16  ;;  %v3381_v48 = vsel %vm3343_vm11, %v3316_v29, %v14481_v60 }
 0x2a4   : > { %v6422_v26 = vsel %vm3538_vm14, %v6390_v1, %v12835_v46  ;;  %v3043_v51 = vsel %vm1788_vm1, %v3041_v8, %v3042_v0  ;;  %v3044_v15 = vrot.slane %v8172_v63, 2  ;;  %v3045_v9 = vrot.slane %v12912_v41, 2  ;;  %v12937_v46 = vld [vmem:[%s9503_s28 + $0xa0] sm:$0xf]  ;;  %v4153_v1 = vld [vmem:[%s9503_s28 + $0x90] sm:$0x8] }
 0x2a5   : > { %v2880_v59 = vpop.permute.xlu0 %2879  ;;  %2897 = vrot.lane.b32.xlu1 %v2838_v32, %s9442_s13  ;;  %v3751_v32 = vshll.u32 %v12908_v35, 16  ;;  %v8523_v29 = vcombine.low %v8331_v47, %v12779_v57  ;;  %v3444_v2 = vsel %vm3408_vm12, %v12854_v58, %v12730_v30  ;;  %v6151_v34 = vsel %vm4886_vm7, %v6149_v6, %v6150_v36  ;;  %v9264_v30 = vld [vmem:[%s9503_s28 + $0xa4] ss:$0 sps:$4 sm:$0x33]   ;;  %v7776_v41 = vld [vmem:[%s9503_s28 + $0xd8] sm:$0xc] }
 0x2a6   : > { %v4693_v4 = vrot.slane %v4691_v10, 1  ;;  %v3446_v43 = vsel %vm3408_vm12, %v3381_v48, %v12695_v14  ;;  %v3509_v57 = vsel %vm3473_vm13, %v3444_v2, %v12809_v11  ;;  %v4701_v40 = vrot.slane %v4699_v44, 1 }
 0x2a7   : > { %2687 = vrot.lane.b32.xlu0 %v9246_v31, %s9441_s12  ;;  %v6182_v27 = vpop.permute.xlu1 %6181  ;;  %v4696_v31 = vrot.slane %v4694_v61, 2  ;;  %v4704_v37 = vrot.slane %v4702_v12, 2  ;;  %v3511_v58 = vsel %vm3473_vm13, %v3446_v43, %v12725_v16  ;;  %v3753_v38 = vrot.slane %v3751_v32, 1 }
 0x2a8   : > { %v6454_v62 = vsel %vm3603_vm15, %v6422_v26, %v6182_v27  ;;  %v3574_v8 = vsel %vm3538_vm14, %v3509_v57, %v2880_v59  ;;  %v8383_v36 = vcombine.low %v4123_v53, %v12937_v46  ;;  %v3576_v14 = vsel %vm3538_vm14, %v3511_v58, %v12802_v52  ;;  %v9262_v53 = vld [vmem:[%s9503_s28 + $0x98] ss:$0 sps:$4 sm:$0x77]  }
 0x2a9   : > { %v12932_v33 = vpop.permute.xlu0 %4774  ;;  %6013 = vrot.lane.b32.xlu1 %v5922_v45, %s9442_s13  ;;  %8746 = vmatmul.mubr.msk.bf16.gmra.mrb[44].mxu0 %vm3849_vm3, %v6454_v62  ;;  %v3046_v39 = vsel %vm1788_vm1, %v3044_v15, %v3045_v9  ;;  %v6152_v6 = vrot.slane %v8523_v29, 3  ;;  %v3749_v16 = vshrl.u32 %v12908_v35, 16  ;;  %v3641_v47 = vsel %vm3603_vm15, %v3576_v14, %v3090_v54  ;;  %v14482_v54 = vld [vmem:[#allocation114_spill] sm:$0xff] }
 0x2aa   : > { %v6153_v10 = vrot.slane %v9258_v20, 3  ;;  %v4697_v61 = vor.u32 %v4696_v31, %v4693_v4  ;;  %v4705_v52 = vor.u32 %v4704_v37, %v4701_v40  ;;  %v4716_v45 = vshrl.u32 %v9264_v30, 16  ;;  %v4155_v31 = vld [vmem:[%s9503_s28 + $0x9c] sm:$0x8] }
 0x2ab   : > { %3101 = vrot.lane.b32.xlu0 %v3043_v51, %s9443_s18  ;;  %v3088_v13 = vpop.permute.xlu1 %3087  ;;  %v4719_v44 = vshll.u32 %v9264_v30, 16  ;;  %v3754_v12 = vor.u32 %v3753_v38, %v3749_v16  ;;  %v4708_v26 = vshrl.u32 %v8383_v36, 16  ;;  %v4711_v35 = vshll.u32 %v8383_v36, 16  ;;  %v9266_v36 = vld [vmem:[%s9503_s28 + $0xa4] ss:$0 sps:$4 sm:$0x77]  }
 0x2ac   : > { %v3639_v11 = vsel %vm3603_vm15, %v3574_v8, %v3088_v13  ;;  %v3318_v32 = vsel %vm3278_vm10, %v12816_v5, %v14482_v54  ;;  %v3761_v27 = vshll.u32 %v3641_v47, 16  ;;  %v8413_v29 = vcombine.low %v4153_v1, %v12860_v17 }
 0x2ad   : > { %v2884_v63 = vpop.permute.xlu0 %2883  ;;  %v3755_v59 = vshll.u32 %v3639_v11, 16  ;;  %2691 = vrot.lane.b32.xlu1 %v9251_v23, %s9441_s12  ;;  %v14483_v23 = vld [vmem:[#allocation46_spill] sm:$0xff]  ;;  %v6154_v5 = vsel %vm4886_vm7, %v6152_v6, %v6153_v10  ;;  %v4706_v20 = vsel %vm4485_vm4, %v4697_v61, %v4705_v52  ;;  %v4718_v4 = vrot.slane %v4716_v45, 1  ;;  %v14485_v61 = vld [vmem:[#allocation83_spill] sm:$0xff] }
 0x2ae   : > { %v3383_v62 = vsel %vm3343_vm11, %v3318_v32, %v14483_v23  ;;  %v4710_v57 = vrot.slane %v4708_v26, 1  ;;  %v4721_v40 = vrot.slane %v4719_v44, 2  ;;  %v3763_v37 = vrot.slane %v3761_v27, 1  ;;  %v7774_v45 = vld [vmem:[%s9503_s28 + $0xcc] sm:$0xc] }
 0x2af   : > { %6187 = vrot.lane.b32.xlu0 %v6151_v34, %s9443_s18  ;;  %v3757_v60 = vrot.slane %v3755_v59, 1  ;;  %v12968_v48 = vpop.permute.xlu1 %4951  ;;  %v3448_v2 = vsel %vm3408_vm12, %v3383_v62, %v12773_v24  ;;  %v14484_v34 = vrot.slane %v12771_v25, 1  ;;  %v4713_v24 = vrot.slane %v4711_v35, 2  ;;  %v13030_v32 = vld [vmem:[%s9503_s28 + $0xd0] sm:$0xf] }
 0x2b0   : > { %v3513_v17 = vsel %vm3473_vm13, %v3448_v2, %v12867_v7  ;;  %v4923_v38 = vrot.slane %v8413_v29, 3  ;;  %v4924_v8 = vrot.slane %v9262_v53, 3  ;;  %v8415_v13 = vcombine.low %v4155_v31, %v12937_v46  ;;  %v13034_v23 = vld [vmem:[%s9503_s28 + $0xd4] ss:$0 sps:$4 sm:$0x77]  }
 0x2b1   : > { %v12973_v51 = vpop.permute.xlu0 %4776  ;;  %3105 = vrot.lane.b32.xlu1 %v3046_v39, %s9443_s18  ;;  %v3758_v15 = vsel %vm3668_vm2, %v3754_v12, %v3757_v60  ;;  %v3578_v25 = vsel %vm3538_vm14, %v3513_v17, %v2884_v63  ;;  %v3759_v14 = vshrl.u32 %v3641_v47, 16  ;;  %v4714_v39 = vor.u32 %v4713_v24, %v4710_v57  ;;  %v14486_v12 = vld [vmem:[#allocation81_spill] sm:$0xff]  ;;  %v8241_v31 = vld [vmem:[%s9503_s28 + $0xb4] sm:$0x8] }
 0x2b2   : > { %8711 = vmatprep.mubr.msk.bf16.mxu1 %vm3849_vm3, %v3758_v15  ;;  %v4722_v6 = vor.u32 %v4721_v40, %v4718_v4  ;;  %v4925_v46 = vsel %vm4886_vm7, %v4923_v38, %v4924_v8  ;;  %v4926_v10 = vrot.slane %v8415_v13, 3  ;;  %v4927_v47 = vrot.slane %v9266_v36, 3  ;;  %v14492_v57 = vld [vmem:[#allocation85_spill] sm:$0xff] }
 0x2b3   : > { %2895 = vrot.lane.b32.xlu0 %v14484_v34, %s9442_s13  ;;  %v12992_v43 = vpop.permute.xlu1 %4953  ;;  %v3764_v63 = vor.u32 %v3763_v37, %v3759_v14  ;;  %v5284_v52 = vshrl.u32 %v14485_v61, 16  ;;  %v5287_v44 = vshll.u32 %v14485_v61, 16  ;;  %v5292_v18 = vshrl.u32 %v14486_v12, 16  ;;  %v14490_v34 = vld [vmem:[#allocation86_spill] sm:$0xff] }
 0x2b4   : > { %v4723_v26 = vsel %vm4485_vm4, %v4714_v39, %v4722_v6  ;;  %v4928_v54 = vsel %vm4886_vm7, %v4926_v10, %v4927_v47  ;;  %v8078_v27 = vcombine.low %v7774_v45, %v13030_v32  ;;  %v5304_v17 = vshll.u32 %v14490_v34, 16 }
 0x2b5   : > { %v3092_v30 = vpop.permute.xlu0 %3091  ;;  %6189 = vrot.lane.b32.xlu1 %v6154_v5, %s9443_s18  ;;  %v5286_v62 = vrot.slane %v5284_v52, 1  ;;  %v5289_v29 = vrot.slane %v5287_v44, 2  ;;  %v5294_v53 = vrot.slane %v5292_v18, 1  ;;  %v5301_v5 = vshrl.u32 %v14490_v34, 16 }
 0x2b6   : > { %v3643_v58 = vsel %vm3603_vm15, %v3578_v25, %v3092_v30  ;;  %v5309_v24 = vshrl.u32 %v14492_v57, 16  ;;  %v5312_v40 = vshll.u32 %v14492_v57, 16  ;;  %v9267_v25 = vld [vmem:[%s9503_s28 + $0xc0] sm:$0xff]   ;;  %v2439_v30 = vrot.slane %v8078_v27, 2 }
 0x2b7   : > { %v3765_v7 = vshll.u32 %v3643_v58, 16  ;;  %4782 = vrot.lane.b32.xlu0 %v4706_v20, %s9436_s29  ;;  %v13000_v11 = vpop.permute.xlu1 %5065  ;;  %v9268_v58 = vld [vmem:[%s9503_s28 + $0xb4] sm:$0xff]   ;;  %v14137_v38 = vrot.slane %v13034_v23, 2  ;;  %v5290_v8 = vor.u32 %v5289_v29, %v5286_v62  ;;  %v8449_v36 = vcombine.low %v8241_v31, %v12669_v28  ;;  %v13077_v44 = vld [vmem:[%s9503_s28 + $0xe0] ss:$0 sps:$4 sm:$0x77]  }
 0x2b8   : > { %v5306_v39 = vrot.slane %v5304_v17, 2  ;;  %v5311_v6 = vrot.slane %v5309_v24, 1  ;;  %v7635_v31 = vld [vmem:[%s9503_s28 + $0x90] sm:$0xf] }
 0x2b9   : > { %v3767_v16 = vrot.slane %v3765_v7, 1  ;;  %v13002_v59 = vpop.permute.xlu0 %5063  ;;  %3103 = vrot.lane.b32.xlu1 %v3042_v0, %s9443_s18  ;;  %v5295_v0 = vshll.u32 %v14486_v12, 16  ;;  %v13023_v56 = vpop.f32.mrb[32].mxu0  ;;  %v5303_v7 = vrot.slane %v5301_v5, 1  ;;  %v2441_v28 = vsel %vm1788_vm1, %v2439_v30, %v14137_v38  ;;  %v8242_v12 = vld [vmem:[%s9503_s28 + $0xc0] sm:$0x8] }
 0x2ba   : > { %14487 = vst [vmem:[#allocation10_spill] sm:$0xff] %v13023_v56  ;;  %v7632_v5 = vld [vmem:[%s9503_s28 + $0x84] sm:$0xf]  ;;  %v8937_v57 = vld [vmem:[%s9503_s28 + $0x8c] ss:$0 sps:$4 sm:$0x11]  }
 0x2bb   : > { %2899 = vrot.lane.b32.xlu0 %v2837_v19, %s9442_s13  ;;  %v3768_v1 = vsel %vm3668_vm2, %v3764_v63, %v3767_v16  ;;  %v13018_v60 = vpop.permute.xlu1 %2485  ;;  %v13026_v19 = vpop.f32.mrb[33].mxu0  ;;  %v5297_v2 = vrot.slane %v5295_v0, 2  ;;  %v5314_v63 = vrot.slane %v5312_v40, 2  ;;  %v5307_v61 = vor.u32 %v5306_v39, %v5303_v7  ;;  %v7820_v0 = vld [vmem:[%s9503_s28 + $0xe4] sm:$0xf] }
 0x2bc   : > { %8712 = vmatmul.mubr.msk.bf16.gmra.mrb[16].mxu1 %vm3849_vm3, %v3768_v1  ;;  %14488 = vst [vmem:[#allocation11_spill] sm:$0xff] %v13026_v19  ;;  %v13037_v15 = vpop.f32.mrb[34].mxu0  ;;  %v13073_v1 = vld [vmem:[%s9503_s28 + $0xdc] sm:$0xf]  ;;  %v8269_v40 = vld [vmem:[%s9503_s28 + $0xd8] sm:$0xf] }
 0x2bd   : > { %v13021_v35 = vpop.permute.xlu0 %5367  ;;  %4959 = vrot.lane.b32.xlu1 %v4925_v46, %s9437_s30  ;;  %14489 = vst [vmem:[#allocation12_spill] sm:$0xff] %v13037_v15  ;;  %v13042_v4 = vpop.f32.mrb[35].mxu0  ;;  %v5298_v13 = vor.u32 %v5297_v2, %v5294_v53  ;;  %v5468_v46 = vrot.slane %v12673_v49, 3  ;;  %v5315_v52 = vor.u32 %v5314_v63, %v5311_v6  ;;  %v8080_v45 = vcombine.low %v7776_v41, %v13073_v1  ;;  %v8301_v2 = vld [vmem:[%s9503_s28 + $0xd8] sm:$0xe]  ;;  %v14502_v15 = vld [vmem:[#allocation72_spill] sm:$0xff] }
 0x2be   : > { %14491 = vst [vmem:[#allocation13_spill] sm:$0xff] %v13042_v4  ;;  %v14136_v53 = vrot.slane %v13077_v44, 2  ;;  %v7854_v7 = vld [vmem:[%s9503_s28 + $0xe4] sm:$0xe]  ;;  %v14508_v4 = vld [vmem:[#allocation117_spill] sm:$0xff] }
 0x2bf   : > { %4784 = vrot.lane.b32.xlu0 %v4723_v26, %s9436_s29  ;;  %v13040_v20 = vpop.permute.xlu1 %5495  ;;  %v5299_v47 = vsel %vm4485_vm4, %v5290_v8, %v5298_v13  ;;  %v13087_v26 = vld [vmem:[%s9503_s28 + $0xe8] sm:$0xf]  ;;  %v5316_v62 = vsel %vm4485_vm4, %v5307_v61, %v5315_v52  ;;  %v2442_v29 = vrot.slane %v8080_v45, 2  ;;  %v9283_v39 = vld [vmem:[%s9503_s28 + $0xe0] ss:$0 sps:$4 sm:$0x33]  }
 0x2c0   : > { %v8110_v17 = vcombine.low %v7820_v0, %v13087_v26  ;;  %v8941_v6 = vld [vmem:[%s9503_s28 + $0x98] ss:$0 sps:$4 sm:$0x11]   ;;  %v7823_v45 = vld [vmem:[%s9503_s28 + $0xf0] sm:$0xf]  ;;  %v8142_v0 = vcombine.low %v7854_v7, %v13087_v26 }
 0x2c1   : > { %v13048_v37 = vpop.permute.xlu0 %5369  ;;  %4961 = vrot.lane.b32.xlu1 %v4928_v54, %s9437_s30  ;;  %v8450_v54 = vcombine.low %v8242_v12, %v12708_v21  ;;  %v13102_v21 = vld [vmem:[%s9503_s28 + $0xdc] sm:$0xf]  ;;  %v8303_v12 = vld [vmem:[%s9503_s28 + $0xe4] sm:$0xe] }
 0x2c2   : > { %v8465_v52 = vcombine.low %v8269_v40, %v13102_v21  ;;  %v5935_v40 = vshll.u32 %v9283_v39, 16  ;;  %v13172_v56 = vld [vmem:[%s9503_s28 + $0xf8] ss:$0 sps:$4 sm:$0x33]  }
 0x2c3   : > { %3107 = vrot.lane.b32.xlu0 %v3045_v9, %s9443_s18  ;;  %v13058_v14 = vpop.permute.xlu1 %2677  ;;  %v5467_v9 = vrot.slane %v8449_v36, 3  ;;  %v5470_v30 = vrot.slane %v8450_v54, 3  ;;  %v2444_v36 = vsel %vm1788_vm1, %v2442_v29, %v14136_v53  ;;  %v13140_v54 = vld [vmem:[%s9503_s28 + $0xec] ss:$0 sps:$4 sm:$0x33]  }
 0x2c4   : > { %v14498_v53 = vld [vmem:[#allocation23_spill] sm:$0xff] }
 0x2c5   : > { %v13060_v16 = vpop.permute.xlu0 %2489  ;;  %5073 = vrot.lane.b32.xlu1 %v9267_v25, %s9438_s7  ;;  %v5469_v49 = vsel %vm4886_vm7, %v5467_v9, %v5468_v46  ;;  %v8493_v25 = vcombine.low %v8301_v2, %v13102_v21  ;;  %v9400_v9 = vld [vmem:[%s9503_s28 + $0x94] sm:$0xf] }
 0x2c6   : > { %v7912_v46 = vcombine.low %v7635_v31, %v9400_v9 }
 0x2c7   : > { %5071 = vrot.lane.b32.xlu0 %v9268_v58, %s9438_s7  ;;  %v13069_v10 = vpop.permute.xlu1 %5607  ;;  %v5471_v58 = vrot.slane %v12712_v22, 3  ;;  %v9399_v22 = vld [vmem:[%s9503_s28 + $0x88] sm:$0xf]  ;;  %v5927_v31 = vshll.u32 %v8493_v25, 16 }
 0x2c9   : > { %v13080_v18 = vpop.permute.xlu0 %5497  ;;  %2501 = vrot.lane.b32.xlu1 %v2441_v28, %s9440_s9  ;;  %v7910_v28 = vcombine.low %v7632_v5, %v9399_v22  ;;  %v5472_v2 = vsel %vm4886_vm7, %v5470_v30, %v5471_v58  ;;  %v13146_v5 = vld [vmem:[%s9503_s28 + $0xe8] sm:$0xf]  ;;  %v14500_v30 = vld [vmem:[#allocation25_spill] sm:$0xff] }
 0x2ca   : > { %v8495_v9 = vcombine.low %v8303_v12, %v13146_v5  ;;  %v3185_v58 = vsel %vm845_vm6, %v7912_v46, %v14500_v30  ;;  %v2839_v12 = vrot.slane %v8142_v0, 1 }
 0x2cb   : > { %5375 = vrot.lane.b32.xlu0 %v5299_v47, %s9439_s8  ;;  %v13090_v27 = vpop.permute.xlu1 %2681  ;;  %v4081_v47 = vld [vmem:[%s9503_s28 + $0x60] sm:$0xf]  ;;  %v3179_v38 = vsel %vm845_vm6, %v7910_v28, %v14498_v53 }
 0x2cc   : > { %v14503_v53 = vld [vmem:[#allocation74_spill] sm:$0xff] }
 0x2cd   : > { %v13095_v34 = vpop.permute.xlu0 %2487  ;;  %5503 = vrot.lane.b32.xlu1 %v5469_v49, %s9440_s9  ;;  %v13105_v24 = vpop.f32.mrb[4].mxu1  ;;  %v13136_v49 = vld [vmem:[%s9503_s28 + $0xf4] sm:$0xf] }
 0x2ce   : > { %14493 = vst [vmem:[#allocation45_spill] sm:$0xff] %v13105_v24  ;;  %v13111_v8 = vpop.f32.mrb[5].mxu1  ;;  %v14499_v24 = vld [vmem:[#allocation24_spill] sm:$0xff] }
 0x2cf   : > { %5377 = vrot.lane.b32.xlu0 %v5316_v62, %s9439_s8  ;;  %14494 = vst [vmem:[#allocation47_spill] sm:$0xff] %v13111_v8  ;;  %v13113_v13 = vpop.permute.xlu1 %5609  ;;  %v13121_v63 = vpop.f32.mrb[6].mxu1  ;;  %v5924_v62 = vshrl.u32 %v8493_v25, 16  ;;  %v8112_v25 = vcombine.low %v7823_v45, %v13136_v49  ;;  %v5937_v45 = vrot.slane %v5935_v40, 2 }
 0x2d0   : > { %14495 = vst [vmem:[#allocation49_spill] sm:$0xff] %v13121_v63  ;;  %v13128_v61 = vpop.f32.mrb[7].mxu1  ;;  %v3188_v63 = vsel %vm845_vm6, %v8941_v6, %v14499_v24  ;;  %v14501_v24 = vld [vmem:[#allocation69_spill] sm:$0xff] }
 0x2d1   : > { %v13123_v41 = vpop.permute.xlu0 %2885  ;;  %14496 = vst [vmem:[#allocation51_spill] sm:$0xff] %v13128_v61  ;;  %2693 = vrot.lane.b32.xlu1 %v8110_v17, %s9441_s12  ;;  %v5932_v17 = vshrl.u32 %v9283_v39, 16  ;;  %v7856_v39 = vld [vmem:[%s9503_s28 + $0xf0] sm:$0xe]  ;;  %v5926_v28 = vrot.slane %v5924_v62, 1  ;;  %v5941_v62 = vshrl.u32 %v8495_v9, 16 }
 0x2d2   : > { %v9288_v61 = vld [vmem:[%s9503_s28 + $0xec] ss:$0 sps:$4 sm:$0x33]   ;;  %v8144_v0 = vcombine.low %v7856_v39, %v13136_v49 }
 0x2d3   : > { %2505 = vrot.lane.b32.xlu0 %v2444_v36, %s9440_s9  ;;  %v13142_v29 = vpop.permute.xlu1 %2491  ;;  %v14497_v36 = vld [vmem:[#allocation22_spill] sm:$0xff]  ;;  %v5934_v30 = vrot.slane %v5932_v17, 1  ;;  %v14505_v17 = vld [vmem:[#allocation116_spill] sm:$0xff]  ;;  %v4083_v39 = vld [vmem:[%s9503_s28 + $0x6c] sm:$0xf] }
 0x2d4   : > { %v3182_v22 = vsel %vm845_vm6, %v8937_v57, %v14497_v36  ;;  %v8271_v57 = vld [vmem:[%s9503_s28 + $0xe4] sm:$0xf]  ;;  %v2842_v19 = vrot.slane %v8144_v0, 1 }
 0x2d5   : > { %v13150_v7 = vpop.permute.xlu0 %6007  ;;  %5615 = vrot.lane.b32.xlu1 %v8465_v52, %s9441_s12  ;;  %v9401_v36 = vld [vmem:[%s9503_s28 + $0x64] sm:$0xf]  ;;  %v3257_v6 = vsel %vm3213_vm9, %v3182_v22, %v14501_v24  ;;  %v5929_v52 = vrot.slane %v5927_v31, 2  ;;  %v13181_v22 = vsel %vm3213_vm9, %v3188_v63, %v14503_v53  ;;  %v14504_v24 = vld [vmem:[#allocation76_spill] sm:$0xff]  ;;  %v14507_v63 = vrot.slane %v13140_v54, 1 }
 0x2d6   : > { %v8349_v8 = vcombine.low %v4081_v47, %v9401_v36  ;;  %v3255_v47 = vsel %vm3213_vm9, %v3179_v38, %v14502_v15  ;;  %v5944_v36 = vshll.u32 %v8495_v9, 16  ;;  %v3259_v31 = vsel %vm3213_vm9, %v3185_v58, %v14504_v24  ;;  %v14510_v0 = vld [vmem:[#allocation134_spill] sm:$0xff] }
 0x2d7   : > { %5505 = vrot.lane.b32.xlu0 %v5472_v2, %s9440_s9  ;;  %v13169_v46 = vpop.permute.xlu1 %2889  ;;  %v3322_v40 = vsel %vm3278_vm10, %v3257_v6, %v14505_v17  ;;  %v8466_v15 = vcombine.low %v8271_v57, %v13146_v5  ;;  %v14506_v9 = vrot.slane %v13034_v23, 2  ;;  %v2841_v58 = vsel %vm1579_vm0, %v2839_v12, %v14507_v63  ;;  %v7886_v63 = vld [vmem:[%s9503_s28 + $0xe4] sm:$0xc] }
 0x2d8   : > { %v6225_v38 = vsel %vm845_vm6, %v8349_v8, %v12932_v33  ;;  %v5949_v53 = vshrl.u32 %v9288_v61, 16  ;;  %v5952_v6 = vshll.u32 %v9288_v61, 16  ;;  %v5930_v33 = vor.u32 %v5929_v52, %v5926_v28  ;;  %v9402_v52 = vld [vmem:[%s9503_s28 + $0x70] sm:$0xf] }
 0x2d9   : > { %v13176_v2 = vpop.permute.xlu0 %2679  ;;  %2697 = vrot.lane.b32.xlu1 %v8112_v25, %s9441_s12  ;;  %v6264_v25 = vsel %vm3213_vm9, %v6225_v38, %v12968_v48  ;;  %v5938_v8 = vor.u32 %v5937_v45, %v5934_v30  ;;  %v2843_v24 = vrot.slane %v13172_v56, 1  ;;  %v13205_v12 = vrot.slane %v5941_v62, 1  ;;  %v14509_v38 = vld [vmem:[#allocation119_spill] sm:$0xff]  ;;  %v8333_v45 = vld [vmem:[%s9503_s28 + $0xd8] sm:$0x8] }
 0x2da   : > { %v6296_v17 = vsel %vm3278_vm10, %v6264_v25, %v13002_v59  ;;  %v5946_v61 = vrot.slane %v5944_v36, 2  ;;  %v3320_v48 = vsel %vm3278_vm10, %v3255_v47, %v14508_v4  ;;  %v3324_v28 = vsel %vm3278_vm10, %v3259_v31, %v14509_v38  ;;  %v13225_v31 = vld [vmem:[%s9503_s28 + $0xac] sm:$0xf] }
 0x2db   : > { %2503 = vrot.lane.b32.xlu0 %v14506_v9, %s9440_s9  ;;  %v13200_v57 = vpop.permute.xlu1 %6009  ;;  %v8350_v30 = vcombine.low %v4083_v39, %v9402_v52  ;;  %v6328_v59 = vsel %vm3343_vm11, %v6296_v17, %v13021_v35  ;;  %v13219_v62 = vsel %vm3343_vm11, %v3322_v40, %v14510_v0  ;;  %v5951_v4 = vrot.slane %v5949_v53, 1  ;;  %v4125_v39 = vld [vmem:[%s9503_s28 + $0xa8] sm:$0xe]  ;;  %v13237_v17 = vld [vmem:[%s9503_s28 + $0xec] ss:$0 sps:$4 sm:$0x77]  }
 0x2dc   : > { %v6360_v36 = vsel %vm3408_vm12, %v6328_v59, %v13040_v20  ;;  %v5954_v47 = vrot.slane %v5952_v6, 2  ;;  %v14511_v25 = vld [vmem:[#allocation135_spill] sm:$0xff]  ;;  %v5939_v20 = vsel %vm4485_vm4, %v5930_v33, %v5938_v8  ;;  %v8525_v38 = vcombine.low %v8333_v45, %v13102_v21  ;;  %v9293_v52 = vld [vmem:[%s9503_s28 + $0xe0] ss:$0 sps:$4 sm:$0x77]  }
 0x2dd   : > { %v3094_v9 = vpop.permute.xlu0 %3093  ;;  %5617 = vrot.lane.b32.xlu1 %v8466_v15, %s9441_s12  ;;  %v3385_v35 = vsel %vm3343_vm11, %v3320_v48, %v14511_v25  ;;  %v6392_v15 = vsel %vm3473_vm13, %v6360_v36, %v13069_v10  ;;  %v2844_v48 = vsel %vm1579_vm0, %v2842_v19, %v2843_v24  ;;  %v5947_v10 = vor.u32 %v5946_v61, %v13205_v12  ;;  %v9300_v59 = vld [vmem:[%s9503_s28 + $0xb0] ss:$0 sps:$4 sm:$0x33]  }
 0x2de   : > { %v6424_v53 = vsel %vm3538_vm14, %v6392_v15, %v13150_v7  ;;  %v6228_v33 = vsel %vm845_vm6, %v8350_v30, %v12973_v51  ;;  %v14512_v7 = vrot.slane %v13077_v44, 2  ;;  %v8385_v19 = vcombine.low %v4125_v39, %v13225_v31 }
 0x2df   : > { %2901 = vrot.lane.b32.xlu0 %v2841_v58, %s9442_s13  ;;  %v13232_v40 = vpop.permute.xlu1 %2683  ;;  %v8174_v58 = vcombine.low %v7886_v63, %v13087_v26  ;;  %v3450_v26 = vsel %vm3408_vm12, %v3385_v35, %v13018_v60  ;;  %v7888_v63 = vld [vmem:[%s9503_s28 + $0xf0] sm:$0xc]  ;;  %v6266_v21 = vsel %vm3213_vm9, %v6228_v33, %v12992_v43  ;;  %v9286_v60 = vld [vmem:[%s9503_s28 + $0xec] ss:$0 sps:$4 sm:$0x11]   ;;  %v5955_v12 = vor.u32 %v5954_v47, %v5951_v4 }
 0x2e0   : > { %v3515_v51 = vsel %vm3473_vm13, %v3450_v26, %v13058_v14  ;;  %v6298_v61 = vsel %vm3278_vm10, %v6266_v21, %v13000_v11  ;;  %v3048_v43 = vrot.slane %v13237_v17, 2  ;;  %v6156_v25 = vrot.slane %v9293_v52, 3  ;;  %v13277_v47 = vld [vmem:[%s9503_s28 + $0xf8] ss:$0 sps:$4 sm:$0x77]  }
 0x2e1   : > { %v6184_v6 = vpop.permute.xlu0 %6183  ;;  %2507 = vrot.lane.b32.xlu1 %v14512_v7, %s9440_s9  ;;  %v3580_v30 = vsel %vm3538_vm14, %v3515_v51, %v13123_v41  ;;  %v3047_v0 = vrot.slane %v8174_v58, 2  ;;  %v6330_v14 = vsel %vm3343_vm11, %v6298_v61, %v13048_v37  ;;  %v8176_v4 = vcombine.low %v7888_v63, %v13136_v49  ;;  %v8335_v35 = vld [vmem:[%s9503_s28 + $0xe4] sm:$0x8]  ;;  %v9291_v52 = vld [vmem:[%s9503_s28 + $0xf8] ss:$0 sps:$4 sm:$0x11]  }
 0x2e2   : > { %v6456_v8 = vsel %vm3603_vm15, %v6424_v53, %v6184_v6  ;;  %v13273_v36 = vsel %vm3603_vm15, %v3580_v30, %v3094_v9  ;;  %v6362_v11 = vsel %vm3408_vm12, %v6330_v14, %v13080_v18  ;;  %v6155_v41 = vrot.slane %v8525_v38, 3  ;;  %v14513_v53 = vld [vmem:[#allocation137_spill] sm:$0xff]  ;;  %v4127_v7 = vld [vmem:[%s9503_s28 + $0xb4] sm:$0xe] }
 0x2e3   : > { %6015 = vrot.lane.b32.xlu0 %v5939_v20, %s9442_s13  ;;  %8749 = vmatprep.mubr.msk.bf16.mxu0 %vm3849_vm3, %v6456_v8  ;;  %v3098_v45 = vpop.permute.xlu1 %3097  ;;  %v4725_v15 = vshrl.u32 %v8385_v19, 16  ;;  %v4733_v20 = vshrl.u32 %v9300_v59, 16  ;;  %v6394_v37 = vsel %vm3473_vm13, %v6362_v11, %v13113_v13  ;;  %v5956_v49 = vsel %vm4485_vm4, %v5947_v10, %v5955_v12 }
 0x2e4   : > { %v4728_v9 = vshll.u32 %v8385_v19, 16  ;;  %v4736_v58 = vshll.u32 %v9300_v59, 16  ;;  %v3389_v18 = vsel %vm3343_vm11, %v3324_v28, %v14513_v53  ;;  %v6426_v6 = vsel %vm3538_vm14, %v6394_v37, %v13200_v57  ;;  %v13302_v57 = vld [vmem:[%s9503_s28 + $0xb8] sm:$0xf]  ;;  %v4157_v37 = vld [vmem:[%s9503_s28 + $0xa8] sm:$0x8] }
 0x2e5   : > { %v2888_v39 = vpop.permute.xlu0 %2887  ;;  %2905 = vrot.lane.b32.xlu1 %v2844_v48, %s9442_s13  ;;  %v3771_v48 = vshll.u32 %v13273_v36, 16  ;;  %v3049_v13 = vsel %vm1788_vm1, %v3047_v0, %v3048_v43  ;;  %v3050_v26 = vrot.slane %v8176_v4, 2  ;;  %v3051_v8 = vrot.slane %v13277_v47, 2  ;;  %v9298_v59 = vld [vmem:[%s9503_s28 + $0xec] ss:$0 sps:$4 sm:$0x77]  }
 0x2e6   : > { %v8527_v28 = vcombine.low %v8335_v35, %v13146_v5  ;;  %v3452_v63 = vsel %vm3408_vm12, %v13219_v62, %v13095_v34  ;;  %v6157_v19 = vsel %vm4886_vm7, %v6155_v41, %v6156_v25  ;;  %v4727_v21 = vrot.slane %v4725_v15, 1  ;;  %v9304_v34 = vld [vmem:[%s9503_s28 + $0xbc] ss:$0 sps:$4 sm:$0x33]  }
 0x2e7   : > { %2695 = vrot.lane.b32.xlu0 %v9286_v60, %s9441_s12  ;;  %v6186_v38 = vpop.permute.xlu1 %6185  ;;  %v4735_v51 = vrot.slane %v4733_v20, 1  ;;  %v3454_v60 = vsel %vm3408_vm12, %v3389_v18, %v13060_v16  ;;  %v3517_v5 = vsel %vm3473_vm13, %v3452_v63, %v13176_v2  ;;  %v4730_v12 = vrot.slane %v4728_v9, 2 }
 0x2e8   : > { %v6458_v33 = vsel %vm3603_vm15, %v6426_v6, %v6186_v38  ;;  %v4738_v61 = vrot.slane %v4736_v58, 2  ;;  %v3519_v62 = vsel %vm3473_vm13, %v3454_v60, %v13090_v27  ;;  %v3773_v30 = vrot.slane %v3771_v48, 1  ;;  %v14514_v48 = vld [vmem:[#allocation118_spill] sm:$0xff] }
 0x2e9   : > { %v13297_v10 = vpop.permute.xlu0 %4778  ;;  %6017 = vrot.lane.b32.xlu1 %v5956_v49, %s9442_s13  ;;  %8750 = vmatmul.mubr.msk.bf16.gmra.mrb[48].mxu0 %vm3849_vm3, %v6458_v33  ;;  %v3582_v0 = vsel %vm3538_vm14, %v3517_v5, %v2888_v39  ;;  %v8387_v25 = vcombine.low %v4127_v7, %v13302_v57  ;;  %v3584_v16 = vsel %vm3538_vm14, %v3519_v62, %v13169_v46  ;;  %v6158_v41 = vrot.slane %v8527_v28, 3  ;;  %v9302_v7 = vld [vmem:[%s9503_s28 + $0xb0] ss:$0 sps:$4 sm:$0x77]  }
 0x2ea   : > { %v3052_v11 = vsel %vm1788_vm1, %v3050_v26, %v3051_v8  ;;  %v3769_v27 = vshrl.u32 %v13273_v36, 16  ;;  %v3649_v35 = vsel %vm3603_vm15, %v3584_v16, %v3098_v45  ;;  %v6159_v15 = vrot.slane %v9298_v59, 3 }
 0x2eb   : > { %3109 = vrot.lane.b32.xlu0 %v3049_v13, %s9443_s18  ;;  %v3096_v14 = vpop.permute.xlu1 %3095  ;;  %v4731_v20 = vor.u32 %v4730_v12, %v4727_v21  ;;  %v4739_v46 = vor.u32 %v4738_v61, %v4735_v51  ;;  %v4750_v49 = vshrl.u32 %v9304_v34, 16  ;;  %v4753_v9 = vshll.u32 %v9304_v34, 16  ;;  %v4159_v12 = vld [vmem:[%s9503_s28 + $0xb4] sm:$0x8] }
 0x2ec   : > { %v3647_v2 = vsel %vm3603_vm15, %v3582_v0, %v3096_v14  ;;  %v3774_v58 = vor.u32 %v3773_v30, %v3769_v27  ;;  %v4742_v6 = vshrl.u32 %v8387_v25, 16  ;;  %v4745_v36 = vshll.u32 %v8387_v25, 16  ;;  %v14517_v27 = vld [vmem:[#allocation92_spill] sm:$0xff] }
 0x2ed   : > { %v2892_v4 = vpop.permute.xlu0 %2891  ;;  %v3775_v39 = vshll.u32 %v3647_v2, 16  ;;  %2699 = vrot.lane.b32.xlu1 %v9291_v52, %s9441_s12  ;;  %v3326_v45 = vsel %vm3278_vm10, %v13181_v22, %v14514_v48  ;;  %v3781_v38 = vshll.u32 %v3649_v35, 16  ;;  %v14515_v52 = vld [vmem:[#allocation136_spill] sm:$0xff]  ;;  %v8417_v28 = vcombine.low %v4157_v37, %v13225_v31  ;;  %v9306_v2 = vld [vmem:[%s9503_s28 + $0xbc] ss:$0 sps:$4 sm:$0x77]  }
 0x2ee   : > { %v3391_v33 = vsel %vm3343_vm11, %v3326_v45, %v14515_v52  ;;  %v14516_v22 = vrot.slane %v13140_v54, 1  ;;  %v4752_v59 = vrot.slane %v4750_v49, 1  ;;  %v4755_v21 = vrot.slane %v4753_v9, 2  ;;  %v14519_v9 = vld [vmem:[#allocation88_spill] sm:$0xff] }
 0x2ef   : > { %6191 = vrot.lane.b32.xlu0 %v6157_v19, %s9443_s18  ;;  %v3777_v53 = vrot.slane %v3775_v39, 1  ;;  %v13333_v18 = vpop.permute.xlu1 %4955  ;;  %v3456_v63 = vsel %vm3408_vm12, %v3391_v33, %v13142_v29  ;;  %v6160_v19 = vsel %vm4886_vm7, %v6158_v41, %v6159_v15  ;;  %v4740_v31 = vsel %vm4485_vm4, %v4731_v20, %v4739_v46  ;;  %v14518_v15 = vld [vmem:[#allocation90_spill] sm:$0xff] }
 0x2f0   : > { %v3521_v51 = vsel %vm3473_vm13, %v3456_v63, %v13232_v40  ;;  %v4744_v5 = vrot.slane %v4742_v6, 1  ;;  %v4747_v29 = vrot.slane %v4745_v36, 2  ;;  %v3783_v61 = vrot.slane %v3781_v38, 1  ;;  %v14520_v6 = vld [vmem:[#allocation87_spill] sm:$0xff] }
 0x2f1   : > { %v13338_v13 = vpop.permute.xlu0 %4780  ;;  %3113 = vrot.lane.b32.xlu1 %v3052_v11, %s9443_s18  ;;  %v3778_v26 = vsel %vm3668_vm2, %v3774_v58, %v3777_v53  ;;  %v3586_v54 = vsel %vm3538_vm14, %v3521_v51, %v2892_v4  ;;  %v4929_v30 = vrot.slane %v8417_v28, 3  ;;  %v4930_v0 = vrot.slane %v9302_v7, 3 }
 0x2f2   : > { %8715 = vmatprep.mubr.msk.bf16.mxu1 %vm3849_vm3, %v3778_v26  ;;  %v3779_v14 = vshrl.u32 %v3649_v35, 16  ;;  %v4756_v25 = vor.u32 %v4755_v21, %v4752_v59  ;;  %v8419_v16 = vcombine.low %v4159_v12, %v13302_v57  ;;  %v4748_v41 = vor.u32 %v4747_v29, %v4744_v5  ;;  %v8243_v12 = vld [vmem:[%s9503_s28 + $0xcc] sm:$0x8] }
 0x2f3   : > { %2903 = vrot.lane.b32.xlu0 %v14516_v22, %s9442_s13  ;;  %v13355_v60 = vpop.permute.xlu1 %4957  ;;  %v5335_v4 = vshrl.u32 %v14517_v27, 16  ;;  %v5338_v39 = vshll.u32 %v14517_v27, 16  ;;  %v5343_v20 = vshrl.u32 %v14518_v15, 16  ;;  %v5346_v35 = vshll.u32 %v14518_v15, 16 }
 0x2f4   : > { %v3784_v46 = vor.u32 %v3783_v61, %v3779_v14  ;;  %v5318_v58 = vshrl.u32 %v14519_v9, 16  ;;  %v5321_v53 = vshll.u32 %v14519_v9, 16  ;;  %v5326_v36 = vshrl.u32 %v14520_v6, 16 }
 0x2f5   : > { %v3100_v34 = vpop.permute.xlu0 %3099  ;;  %6193 = vrot.lane.b32.xlu1 %v6160_v19, %s9443_s18  ;;  %v5329_v48 = vshll.u32 %v14520_v6, 16  ;;  %v4931_v38 = vsel %vm4886_vm7, %v4929_v30, %v4930_v0  ;;  %v4932_v52 = vrot.slane %v8419_v16, 3  ;;  %v4933_v33 = vrot.slane %v9306_v2, 3  ;;  %v8305_v16 = vld [vmem:[%s9503_s28 + $0xf0] sm:$0xe]  ;;  %v9307_v2 = vld [vmem:[%s9503_s28 + $0xd8] sm:$0xff]  }
 0x2f6   : > { %v3651_v62 = vsel %vm3603_vm15, %v3586_v54, %v3100_v34  ;;  %v5337_v26 = vrot.slane %v5335_v4, 1  ;;  %v5340_v56 = vrot.slane %v5338_v39, 2  ;;  %v5348_v63 = vrot.slane %v5346_v35, 2  ;;  %v13407_v34 = vld [vmem:[%s9503_s28 + $0x100] sm:$0xf]  ;;  %v9308_v39 = vld [vmem:[%s9503_s28 + $0xcc] sm:$0xff]  }
 0x2f7   : > { %v3785_v40 = vshll.u32 %v3651_v62, 16  ;;  %4786 = vrot.lane.b32.xlu0 %v4740_v31, %s9436_s29  ;;  %v13365_v11 = vpop.permute.xlu1 %5069  ;;  %v5320_v22 = vrot.slane %v5318_v58, 1  ;;  %v5323_v59 = vrot.slane %v5321_v53, 2  ;;  %v5328_v21 = vrot.slane %v5326_v36, 1  ;;  %v8244_v31 = vld [vmem:[%s9503_s28 + $0xd8] sm:$0x8] }
 0x2f8   : > { %v5331_v51 = vrot.slane %v5329_v48, 2  ;;  %v4934_v29 = vsel %vm4886_vm7, %v4932_v52, %v4933_v33  ;;  %v8307_v62 = vld [vmem:[%s9503_s28 + $0xfc] sm:$0xe]  ;;  %v5341_v0 = vor.u32 %v5340_v56, %v5337_v26  ;;  %v8451_v4 = vcombine.low %v8243_v12, %v13030_v32 }
 0x2f9   : > { %v3787_v37 = vrot.slane %v3785_v40, 1  ;;  %v13370_v49 = vpop.permute.xlu0 %5067  ;;  %3111 = vrot.lane.b32.xlu1 %v3048_v43, %s9443_s18  ;;  %v4757_v43 = vsel %vm4485_vm4, %v4748_v41, %v4756_v25  ;;  %v8452_v40 = vcombine.low %v8244_v31, %v13073_v1  ;;  %v13414_v25 = vld [vmem:[%s9503_s28 + $0xf4] sm:$0xf]  ;;  %v5324_v41 = vor.u32 %v5323_v59, %v5320_v22 }
 0x2fa   : > { %v5332_v27 = vor.u32 %v5331_v51, %v5328_v21  ;;  %v8499_v15 = vcombine.low %v8307_v62, %v13407_v34  ;;  %v8497_v1 = vcombine.low %v8305_v16, %v13414_v25  ;;  %v5477_v47 = vrot.slane %v13077_v44, 3  ;;  %v8337_v16 = vld [vmem:[%s9503_s28 + $0xf0] sm:$0x8] }
 0x2fb   : > { %2907 = vrot.lane.b32.xlu0 %v2843_v24, %s9442_s13  ;;  %v3788_v45 = vsel %vm3668_vm2, %v3784_v46, %v3787_v37  ;;  %v13386_v17 = vpop.permute.xlu1 %2493  ;;  %v5345_v24 = vrot.slane %v5343_v20, 1  ;;  %v9315_v20 = vld [vmem:[%s9503_s28 + $0x104] ss:$0 sps:$4 sm:$0x33]   ;;  %v5476_v58 = vrot.slane %v8452_v40, 3  ;;  %v5474_v53 = vrot.slane %v13034_v23, 3 }
 0x2fc   : > { %8716 = vmatmul.mubr.msk.bf16.gmra.mrb[20].mxu1 %vm3849_vm3, %v3788_v45  ;;  %v13391_v7 = vpop.f32.mrb[36].mxu0  ;;  %v9316_v37 = vld [vmem:[%s9503_s28 + $0xf8] ss:$0 sps:$4 sm:$0x33]   ;;  %v5333_v32 = vsel %vm4485_vm4, %v5324_v41, %v5332_v27  ;;  %v5975_v6 = vshrl.u32 %v8499_v15, 16  ;;  %v5978_v36 = vshll.u32 %v8499_v15, 16 }
 0x2fd   : > { %v13389_v28 = vpop.permute.xlu0 %5371  ;;  %4963 = vrot.lane.b32.xlu1 %v4931_v38, %s9437_s30  ;;  %v13394_v19 = vpop.f32.mrb[37].mxu0  ;;  %v5349_v14 = vor.u32 %v5348_v63, %v5345_v24  ;;  %v5983_v48 = vshrl.u32 %v9315_v20, 16  ;;  %v5986_v45 = vshll.u32 %v9315_v20, 16  ;;  %v5958_v52 = vshrl.u32 %v8497_v1, 16  ;;  %v8275_v24 = vld [vmem:[%s9503_s28 + $0xfc] sm:$0xf] }
 0x2fe   : > { %v13398_v5 = vpop.f32.mrb[38].mxu0  ;;  %v5961_v33 = vshll.u32 %v8497_v1, 16  ;;  %v5969_v26 = vshll.u32 %v9316_v37, 16  ;;  %v5478_v23 = vsel %vm4886_vm7, %v5476_v58, %v5477_v47  ;;  %v8273_v63 = vld [vmem:[%s9503_s28 + $0xf0] sm:$0xf]  ;;  %v5977_v22 = vrot.slane %v5975_v6, 1 }
 0x2ff   : > { %4788 = vrot.lane.b32.xlu0 %v4757_v43, %s9436_s29  ;;  %v13402_v61 = vpop.permute.xlu1 %5499  ;;  %v13404_v54 = vpop.f32.mrb[39].mxu0  ;;  %v5350_v9 = vsel %vm4485_vm4, %v5341_v0, %v5349_v14  ;;  %v5966_v43 = vshrl.u32 %v9316_v37, 16  ;;  %v5980_v59 = vrot.slane %v5978_v36, 2  ;;  %v5985_v21 = vrot.slane %v5983_v48, 1  ;;  %v8339_v14 = vld [vmem:[%s9503_s28 + $0xfc] sm:$0x8] }
 0x300   : > { %v5988_v51 = vrot.slane %v5986_v45, 2  ;;  %v5963_v12 = vrot.slane %v5961_v33, 2  ;;  %v5971_v0 = vrot.slane %v5969_v26, 2  ;;  %v8467_v27 = vcombine.low %v8273_v63, %v13414_v25  ;;  %v9318_v20 = vld [vmem:[%s9503_s28 + $0x104] ss:$0 sps:$4 sm:$0x77]  }
 0x301   : > { %v13410_v30 = vpop.permute.xlu0 %5373  ;;  %4965 = vrot.lane.b32.xlu1 %v4934_v29, %s9437_s30  ;;  %v5960_v29 = vrot.slane %v5958_v52, 1  ;;  %v5968_v62 = vrot.slane %v5966_v43, 1  ;;  %v8531_v15 = vcombine.low %v8339_v14, %v13407_v34  ;;  %v9320_v47 = vld [vmem:[%s9503_s28 + $0xf8] ss:$0 sps:$4 sm:$0x77]   ;;  %v6165_v48 = vrot.slane %v9318_v20, 3 }
 0x302   : > { %v4085_v45 = vld [vmem:[%s9503_s28 + $0x78] sm:$0xf]  ;;  %v6162_v43 = vrot.slane %v9320_v47, 3  ;;  %v9326_v14 = vld [vmem:[%s14066_s4 + $0x8] sm:$0xff]   ;;  %vm7126_vm0 = vcmask 392192  }
 0x303   : > { %3115 = vrot.lane.b32.xlu0 %v3051_v8, %s9443_s18  ;;  %v13426_v46 = vpop.permute.xlu1 %2685  ;;  %v5473_v8 = vrot.slane %v8451_v4, 3  ;;  %v5981_v4 = vor.u32 %v5980_v59, %v5977_v22  ;;  %v5972_v58 = vor.u32 %v5971_v0, %v5968_v62  ;;  %v6164_v36 = vrot.slane %v8531_v15, 3  ;;  %v9325_v22 = vld [vmem:[%s14066_s4] sm:$0xff]   ;;  %v9405_v15 = vld [vmem:[%s9503_s28 + $0x88] sm:$0xf] }
 0x304   : > { %8765 = vmatprep.subr.bf16.mxu1 %v9325_v22  ;;  %v4087_v0 = vld [vmem:[%s9503_s28 + $0x84] sm:$0xf]  ;;  %v7641_v47 = vld [vmem:[%s9503_s28 + $0xa8] sm:$0xf] }
 0x305   : > { %v13430_v35 = vpop.permute.xlu0 %2497  ;;  %5077 = vrot.lane.b32.xlu1 %v9307_v2, %s9438_s7  ;;  %v5475_v44 = vsel %vm4886_vm7, %v5473_v8, %v5474_v53  ;;  %v8468_v2 = vcombine.low %v8275_v24, %v13407_v34  ;;  %v6166_v63 = vsel %vm4886_vm7, %v6164_v36, %v6165_v48  ;;  %8766 = vmatpush3.bf16.msra.mxu1 %v9325_v22  ;;  %v14524_v48 = vld [vmem:[#allocation139_spill] sm:$0xff] }
 0x306   : > { %8767 = vmatprep.subr.bf16.mxu1 %v9326_v14  ;;  %v8352_v20 = vcombine.low %v4087_v0, %v9405_v15  ;;  %v14529_v0 = vld [vmem:[#allocation11_spill] sm:$0xff] }
 0x307   : > { %5075 = vrot.lane.b32.xlu0 %v9308_v39, %s9438_s7  ;;  %v13438_v38 = vpop.permute.xlu1 %5611  ;;  %v5989_v39 = vor.u32 %v5988_v51, %v5985_v21  ;;  %v14532_v15 = vld [vmem:[#allocation123_spill] sm:$0xff] }
 0x309   : > { %v13440_v56 = vpop.permute.xlu0 %5501  ;;  %5381 = vrot.lane.b32.xlu1 %v5350_v9, %s9439_s8  ;;  %v5964_v9 = vor.u32 %v5963_v12, %v5960_v29  ;;  %v5990_v34 = vsel %vm4485_vm4, %v5981_v4, %v5989_v39  ;;  %v9404_v29 = vld [vmem:[%s9503_s28 + $0xa0] sm:$0xf]  ;;  %v14521_v39 = vld [vmem:[#allocation27_spill] sm:$0xff]  ;;  %8768 = vmatpush3.bf16.msra.mxu1 %v9326_v14  ;;  %v14530_v14 = vld [vmem:[#allocation84_spill] sm:$0xff] }
 0x30b   : > { %5379 = vrot.lane.b32.xlu0 %v5333_v32, %s9439_s8  ;;  %v13448_v31 = vpop.permute.xlu1 %2689  ;;  %v8529_v32 = vcombine.low %v8337_v16, %v13414_v25  ;;  %v5973_v25 = vsel %vm4485_vm4, %v5964_v9, %v5972_v58 }
 0x30d   : > { %v13451_v40 = vpop.permute.xlu0 %2495  ;;  %5509 = vrot.lane.b32.xlu1 %v5478_v23, %s9440_s9  ;;  %v13456_v41 = vpop.f32.mrb[8].mxu1  ;;  %v6161_v33 = vrot.slane %v8529_v32, 3  ;;  %v7638_v23 = vld [vmem:[%s9503_s28 + $0x9c] sm:$0xf]  ;;  %v9327_v32 = vld [vmem:[%s14066_s4 + $0x10] sm:$0xff]  }
 0x30e   : > { %v13462_v1 = vpop.f32.mrb[9].mxu1  ;;  %v7914_v12 = vcombine.low %v7638_v23, %v9404_v29  ;;  %8769 = vmatprep.subr.bf16.mxu1 %v9327_v32  ;;  %v14526_v29 = vld [vmem:[#allocation13_spill] sm:$0xff] }
 0x30f   : > { %5507 = vrot.lane.b32.xlu0 %v5475_v44, %s9440_s9  ;;  %v13464_v37 = vpop.permute.xlu1 %5613  ;;  %v13468_v8 = vpop.f32.mrb[10].mxu1  ;;  %v9403_v44 = vld [vmem:[%s9503_s28 + $0x7c] sm:$0xf]  ;;  %v6163_v21 = vsel %vm4886_vm7, %v6161_v33, %v6162_v43  ;;  %v6234_v33 = vsel %vm845_vm6, %v8352_v20, %v13338_v13  ;;  %8770 = vmatpush3.bf16.msra.mxu1 %v9327_v32 }
 0x310   : > { %v13472_v6 = vpop.f32.mrb[11].mxu1  ;;  %v8351_v24 = vcombine.low %v4085_v45, %v9403_v44 }
 0x311   : > { %v13470_v53 = vpop.permute.xlu0 %2893  ;;  %5621 = vrot.lane.b32.xlu1 %v8468_v2, %s9441_s12 }
 0x312   : > { %v6231_v62 = vsel %vm845_vm6, %v8351_v24, %v13297_v10  ;;  %v3191_v10 = vsel %vm845_vm6, %v7914_v12, %v14521_v39 }
 0x313   : > { %5619 = vrot.lane.b32.xlu0 %v8467_v27, %s9441_s12  ;;  %v13478_v52 = vpop.permute.xlu1 %2499  ;;  %v6268_v16 = vsel %vm3213_vm9, %v6231_v62, %v13333_v18  ;;  %v14522_v18 = vld [vmem:[#allocation80_spill] sm:$0xff] }
 0x314   : > { %v6300_v27 = vsel %vm3278_vm10, %v6268_v16, %v13370_v49  ;;  %v3263_v58 = vsel %vm3213_vm9, %v3191_v10, %v14522_v18 }
 0x315   : > { %v6012_v26 = vpop.permute.xlu0 %6011  ;;  %6021 = vrot.lane.b32.xlu1 %v5990_v34, %s9442_s13  ;;  %v6332_v9 = vsel %vm3343_vm11, %v6300_v27, %v13389_v28  ;;  %v14523_v28 = vld [vmem:[#allocation121_spill] sm:$0xff] }
 0x316   : > { %v6364_v49 = vsel %vm3408_vm12, %v6332_v9, %v13402_v61  ;;  %v3328_v34 = vsel %vm3278_vm10, %v3263_v58, %v14523_v28  ;;  %v14533_v9 = vld [vmem:[#allocation138_spill] sm:$0xff]  ;;  %v8949_v28 = vld [vmem:[%s9503_s28 + $0xb0] ss:$0 sps:$4 sm:$0x11]  }
 0x317   : > { %6019 = vrot.lane.b32.xlu0 %v5973_v25, %s9442_s13  ;;  %v13489_v59 = vpop.permute.xlu1 %2897  ;;  %v3393_v61 = vsel %vm3343_vm11, %v3328_v34, %v14524_v48  ;;  %v8945_v25 = vld [vmem:[%s9503_s28 + $0xa4] ss:$0 sps:$4 sm:$0x11]  }
 0x318   : > { %v3458_v43 = vsel %vm3408_vm12, %v3393_v61, %v13386_v17  ;;  %v14536_v48 = vld [vmem:[#allocation10_spill] sm:$0xff] }
 0x319   : > { %v13492_v51 = vpop.permute.xlu0 %2687  ;;  %6197 = vrot.lane.b32.xlu1 %v6166_v63, %s9443_s18  ;;  %v3523_v24 = vsel %vm3473_vm13, %v3458_v43, %v13426_v46 }
 0x31b   : > { %6195 = vrot.lane.b32.xlu0 %v6163_v21, %s9443_s18  ;;  %v6014_v2 = vpop.permute.xlu1 %6013  ;;  %v14525_v21 = vld [vmem:[#allocation26_spill] sm:$0xff] }
 0x31c   : > { %v3194_v46 = vsel %vm845_vm6, %v8945_v25, %v14525_v21 }
 0x31d   : > { %v3102_v4 = vpop.permute.xlu0 %3101  ;;  %6722 = vrot.lane.b32.xlu1 %v12785_v42, %s9439_s8  ;;  %v6396_v42 = vsel %vm3473_vm13, %v6364_v49, %v13438_v38  ;;  %v9406_v38 = vld [vmem:[%s9503_s28 + $0xac] sm:$0xf]  ;;  %v14534_v49 = vld [vmem:[#allocation141_spill] sm:$0xff] }
 0x31e   : > { %v6428_v45 = vsel %vm3538_vm14, %v6396_v42, %v6012_v26  ;;  %v7916_v44 = vcombine.low %v7641_v47, %v9406_v38  ;;  %v6270_v26 = vsel %vm3213_vm9, %v6234_v33, %v13355_v60  ;;  %v14537_v38 = vld [vmem:[#allocation51_spill] sm:$0xff] }
 0x31f   : > { %6720 = vrot.lane.b32.xlu0 %v12767_v55, %s9439_s8  ;;  %v13528_v36 = vpop.permute.xlu1 %2691  ;;  %v6302_v13 = vsel %vm3278_vm10, %v6270_v26, %v13365_v11  ;;  %v14527_v11 = vld [vmem:[#allocation29_spill] sm:$0xff]  ;;  %v14539_v26 = vld [vmem:[#allocation47_spill] sm:$0xff] }
 0x320   : > { %v6334_v63 = vsel %vm3343_vm11, %v6302_v13, %v13410_v30  ;;  %v3197_v12 = vsel %vm845_vm6, %v7916_v44, %v14527_v11  ;;  %v14538_v44 = vld [vmem:[#allocation28_spill] sm:$0xff] }
 0x321   : > { %v6188_v55 = vpop.permute.xlu0 %6187  ;;  %6726 = vrot.lane.b32.xlu1 %v12775_v50, %s9439_s8  ;;  %v3588_v50 = vsel %vm3538_vm14, %v3523_v24, %v13470_v53  ;;  %v14528_v53 = vld [vmem:[#allocation78_spill] sm:$0xff]  ;;  %v3267_v16 = vsel %vm3213_vm9, %v3197_v12, %v14530_v14 }
 0x322   : > { %v6460_v23 = vsel %vm3603_vm15, %v6428_v45, %v6188_v55  ;;  %v3653_v60 = vsel %vm3603_vm15, %v3588_v50, %v3102_v4  ;;  %v3265_v62 = vsel %vm3213_vm9, %v3194_v46, %v14528_v53  ;;  %v3332_v20 = vsel %vm3278_vm10, %v3267_v16, %v14532_v15  ;;  %v14540_v24 = vld [vmem:[#allocation82_spill] sm:$0xff]  ;;  %v14542_v46 = vld [vmem:[#allocation140_spill] sm:$0xff]  ;;  %v14544_v53 = vld [vmem:[#allocation45_spill] sm:$0xff] }
 0x323   : > { %6724 = vrot.lane.b32.xlu0 %v12759_v3, %s9439_s8  ;;  %8753 = vmatprep.mubr.msk.bf16.mxu0 %vm3849_vm3, %v6460_v23  ;;  %v3106_v17 = vpop.permute.xlu1 %3105  ;;  %v6366_v3 = vsel %vm3408_vm12, %v6334_v63, %v13440_v56  ;;  %v14531_v56 = vld [vmem:[#allocation120_spill] sm:$0xff]  ;;  %v3791_v39 = vshll.u32 %v3653_v60, 16  ;;  %v3397_v32 = vsel %vm3343_vm11, %v3332_v20, %v14534_v49 }
 0x324   : > { %v6398_v30 = vsel %vm3473_vm13, %v6366_v3, %v13464_v37  ;;  %v3330_v27 = vsel %vm3278_vm10, %v3265_v62, %v14531_v56  ;;  %v3462_v34 = vsel %vm3408_vm12, %v3397_v32, %v13430_v35  ;;  %v3789_v35 = vshrl.u32 %v3653_v60, 16  ;;  %v14541_v60 = vld [vmem:[#allocation122_spill] sm:$0xff] }
 0x325   : > { %v2896_v22 = vpop.permute.xlu0 %2895  ;;  %6850 = vrot.lane.b32.xlu1 %v14526_v29, %s9443_s18  ;;  %v6430_v4 = vsel %vm3538_vm14, %v6398_v30, %v6014_v2  ;;  %v3395_v18 = vsel %vm3343_vm11, %v3330_v27, %v14533_v9  ;;  %v14535_v2 = vld [vmem:[#allocation12_spill] sm:$0xff]  ;;  %v3527_v61 = vsel %vm3473_vm13, %v3462_v34, %v13448_v31  ;;  %v3793_v45 = vrot.slane %v3791_v39, 1  ;;  %v14543_v29 = vld [vmem:[#allocation49_spill] sm:$0xff] }
 0x326   : > { %v3460_v47 = vsel %vm3408_vm12, %v3395_v18, %v13451_v40  ;;  %v3592_v25 = vsel %vm3538_vm14, %v3527_v61, %v13489_v59  ;;  %v3200_v31 = vsel %vm845_vm6, %v8949_v28, %v14538_v44  ;;  %v4089_v61 = vld [vmem:[%s9503_s28 + $0x90] sm:$0xf]  ;;  %v4091_v44 = vld [vmem:[%s9503_s28 + $0x9c] sm:$0xf] }
 0x327   : > { %6848 = vrot.lane.b32.xlu0 %v14529_v0, %s9443_s18  ;;  %v6190_v10 = vpop.permute.xlu1 %6189  ;;  %v3525_v42 = vsel %vm3473_vm13, %v3460_v47, %v13492_v51  ;;  %v3657_v23 = vsel %vm3603_vm15, %v3592_v25, %v3106_v17  ;;  %v3269_v13 = vsel %vm3213_vm9, %v3200_v31, %v14540_v24  ;;  %v3794_v59 = vor.u32 %v3793_v45, %v3789_v35  ;;  %v9407_v25 = vld [vmem:[%s9503_s28 + $0x94] sm:$0xf] }
 0x328   : > { %v6462_v37 = vsel %vm3603_vm15, %v6430_v4, %v6190_v10  ;;  %v3590_v40 = vsel %vm3538_vm14, %v3525_v42, %v2896_v22  ;;  %v3334_v17 = vsel %vm3278_vm10, %v3269_v13, %v14541_v60  ;;  %v3801_v22 = vshll.u32 %v3657_v23, 16  ;;  %v9409_v60 = vld [vmem:[%s9503_s28 + $0xa0] sm:$0xf] }
 0x329   : > { %v13580_v58 = vpop.permute.xlu0 %4782  ;;  %8754 = vmatmul.mubr.msk.bf16.gmra.mrb[52].mxu0 %vm3849_vm3, %v6462_v37  ;;  %6854 = vrot.lane.b32.xlu1 %v14535_v2, %s9443_s18  ;;  %v3399_v3 = vsel %vm3343_vm11, %v3334_v17, %v14542_v46  ;;  %v8354_v17 = vcombine.low %v4091_v44, %v9409_v60  ;;  %v14546_v46 = vld [vmem:[#allocation91_spill] sm:$0xff] }
 0x32a   : > { %v3464_v12 = vsel %vm3408_vm12, %v3399_v3, %v13478_v52  ;;  %v3803_v0 = vrot.slane %v3801_v22, 1  ;;  %v3799_v52 = vshrl.u32 %v3657_v23, 16  ;;  %v9408_v23 = vld [vmem:[%s9503_s28 + $0xb8] sm:$0xf] }
 0x32b   : > { %6852 = vrot.lane.b32.xlu0 %v14536_v48, %s9443_s18  ;;  %v3104_v55 = vpop.permute.xlu1 %3103  ;;  %v3529_v62 = vsel %vm3473_vm13, %v3464_v12, %v13528_v36 }
 0x32c   : > { %v3655_v33 = vsel %vm3603_vm15, %v3590_v40, %v3104_v55  ;;  %v3804_v39 = vor.u32 %v3803_v0, %v3799_v52  ;;  %v7644_v55 = vld [vmem:[%s9503_s28 + $0xb4] sm:$0xf] }
 0x32d   : > { %v2900_v43 = vpop.permute.xlu0 %2899  ;;  %v3795_v51 = vshll.u32 %v3655_v33, 16  ;;  %6730 = vrot.lane.b32.xlu1 %v14537_v38, %s9439_s8  ;;  %v8353_v33 = vcombine.low %v4089_v61, %v9407_v25 }
 0x32e   : > { %v3594_v14 = vsel %vm3538_vm14, %v3529_v62, %v2900_v43  ;;  %v14548_v62 = vld [vmem:[#allocation143_spill] sm:$0xff] }
 0x32f   : > { %6728 = vrot.lane.b32.xlu0 %v14539_v26, %s9439_s8  ;;  %v3797_v50 = vrot.slane %v3795_v51, 1  ;;  %v13611_v63 = vpop.permute.xlu1 %4959  ;;  %v7918_v51 = vcombine.low %v7644_v55, %v9408_v23  ;;  %v6237_v38 = vsel %vm845_vm6, %v8353_v33, %v13580_v58  ;;  %v14555_v23 = vld [vmem:[#allocation142_spill] sm:$0xff] }
 0x330   : > { %v6272_v31 = vsel %vm3213_vm9, %v6237_v38, %v13611_v63  ;;  %v14547_v63 = vld [vmem:[#allocation52_spill] sm:$0xff] }
 0x331   : > { %v13615_v21 = vpop.permute.xlu0 %4784  ;;  %6734 = vrot.lane.b32.xlu1 %v14543_v29, %s9439_s8  ;;  %v3798_v11 = vsel %vm3668_vm2, %v3794_v59, %v3797_v50  ;;  %v14545_v59 = vld [vmem:[#allocation31_spill] sm:$0xff]  ;;  %v7647_v29 = vld [vmem:[%s9503_s28 + $0xc0] sm:$0xf] }
 0x332   : > { %8719 = vmatprep.mubr.msk.bf16.mxu1 %vm3849_vm3, %v3798_v11  ;;  %v3203_v50 = vsel %vm845_vm6, %v7918_v51, %v14545_v59  ;;  %v6240_v52 = vsel %vm845_vm6, %v8354_v17, %v13615_v21 }
 0x333   : > { %6732 = vrot.lane.b32.xlu0 %v14544_v53, %s9439_s8  ;;  %v13629_v30 = vpop.permute.xlu1 %4961  ;;  %v3271_v58 = vsel %vm3213_vm9, %v3203_v50, %v14546_v46 }
 0x334   : > { %v3336_v11 = vsel %vm3278_vm10, %v3271_v58, %v14547_v63 }
 0x335   : > { %v3108_v16 = vpop.permute.xlu0 %3107  ;;  %6858 = vrot.lane.b32.xlu1 %v13404_v54, %s9443_s18  ;;  %v3401_v0 = vsel %vm3343_vm11, %v3336_v11, %v14548_v62  ;;  %v14558_v11 = vld [vmem:[#allocation93_spill] sm:$0xff] }
 0x336   : > { %v3659_v56 = vsel %vm3603_vm15, %v3594_v14, %v3108_v16 }
 0x337   : > { %v3805_v27 = vshll.u32 %v3659_v56, 16  ;;  %6856 = vrot.lane.b32.xlu0 %v13394_v19, %s9443_s18  ;;  %v13637_v4 = vpop.permute.xlu1 %5073  ;;  %v8953_v56 = vld [vmem:[%s9503_s28 + $0xbc] ss:$0 sps:$4 sm:$0x11]  }
 0x339   : > { %v3807_v36 = vrot.slane %v3805_v27, 1  ;;  %v5072_v10 = vpop.permute.xlu0 %5071  ;;  %6862 = vrot.lane.b32.xlu1 %v13398_v5, %s9443_s18 }
 0x33a   : > { %v6304_v24 = vsel %vm3278_vm10, %v6272_v31, %v5072_v10 }
 0x33b   : > { %6860 = vrot.lane.b32.xlu0 %v13391_v7, %s9443_s18  ;;  %v3808_v15 = vsel %vm3668_vm2, %v3804_v39, %v3807_v36  ;;  %v13645_v54 = vpop.permute.xlu1 %2501  ;;  %v9410_v36 = vld [vmem:[%s9503_s28 + $0xc4] sm:$0xf] }
 0x33c   : > { %8720 = vmatmul.mubr.msk.bf16.gmra.mrb[24].mxu1 %vm3849_vm3, %v3808_v15  ;;  %v8743_v9 = vpop.f32.mrb[40].mxu0  ;;  %v3466_v27 = vsel %vm3408_vm12, %v3401_v0, %v13645_v54  ;;  %v7920_v10 = vcombine.low %v7647_v29, %v9410_v36  ;;  %v6274_v15 = vsel %vm3213_vm9, %v6240_v52, %v13629_v30  ;;  %v14560_v52 = vld [vmem:[#allocation144_spill] sm:$0xff] }
 0x33d   : > { %v5376_v20 = vpop.permute.xlu0 %5375  ;;  %6738 = vrot.lane.b32.xlu1 %v13472_v6, %s9439_s8  ;;  %v6593_v19 = vpop.f32.mrb[41].mxu0 }
 0x33e   : > { %v8744_v18 = vpop.f32.mrb[42].mxu0  ;;  %v6336_v22 = vsel %vm3343_vm11, %v6304_v24, %v5376_v20 }
 0x33f   : > { %6736 = vrot.lane.b32.xlu0 %v13462_v1, %s9439_s8  ;;  %v5504_v5 = vpop.permute.xlu1 %5503  ;;  %v6596_v37 = vpop.f32.mrb[43].mxu0 }
 0x340   : > { %v6368_v3 = vsel %vm3408_vm12, %v6336_v22, %v5504_v5 }
 0x341   : > { %v13651_v49 = vpop.permute.xlu0 %5377  ;;  %6742 = vrot.lane.b32.xlu1 %v13468_v8, %s9439_s8 }
 0x343   : > { %6740 = vrot.lane.b32.xlu0 %v13456_v41, %s9439_s8  ;;  %v2694_v7 = vpop.permute.xlu1 %2693 }
 0x344   : > { %v3531_v20 = vsel %vm3473_vm13, %v3466_v27, %v2694_v7  ;;  %v14550_v7 = vld [vmem:[#allocation33_spill] sm:$0xff] }
 0x345   : > { %v13657_v32 = vpop.permute.xlu0 %2505  ;;  %6866 = vrot.lane.b32.xlu1 %v6596_v37, %s9443_s18  ;;  %v14549_v37 = vld [vmem:[#allocation30_spill] sm:$0xff] }
 0x347   : > { %6864 = vrot.lane.b32.xlu0 %v6593_v19, %s9443_s18  ;;  %v5616_v1 = vpop.permute.xlu1 %5615 }
 0x348   : > { %v6400_v12 = vsel %vm3473_vm13, %v6368_v3, %v5616_v1  ;;  %v3206_v1 = vsel %vm845_vm6, %v8953_v56, %v14549_v37 }
 0x349   : > { %v5506_v6 = vpop.permute.xlu0 %5505  ;;  %6870 = vrot.lane.b32.xlu1 %v8744_v18, %s9443_s18 }
 0x34b   : > { %6868 = vrot.lane.b32.xlu0 %v8743_v9, %s9443_s18  ;;  %v13663_v8 = vpop.permute.xlu1 %2697  ;;  %v6306_v9 = vsel %vm3278_vm10, %v6274_v15, %v13637_v4 }
 0x34c   : > { %v6338_v54 = vsel %vm3343_vm11, %v6306_v9, %v13651_v49 }
 0x34d   : > { %v13665_v47 = vpop.permute.xlu0 %2503  ;;  %v6370_v30 = vsel %vm3408_vm12, %v6338_v54, %v5506_v6  ;;  %v14554_v6 = vld [vmem:[#allocation126_spill] sm:$0xff] }
 0x34f   : > { %v8709_v41 = vpop.f32.mrb[12].mxu1  ;;  %v5618_v28 = vpop.permute.xlu1 %5617 }
 0x350   : > { %v3983_v2 = vpop.f32.mrb[13].mxu1 }
 0x351   : > { %v8710_v34 = vpop.f32.mrb[14].mxu1  ;;  %v2902_v42 = vpop.permute.xlu0 %2901  ;;  %6744 = vrot.lane.b32.xlu0 %v3983_v2, %s9439_s8  ;;  %v14551_v2 = vld [vmem:[#allocation89_spill] sm:$0xff] }
 0x352   : > { %v3986_v48 = vpop.f32.mrb[15].mxu1  ;;  %v3596_v19 = vsel %vm3538_vm14, %v3531_v20, %v2902_v42  ;;  %v3273_v4 = vsel %vm3213_vm9, %v3206_v1, %v14551_v2  ;;  %v14552_v42 = vld [vmem:[#allocation94_spill] sm:$0xff] }
 0x353   : > { %6746 = vrot.lane.b32.xlu1 %v3986_v48, %s9439_s8  ;;  %v13670_v45 = vpop.permute.xlu1 %2507  ;;  %v14553_v48 = vld [vmem:[#allocation124_spill] sm:$0xff] }
 0x354   : > { %v3338_v61 = vsel %vm3278_vm10, %v3273_v4, %v14553_v48  ;;  %v4095_v4 = vld [vmem:[%s9503_s28 + $0xb4] sm:$0xf] }
 0x355   : > { %v6016_v40 = vpop.permute.xlu0 %6015  ;;  %6748 = vrot.lane.b32.xlu0 %v8709_v41, %s9439_s8  ;;  %v3209_v41 = vsel %vm845_vm6, %v7920_v10, %v14550_v7  ;;  %v3403_v51 = vsel %vm3343_vm11, %v3338_v61, %v14555_v23 }
 0x356   : > { %v6432_v14 = vsel %vm3538_vm14, %v6400_v12, %v6016_v40  ;;  %v3275_v49 = vsel %vm3213_vm9, %v3209_v41, %v14552_v42  ;;  %v3468_v24 = vsel %vm3408_vm12, %v3403_v51, %v13665_v47  ;;  %v4093_v42 = vld [vmem:[%s9503_s28 + $0xa8] sm:$0xf] }
 0x357   : > { %6750 = vrot.lane.b32.xlu1 %v8710_v34, %s9439_s8  ;;  %v13676_v43 = vpop.permute.xlu1 %2905  ;;  %v6402_v34 = vsel %vm3473_vm13, %v6370_v30, %v5618_v28  ;;  %v3340_v33 = vsel %vm3278_vm10, %v3275_v49, %v14554_v6  ;;  %v14556_v28 = vld [vmem:[#allocation145_spill] sm:$0xff] }
 0x358   : > { %v3405_v31 = vsel %vm3343_vm11, %v3340_v33, %v14556_v28 }
 0x359   : > { %v2696_v35 = vpop.permute.xlu0 %2695 }
 0x35a   : > { %v3533_v59 = vsel %vm3473_vm13, %v3468_v24, %v2696_v35 }
 0x35b   : > { %v6018_v26 = vpop.permute.xlu1 %6017 }
 0x35c   : > { %v6434_v40 = vsel %vm3538_vm14, %v6402_v34, %v6018_v26  ;;  %v8957_v26 = vld [vmem:[%s9503_s28 + $0xc8] ss:$0 sps:$4 sm:$0x11]  }
 0x35d   : > { %v3110_v13 = vpop.permute.xlu0 %3109 }
 0x35e   : > { %v3661_v18 = vsel %vm3603_vm15, %v3596_v19, %v3110_v13  ;;  %v3470_v13 = vsel %vm3408_vm12, %v3405_v31, %v13657_v32  ;;  %v14557_v32 = vld [vmem:[#allocation32_spill] sm:$0xff] }
 0x35f   : > { %v2700_v53 = vpop.permute.xlu1 %2699  ;;  %v3811_v55 = vshll.u32 %v3661_v18, 16  ;;  %v3535_v50 = vsel %vm3473_vm13, %v3470_v13, %v13663_v8  ;;  %v3809_v3 = vshrl.u32 %v3661_v18, 16  ;;  %v3212_v35 = vsel %vm845_vm6, %v8957_v26, %v14557_v32 }
 0x360   : > { %v3600_v46 = vsel %vm3538_vm14, %v3535_v50, %v13676_v43  ;;  %v3277_v8 = vsel %vm3213_vm9, %v3212_v35, %v14558_v11 }
 0x361   : > { %v6192_v16 = vpop.permute.xlu0 %6191  ;;  %v3813_v60 = vrot.slane %v3811_v55, 1  ;;  %v9411_v55 = vld [vmem:[%s9503_s28 + $0xac] sm:$0xf] }
 0x362   : > { %v6464_v39 = vsel %vm3603_vm15, %v6432_v14, %v6192_v16  ;;  %v14559_v14 = vld [vmem:[#allocation125_spill] sm:$0xff] }
 0x363   : > { %8757 = vmatprep.mubr.msk.bf16.mxu0 %vm3849_vm3, %v6464_v39  ;;  %v3114_v21 = vpop.permute.xlu1 %3113  ;;  %v3814_v12 = vor.u32 %v3813_v60, %v3809_v3  ;;  %v3342_v16 = vsel %vm3278_vm10, %v3277_v8, %v14559_v14  ;;  %v13803_v14 = vld [vmem:[%s14065_s3] ss:$0 sm:$0xff] }
 0x364   : > { %v3665_v29 = vsel %vm3603_vm15, %v3600_v46, %v3114_v21  ;;  %v3407_v27 = vsel %vm3343_vm11, %v3342_v16, %v14560_v52  ;;  %v14561_v16 = vld [vmem:[#allocation8_spill] sm:$0xff]  ;;  %v14562_v52 = vld [vmem:[#allocation3_spill] sm:$0xff] }
 0x365   : > { %v2904_v5 = vpop.permute.xlu0 %2903  ;;  %v3821_v43 = vshll.u32 %v3665_v29, 16  ;;  %v3472_v36 = vsel %vm3408_vm12, %v3407_v27, %v13670_v45  ;;  %v3819_v54 = vshrl.u32 %v3665_v29, 16 }
 0x366   : > { %v3598_v17 = vsel %vm3538_vm14, %v3533_v59, %v2904_v5  ;;  %v3537_v10 = vsel %vm3473_vm13, %v3472_v36, %v2700_v53 }
 0x367   : > { %v6194_v25 = vpop.permute.xlu1 %6193  ;;  %v3823_v20 = vrot.slane %v3821_v43, 1 }
 0x368   : > { %v6466_v38 = vsel %vm3603_vm15, %v6434_v40, %v6194_v25  ;;  %v8356_v40 = vcombine.low %v4095_v4, %v13302_v57  ;;  %v8355_v25 = vcombine.low %v4093_v42, %v9411_v55 }
 0x369   : > { %v13734_v44 = vpop.permute.xlu0 %4786  ;;  %8758 = vmatmul.mubr.msk.bf16.gmra.mrb[56].mxu0 %vm3849_vm3, %v6466_v38  ;;  %v3824_v37 = vor.u32 %v3823_v20, %v3819_v54 }
 0x36a   : > { %v6243_v51 = vsel %vm845_vm6, %v8355_v25, %v13734_v44 }
 0x36b   : > { %v3112_v22 = vpop.permute.xlu1 %3111 }
 0x36c   : > { %v3663_v47 = vsel %vm3603_vm15, %v3598_v17, %v3112_v22 }
 0x36d   : > { %v2908_v58 = vpop.permute.xlu0 %2907  ;;  %v3815_v63 = vshll.u32 %v3663_v47, 16 }
 0x36e   : > { %v3602_v9 = vsel %vm3538_vm14, %v3537_v10, %v2908_v58 }
 0x36f   : > { %v3817_v62 = vrot.slane %v3815_v63, 1  ;;  %v4964_v0 = vpop.permute.xlu1 %4963 }
 0x370   : > { %v6276_v28 = vsel %vm3213_vm9, %v6243_v51, %v4964_v0 }
 0x371   : > { %v4789_v56 = vpop.permute.xlu0 %4788  ;;  %v3818_v39 = vsel %vm3668_vm2, %v3814_v12, %v3817_v62 }
 0x372   : > { %8723 = vmatprep.mubr.msk.bf16.mxu1 %vm3849_vm3, %v3818_v39  ;;  %v6246_v23 = vsel %vm845_vm6, %v8356_v40, %v4789_v56  ;;  %v14565_v40 = vld [vmem:[#allocation37_spill] sm:$0xff] }
 0x373   : > { %v4966_v15 = vpop.permute.xlu1 %4965 }
 0x374   : > { %v6278_v38 = vsel %vm3213_vm9, %v6246_v23, %v4966_v15 }
 0x375   : > { %v3116_v19 = vpop.permute.xlu0 %3115 }
 0x376   : > { %v3667_v21 = vsel %vm3603_vm15, %v3602_v9, %v3116_v19  ;;  %v14563_v9 = vld [vmem:[#allocation5_spill] sm:$0xff] }
 0x377   : > { %v3825_v18 = vshll.u32 %v3667_v21, 16  ;;  %v5078_v5 = vpop.permute.xlu1 %5077 }
 0x378   : > { %v6310_v31 = vsel %vm3278_vm10, %v6278_v38, %v5078_v5 }
 0x379   : > { %v3827_v1 = vrot.slane %v3825_v18, 1  ;;  %v5076_v30 = vpop.permute.xlu0 %5075  ;;  %v14564_v18 = vld [vmem:[#allocation2_spill] sm:$0xff] }
 0x37a   : > { %v6308_v24 = vsel %vm3278_vm10, %v6276_v28, %v5076_v30 }
 0x37b   : > { %v3828_v45 = vsel %vm3668_vm2, %v3824_v37, %v3827_v1  ;;  %v5382_v53 = vpop.permute.xlu1 %5381 }
 0x37c   : > { %8724 = vmatmul.mubr.msk.bf16.gmra.mrb[28].mxu1 %vm3849_vm3, %v3828_v45  ;;  %v8747_v41 = vpop.f32.mrb[44].mxu0  ;;  %v6342_v26 = vsel %vm3343_vm11, %v6310_v31, %v5382_v53 }
 0x37d   : > { %v5380_v7 = vpop.permute.xlu0 %5379  ;;  %v6609_v2 = vpop.f32.mrb[45].mxu0 }
 0x37e   : > { %6872 = vrot.lane.b32.xlu0 %v6609_v2, %s9443_s18  ;;  %v8748_v34 = vpop.f32.mrb[46].mxu0  ;;  %v6340_v59 = vsel %vm3343_vm11, %v6308_v24, %v5380_v7 }
 0x37f   : > { %v5510_v49 = vpop.permute.xlu1 %5509  ;;  %v6612_v48 = vpop.f32.mrb[47].mxu0 }
 0x380   : > { %6874 = vrot.lane.b32.xlu1 %v6612_v48, %s9443_s18  ;;  %v6374_v50 = vsel %vm3408_vm12, %v6342_v26, %v5510_v49 }
 0x381   : > { %v5508_v61 = vpop.permute.xlu0 %5507 }
 0x382   : > { %6876 = vrot.lane.b32.xlu0 %v8747_v41, %s9443_s18  ;;  %v6372_v60 = vsel %vm3408_vm12, %v6340_v59, %v5508_v61  ;;  %v14568_v59 = vld [vmem:[#allocation34_spill] sm:$0xff] }
 0x383   : > { %v5622_v6 = vpop.permute.xlu1 %5621 }
 0x384   : > { %6878 = vrot.lane.b32.xlu1 %v8748_v34, %s9443_s18  ;;  %v6406_v44 = vsel %vm3473_vm13, %v6374_v50, %v5622_v6  ;;  %v14566_v6 = vld [vmem:[#allocation35_spill] sm:$0xff] }
 0x385   : > { %v5620_v33 = vpop.permute.xlu0 %5619 }
 0x386   : > { %v6404_v17 = vsel %vm3473_vm13, %v6372_v60, %v5620_v33 }
 0x387   : > { %v6022_v57 = vpop.permute.xlu1 %6021 }
 0x388   : > { %v6438_v22 = vsel %vm3538_vm14, %v6406_v44, %v6022_v57  ;;  %v14567_v57 = vld [vmem:[#allocation97_spill] sm:$0xff] }
 0x389   : > { %v6020_v13 = vpop.permute.xlu0 %6019 }
 0x38a   : > { %v6436_v47 = vsel %vm3538_vm14, %v6404_v17, %v6020_v13 }
 0x38b   : > { %v6198_v46 = vpop.permute.xlu1 %6197 }
 0x38c   : > { %v6470_v58 = vsel %vm3603_vm15, %v6438_v22, %v6198_v46 }
 0x38d   : > { %v6196_v3 = vpop.permute.xlu0 %6195 }
 0x38e   : > { %v6468_v29 = vsel %vm3603_vm15, %v6436_v47, %v6196_v3 }
 0x38f   : > { %v8713_v63 = vpop.f32.mrb[16].mxu1  ;;  %8761 = vmatprep.mubr.msk.bf16.mxu0 %vm3849_vm3, %v6468_v29  ;;  %v6723_v35 = vpop.permute.xlu1 %6722 }
 0x390   : > { %v3999_v32 = vpop.f32.mrb[17].mxu1  ;;  %8762 = vmatmul.mubr.msk.bf16.gmra.mrb[60].mxu0 %vm3849_vm3, %v6470_v58  ;;  %v6945_v43 = vsel %vm3343_vm11, %v14561_v16, %v6723_v35  ;;  %v14570_v16 = vld [vmem:[#allocation36_spill] sm:$0xff] }
 0x391   : > { %v8714_v11 = vpop.f32.mrb[18].mxu1  ;;  %v6721_v8 = vpop.permute.xlu0 %6720  ;;  %6752 = vrot.lane.b32.xlu0 %v3999_v32, %s9439_s8 }
 0x392   : > { %v4002_v12 = vpop.f32.mrb[19].mxu1  ;;  %v6944_v27 = vsel %vm3343_vm11, %v14562_v52, %v6721_v8 }
 0x393   : > { %6754 = vrot.lane.b32.xlu1 %v4002_v12, %s9439_s8  ;;  %v6727_v62 = vpop.permute.xlu1 %6726  ;;  %v14569_v12 = vld [vmem:[#allocation98_spill] sm:$0xff] }
 0x394   : > { %v6947_v19 = vsel %vm3343_vm11, %v14563_v9, %v6727_v62 }
 0x395   : > { %v6725_v0 = vpop.permute.xlu0 %6724  ;;  %6756 = vrot.lane.b32.xlu0 %v8713_v63, %s9439_s8 }
 0x396   : > { %v6946_v5 = vsel %vm3343_vm11, %v14564_v18, %v6725_v0 }
 0x397   : > { %6758 = vrot.lane.b32.xlu1 %v8714_v11, %s9439_s8  ;;  %v6851_v56 = vpop.permute.xlu1 %6850 }
 0x398   : > { %v6977_v36 = vsel %vm3603_vm15, %v6945_v43, %v6851_v56 }
 0x399   : > { %v6849_v39 = vpop.permute.xlu0 %6848  ;;  %v7016_v15 = vadd.f32 %v13803_v14, %v6977_v36 }
 0x39a   : > { %v6976_v10 = vsel %vm3603_vm15, %v6944_v27, %v6849_v39 }
 0x39b   : > { %v7015_v20 = vadd.f32 %v13803_v14, %v6976_v10  ;;  %v7048_v21 = vmax.f32 %v7016_v15, 0.0  ;;  %v6855_v54 = vpop.permute.xlu1 %6854  ;;  %v14571_v10 = vld [vmem:[#allocation96_spill] sm:$0xff] }
 0x39c   : > { %v6979_v30 = vsel %vm3603_vm15, %v6947_v19, %v6855_v54  ;;  %v14572_v19 = vld [vmem:[#allocation99_spill] sm:$0xff] }
 0x39d   : > { %v7047_v37 = vmax.f32 %v7015_v20, 0.0  ;;  %v6853_v1 = vpop.permute.xlu0 %6852  ;;  %v7018_v53 = vadd.f32 %v13803_v14, %v6979_v30 }
 0x39e   : > { %v6978_v45 = vsel %vm3603_vm15, %v6946_v5, %v6853_v1 }
 0x39f   : > { %v7079_v7 = vpack.c.bf16 %v7048_v21, %v7047_v37  ;;  %v7017_v41 = vadd.f32 %v13803_v14, %v6978_v45  ;;  %v7050_v2 = vmax.f32 %v7018_v53, 0.0  ;;  %v6731_v4 = vpop.permute.xlu1 %6730 }
 0x3a0   : > { %v6949_v55 = vsel %vm3343_vm11, %v14565_v40, %v6731_v4 }
 0x3a1   : > { %v7049_v34 = vmax.f32 %v7017_v41, 0.0  ;;  %v6729_v42 = vpop.permute.xlu0 %6728  ;;  %8771 = vmatprep.mubr.msk.bf16.mxu1 %vm7126_vm0, %v7079_v7 }
 0x3a2   : > { %v6948_v33 = vsel %vm3343_vm11, %v14566_v6, %v6729_v42 }
 0x3a3   : > { %v7080_v49 = vpack.c.bf16 %v7050_v2, %v7049_v34  ;;  %v6735_v48 = vpop.permute.xlu1 %6734 }
 0x3a4   : > { %v6951_v24 = vsel %vm3343_vm11, %v14567_v57, %v6735_v48 }
 0x3a5   : > { %v6733_v61 = vpop.permute.xlu0 %6732  ;;  %8772 = vmatmul.mubr.msk.bf16.vlgmr.msra.gmra.mrb[32].mxu1 %vm7126_vm0, %v7080_v49 }
 0x3a6   : > { %v6950_v50 = vsel %vm3343_vm11, %v14568_v59, %v6733_v61  ;;  %v14575_v59 = vld [vmem:[#allocation50_spill] sm:$0xff] }
 0x3a7   : > { %v6859_v25 = vpop.permute.xlu1 %6858 }
 0x3a8   : > { %v6981_v51 = vsel %vm3603_vm15, %v6949_v55, %v6859_v25 }
 0x3a9   : > { %v6857_v23 = vpop.permute.xlu0 %6856  ;;  %v7020_v28 = vadd.f32 %v13803_v14, %v6981_v51 }
 0x3aa   : > { %v6980_v38 = vsel %vm3603_vm15, %v6948_v33, %v6857_v23  ;;  %v14573_v23 = vld [vmem:[#allocation48_spill] sm:$0xff] }
 0x3ab   : > { %v7019_v31 = vadd.f32 %v13803_v14, %v6980_v38  ;;  %v7052_v26 = vmax.f32 %v7020_v28, 0.0  ;;  %v6863_v13 = vpop.permute.xlu1 %6862 }
 0x3ac   : > { %v6983_v17 = vsel %vm3603_vm15, %v6951_v24, %v6863_v13 }
 0x3ad   : > { %v7051_v60 = vmax.f32 %v7019_v31, 0.0  ;;  %v6861_v44 = vpop.permute.xlu0 %6860  ;;  %v7022_v46 = vadd.f32 %v13803_v14, %v6983_v17  ;;  %v14574_v31 = vld [vmem:[#allocation54_spill] sm:$0xff] }
 0x3ae   : > { %v6982_v22 = vsel %vm3603_vm15, %v6950_v50, %v6861_v44 }
 0x3af   : > { %v7081_v47 = vpack.c.bf16 %v7052_v26, %v7051_v60  ;;  %v7021_v58 = vadd.f32 %v13803_v14, %v6982_v22  ;;  %v7054_v3 = vmax.f32 %v7022_v46, 0.0  ;;  %v6739_v29 = vpop.permute.xlu1 %6738  ;;  %v14576_v22 = vld [vmem:[#allocation55_spill] sm:$0xff] }
 0x3b0   : > { %v6953_v62 = vsel %vm3343_vm11, %v14569_v12, %v6739_v29 }
 0x3b1   : > { %v7053_v63 = vmax.f32 %v7021_v58, 0.0  ;;  %v6737_v32 = vpop.permute.xlu0 %6736  ;;  %8775 = vmatprep.mubr.msk.bf16.mxu1 %vm7126_vm0, %v7081_v47 }
 0x3b2   : > { %v6952_v43 = vsel %vm3343_vm11, %v14570_v16, %v6737_v32 }
 0x3b3   : > { %v7082_v35 = vpack.c.bf16 %v7054_v3, %v7053_v63  ;;  %v6743_v11 = vpop.permute.xlu1 %6742 }
 0x3b4   : > { %v6955_v15 = vsel %vm3343_vm11, %v14571_v10, %v6743_v11 }
 0x3b5   : > { %v6741_v8 = vpop.permute.xlu0 %6740  ;;  %8776 = vmatmul.mubr.msk.bf16.gmra.mrb[36].mxu1 %vm7126_vm0, %v7082_v35 }
 0x3b6   : > { %v6954_v21 = vsel %vm3343_vm11, %v14572_v19, %v6741_v8 }
 0x3b7   : > { %v6867_v0 = vpop.permute.xlu1 %6866 }
 0x3b8   : > { %v6985_v52 = vsel %vm3603_vm15, %v6953_v62, %v6867_v0 }
 0x3b9   : > { %v6865_v56 = vpop.permute.xlu0 %6864  ;;  %v7024_v39 = vadd.f32 %v13803_v14, %v6985_v52 }
 0x3ba   : > { %v6984_v27 = vsel %vm3603_vm15, %v6952_v43, %v6865_v56 }
 0x3bb   : > { %v7023_v36 = vadd.f32 %v13803_v14, %v6984_v27  ;;  %v7056_v20 = vmax.f32 %v7024_v39, 0.0  ;;  %v6871_v9 = vpop.permute.xlu1 %6870 }
 0x3bc   : > { %v6987_v5 = vsel %vm3603_vm15, %v6955_v15, %v6871_v9  ;;  %v8751_v37 = vpop.f32.mrb[48].mxu0  ;;  %v14577_v9 = vld [vmem:[#allocation6_spill] sm:$0xff] }
 0x3bd   : > { %v7055_v54 = vmax.f32 %v7023_v36, 0.0  ;;  %v6869_v18 = vpop.permute.xlu0 %6868  ;;  %v7026_v30 = vadd.f32 %v13803_v14, %v6987_v5  ;;  %v6625_v45 = vpop.f32.mrb[49].mxu0 }
 0x3be   : > { %v6986_v1 = vsel %vm3603_vm15, %v6954_v21, %v6869_v18  ;;  %6880 = vrot.lane.b32.xlu0 %v6625_v45, %s9443_s18  ;;  %v8752_v41 = vpop.f32.mrb[50].mxu0  ;;  %v14578_v18 = vld [vmem:[#allocation9_spill] sm:$0xff]  ;;  %v14579_v45 = vld [vmem:[#allocation4_spill] sm:$0xff] }
 0x3bf   : > { %v7083_v53 = vpack.c.bf16 %v7056_v20, %v7055_v54  ;;  %v7025_v7 = vadd.f32 %v13803_v14, %v6986_v1  ;;  %v7058_v2 = vmax.f32 %v7026_v30, 0.0  ;;  %v6628_v4 = vpop.f32.mrb[51].mxu0 }
 0x3c0   : > { %6882 = vrot.lane.b32.xlu1 %v6628_v4, %s9443_s18  ;;  %v14580_v4 = vld [vmem:[#allocation7_spill] sm:$0xff] }
 0x3c1   : > { %v7057_v34 = vmax.f32 %v7025_v7, 0.0  ;;  %8779 = vmatprep.mubr.msk.bf16.mxu1 %vm7126_vm0, %v7083_v53 }
 0x3c2   : > { %6884 = vrot.lane.b32.xlu0 %v8751_v37, %s9443_s18 }
 0x3c3   : > { %v7084_v42 = vpack.c.bf16 %v7058_v2, %v7057_v34  ;;  %v6745_v55 = vpop.permute.xlu0 %6744 }
 0x3c4   : > { %6886 = vrot.lane.b32.xlu1 %v8752_v41, %s9443_s18  ;;  %v6956_v51 = vsel %vm3343_vm11, %v14573_v23, %v6745_v55 }
 0x3c5   : > { %8780 = vmatmul.mubr.msk.bf16.gmra.mrb[40].mxu1 %vm7126_vm0, %v7084_v42  ;;  %v6747_v25 = vpop.permute.xlu1 %6746 }
 0x3c6   : > { %v6957_v57 = vsel %vm3343_vm11, %v14574_v31, %v6747_v25 }
 0x3c7   : > { %v6749_v6 = vpop.permute.xlu0 %6748 }
 0x3c8   : > { %v6958_v50 = vsel %vm3343_vm11, %v14575_v59, %v6749_v6 }
 0x3c9   : > { %v6751_v33 = vpop.permute.xlu1 %6750 }
 0x3ca   : > { %v6959_v46 = vsel %vm3343_vm11, %v14576_v22, %v6751_v33 }
 0x3cf   : > { %v8717_v49 = vpop.f32.mrb[20].mxu1 }
 0x3d0   : > { %v4015_v48 = vpop.f32.mrb[21].mxu1 }
 0x3d1   : > { %v8718_v61 = vpop.f32.mrb[22].mxu1  ;;  %6760 = vrot.lane.b32.xlu0 %v4015_v48, %s9439_s8 }
 0x3d2   : > { %v4018_v40 = vpop.f32.mrb[23].mxu1 }
 0x3d3   : > { %6762 = vrot.lane.b32.xlu1 %v4018_v40, %s9439_s8 }
 0x3d5   : > { %6764 = vrot.lane.b32.xlu0 %v8717_v49, %s9439_s8 }
 0x3d7   : > { %6766 = vrot.lane.b32.xlu1 %v8718_v61, %s9439_s8 }
 0x3f0   : > { %v6873_v38 = vpop.permute.xlu0 %6872 }
 0x3f1   : > { %v6988_v28 = vsel %vm3603_vm15, %v6956_v51, %v6873_v38 }
 0x3f2   : > { %v7027_v24 = vadd.f32 %v13803_v14, %v6988_v28  ;;  %v6875_v26 = vpop.permute.xlu1 %6874 }
 0x3f3   : > { %v6989_v13 = vsel %vm3603_vm15, %v6957_v57, %v6875_v26 }
 0x3f4   : > { %v7028_v60 = vadd.f32 %v13803_v14, %v6989_v13  ;;  %v6877_v44 = vpop.permute.xlu0 %6876  ;;  %v7059_v47 = vmax.f32 %v7027_v24, 0.0 }
 0x3f5   : > { %v6990_v17 = vsel %vm3603_vm15, %v6958_v50, %v6877_v44 }
 0x3f6   : > { %v7060_v58 = vmax.f32 %v7028_v60, 0.0  ;;  %v7029_v3 = vadd.f32 %v13803_v14, %v6990_v17  ;;  %v6879_v29 = vpop.permute.xlu1 %6878 }
 0x3f7   : > { %v6991_v63 = vsel %vm3603_vm15, %v6959_v46, %v6879_v29 }
 0x3f8   : > { %v7085_v32 = vpack.c.bf16 %v7060_v58, %v7059_v47  ;;  %v7030_v35 = vadd.f32 %v13803_v14, %v6991_v63  ;;  %v7061_v11 = vmax.f32 %v7029_v3, 0.0  ;;  %v14581_v58 = vld [vmem:[#allocation39_spill] sm:$0xff] }
 0x3fa   : > { %v7062_v8 = vmax.f32 %v7030_v35, 0.0  ;;  %8783 = vmatprep.mubr.msk.bf16.mxu1 %vm7126_vm0, %v7085_v32  ;;  %v14582_v32 = vld [vmem:[#allocation43_spill] sm:$0xff] }
 0x3fc   : > { %v7086_v12 = vpack.c.bf16 %v7062_v8, %v7061_v11  ;;  %v8755_v62 = vpop.f32.mrb[52].mxu0 }
 0x3fd   : > { %v6641_v0 = vpop.f32.mrb[53].mxu0 }
 0x3fe   : > { %8784 = vmatmul.mubr.msk.bf16.gmra.mrb[44].mxu1 %vm7126_vm0, %v7086_v12  ;;  %6888 = vrot.lane.b32.xlu0 %v6641_v0, %s9443_s18  ;;  %v8756_v16 = vpop.f32.mrb[54].mxu0 }
 0x3ff   : > { %v6644_v43 = vpop.f32.mrb[55].mxu0 }
 0x400   : > { %6890 = vrot.lane.b32.xlu1 %v6644_v43, %s9443_s18 }
 0x402   : > { %6892 = vrot.lane.b32.xlu0 %v8755_v62, %s9443_s18  ;;  %v14583_v62 = vld [vmem:[#allocation38_spill] sm:$0xff] }
 0x403   : > { %v6753_v36 = vpop.permute.xlu0 %6752 }
 0x404   : > { %6894 = vrot.lane.b32.xlu1 %v8756_v16, %s9443_s18  ;;  %v6960_v19 = vsel %vm3343_vm11, %v14577_v9, %v6753_v36 }
 0x405   : > { %v6755_v10 = vpop.permute.xlu1 %6754 }
 0x406   : > { %v6961_v5 = vsel %vm3343_vm11, %v14578_v18, %v6755_v10 }
 0x407   : > { %v6757_v15 = vpop.permute.xlu0 %6756 }
 0x408   : > { %v6962_v53 = vsel %vm3343_vm11, %v14579_v45, %v6757_v15 }
 0x409   : > { %v6759_v20 = vpop.permute.xlu1 %6758 }
 0x40a   : > { %v6963_v34 = vsel %vm3343_vm11, %v14580_v4, %v6759_v20 }
 0x40f   : > { %v8721_v56 = vpop.f32.mrb[24].mxu1 }
 0x410   : > { %v4031_v52 = vpop.f32.mrb[25].mxu1 }
 0x411   : > { %v8722_v27 = vpop.f32.mrb[26].mxu1  ;;  %6768 = vrot.lane.b32.xlu0 %v4031_v52, %s9439_s8  ;;  %v13938_v52 = vld [vmem:[%s279_s17] ss:$0 sm:$0xff] }
 0x412   : > { %v4034_v39 = vpop.f32.mrb[27].mxu1 }
 0x413   : > { %6770 = vrot.lane.b32.xlu1 %v4034_v39, %s9439_s8 }
 0x415   : > { %6772 = vrot.lane.b32.xlu0 %v8721_v56, %s9439_s8 }
 0x417   : > { %6774 = vrot.lane.b32.xlu1 %v8722_v27, %s9439_s8  ;;  %v14584_v27 = vld [vmem:[#allocation41_spill] sm:$0xff] }
 0x430   : > { %v6881_v21 = vpop.permute.xlu0 %6880 }
 0x431   : > { %v6992_v54 = vsel %vm3603_vm15, %v6960_v19, %v6881_v21 }
 0x432   : > { %v7031_v37 = vadd.f32 %v13803_v14, %v6992_v54  ;;  %v6883_v1 = vpop.permute.xlu1 %6882 }
 0x433   : > { %v6993_v30 = vsel %vm3603_vm15, %v6961_v5, %v6883_v1 }
 0x434   : > { %v7032_v7 = vadd.f32 %v13803_v14, %v6993_v30  ;;  %v6885_v41 = vpop.permute.xlu0 %6884  ;;  %v7063_v42 = vmax.f32 %v7031_v37, 0.0 }
 0x435   : > { %v6994_v2 = vsel %vm3603_vm15, %v6962_v53, %v6885_v41 }
 0x436   : > { %v7064_v49 = vmax.f32 %v7032_v7, 0.0  ;;  %v7033_v48 = vadd.f32 %v13803_v14, %v6994_v2  ;;  %v6887_v61 = vpop.permute.xlu1 %6886 }
 0x437   : > { %v6995_v40 = vsel %vm3603_vm15, %v6963_v34, %v6887_v61 }
 0x438   : > { %v7087_v55 = vpack.c.bf16 %v7064_v49, %v7063_v42  ;;  %v7034_v25 = vadd.f32 %v13803_v14, %v6995_v40  ;;  %v7065_v6 = vmax.f32 %v7033_v48, 0.0 }
 0x43a   : > { %v7066_v33 = vmax.f32 %v7034_v25, 0.0  ;;  %8787 = vmatprep.mubr.msk.bf16.mxu1 %vm7126_vm0, %v7087_v55 }
 0x43c   : > { %v7088_v23 = vpack.c.bf16 %v7066_v33, %v7065_v6  ;;  %v8759_v51 = vpop.f32.mrb[56].mxu0 }
 0x43d   : > { %v6657_v38 = vpop.f32.mrb[57].mxu0 }
 0x43e   : > { %8788 = vmatmul.mubr.msk.bf16.gmra.mrb[48].mxu1 %vm7126_vm0, %v7088_v23  ;;  %6896 = vrot.lane.b32.xlu0 %v6657_v38, %s9443_s18  ;;  %v8760_v28 = vpop.f32.mrb[58].mxu0 }
 0x43f   : > { %v6660_v31 = vpop.f32.mrb[59].mxu0 }
 0x440   : > { %6898 = vrot.lane.b32.xlu1 %v6660_v31, %s9443_s18 }
 0x442   : > { %6900 = vrot.lane.b32.xlu0 %v8759_v51, %s9443_s18 }
 0x443   : > { %v6761_v17 = vpop.permute.xlu0 %6760 }
 0x444   : > { %6902 = vrot.lane.b32.xlu1 %v8760_v28, %s9443_s18  ;;  %v6964_v3 = vsel %vm3343_vm11, %v14581_v58, %v6761_v17 }
 0x445   : > { %v6763_v22 = vpop.permute.xlu1 %6762 }
 0x446   : > { %v6965_v35 = vsel %vm3343_vm11, %v14582_v32, %v6763_v22  ;;  %v14585_v32 = vld [vmem:[#allocation101_spill] sm:$0xff] }
 0x447   : > { %v6765_v46 = vpop.permute.xlu0 %6764 }
 0x448   : > { %v6966_v0 = vsel %vm3343_vm11, %v14583_v62, %v6765_v46 }
 0x449   : > { %v6767_v47 = vpop.permute.xlu1 %6766 }
 0x44a   : > { %v6967_v39 = vsel %vm3343_vm11, %v14584_v27, %v6767_v47 }
 0x44f   : > { %v8725_v57 = vpop.f32.mrb[28].mxu1 }
 0x450   : > { %v4047_v24 = vpop.f32.mrb[29].mxu1 }
 0x451   : > { %v8726_v26 = vpop.f32.mrb[30].mxu1  ;;  %6776 = vrot.lane.b32.xlu0 %v4047_v24, %s9439_s8 }
 0x452   : > { %v4050_v13 = vpop.f32.mrb[31].mxu1 }
 0x453   : > { %6778 = vrot.lane.b32.xlu1 %v4050_v13, %s9439_s8 }
 0x455   : > { %6780 = vrot.lane.b32.xlu0 %v8725_v57, %s9439_s8 }
 0x457   : > { %6782 = vrot.lane.b32.xlu1 %v8726_v26, %s9439_s8 }
 0x463   : > { %v8763_v59 = vpop.f32.mrb[60].mxu0 }
 0x464   : > { %v6673_v50 = vpop.f32.mrb[61].mxu0 }
 0x465   : > { %6904 = vrot.lane.b32.xlu0 %v6673_v50, %s9443_s18  ;;  %v8764_v60 = vpop.f32.mrb[62].mxu0 }
 0x466   : > { %v6676_v44 = vpop.f32.mrb[63].mxu0 }
 0x467   : > { %6906 = vrot.lane.b32.xlu1 %v6676_v44, %s9443_s18 }
 0x469   : > { %6908 = vrot.lane.b32.xlu0 %v8763_v59, %s9443_s18 }
 0x46b   : > { %6910 = vrot.lane.b32.xlu1 %v8764_v60, %s9443_s18  ;;  %s8580_s18 = sshll.u32 %s14598_s21, 8 }
 0x46c   : > { %s13950_s25 = scalar_lea.vmem %s14068_s6, %s8580_s18 }
 0x470   : > { %v6889_v29 = vpop.permute.xlu0 %6888 }
 0x471   : > { %v6996_v63 = vsel %vm3603_vm15, %v6964_v3, %v6889_v29 }
 0x472   : > { %v7035_v11 = vadd.f32 %v13803_v14, %v6996_v63  ;;  %v6891_v8 = vpop.permute.xlu1 %6890 }
 0x473   : > { %v6997_v12 = vsel %vm3603_vm15, %v6965_v35, %v6891_v8 }
 0x474   : > { %v7036_v16 = vadd.f32 %v13803_v14, %v6997_v12  ;;  %v6893_v43 = vpop.permute.xlu0 %6892  ;;  %v7067_v36 = vmax.f32 %v7035_v11, 0.0  ;;  %v14586_v12 = vld [vmem:[#allocation102_spill] sm:$0xff] }
 0x475   : > { %v6998_v56 = vsel %vm3603_vm15, %v6966_v0, %v6893_v43 }
 0x476   : > { %v7068_v10 = vmax.f32 %v7036_v16, 0.0  ;;  %v7037_v15 = vadd.f32 %v13803_v14, %v6998_v56  ;;  %v6895_v20 = vpop.permute.xlu1 %6894  ;;  %v14587_v56 = vld [vmem:[#allocation100_spill] sm:$0xff] }
 0x477   : > { %v6999_v19 = vsel %vm3603_vm15, %v6967_v39, %v6895_v20 }
 0x478   : > { %v8773_v9 = vpop.f32.mrb[32].mxu1  ;;  %v7089_v21 = vpack.c.bf16 %v7068_v10, %v7067_v36  ;;  %v7038_v18 = vadd.f32 %v13803_v14, %v6999_v19  ;;  %v7069_v30 = vmax.f32 %v7037_v15, 0.0  ;;  %v14588_v15 = vld [vmem:[#allocation103_spill] sm:$0xff] }
 0x479   : > { %v7218_v54 = vadd.f32 %v8773_v9, %v13938_v52  ;;  %v7209_v5 = vpop.f32.mrb[33].mxu1 }
 0x47a   : > { %v7210_v37 = vadd.f32 %v13938_v52, %v7209_v5  ;;  %v8774_v1 = vpop.f32.mrb[34].mxu1  ;;  %v7070_v53 = vmax.f32 %v7038_v18, 0.0  ;;  %8791 = vmatprep.mubr.msk.bf16.mxu1 %vm7126_vm0, %v7089_v21 }
 0x47b   : > { %v7338_v45 = vmax.f32 %v7218_v54, 0.0  ;;  %v7221_v7 = vadd.f32 %v8774_v1, %v13938_v52  ;;  %v7212_v41 = vpop.f32.mrb[35].mxu1 }
 0x47c   : > { %v7336_v2 = vmax.f32 %v7210_v37, 0.0  ;;  %v7213_v4 = vadd.f32 %v13938_v52, %v7212_v41  ;;  %v7090_v34 = vpack.c.bf16 %v7070_v53, %v7069_v30 }
 0x47d   : > { %7370 = vst [vmem:[%s13950_s25 + $0x10] sm:$0xff] %v7338_v45  ;;  %v7339_v42 = vmax.f32 %v7221_v7, 0.0 }
 0x47e   : > { %7368 = vst [vmem:[%s13950_s25] sm:$0xff] %v7336_v2  ;;  %v7337_v49 = vmax.f32 %v7213_v4, 0.0  ;;  %8792 = vmatmul.mubr.msk.bf16.gmra.mrb[52].mxu1 %vm7126_vm0, %v7090_v34 }
 0x47f   : > { %7371 = vst [vmem:[%s13950_s25 + $0x18] sm:$0xff] %v7339_v42 }
 0x480   : > { %7369 = vst [vmem:[%s13950_s25 + $0x8] sm:$0xff] %v7337_v49 }
 0x483   : > { %v6769_v58 = vpop.permute.xlu0 %6768 }
 0x484   : > { %v6968_v35 = vsel %vm3343_vm11, %v14585_v32, %v6769_v58 }
 0x485   : > { %v6771_v3 = vpop.permute.xlu1 %6770 }
 0x486   : > { %v6969_v62 = vsel %vm3343_vm11, %v14586_v12, %v6771_v3 }
 0x487   : > { %v6773_v29 = vpop.permute.xlu0 %6772 }
 0x488   : > { %v8777_v48 = vpop.f32.mrb[36].mxu1  ;;  %v6970_v27 = vsel %vm3343_vm11, %v14587_v56, %v6773_v29 }
 0x489   : > { %v7234_v61 = vadd.f32 %v8777_v48, %v13938_v52  ;;  %v7225_v40 = vpop.f32.mrb[37].mxu1  ;;  %v6775_v63 = vpop.permute.xlu1 %6774 }
 0x48a   : > { %v7226_v55 = vadd.f32 %v13938_v52, %v7225_v40  ;;  %v8778_v25 = vpop.f32.mrb[38].mxu1  ;;  %v6971_v20 = vsel %vm3343_vm11, %v14588_v15, %v6775_v63 }
 0x48b   : > { %v7342_v6 = vmax.f32 %v7234_v61, 0.0  ;;  %v7237_v33 = vadd.f32 %v8778_v25, %v13938_v52  ;;  %v7228_v23 = vpop.f32.mrb[39].mxu1 }
 0x48c   : > { %v7340_v51 = vmax.f32 %v7226_v55, 0.0  ;;  %v7229_v38 = vadd.f32 %v13938_v52, %v7228_v23 }
 0x48d   : > { %7374 = vst [vmem:[%s13950_s25 + $0x30] sm:$0xff] %v7342_v6  ;;  %v7343_v28 = vmax.f32 %v7237_v33, 0.0  ;;  %v14589_v33 = vld [vmem:[#allocation57_spill] sm:$0xff] }
 0x48e   : > { %7372 = vst [vmem:[%s13950_s25 + $0x20] sm:$0xff] %v7340_v51  ;;  %v7341_v31 = vmax.f32 %v7229_v38, 0.0 }
 0x48f   : > { %7375 = vst [vmem:[%s13950_s25 + $0x38] sm:$0xff] %v7343_v28 }
 0x490   : > { %7373 = vst [vmem:[%s13950_s25 + $0x28] sm:$0xff] %v7341_v31 }
 0x498   : > { %v8781_v57 = vpop.f32.mrb[40].mxu1 }
 0x499   : > { %v7250_v24 = vadd.f32 %v8781_v57, %v13938_v52  ;;  %v7241_v26 = vpop.f32.mrb[41].mxu1  ;;  %v14590_v57 = vld [vmem:[#allocation61_spill] sm:$0xff] }
 0x49a   : > { %v7242_v13 = vadd.f32 %v13938_v52, %v7241_v26  ;;  %v8782_v59 = vpop.f32.mrb[42].mxu1 }
 0x49b   : > { %v7346_v50 = vmax.f32 %v7250_v24, 0.0  ;;  %v7253_v60 = vadd.f32 %v8782_v59, %v13938_v52  ;;  %v7244_v44 = vpop.f32.mrb[43].mxu1 }
 0x49c   : > { %v7344_v17 = vmax.f32 %v7242_v13, 0.0  ;;  %v7245_v22 = vadd.f32 %v13938_v52, %v7244_v44 }
 0x49d   : > { %7378 = vst [vmem:[%s13950_s25 + $0x50] sm:$0xff] %v7346_v50  ;;  %v7347_v46 = vmax.f32 %v7253_v60, 0.0  ;;  %v14591_v50 = vld [vmem:[#allocation59_spill] sm:$0xff] }
 0x49e   : > { %7376 = vst [vmem:[%s13950_s25 + $0x40] sm:$0xff] %v7344_v17  ;;  %v7345_v47 = vmax.f32 %v7245_v22, 0.0 }
 0x49f   : > { %7379 = vst [vmem:[%s13950_s25 + $0x58] sm:$0xff] %v7347_v46  ;;  %v14592_v46 = vld [vmem:[#allocation63_spill] sm:$0xff] }
 0x4a0   : > { %7377 = vst [vmem:[%s13950_s25 + $0x48] sm:$0xff] %v7345_v47 }
 0x4b0   : > { %v6897_v11 = vpop.permute.xlu0 %6896 }
 0x4b1   : > { %v7000_v8 = vsel %vm3603_vm15, %v6968_v35, %v6897_v11 }
 0x4b2   : > { %v7039_v0 = vadd.f32 %v13803_v14, %v7000_v8  ;;  %v6899_v16 = vpop.permute.xlu1 %6898 }
 0x4b3   : > { %v7001_v43 = vsel %vm3603_vm15, %v6969_v62, %v6899_v16 }
 0x4b4   : > { %v7040_v39 = vadd.f32 %v13803_v14, %v7001_v43  ;;  %v6901_v36 = vpop.permute.xlu0 %6900  ;;  %v7071_v9 = vmax.f32 %v7039_v0, 0.0 }
 0x4b5   : > { %v7002_v10 = vsel %vm3603_vm15, %v6970_v27, %v6901_v36 }
 0x4b6   : > { %v7072_v19 = vmax.f32 %v7040_v39, 0.0  ;;  %v7041_v21 = vadd.f32 %v13803_v14, %v7002_v10  ;;  %v6903_v54 = vpop.permute.xlu1 %6902 }
 0x4b7   : > { %v7003_v18 = vsel %vm3603_vm15, %v6971_v20, %v6903_v54 }
 0x4b8   : > { %v7091_v5 = vpack.c.bf16 %v7072_v19, %v7071_v9  ;;  %v7042_v37 = vadd.f32 %v13803_v14, %v7003_v18  ;;  %v7073_v1 = vmax.f32 %v7041_v21, 0.0 }
 0x4ba   : > { %v7074_v30 = vmax.f32 %v7042_v37, 0.0  ;;  %8795 = vmatprep.mubr.msk.bf16.mxu1 %vm7126_vm0, %v7091_v5 }
 0x4bc   : > { %v7092_v45 = vpack.c.bf16 %v7074_v30, %v7073_v1 }
 0x4be   : > { %8796 = vmatmul.mubr.msk.bf16.gmra.mrb[56].mxu1 %vm7126_vm0, %v7092_v45 }
 0x4c3   : > { %v6777_v53 = vpop.permute.xlu0 %6776 }
 0x4c4   : > { %v6972_v23 = vsel %vm3343_vm11, %v14589_v33, %v6777_v53 }
 0x4c5   : > { %v6779_v7 = vpop.permute.xlu1 %6778 }
 0x4c6   : > { %v6973_v24 = vsel %vm3343_vm11, %v14590_v57, %v6779_v7 }
 0x4c7   : > { %v6781_v2 = vpop.permute.xlu0 %6780 }
 0x4c8   : > { %v6974_v60 = vsel %vm3343_vm11, %v14591_v50, %v6781_v2 }
 0x4c9   : > { %v6783_v48 = vpop.permute.xlu1 %6782 }
 0x4ca   : > { %v6975_v47 = vsel %vm3343_vm11, %v14592_v46, %v6783_v48 }
 0x4d1   : > { %v8785_v41 = vpop.f32.mrb[44].mxu1 }
 0x4d2   : > { %v7266_v4 = vadd.f32 %v8785_v41, %v13938_v52  ;;  %v7257_v34 = vpop.f32.mrb[45].mxu1 }
 0x4d3   : > { %v7258_v42 = vadd.f32 %v13938_v52, %v7257_v34  ;;  %v8786_v49 = vpop.f32.mrb[46].mxu1 }
 0x4d4   : > { %v7350_v61 = vmax.f32 %v7266_v4, 0.0  ;;  %v7269_v40 = vadd.f32 %v8786_v49, %v13938_v52  ;;  %v7260_v55 = vpop.f32.mrb[47].mxu1 }
 0x4d5   : > { %v7348_v25 = vmax.f32 %v7258_v42, 0.0  ;;  %v7261_v6 = vadd.f32 %v13938_v52, %v7260_v55 }
 0x4d6   : > { %7382 = vst [vmem:[%s13950_s25 + $0x70] sm:$0xff] %v7350_v61  ;;  %v7351_v51 = vmax.f32 %v7269_v40, 0.0 }
 0x4d7   : > { %v6905_v38 = vpop.permute.xlu0 %6904  ;;  %7380 = vst [vmem:[%s13950_s25 + $0x60] sm:$0xff] %v7348_v25  ;;  %v7349_v28 = vmax.f32 %v7261_v6, 0.0 }
 0x4d8   : > { %v7004_v31 = vsel %vm3603_vm15, %v6972_v23, %v6905_v38  ;;  %7383 = vst [vmem:[%s13950_s25 + $0x78] sm:$0xff] %v7351_v51 }
 0x4d9   : > { %v7043_v26 = vadd.f32 %v13803_v14, %v7004_v31  ;;  %v6907_v13 = vpop.permute.xlu1 %6906  ;;  %7381 = vst [vmem:[%s13950_s25 + $0x68] sm:$0xff] %v7349_v28 }
 0x4da   : > { %v7005_v59 = vsel %vm3603_vm15, %v6973_v24, %v6907_v13 }
 0x4db   : > { %v7044_v44 = vadd.f32 %v13803_v14, %v7005_v59  ;;  %v6909_v17 = vpop.permute.xlu0 %6908  ;;  %v7075_v58 = vmax.f32 %v7043_v26, 0.0 }
 0x4dc   : > { %v7006_v22 = vsel %vm3603_vm15, %v6974_v60, %v6909_v17 }
 0x4dd   : > { %v7076_v3 = vmax.f32 %v7044_v44, 0.0  ;;  %v7045_v29 = vadd.f32 %v13803_v14, %v7006_v22  ;;  %v6911_v63 = vpop.permute.xlu1 %6910 }
 0x4de   : > { %v7007_v32 = vsel %vm3603_vm15, %v6975_v47, %v6911_v63 }
 0x4df   : > { %v7093_v35 = vpack.c.bf16 %v7076_v3, %v7075_v58  ;;  %v7046_v11 = vadd.f32 %v13803_v14, %v7007_v32  ;;  %v7077_v8 = vmax.f32 %v7045_v29, 0.0 }
 0x4e1   : > { %v7078_v12 = vmax.f32 %v7046_v11, 0.0  ;;  %8799 = vmatprep.mubr.msk.bf16.mxu1 %vm7126_vm0, %v7093_v35 }
 0x4e3   : > { %v7094_v62 = vpack.c.bf16 %v7078_v12, %v7077_v8 }
 0x4e5   : > { %8800 = vmatmul.mubr.msk.bf16.gmra.mrb[60].mxu1 %vm7126_vm0, %v7094_v62 }
 0x511   : > { %v8789_v0 = vpop.f32.mrb[48].mxu1 }
 0x512   : > { %v7282_v16 = vadd.f32 %v8789_v0, %v13938_v52  ;;  %v7273_v43 = vpop.f32.mrb[49].mxu1 }
 0x513   : > { %v7274_v56 = vadd.f32 %v13938_v52, %v7273_v43  ;;  %v8790_v27 = vpop.f32.mrb[50].mxu1 }
 0x514   : > { %v7354_v39 = vmax.f32 %v7282_v16, 0.0  ;;  %v7285_v14 = vadd.f32 %v8790_v27, %v13938_v52  ;;  %v7276_v36 = vpop.f32.mrb[51].mxu1 }
 0x515   : > { %v7352_v10 = vmax.f32 %v7274_v56, 0.0  ;;  %v7277_v15 = vadd.f32 %v13938_v52, %v7276_v36 }
 0x516   : > { %7386 = vst [vmem:[%s13950_s25 + $0x90] sm:$0xff] %v7354_v39  ;;  %v7355_v20 = vmax.f32 %v7285_v14, 0.0 }
 0x517   : > { %7384 = vst [vmem:[%s13950_s25 + $0x80] sm:$0xff] %v7352_v10  ;;  %v7353_v9 = vmax.f32 %v7277_v15, 0.0 }
 0x518   : > { %7387 = vst [vmem:[%s13950_s25 + $0x98] sm:$0xff] %v7355_v20 }
 0x519   : > { %7385 = vst [vmem:[%s13950_s25 + $0x88] sm:$0xff] %v7353_v9 }
 0x551   : > { %v8793_v19 = vpop.f32.mrb[52].mxu1 }
 0x552   : > { %v7298_v21 = vadd.f32 %v8793_v19, %v13938_v52  ;;  %v7289_v54 = vpop.f32.mrb[53].mxu1 }
 0x553   : > { %v7290_v18 = vadd.f32 %v13938_v52, %v7289_v54  ;;  %v8794_v5 = vpop.f32.mrb[54].mxu1 }
 0x554   : > { %v7358_v37 = vmax.f32 %v7298_v21, 0.0  ;;  %v7301_v1 = vadd.f32 %v8794_v5, %v13938_v52  ;;  %v7292_v30 = vpop.f32.mrb[55].mxu1 }
 0x555   : > { %v7356_v45 = vmax.f32 %v7290_v18, 0.0  ;;  %v7293_v53 = vadd.f32 %v13938_v52, %v7292_v30 }
 0x556   : > { %7390 = vst [vmem:[%s13950_s25 + $0xb0] sm:$0xff] %v7358_v37  ;;  %v7359_v7 = vmax.f32 %v7301_v1, 0.0 }
 0x557   : > { %7388 = vst [vmem:[%s13950_s25 + $0xa0] sm:$0xff] %v7356_v45  ;;  %v7357_v41 = vmax.f32 %v7293_v53, 0.0 }
 0x558   : > { %7391 = vst [vmem:[%s13950_s25 + $0xb8] sm:$0xff] %v7359_v7 }
 0x559   : > { %7389 = vst [vmem:[%s13950_s25 + $0xa8] sm:$0xff] %v7357_v41 }
 0x591   : > { %v8797_v2 = vpop.f32.mrb[56].mxu1 }
 0x592   : > { %v7314_v4 = vadd.f32 %v8797_v2, %v13938_v52  ;;  %v7305_v34 = vpop.f32.mrb[57].mxu1 }
 0x593   : > { %v7306_v42 = vadd.f32 %v13938_v52, %v7305_v34  ;;  %v8798_v49 = vpop.f32.mrb[58].mxu1 }
 0x594   : > { %v7362_v48 = vmax.f32 %v7314_v4, 0.0  ;;  %v7317_v61 = vadd.f32 %v8798_v49, %v13938_v52  ;;  %v7308_v40 = vpop.f32.mrb[59].mxu1 }
 0x595   : > { %v7360_v55 = vmax.f32 %v7306_v42, 0.0  ;;  %v7309_v25 = vadd.f32 %v13938_v52, %v7308_v40 }
 0x596   : > { %7394 = vst [vmem:[%s13950_s25 + $0xd0] sm:$0xff] %v7362_v48  ;;  %v7363_v6 = vmax.f32 %v7317_v61, 0.0 }
 0x597   : > { %7392 = vst [vmem:[%s13950_s25 + $0xc0] sm:$0xff] %v7360_v55  ;;  %v7361_v33 = vmax.f32 %v7309_v25, 0.0 }
 0x598   : > { %7395 = vst [vmem:[%s13950_s25 + $0xd8] sm:$0xff] %v7363_v6 }
 0x599   : > { %7393 = vst [vmem:[%s13950_s25 + $0xc8] sm:$0xff] %v7361_v33 }
 0x5b8   : > { %v8801_v23 = vpop.f32.mrb[60].mxu1 }
 0x5b9   : > { %v7330_v51 = vadd.f32 %v8801_v23, %v13938_v52  ;;  %v7321_v38 = vpop.f32.mrb[61].mxu1 }
 0x5ba   : > { %v7322_v28 = vadd.f32 %v13938_v52, %v7321_v38  ;;  %v8802_v31 = vpop.f32.mrb[62].mxu1 }
 0x5bb   : > { %v7366_v57 = vmax.f32 %v7330_v51, 0.0  ;;  %v7333_v24 = vadd.f32 %v8802_v31, %v13938_v52  ;;  %v7324_v26 = vpop.f32.mrb[63].mxu1 }
 0x5bc   : > { %v7364_v13 = vmax.f32 %v7322_v28, 0.0  ;;  %v7325_v59 = vadd.f32 %v13938_v52, %v7324_v26 }
 0x5bd   : > { %7398 = vst [vmem:[%s13950_s25 + $0xf0] sm:$0xff] %v7366_v57  ;;  %v7367_v50 = vmax.f32 %v7333_v24, 0.0 }
 0x5be   : > { %7396 = vst [vmem:[%s13950_s25 + $0xe0] sm:$0xff] %v7364_v13  ;;  %v7365_v60 = vmax.f32 %v7325_v59, 0.0 }
 0x5bf   : > { %7399 = vst [vmem:[%s13950_s25 + $0xf8] sm:$0xff] %v7367_v50 }
 0x5c0   : > { %7397 = vst [vmem:[%s13950_s25 + $0xe8] sm:$0xff] %v7365_v60 }
 0x5c1 PF: > { %s16_s23 = sadd.s32 1, %s9434_s23   ;;  %s14593_s21 = smov %s9430_s22 }
 0x5c2   : > { %p13_p5 = scmp.ge.s32.totalorder %s16_s23, 4   ;;  %s14594_s22 = smov %s14596_s24 }
 0x5c4   :  { %15 = sbr.rel (!%p13_p5) target bundleno = 2 (0x2), region = 83 }

</bundles_post_ra>
